<compile_context>
chip_gen: v7x
topology: tpu7x:2x2x1
jax: 0.10.0
libtpu: 0.0.40
codegen_flags: <defaults>
</compile_context>

<pallas_src>
import functools

import jax
import jax.numpy as jnp
from jax.experimental import pallas as pl
from jax.experimental.pallas import tpu as pltpu

_VMEM_LIMIT = 32 * 1024 * 1024
_LANE = 128

# ConvTranspose2d(k=4, s=2, p=1): for output phase 0/1 along an axis, the two kernel
# taps hit by window positions (0, 1) of the 2x2 sub-filter, and the (before, after)
# zero padding of the input needed for that phase.
_PHASE_TAPS = ((3, 1), (2, 0))
_PHASE_PADS = ((1, 0), (0, 1))


# ----------------------------------------------------------------------------------
# small helpers
# ----------------------------------------------------------------------------------
def _round_up(n, m):
    return ((n + m - 1) // m) * m


def _pad_axis(x, axis, new_size):
    old = x.shape[axis]
    if old == new_size:
        return x
    pads = [(0, 0)] * x.ndim
    pads[axis % x.ndim] = (0, new_size - old)
    return jnp.pad(x, pads)


def _pick_tile(m, target):
    """Largest row-tile <= target that divides m and keeps sublane (x8) alignment."""
    if m <= target:
        return m
    for t in range(target, 7, -1):
        if m % t == 0 and t % 8 == 0:
            return t
    return m


# ----------------------------------------------------------------------------------
# Pallas kernels
# ----------------------------------------------------------------------------------
def _bmm_bias_stats_kernel(x_ref, w_ref, b_ref, y_ref, s1_ref, s2_ref):
    # [tm, K] @ [K, N] on the MXU (bf16 in, f32 accumulate) + bias.
    y = jnp.dot(x_ref[0], w_ref[0], preferred_element_type=jnp.float32)
    y = y + b_ref[...]
    y_ref[0] = y
    n = y.shape[1]
    # per-tile per-channel partial statistics for the two-pass BatchNorm
    s1_ref[...] = jnp.sum(y, axis=0).reshape(1, 1, 1, n)
    s2_ref[...] = jnp.sum(y * y, axis=0).reshape(1, 1, 1, n)


def _bmm_bias_tanh_kernel(x_ref, w_ref, b_ref, o_ref):
    y = jnp.dot(x_ref[0], w_ref[0], preferred_element_type=jnp.float32)
    o_ref[0] = jnp.tanh(y + b_ref[...])


def _bn_act_kernel(y_ref, sc_ref, sh_ref, o_ref, *, relu):
    y = y_ref[...] * sc_ref[...] + sh_ref[...]
    if relu:
        y = jnp.maximum(y, 0.0)
    o_ref[...] = y.astype(o_ref.dtype)


def _bn_add_kernel(y_ref, sc_ref, sh_ref, res_ref, o_ref):
    y = y_ref[...] * sc_ref[...] + sh_ref[...] + res_ref[...].astype(jnp.float32)
    o_ref[...] = y.astype(o_ref.dtype)


# ----------------------------------------------------------------------------------
# Pallas wrappers
# ----------------------------------------------------------------------------------
def bmm_bias_stats(x, w, b, tm_target=256):
    """x: [G, M, K] bf16, w: [G, K, N] bf16, b: [N] f32.
    Returns (y: [G, M, N] f32, sum: [G, nt, 1, N] f32, sumsq: [G, nt, 1, N] f32)."""
    G, M, K = x.shape
    N = w.shape[2]
    tm = _pick_tile(M, tm_target)
    nt = M // tm
    return pl.pallas_call(
        _bmm_bias_stats_kernel,
        out_shape=(jax.ShapeDtypeStruct((G, M, N), jnp.float32),
                   jax.ShapeDtypeStruct((G, nt, 1, N), jnp.float32),
                   jax.ShapeDtypeStruct((G, nt, 1, N), jnp.float32)),
        grid=(G, nt),
        in_specs=[
            pl.BlockSpec((1, tm, K), lambda g, i: (g, i, 0)),
            pl.BlockSpec((1, K, N), lambda g, i: (g, 0, 0)),
            pl.BlockSpec((1, N), lambda g, i: (0, 0)),
        ],
        out_specs=(
            pl.BlockSpec((1, tm, N), lambda g, i: (g, i, 0)),
            pl.BlockSpec((1, 1, 1, N), lambda g, i: (g, i, 0, 0)),
            pl.BlockSpec((1, 1, 1, N), lambda g, i: (g, i, 0, 0)),
        ),
        compiler_params=pltpu.CompilerParams(
            dimension_semantics=("parallel", "parallel"),
            vmem_limit_bytes=_VMEM_LIMIT),
    )(x, w, b.reshape(1, N))


def bmm_bias_tanh(x, w, b, tm_target=256):
    """Final layer: per-group matmul + bias + tanh, lane-dense N (padded to 128)."""
    G, M, K = x.shape
    N = w.shape[2]
    tm = _pick_tile(M, tm_target)
    return pl.pallas_call(
        _bmm_bias_tanh_kernel,
        out_shape=jax.ShapeDtypeStruct((G, M, N), jnp.float32),
        grid=(G, M // tm),
        in_specs=[
            pl.BlockSpec((1, tm, K), lambda g, i: (g, i, 0)),
            pl.BlockSpec((1, K, N), lambda g, i: (g, 0, 0)),
            pl.BlockSpec((1, N), lambda g, i: (0, 0)),
        ],
        out_specs=pl.BlockSpec((1, tm, N), lambda g, i: (g, i, 0)),
        compiler_params=pltpu.CompilerParams(
            dimension_semantics=("parallel", "parallel"),
            vmem_limit_bytes=_VMEM_LIMIT),
    )(x, w, b.reshape(1, N))


def bn_act(y, scale, shift, *, relu, residual=None, out_dtype=jnp.bfloat16,
           tm_target=512):
    """Pass 2: y*scale + shift (+ReLU | +residual), tiled over rows, bf16 output."""
    M, N = y.shape
    tm = _pick_tile(M, tm_target)
    row = lambda i: (i, 0)
    vec = lambda i: (0, 0)
    in_specs = [pl.BlockSpec((tm, N), row),
                pl.BlockSpec((1, N), vec),
                pl.BlockSpec((1, N), vec)]
    args = [y, scale.reshape(1, N), shift.reshape(1, N)]
    if residual is None:
        kernel = functools.partial(_bn_act_kernel, relu=relu)
    else:
        kernel = _bn_add_kernel
        in_specs.append(pl.BlockSpec((tm, N), row))
        args.append(residual)
    return pl.pallas_call(
        kernel,
        out_shape=jax.ShapeDtypeStruct((M, N), out_dtype),
        grid=(M // tm,),
        in_specs=in_specs,
        out_specs=pl.BlockSpec((tm, N), row),
        compiler_params=pltpu.CompilerParams(
            dimension_semantics=("parallel",),
            vmem_limit_bytes=_VMEM_LIMIT),
    )(*args)


def _bn_scale_shift(s1, s2, count, gamma, beta, eps=1e-5):
    """Fold the partial sums into per-channel BN scale/shift (train-mode batch stats)."""
    mean = jnp.sum(s1, axis=(0, 1, 2)) / count
    ex2 = jnp.sum(s2, axis=(0, 1, 2)) / count
    var = jnp.maximum(ex2 - mean * mean, 0.0)
    scale = gamma * jax.lax.rsqrt(var + eps)
    shift = beta - mean * scale
    return scale, shift


# ----------------------------------------------------------------------------------
# JAX glue: im2col / phase packing (layout plumbing only)
# ----------------------------------------------------------------------------------
# TODO(synk): im2col is still materialized in HBM via XLA; fusing it into the matmul
# kernel (grid axis over the k*k taps) would remove the remaining HBM amplification.
def _im2col_nhwc(xp, k):
    """xp: [B, Hp, Wp, C] (already padded), stride 1 -> [B*Ho*Wo, C*k*k]."""
    B, Hp, Wp, C = xp.shape
    Ho, Wo = Hp - k + 1, Wp - k + 1
    cols = [xp[:, dy:dy + Ho, dx:dx + Wo, :] for dy in range(k) for dx in range(k)]
    patches = jnp.stack(cols, axis=-1)                     # [B, Ho, Wo, C, k*k]
    return patches.reshape(B * Ho * Wo, C * k * k)


def _conv3_im2col(h, k_padded):
    xp = jnp.pad(h, ((0, 0), (1, 1), (1, 1), (0, 0)))
    return _pad_axis(_im2col_nhwc(xp, 3), -1, k_padded)[None]   # [1, M, Kp]


def _convt_phase_im2col(h, k_padded):
    """Sub-pixel phases of ConvTranspose2d(k=4, s=2, p=1): [4, B*H*W, Cin*4]."""
    xs = []
    for phy in range(2):
        for phx in range(2):
            pt, pb = _PHASE_PADS[phy]
            lf, rt = _PHASE_PADS[phx]
            xp = jnp.pad(h, ((0, 0), (pt, pb), (lf, rt), (0, 0)))
            xs.append(_im2col_nhwc(xp, 2))
    return _pad_axis(jnp.stack(xs, axis=0), -1, k_padded)


def _interleave_phases(y, B, H, W):
    """y: [4, B*H*W, C] in phase order (phy, phx) -> NHWC [B, 2H, 2W, C]."""
    C = y.shape[-1]
    yp = y.reshape(2, 2, B, H, W, C)
    return jnp.transpose(yp, (2, 3, 0, 4, 1, 5)).reshape(B, 2 * H, 2 * W, C)


# ----------------------------------------------------------------------------------
# Layers
# ----------------------------------------------------------------------------------
def _convt0_layer(x2d, p):
    """ConvTranspose2d(in_dim, 256, 4, 1, 0) on 1x1 input + BN + ReLU -> [B,4,4,256]."""
    B = x2d.shape[0]
    kp, cout = p["wf"].shape[1], p["wf"].shape[2]
    X = jnp.broadcast_to(_pad_axis(x2d, -1, kp)[None], (16, B, kp))
    y, s1, s2 = bmm_bias_stats(X, p["wf"], p["b"])
    sc, sh = _bn_scale_shift(s1, s2, 16 * B, p["gamma"], p["beta"])
    yn = bn_act(y.reshape(16 * B, cout), sc, sh, relu=True)
    return jnp.transpose(yn.reshape(16, B, cout), (1, 0, 2)).reshape(B, 4, 4, cout)


def _convt_bn_relu(h, p):
    """ConvTranspose2d(k=4, s=2, p=1) + BN + ReLU via phase decomposition."""
    B, H, W, _ = h.shape
    M = B * H * W
    cout = p["wf"].shape[2]
    X = _convt_phase_im2col(h, p["wf"].shape[1])
    y, s1, s2 = bmm_bias_stats(X, p["wf"], p["b"])
    sc, sh = _bn_scale_shift(s1, s2, 4 * M, p["gamma"], p["beta"])
    yn = bn_act(y.reshape(4 * M, cout), sc, sh, relu=True)
    return _interleave_phases(yn.reshape(4, M, cout), B, H, W)


def _conv3_bn(h, p, *, relu, residual=None):
    """Conv2d(k=3, p=1) + BN (+ReLU or fused residual add)."""
    B, H, W, _ = h.shape
    M = B * H * W
    cout = p["wf"].shape[2]
    X = _conv3_im2col(h, p["wf"].shape[1])
    y, s1, s2 = bmm_bias_stats(X, p["wf"], p["b"])
    sc, sh = _bn_scale_shift(s1, s2, M, p["gamma"], p["beta"])
    yn = bn_act(y.reshape(M, cout), sc, sh, relu=relu, residual=residual)
    return yn.reshape(B, H, W, cout)


def _residual_block(h, p):
    B, H, W, C = h.shape
    r = _conv3_bn(h, p["conv1"], relu=True)
    return _conv3_bn(r, p["conv2"], relu=False, residual=h.reshape(B * H * W, C))


# ----------------------------------------------------------------------------------
# Parameters (deterministic synthetic init; shapes match the PyTorch module) + packing
# ----------------------------------------------------------------------------------
def init_params(key, label_dim, noise_dim, num_classes):
    keys = iter(jax.random.split(key, 64))
    nrm = lambda shape, s=0.1: (s * jax.random.normal(next(keys), shape)).astype(jnp.float32)

    def bn(c):
        return dict(gamma=jnp.ones((c,), jnp.float32) + nrm((c,), 0.01),
                    beta=nrm((c,), 0.01))

    def convt(cin, cout):
        d = dict(w=nrm((cin, cout, 4, 4)), b=nrm((cout,), 0.01))
        d.update(bn(cout))
        return d

    def conv3(c):
        d = dict(w=nrm((c, c, 3, 3)), b=nrm((c,), 0.01))
        d.update(bn(c))
        return d

    in_dim = noise_dim + label_dim
    return dict(
        emb=nrm((num_classes, label_dim), 1.0),
        ct0=convt(in_dim, 256),
        res1=dict(conv1=conv3(256), conv2=conv3(256)),
        ct1=convt(256, 128),
        res2=dict(conv1=conv3(128), conv2=conv3(128)),
        ct2=convt(128, 64),
        res3=dict(conv1=conv3(64), conv2=conv3(64)),
        ct3=dict(w=nrm((64, 3, 4, 4)), b=nrm((3,), 0.01)),
    )


def prepare_params(params):
    """Re-lay-out PyTorch-convention weights into matmul-ready bf16 matrices (once)."""

    def prep_ct0(p):
        w = p["w"]                                         # [Cin, Cout, 4, 4]
        cin, cout = w.shape[0], w.shape[1]
        wf = jnp.transpose(w, (2, 3, 0, 1)).reshape(16, cin, cout)
        wf = _pad_axis(wf, -2, _round_up(cin, _LANE)).astype(jnp.bfloat16)
        return dict(wf=wf, b=p["b"], gamma=p["gamma"], beta=p["beta"])

    def prep_convt(p, pad_cout_to=None):
        w = p["w"]                                         # [Cin, Cout, 4, 4]
        cin, cout = w.shape[0], w.shape[1]
        mats = []
        for phy in range(2):
            for phx in range(2):
                sub = jnp.take(w, jnp.array(_PHASE_TAPS[phy]), axis=2)
                sub = jnp.take(sub, jnp.array(_PHASE_TAPS[phx]), axis=3)
                mats.append(jnp.transpose(sub, (0, 2, 3, 1)).reshape(cin * 4, cout))
        wf = jnp.stack(mats, axis=0)                       # [4, Cin*4, Cout]
        wf = _pad_axis(wf, -2, _round_up(cin * 4, _LANE))
        b = p["b"]
        if pad_cout_to is not None:                        # lane-dense final layer
            wf = _pad_axis(wf, -1, pad_cout_to)
            b = _pad_axis(b, -1, pad_cout_to)
        out = dict(wf=wf.astype(jnp.bfloat16), b=b)
        if "gamma" in p:
            out.update(gamma=p["gamma"], beta=p["beta"])
        return out

    def prep_conv3(p):
        w = p["w"]                                         # [Cout, Cin, 3, 3]
        cout, cin = w.shape[0], w.shape[1]
        wf = jnp.transpose(w, (1, 2, 3, 0)).reshape(cin * 9, cout)[None]
        wf = _pad_axis(wf, -2, _round_up(cin * 9, _LANE)).astype(jnp.bfloat16)
        return dict(wf=wf, b=p["b"], gamma=p["gamma"], beta=p["beta"])

    def prep_res(p):
        return dict(conv1=prep_conv3(p["conv1"]), conv2=prep_conv3(p["conv2"]))

    return dict(
        emb=params["emb"],
        ct0=prep_ct0(params["ct0"]),
        res1=prep_res(params["res1"]),
        ct1=prep_convt(params["ct1"]),
        res2=prep_res(params["res2"]),
        ct2=prep_convt(params["ct2"]),
        res3=prep_res(params["res3"]),
        ct3=prep_convt(params["ct3"], pad_cout_to=_LANE),
    )


# ----------------------------------------------------------------------------------
# Forward pass (mirrors rcGenerator.forward)
# ----------------------------------------------------------------------------------
def rc_generator_forward(prep, z, labels):
    # z: [B, noise_dim, 1, 1] (NCHW like PyTorch), labels: [B] int32
    B = z.shape[0]
    emb = prep["emb"][labels]                              # nn.Embedding lookup
    x = jnp.concatenate([z.reshape(B, -1), emb], axis=1).astype(jnp.bfloat16)

    h = _convt0_layer(x, prep["ct0"])                      # -> [B, 4, 4, 256]
    h = _residual_block(h, prep["res1"])
    h = _convt_bn_relu(h, prep["ct1"])                     # -> [B, 8, 8, 128]
    h = _residual_block(h, prep["res2"])
    h = _convt_bn_relu(h, prep["ct2"])                     # -> [B, 16, 16, 64]
    h = _residual_block(h, prep["res3"])

    # Final ConvTranspose2d(64, 3, 4, 2, 1) + Tanh; Cout padded 3->128 for lane-dense
    # stores, sliced back to 3 channels afterwards.
    p = prep["ct3"]
    Bh, H, W, _ = h.shape
    X = _convt_phase_im2col(h, p["wf"].shape[1])
    y = bmm_bias_tanh(X, p["wf"], p["b"])                  # [4, B*H*W, 128] f32
    out = _interleave_phases(y[..., :3], Bh, H, W)         # [B, 2H, 2W, 3]
    return jnp.transpose(out, (0, 3, 1, 2))                # back to NCHW


# NOTE: BatchNorm2d is evaluated with batch statistics (PyTorch train-mode default for a
# freshly constructed module); running-stat buffer updates do not affect this forward.
# TODO(synk): running_mean/running_var buffer updates (training side effect) not modeled.

if __name__ == "__main__":
    B, noise_dim, label_dim, num_classes = 2, 8, 8, 10

    key = jax.random.PRNGKey(0)
    kp, kz, kl = jax.random.split(key, 3)
    params = init_params(kp, label_dim=label_dim, noise_dim=noise_dim,
                         num_classes=num_classes)
    prep = prepare_params(params)

    z = jax.random.normal(kz, (B, noise_dim, 1, 1), dtype=jnp.float32)
    labels = jax.random.randint(kl, (B,), 0, num_classes, dtype=jnp.int32)

    fwd = jax.jit(rc_generator_forward)
    out = jax.block_until_ready(fwd(prep, z, labels))

    assert out.shape == (B, 3, 32, 32), out.shape
    assert bool(jnp.all(jnp.isfinite(out)))
    print("KERNEL_OK")
</pallas_src>

<mosaic_0001>
module attributes {stable_mosaic.version = 11 : i64} {
  func.func @_bmm_bias_stats_kernel(%arg0: i32, %arg1: i32, %arg2: memref<1x2x128xbf16, #tpu.memory_space<vmem>>, %arg3: memref<1x128x256xbf16, #tpu.memory_space<vmem>>, %arg4: memref<1x256xf32, #tpu.memory_space<vmem>>, %arg5: memref<1x2x256xf32, #tpu.memory_space<vmem>>, %arg6: memref<1x1x1x256xf32, #tpu.memory_space<vmem>>, %arg7: memref<1x1x1x256xf32, #tpu.memory_space<vmem>>) attributes {dimension_semantics = [#tpu.dimension_semantics<parallel>, #tpu.dimension_semantics<parallel>], iteration_bounds = array<i64: 16, 1>, scalar_prefetch = 0 : i64, scratch_operands = 0 : i64, tpu.core_type = #tpu.core_type<tc>, window_params = [{transform_indices = @transform_0, window_bounds = array<i64: 1, 2, 128>}, {transform_indices = @transform_1, window_bounds = array<i64: 1, 128, 256>}, {pipeline_mode = #tpu.pipeline_mode<synchronous>, transform_indices = @transform_2, window_bounds = array<i64: 1, 256>}, {transform_indices = @transform_3, window_bounds = array<i64: 1, 2, 256>}, {transform_indices = @transform_4, window_bounds = array<i64: 1, 1, 1, 256>}, {transform_indices = @transform_5, window_bounds = array<i64: 1, 1, 1, 256>}]} {
    %c0 = arith.constant 0 : index
    %c0_0 = arith.constant 0 : index
    %c0_1 = arith.constant 0 : index
    %0 = vector.load %arg2[%c0, %c0_0, %c0_1] : memref<1x2x128xbf16, #tpu.memory_space<vmem>>, vector<1x2x128xbf16>
    %1 = vector.shape_cast %0 : vector<1x2x128xbf16> to vector<2x128xbf16>
    %c0_2 = arith.constant 0 : index
    %c0_3 = arith.constant 0 : index
    %c0_4 = arith.constant 0 : index
    %2 = vector.load %arg3[%c0_2, %c0_3, %c0_4] : memref<1x128x256xbf16, #tpu.memory_space<vmem>>, vector<1x128x256xbf16>
    %3 = vector.shape_cast %2 : vector<1x128x256xbf16> to vector<128x256xbf16>
    %cst = arith.constant dense<0.000000e+00> : vector<2x256xf32>
    %4 = tpu.matmul %1, %3, %cst {dimension_numbers = #tpu.dot_dimension_numbers<[1], [0], [0], [1], [0, 0, 1, 1], [], []>} : vector<2x128xbf16>, vector<128x256xbf16>, vector<2x256xf32> -> vector<2x256xf32>
    %c0_5 = arith.constant 0 : index
    %c0_6 = arith.constant 0 : index
    %5 = vector.load %arg4[%c0_5, %c0_6] : memref<1x256xf32, #tpu.memory_space<vmem>>, vector<1x256xf32>
    %6 = vector.broadcast %5 : vector<1x256xf32> to vector<2x256xf32>
    %7 = arith.addf %4, %6 : vector<2x256xf32>
    %c0_7 = arith.constant 0 : index
    %c0_8 = arith.constant 0 : index
    %c0_9 = arith.constant 0 : index
    %8 = vector.load %arg5[%c0_7, %c0_8, %c0_9] : memref<1x2x256xf32, #tpu.memory_space<vmem>>, vector<1x2x256xf32>
    %9 = vector.shape_cast %8 : vector<1x2x256xf32> to vector<2x256xf32>
    %10 = vector.shape_cast %7 : vector<2x256xf32> to vector<1x2x256xf32>
    tpu.vector_store %arg5[%c0_7, %c0_8, %c0_9], %10 {strides = array<i32>} : memref<1x2x256xf32, #tpu.memory_space<vmem>>, vector<1x2x256xf32>,
    %cst_10 = arith.constant dense<0.000000e+00> : vector<256xf32>
    %11 = vector.multi_reduction <add>, %7, %cst_10 [0] : vector<2x256xf32> to vector<256xf32>
    %12 = vector.shape_cast %11 : vector<256xf32> to vector<1x1x1x256xf32>
    %c0_11 = arith.constant 0 : index
    %c0_12 = arith.constant 0 : index
    %c0_13 = arith.constant 0 : index
    %c0_14 = arith.constant 0 : index
    %13 = vector.load %arg6[%c0_11, %c0_12, %c0_13, %c0_14] : memref<1x1x1x256xf32, #tpu.memory_space<vmem>>, vector<1x1x1x256xf32>
    tpu.vector_store %arg6[%c0_11, %c0_12, %c0_13, %c0_14], %12 {strides = array<i32>} : memref<1x1x1x256xf32, #tpu.memory_space<vmem>>, vector<1x1x1x256xf32>,
    %14 = arith.mulf %7, %7 : vector<2x256xf32>
    %cst_15 = arith.constant dense<0.000000e+00> : vector<256xf32>
    %15 = vector.multi_reduction <add>, %14, %cst_15 [0] : vector<2x256xf32> to vector<256xf32>
    %16 = vector.shape_cast %15 : vector<256xf32> to vector<1x1x1x256xf32>
    %c0_16 = arith.constant 0 : index
    %c0_17 = arith.constant 0 : index
    %c0_18 = arith.constant 0 : index
    %c0_19 = arith.constant 0 : index
    %17 = vector.load %arg7[%c0_16, %c0_17, %c0_18, %c0_19] : memref<1x1x1x256xf32, #tpu.memory_space<vmem>>, vector<1x1x1x256xf32>
    tpu.vector_store %arg7[%c0_16, %c0_17, %c0_18, %c0_19], %16 {strides = array<i32>} : memref<1x1x1x256xf32, #tpu.memory_space<vmem>>, vector<1x1x1x256xf32>,
    return
  }
  func.func @transform_0(%arg0: i32, %arg1: i32) -> (i32, i32, i32) {
    %c0_i32 = arith.constant 0 : i32
    %c0_i32_0 = arith.constant 0 : i32
    return %arg0, %arg1, %c0_i32 : i32, i32, i32
  }
  func.func @transform_1(%arg0: i32, %arg1: i32) -> (i32, i32, i32) {
    %c0_i32 = arith.constant 0 : i32
    %c0_i32_0 = arith.constant 0 : i32
    %c0_i32_1 = arith.constant 0 : i32
    return %arg0, %c0_i32, %c0_i32_0 : i32, i32, i32
  }
  func.func @transform_2(%arg0: i32, %arg1: i32) -> (i32, i32) {
    %c0_i32 = arith.constant 0 : i32
    %c0_i32_0 = arith.constant 0 : i32
    %c0_i32_1 = arith.constant 0 : i32
    return %c0_i32, %c0_i32_0 : i32, i32
  }
  func.func @transform_3(%arg0: i32, %arg1: i32) -> (i32, i32, i32) {
    %c0_i32 = arith.constant 0 : i32
    %c0_i32_0 = arith.constant 0 : i32
    return %arg0, %arg1, %c0_i32 : i32, i32, i32
  }
  func.func @transform_4(%arg0: i32, %arg1: i32) -> (i32, i32, i32, i32) {
    %c0_i32 = arith.constant 0 : i32
    %c0_i32_0 = arith.constant 0 : i32
    %c0_i32_1 = arith.constant 0 : i32
    return %arg0, %arg1, %c0_i32, %c0_i32_0 : i32, i32, i32, i32
  }
  func.func @transform_5(%arg0: i32, %arg1: i32) -> (i32, i32, i32, i32) {
    %c0_i32 = arith.constant 0 : i32
    %c0_i32_0 = arith.constant 0 : i32
    %c0_i32_1 = arith.constant 0 : i32
    return %arg0, %arg1, %c0_i32, %c0_i32_0 : i32, i32, i32, i32
  }
}

module attributes {stable_mosaic.version = 11 : i64} {
  func.func @_bn_act_kernel(%arg0: i32, %arg1: memref<32x256xf32, #tpu.memory_space<vmem>>, %arg2: memref<1x256xf32, #tpu.memory_space<vmem>>, %arg3: memref<1x256xf32, #tpu.memory_space<vmem>>, %arg4: memref<32x256xbf16, #tpu.memory_space<vmem>>) attributes {dimension_semantics = [#tpu.dimension_semantics<parallel>], iteration_bounds = array<i64: 1>, scalar_prefetch = 0 : i64, scratch_operands = 0 : i64, tpu.core_type = #tpu.core_type<tc>, window_params = [{transform_indices = @transform_0, window_bounds = array<i64: 32, 256>}, {pipeline_mode = #tpu.pipeline_mode<synchronous>, transform_indices = @transform_1, window_bounds = array<i64: 1, 256>}, {pipeline_mode = #tpu.pipeline_mode<synchronous>, transform_indices = @transform_2, window_bounds = array<i64: 1, 256>}, {transform_indices = @transform_3, window_bounds = array<i64: 32, 256>}]} {
    %c0 = arith.constant 0 : index
    %c0_0 = arith.constant 0 : index
    %0 = vector.load %arg1[%c0, %c0_0] : memref<32x256xf32, #tpu.memory_space<vmem>>, vector<32x256xf32>
    %c0_1 = arith.constant 0 : index
    %c0_2 = arith.constant 0 : index
    %1 = vector.load %arg2[%c0_1, %c0_2] : memref<1x256xf32, #tpu.memory_space<vmem>>, vector<1x256xf32>
    %2 = vector.broadcast %1 : vector<1x256xf32> to vector<32x256xf32>
    %3 = arith.mulf %0, %2 : vector<32x256xf32>
    %c0_3 = arith.constant 0 : index
    %c0_4 = arith.constant 0 : index
    %4 = vector.load %arg3[%c0_3, %c0_4] : memref<1x256xf32, #tpu.memory_space<vmem>>, vector<1x256xf32>
    %5 = vector.broadcast %4 : vector<1x256xf32> to vector<32x256xf32>
    %6 = arith.addf %3, %5 : vector<32x256xf32>
    %cst = arith.constant 0.000000e+00 : f32
    %7 = vector.broadcast %cst : f32 to vector<32x256xf32>
    %8 = arith.maximumf %6, %7 : vector<32x256xf32>
    %9 = arith.truncf %8 : vector<32x256xf32> to vector<32x256xbf16>
    %c0_5 = arith.constant 0 : index
    %c0_6 = arith.constant 0 : index
    %10 = vector.load %arg4[%c0_5, %c0_6] : memref<32x256xbf16, #tpu.memory_space<vmem>>, vector<32x256xbf16>
    tpu.vector_store %arg4[%c0_5, %c0_6], %9 {strides = array<i32>} : memref<32x256xbf16, #tpu.memory_space<vmem>>, vector<32x256xbf16>,
    return
  }
  func.func @transform_0(%arg0: i32) -> (i32, i32) {
    %c0_i32 = arith.constant 0 : i32
    %c0_i32_0 = arith.constant 0 : i32
    return %arg0, %c0_i32 : i32, i32
  }
  func.func @transform_1(%arg0: i32) -> (i32, i32) {
    %c0_i32 = arith.constant 0 : i32
    %c0_i32_0 = arith.constant 0 : i32
    %c0_i32_1 = arith.constant 0 : i32
    return %c0_i32, %c0_i32_0 : i32, i32
  }
  func.func @transform_2(%arg0: i32) -> (i32, i32) {
    %c0_i32 = arith.constant 0 : i32
    %c0_i32_0 = arith.constant 0 : i32
    %c0_i32_1 = arith.constant 0 : i32
    return %c0_i32, %c0_i32_0 : i32, i32
  }
  func.func @transform_3(%arg0: i32) -> (i32, i32) {
    %c0_i32 = arith.constant 0 : i32
    %c0_i32_0 = arith.constant 0 : i32
    return %arg0, %c0_i32 : i32, i32
  }
}

module attributes {stable_mosaic.version = 11 : i64} {
  func.func @_bmm_bias_stats_kernel(%arg0: i32, %arg1: i32, %arg2: memref<1x32x2304xbf16, #tpu.memory_space<vmem>>, %arg3: memref<1x2304x256xbf16, #tpu.memory_space<vmem>>, %arg4: memref<1x256xf32, #tpu.memory_space<vmem>>, %arg5: memref<1x32x256xf32, #tpu.memory_space<vmem>>, %arg6: memref<1x1x1x256xf32, #tpu.memory_space<vmem>>, %arg7: memref<1x1x1x256xf32, #tpu.memory_space<vmem>>) attributes {dimension_semantics = [#tpu.dimension_semantics<parallel>, #tpu.dimension_semantics<parallel>], iteration_bounds = array<i64: 1, 1>, scalar_prefetch = 0 : i64, scratch_operands = 0 : i64, tpu.core_type = #tpu.core_type<tc>, window_params = [{transform_indices = @transform_0, window_bounds = array<i64: 1, 32, 2304>}, {transform_indices = @transform_1, window_bounds = array<i64: 1, 2304, 256>}, {pipeline_mode = #tpu.pipeline_mode<synchronous>, transform_indices = @transform_2, window_bounds = array<i64: 1, 256>}, {transform_indices = @transform_3, window_bounds = array<i64: 1, 32, 256>}, {transform_indices = @transform_4, window_bounds = array<i64: 1, 1, 1, 256>}, {transform_indices = @transform_5, window_bounds = array<i64: 1, 1, 1, 256>}]} {
    %c0 = arith.constant 0 : index
    %c0_0 = arith.constant 0 : index
    %c0_1 = arith.constant 0 : index
    %0 = vector.load %arg2[%c0, %c0_0, %c0_1] : memref<1x32x2304xbf16, #tpu.memory_space<vmem>>, vector<1x32x2304xbf16>
    %1 = vector.shape_cast %0 : vector<1x32x2304xbf16> to vector<32x2304xbf16>
    %c0_2 = arith.constant 0 : index
    %c0_3 = arith.constant 0 : index
    %c0_4 = arith.constant 0 : index
    %2 = vector.load %arg3[%c0_2, %c0_3, %c0_4] : memref<1x2304x256xbf16, #tpu.memory_space<vmem>>, vector<1x2304x256xbf16>
    %3 = vector.shape_cast %2 : vector<1x2304x256xbf16> to vector<2304x256xbf16>
    %cst = arith.constant dense<0.000000e+00> : vector<32x256xf32>
    %4 = tpu.matmul %1, %3, %cst {dimension_numbers = #tpu.dot_dimension_numbers<[1], [0], [0], [1], [0, 0, 1, 1], [], []>} : vector<32x2304xbf16>, vector<2304x256xbf16>, vector<32x256xf32> -> vector<32x256xf32>
    %c0_5 = arith.constant 0 : index
    %c0_6 = arith.constant 0 : index
    %5 = vector.load %arg4[%c0_5, %c0_6] : memref<1x256xf32, #tpu.memory_space<vmem>>, vector<1x256xf32>
    %6 = vector.broadcast %5 : vector<1x256xf32> to vector<32x256xf32>
    %7 = arith.addf %4, %6 : vector<32x256xf32>
    %c0_7 = arith.constant 0 : index
    %c0_8 = arith.constant 0 : index
    %c0_9 = arith.constant 0 : index
    %8 = vector.load %arg5[%c0_7, %c0_8, %c0_9] : memref<1x32x256xf32, #tpu.memory_space<vmem>>, vector<1x32x256xf32>
    %9 = vector.shape_cast %8 : vector<1x32x256xf32> to vector<32x256xf32>
    %10 = vector.shape_cast %7 : vector<32x256xf32> to vector<1x32x256xf32>
    tpu.vector_store %arg5[%c0_7, %c0_8, %c0_9], %10 {strides = array<i32>} : memref<1x32x256xf32, #tpu.memory_space<vmem>>, vector<1x32x256xf32>,
    %cst_10 = arith.constant dense<0.000000e+00> : vector<256xf32>
    %11 = vector.multi_reduction <add>, %7, %cst_10 [0] : vector<32x256xf32> to vector<256xf32>
    %12 = vector.shape_cast %11 : vector<256xf32> to vector<1x1x1x256xf32>
    %c0_11 = arith.constant 0 : index
    %c0_12 = arith.constant 0 : index
    %c0_13 = arith.constant 0 : index
    %c0_14 = arith.constant 0 : index
    %13 = vector.load %arg6[%c0_11, %c0_12, %c0_13, %c0_14] : memref<1x1x1x256xf32, #tpu.memory_space<vmem>>, vector<1x1x1x256xf32>
    tpu.vector_store %arg6[%c0_11, %c0_12, %c0_13, %c0_14], %12 {strides = array<i32>} : memref<1x1x1x256xf32, #tpu.memory_space<vmem>>, vector<1x1x1x256xf32>,
    %14 = arith.mulf %7, %7 : vector<32x256xf32>
    %cst_15 = arith.constant dense<0.000000e+00> : vector<256xf32>
    %15 = vector.multi_reduction <add>, %14, %cst_15 [0] : vector<32x256xf32> to vector<256xf32>
    %16 = vector.shape_cast %15 : vector<256xf32> to vector<1x1x1x256xf32>
    %c0_16 = arith.constant 0 : index
    %c0_17 = arith.constant 0 : index
    %c0_18 = arith.constant 0 : index
    %c0_19 = arith.constant 0 : index
    %17 = vector.load %arg7[%c0_16, %c0_17, %c0_18, %c0_19] : memref<1x1x1x256xf32, #tpu.memory_space<vmem>>, vector<1x1x1x256xf32>
    tpu.vector_store %arg7[%c0_16, %c0_17, %c0_18, %c0_19], %16 {strides = array<i32>} : memref<1x1x1x256xf32, #tpu.memory_space<vmem>>, vector<1x1x1x256xf32>,
    return
  }
  func.func @transform_0(%arg0: i32, %arg1: i32) -> (i32, i32, i32) {
    %c0_i32 = arith.constant 0 : i32
    %c0_i32_0 = arith.constant 0 : i32
    return %arg0, %arg1, %c0_i32 : i32, i32, i32
  }
  func.func @transform_1(%arg0: i32, %arg1: i32) -> (i32, i32, i32) {
    %c0_i32 = arith.constant 0 : i32
    %c0_i32_0 = arith.constant 0 : i32
    %c0_i32_1 = arith.constant 0 : i32
    return %arg0, %c0_i32, %c0_i32_0 : i32, i32, i32
  }
  func.func @transform_2(%arg0: i32, %arg1: i32) -> (i32, i32) {
    %c0_i32 = arith.constant 0 : i32
    %c0_i32_0 = arith.constant 0 : i32
    %c0_i32_1 = arith.constant 0 : i32
    return %c0_i32, %c0_i32_0 : i32, i32
  }
  func.func @transform_3(%arg0: i32, %arg1: i32) -> (i32, i32, i32) {
    %c0_i32 = arith.constant 0 : i32
    %c0_i32_0 = arith.constant 0 : i32
    return %arg0, %arg1, %c0_i32 : i32, i32, i32
  }
  func.func @transform_4(%arg0: i32, %arg1: i32) -> (i32, i32, i32, i32) {
    %c0_i32 = arith.constant 0 : i32
    %c0_i32_0 = arith.constant 0 : i32
    %c0_i32_1 = arith.constant 0 : i32
    return %arg0, %arg1, %c0_i32, %c0_i32_0 : i32, i32, i32, i32
  }
  func.func @transform_5(%arg0: i32, %arg1: i32) -> (i32, i32, i32, i32) {
    %c0_i32 = arith.constant 0 : i32
    %c0_i32_0 = arith.constant 0 : i32
    %c0_i32_1 = arith.constant 0 : i32
    return %arg0, %arg1, %c0_i32, %c0_i32_0 : i32, i32, i32, i32
  }
}

module attributes {stable_mosaic.version = 11 : i64} {
  func.func @_bn_add_kernel(%arg0: i32, %arg1: memref<32x256xf32, #tpu.memory_space<vmem>>, %arg2: memref<1x256xf32, #tpu.memory_space<vmem>>, %arg3: memref<1x256xf32, #tpu.memory_space<vmem>>, %arg4: memref<32x256xbf16, #tpu.memory_space<vmem>>, %arg5: memref<32x256xbf16, #tpu.memory_space<vmem>>) attributes {dimension_semantics = [#tpu.dimension_semantics<parallel>], iteration_bounds = array<i64: 1>, scalar_prefetch = 0 : i64, scratch_operands = 0 : i64, tpu.core_type = #tpu.core_type<tc>, window_params = [{transform_indices = @transform_0, window_bounds = array<i64: 32, 256>}, {pipeline_mode = #tpu.pipeline_mode<synchronous>, transform_indices = @transform_1, window_bounds = array<i64: 1, 256>}, {pipeline_mode = #tpu.pipeline_mode<synchronous>, transform_indices = @transform_2, window_bounds = array<i64: 1, 256>}, {transform_indices = @transform_3, window_bounds = array<i64: 32, 256>}, {transform_indices = @transform_4, window_bounds = array<i64: 32, 256>}]} {
    %c0 = arith.constant 0 : index
    %c0_0 = arith.constant 0 : index
    %0 = vector.load %arg1[%c0, %c0_0] : memref<32x256xf32, #tpu.memory_space<vmem>>, vector<32x256xf32>
    %c0_1 = arith.constant 0 : index
    %c0_2 = arith.constant 0 : index
    %1 = vector.load %arg2[%c0_1, %c0_2] : memref<1x256xf32, #tpu.memory_space<vmem>>, vector<1x256xf32>
    %2 = vector.broadcast %1 : vector<1x256xf32> to vector<32x256xf32>
    %3 = arith.mulf %0, %2 : vector<32x256xf32>
    %c0_3 = arith.constant 0 : index
    %c0_4 = arith.constant 0 : index
    %4 = vector.load %arg3[%c0_3, %c0_4] : memref<1x256xf32, #tpu.memory_space<vmem>>, vector<1x256xf32>
    %5 = vector.broadcast %4 : vector<1x256xf32> to vector<32x256xf32>
    %6 = arith.addf %3, %5 : vector<32x256xf32>
    %c0_5 = arith.constant 0 : index
    %c0_6 = arith.constant 0 : index
    %7 = vector.load %arg4[%c0_5, %c0_6] : memref<32x256xbf16, #tpu.memory_space<vmem>>, vector<32x256xbf16>
    %8 = arith.extf %7 : vector<32x256xbf16> to vector<32x256xf32>
    %9 = arith.addf %6, %8 : vector<32x256xf32>
    %10 = arith.truncf %9 : vector<32x256xf32> to vector<32x256xbf16>
    %c0_7 = arith.constant 0 : index
    %c0_8 = arith.constant 0 : index
    %11 = vector.load %arg5[%c0_7, %c0_8] : memref<32x256xbf16, #tpu.memory_space<vmem>>, vector<32x256xbf16>
    tpu.vector_store %arg5[%c0_7, %c0_8], %10 {strides = array<i32>} : memref<32x256xbf16, #tpu.memory_space<vmem>>, vector<32x256xbf16>,
    return
  }
  func.func @transform_0(%arg0: i32) -> (i32, i32) {
    %c0_i32 = arith.constant 0 : i32
    %c0_i32_0 = arith.constant 0 : i32
    return %arg0, %c0_i32 : i32, i32
  }
  func.func @transform_1(%arg0: i32) -> (i32, i32) {
    %c0_i32 = arith.constant 0 : i32
    %c0_i32_0 = arith.constant 0 : i32
    %c0_i32_1 = arith.constant 0 : i32
    return %c0_i32, %c0_i32_0 : i32, i32
  }
  func.func @transform_2(%arg0: i32) -> (i32, i32) {
    %c0_i32 = arith.constant 0 : i32
    %c0_i32_0 = arith.constant 0 : i32
    %c0_i32_1 = arith.constant 0 : i32
    return %c0_i32, %c0_i32_0 : i32, i32
  }
  func.func @transform_3(%arg0: i32) -> (i32, i32) {
    %c0_i32 = arith.constant 0 : i32
    %c0_i32_0 = arith.constant 0 : i32
    return %arg0, %c0_i32 : i32, i32
  }
  func.func @transform_4(%arg0: i32) -> (i32, i32) {
    %c0_i32 = arith.constant 0 : i32
    %c0_i32_0 = arith.constant 0 : i32
    return %arg0, %c0_i32 : i32, i32
  }
}

module attributes {stable_mosaic.version = 11 : i64} {
  func.func @_bmm_bias_stats_kernel(%arg0: i32, %arg1: i32, %arg2: memref<1x32x1024xbf16, #tpu.memory_space<vmem>>, %arg3: memref<1x1024x128xbf16, #tpu.memory_space<vmem>>, %arg4: memref<1x128xf32, #tpu.memory_space<vmem>>, %arg5: memref<1x32x128xf32, #tpu.memory_space<vmem>>, %arg6: memref<1x1x1x128xf32, #tpu.memory_space<vmem>>, %arg7: memref<1x1x1x128xf32, #tpu.memory_space<vmem>>) attributes {dimension_semantics = [#tpu.dimension_semantics<parallel>, #tpu.dimension_semantics<parallel>], iteration_bounds = array<i64: 4, 1>, scalar_prefetch = 0 : i64, scratch_operands = 0 : i64, tpu.core_type = #tpu.core_type<tc>, window_params = [{transform_indices = @transform_0, window_bounds = array<i64: 1, 32, 1024>}, {transform_indices = @transform_1, window_bounds = array<i64: 1, 1024, 128>}, {pipeline_mode = #tpu.pipeline_mode<synchronous>, transform_indices = @transform_2, window_bounds = array<i64: 1, 128>}, {transform_indices = @transform_3, window_bounds = array<i64: 1, 32, 128>}, {transform_indices = @transform_4, window_bounds = array<i64: 1, 1, 1, 128>}, {transform_indices = @transform_5, window_bounds = array<i64: 1, 1, 1, 128>}]} {
    %c0 = arith.constant 0 : index
    %c0_0 = arith.constant 0 : index
    %c0_1 = arith.constant 0 : index
    %0 = vector.load %arg2[%c0, %c0_0, %c0_1] : memref<1x32x1024xbf16, #tpu.memory_space<vmem>>, vector<1x32x1024xbf16>
    %1 = vector.shape_cast %0 : vector<1x32x1024xbf16> to vector<32x1024xbf16>
    %c0_2 = arith.constant 0 : index
    %c0_3 = arith.constant 0 : index
    %c0_4 = arith.constant 0 : index
    %2 = vector.load %arg3[%c0_2, %c0_3, %c0_4] : memref<1x1024x128xbf16, #tpu.memory_space<vmem>>, vector<1x1024x128xbf16>
    %3 = vector.shape_cast %2 : vector<1x1024x128xbf16> to vector<1024x128xbf16>
    %cst = arith.constant dense<0.000000e+00> : vector<32x128xf32>
    %4 = tpu.matmul %1, %3, %cst {dimension_numbers = #tpu.dot_dimension_numbers<[1], [0], [0], [1], [0, 0, 1, 1], [], []>} : vector<32x1024xbf16>, vector<1024x128xbf16>, vector<32x128xf32> -> vector<32x128xf32>
    %c0_5 = arith.constant 0 : index
    %c0_6 = arith.constant 0 : index
    %5 = vector.load %arg4[%c0_5, %c0_6] : memref<1x128xf32, #tpu.memory_space<vmem>>, vector<1x128xf32>
    %6 = vector.broadcast %5 : vector<1x128xf32> to vector<32x128xf32>
    %7 = arith.addf %4, %6 : vector<32x128xf32>
    %c0_7 = arith.constant 0 : index
    %c0_8 = arith.constant 0 : index
    %c0_9 = arith.constant 0 : index
    %8 = vector.load %arg5[%c0_7, %c0_8, %c0_9] : memref<1x32x128xf32, #tpu.memory_space<vmem>>, vector<1x32x128xf32>
    %9 = vector.shape_cast %8 : vector<1x32x128xf32> to vector<32x128xf32>
    %10 = vector.shape_cast %7 : vector<32x128xf32> to vector<1x32x128xf32>
    tpu.vector_store %arg5[%c0_7, %c0_8, %c0_9], %10 {strides = array<i32>} : memref<1x32x128xf32, #tpu.memory_space<vmem>>, vector<1x32x128xf32>,
    %cst_10 = arith.constant dense<0.000000e+00> : vector<128xf32>
    %11 = vector.multi_reduction <add>, %7, %cst_10 [0] : vector<32x128xf32> to vector<128xf32>
    %12 = vector.shape_cast %11 : vector<128xf32> to vector<1x1x1x128xf32>
    %c0_11 = arith.constant 0 : index
    %c0_12 = arith.constant 0 : index
    %c0_13 = arith.constant 0 : index
    %c0_14 = arith.constant 0 : index
    %13 = vector.load %arg6[%c0_11, %c0_12, %c0_13, %c0_14] : memref<1x1x1x128xf32, #tpu.memory_space<vmem>>, vector<1x1x1x128xf32>
    tpu.vector_store %arg6[%c0_11, %c0_12, %c0_13, %c0_14], %12 {strides = array<i32>} : memref<1x1x1x128xf32, #tpu.memory_space<vmem>>, vector<1x1x1x128xf32>,
    %14 = arith.mulf %7, %7 : vector<32x128xf32>
    %cst_15 = arith.constant dense<0.000000e+00> : vector<128xf32>
    %15 = vector.multi_reduction <add>, %14, %cst_15 [0] : vector<32x128xf32> to vector<128xf32>
    %16 = vector.shape_cast %15 : vector<128xf32> to vector<1x1x1x128xf32>
    %c0_16 = arith.constant 0 : index
    %c0_17 = arith.constant 0 : index
    %c0_18 = arith.constant 0 : index
    %c0_19 = arith.constant 0 : index
    %17 = vector.load %arg7[%c0_16, %c0_17, %c0_18, %c0_19] : memref<1x1x1x128xf32, #tpu.memory_space<vmem>>, vector<1x1x1x128xf32>
    tpu.vector_store %arg7[%c0_16, %c0_17, %c0_18, %c0_19], %16 {strides = array<i32>} : memref<1x1x1x128xf32, #tpu.memory_space<vmem>>, vector<1x1x1x128xf32>,
    return
  }
  func.func @transform_0(%arg0: i32, %arg1: i32) -> (i32, i32, i32) {
    %c0_i32 = arith.constant 0 : i32
    %c0_i32_0 = arith.constant 0 : i32
    return %arg0, %arg1, %c0_i32 : i32, i32, i32
  }
  func.func @transform_1(%arg0: i32, %arg1: i32) -> (i32, i32, i32) {
    %c0_i32 = arith.constant 0 : i32
    %c0_i32_0 = arith.constant 0 : i32
    %c0_i32_1 = arith.constant 0 : i32
    return %arg0, %c0_i32, %c0_i32_0 : i32, i32, i32
  }
  func.func @transform_2(%arg0: i32, %arg1: i32) -> (i32, i32) {
    %c0_i32 = arith.constant 0 : i32
    %c0_i32_0 = arith.constant 0 : i32
    %c0_i32_1 = arith.constant 0 : i32
    return %c0_i32, %c0_i32_0 : i32, i32
  }
  func.func @transform_3(%arg0: i32, %arg1: i32) -> (i32, i32, i32) {
    %c0_i32 = arith.constant 0 : i32
    %c0_i32_0 = arith.constant 0 : i32
    return %arg0, %arg1, %c0_i32 : i32, i32, i32
  }
  func.func @transform_4(%arg0: i32, %arg1: i32) -> (i32, i32, i32, i32) {
    %c0_i32 = arith.constant 0 : i32
    %c0_i32_0 = arith.constant 0 : i32
    %c0_i32_1 = arith.constant 0 : i32
    return %arg0, %arg1, %c0_i32, %c0_i32_0 : i32, i32, i32, i32
  }
  func.func @transform_5(%arg0: i32, %arg1: i32) -> (i32, i32, i32, i32) {
    %c0_i32 = arith.constant 0 : i32
    %c0_i32_0 = arith.constant 0 : i32
    %c0_i32_1 = arith.constant 0 : i32
    return %arg0, %arg1, %c0_i32, %c0_i32_0 : i32, i32, i32, i32
  }
}

module attributes {stable_mosaic.version = 11 : i64} {
  func.func @_bn_act_kernel(%arg0: i32, %arg1: memref<128x128xf32, #tpu.memory_space<vmem>>, %arg2: memref<1x128xf32, #tpu.memory_space<vmem>>, %arg3: memref<1x128xf32, #tpu.memory_space<vmem>>, %arg4: memref<128x128xbf16, #tpu.memory_space<vmem>>) attributes {dimension_semantics = [#tpu.dimension_semantics<parallel>], iteration_bounds = array<i64: 1>, scalar_prefetch = 0 : i64, scratch_operands = 0 : i64, tpu.core_type = #tpu.core_type<tc>, window_params = [{transform_indices = @transform_0, window_bounds = array<i64: 128, 128>}, {pipeline_mode = #tpu.pipeline_mode<synchronous>, transform_indices = @transform_1, window_bounds = array<i64: 1, 128>}, {pipeline_mode = #tpu.pipeline_mode<synchronous>, transform_indices = @transform_2, window_bounds = array<i64: 1, 128>}, {transform_indices = @transform_3, window_bounds = array<i64: 128, 128>}]} {
    %c0 = arith.constant 0 : index
    %c0_0 = arith.constant 0 : index
    %0 = vector.load %arg1[%c0, %c0_0] : memref<128x128xf32, #tpu.memory_space<vmem>>, vector<128x128xf32>
    %c0_1 = arith.constant 0 : index
    %c0_2 = arith.constant 0 : index
    %1 = vector.load %arg2[%c0_1, %c0_2] : memref<1x128xf32, #tpu.memory_space<vmem>>, vector<1x128xf32>
    %2 = vector.broadcast %1 : vector<1x128xf32> to vector<128x128xf32>
    %3 = arith.mulf %0, %2 : vector<128x128xf32>
    %c0_3 = arith.constant 0 : index
    %c0_4 = arith.constant 0 : index
    %4 = vector.load %arg3[%c0_3, %c0_4] : memref<1x128xf32, #tpu.memory_space<vmem>>, vector<1x128xf32>
    %5 = vector.broadcast %4 : vector<1x128xf32> to vector<128x128xf32>
    %6 = arith.addf %3, %5 : vector<128x128xf32>
    %cst = arith.constant 0.000000e+00 : f32
    %7 = vector.broadcast %cst : f32 to vector<128x128xf32>
    %8 = arith.maximumf %6, %7 : vector<128x128xf32>
    %9 = arith.truncf %8 : vector<128x128xf32> to vector<128x128xbf16>
    %c0_5 = arith.constant 0 : index
    %c0_6 = arith.constant 0 : index
    %10 = vector.load %arg4[%c0_5, %c0_6] : memref<128x128xbf16, #tpu.memory_space<vmem>>, vector<128x128xbf16>
    tpu.vector_store %arg4[%c0_5, %c0_6], %9 {strides = array<i32>} : memref<128x128xbf16, #tpu.memory_space<vmem>>, vector<128x128xbf16>,
    return
  }
  func.func @transform_0(%arg0: i32) -> (i32, i32) {
    %c0_i32 = arith.constant 0 : i32
    %c0_i32_0 = arith.constant 0 : i32
    return %arg0, %c0_i32 : i32, i32
  }
  func.func @transform_1(%arg0: i32) -> (i32, i32) {
    %c0_i32 = arith.constant 0 : i32
    %c0_i32_0 = arith.constant 0 : i32
    %c0_i32_1 = arith.constant 0 : i32
    return %c0_i32, %c0_i32_0 : i32, i32
  }
  func.func @transform_2(%arg0: i32) -> (i32, i32) {
    %c0_i32 = arith.constant 0 : i32
    %c0_i32_0 = arith.constant 0 : i32
    %c0_i32_1 = arith.constant 0 : i32
    return %c0_i32, %c0_i32_0 : i32, i32
  }
  func.func @transform_3(%arg0: i32) -> (i32, i32) {
    %c0_i32 = arith.constant 0 : i32
    %c0_i32_0 = arith.constant 0 : i32
    return %arg0, %c0_i32 : i32, i32
  }
}

module attributes {stable_mosaic.version = 11 : i64} {
  func.func @_bmm_bias_stats_kernel(%arg0: i32, %arg1: i32, %arg2: memref<1x128x1152xbf16, #tpu.memory_space<vmem>>, %arg3: memref<1x1152x128xbf16, #tpu.memory_space<vmem>>, %arg4: memref<1x128xf32, #tpu.memory_space<vmem>>, %arg5: memref<1x128x128xf32, #tpu.memory_space<vmem>>, %arg6: memref<1x1x1x128xf32, #tpu.memory_space<vmem>>, %arg7: memref<1x1x1x128xf32, #tpu.memory_space<vmem>>) attributes {dimension_semantics = [#tpu.dimension_semantics<parallel>, #tpu.dimension_semantics<parallel>], iteration_bounds = array<i64: 1, 1>, scalar_prefetch = 0 : i64, scratch_operands = 0 : i64, tpu.core_type = #tpu.core_type<tc>, window_params = [{transform_indices = @transform_0, window_bounds = array<i64: 1, 128, 1152>}, {transform_indices = @transform_1, window_bounds = array<i64: 1, 1152, 128>}, {pipeline_mode = #tpu.pipeline_mode<synchronous>, transform_indices = @transform_2, window_bounds = array<i64: 1, 128>}, {transform_indices = @transform_3, window_bounds = array<i64: 1, 128, 128>}, {transform_indices = @transform_4, window_bounds = array<i64: 1, 1, 1, 128>}, {transform_indices = @transform_5, window_bounds = array<i64: 1, 1, 1, 128>}]} {
    %c0 = arith.constant 0 : index
    %c0_0 = arith.constant 0 : index
    %c0_1 = arith.constant 0 : index
    %0 = vector.load %arg2[%c0, %c0_0, %c0_1] : memref<1x128x1152xbf16, #tpu.memory_space<vmem>>, vector<1x128x1152xbf16>
    %1 = vector.shape_cast %0 : vector<1x128x1152xbf16> to vector<128x1152xbf16>
    %c0_2 = arith.constant 0 : index
    %c0_3 = arith.constant 0 : index
    %c0_4 = arith.constant 0 : index
    %2 = vector.load %arg3[%c0_2, %c0_3, %c0_4] : memref<1x1152x128xbf16, #tpu.memory_space<vmem>>, vector<1x1152x128xbf16>
    %3 = vector.shape_cast %2 : vector<1x1152x128xbf16> to vector<1152x128xbf16>
    %cst = arith.constant dense<0.000000e+00> : vector<128x128xf32>
    %4 = tpu.matmul %1, %3, %cst {dimension_numbers = #tpu.dot_dimension_numbers<[1], [0], [0], [1], [0, 0, 1, 1], [], []>} : vector<128x1152xbf16>, vector<1152x128xbf16>, vector<128x128xf32> -> vector<128x128xf32>
    %c0_5 = arith.constant 0 : index
    %c0_6 = arith.constant 0 : index
    %5 = vector.load %arg4[%c0_5, %c0_6] : memref<1x128xf32, #tpu.memory_space<vmem>>, vector<1x128xf32>
    %6 = vector.broadcast %5 : vector<1x128xf32> to vector<128x128xf32>
    %7 = arith.addf %4, %6 : vector<128x128xf32>
    %c0_7 = arith.constant 0 : index
    %c0_8 = arith.constant 0 : index
    %c0_9 = arith.constant 0 : index
    %8 = vector.load %arg5[%c0_7, %c0_8, %c0_9] : memref<1x128x128xf32, #tpu.memory_space<vmem>>, vector<1x128x128xf32>
    %9 = vector.shape_cast %8 : vector<1x128x128xf32> to vector<128x128xf32>
    %10 = vector.shape_cast %7 : vector<128x128xf32> to vector<1x128x128xf32>
    tpu.vector_store %arg5[%c0_7, %c0_8, %c0_9], %10 {strides = array<i32>} : memref<1x128x128xf32, #tpu.memory_space<vmem>>, vector<1x128x128xf32>,
    %cst_10 = arith.constant dense<0.000000e+00> : vector<128xf32>
    %11 = vector.multi_reduction <add>, %7, %cst_10 [0] : vector<128x128xf32> to vector<128xf32>
    %12 = vector.shape_cast %11 : vector<128xf32> to vector<1x1x1x128xf32>
    %c0_11 = arith.constant 0 : index
    %c0_12 = arith.constant 0 : index
    %c0_13 = arith.constant 0 : index
    %c0_14 = arith.constant 0 : index
    %13 = vector.load %arg6[%c0_11, %c0_12, %c0_13, %c0_14] : memref<1x1x1x128xf32, #tpu.memory_space<vmem>>, vector<1x1x1x128xf32>
    tpu.vector_store %arg6[%c0_11, %c0_12, %c0_13, %c0_14], %12 {strides = array<i32>} : memref<1x1x1x128xf32, #tpu.memory_space<vmem>>, vector<1x1x1x128xf32>,
    %14 = arith.mulf %7, %7 : vector<128x128xf32>
    %cst_15 = arith.constant dense<0.000000e+00> : vector<128xf32>
    %15 = vector.multi_reduction <add>, %14, %cst_15 [0] : vector<128x128xf32> to vector<128xf32>
    %16 = vector.shape_cast %15 : vector<128xf32> to vector<1x1x1x128xf32>
    %c0_16 = arith.constant 0 : index
    %c0_17 = arith.constant 0 : index
    %c0_18 = arith.constant 0 : index
    %c0_19 = arith.constant 0 : index
    %17 = vector.load %arg7[%c0_16, %c0_17, %c0_18, %c0_19] : memref<1x1x1x128xf32, #tpu.memory_space<vmem>>, vector<1x1x1x128xf32>
    tpu.vector_store %arg7[%c0_16, %c0_17, %c0_18, %c0_19], %16 {strides = array<i32>} : memref<1x1x1x128xf32, #tpu.memory_space<vmem>>, vector<1x1x1x128xf32>,
    return
  }
  func.func @transform_0(%arg0: i32, %arg1: i32) -> (i32, i32, i32) {
    %c0_i32 = arith.constant 0 : i32
    %c0_i32_0 = arith.constant 0 : i32
    return %arg0, %arg1, %c0_i32 : i32, i32, i32
  }
  func.func @transform_1(%arg0: i32, %arg1: i32) -> (i32, i32, i32) {
    %c0_i32 = arith.constant 0 : i32
    %c0_i32_0 = arith.constant 0 : i32
    %c0_i32_1 = arith.constant 0 : i32
    return %arg0, %c0_i32, %c0_i32_0 : i32, i32, i32
  }
  func.func @transform_2(%arg0: i32, %arg1: i32) -> (i32, i32) {
    %c0_i32 = arith.constant 0 : i32
    %c0_i32_0 = arith.constant 0 : i32
    %c0_i32_1 = arith.constant 0 : i32
    return %c0_i32, %c0_i32_0 : i32, i32
  }
  func.func @transform_3(%arg0: i32, %arg1: i32) -> (i32, i32, i32) {
    %c0_i32 = arith.constant 0 : i32
    %c0_i32_0 = arith.constant 0 : i32
    return %arg0, %arg1, %c0_i32 : i32, i32, i32
  }
  func.func @transform_4(%arg0: i32, %arg1: i32) -> (i32, i32, i32, i32) {
    %c0_i32 = arith.constant 0 : i32
    %c0_i32_0 = arith.constant 0 : i32
    %c0_i32_1 = arith.constant 0 : i32
    return %arg0, %arg1, %c0_i32, %c0_i32_0 : i32, i32, i32, i32
  }
  func.func @transform_5(%arg0: i32, %arg1: i32) -> (i32, i32, i32, i32) {
    %c0_i32 = arith.constant 0 : i32
    %c0_i32_0 = arith.constant 0 : i32
    %c0_i32_1 = arith.constant 0 : i32
    return %arg0, %arg1, %c0_i32, %c0_i32_0 : i32, i32, i32, i32
  }
}

module attributes {stable_mosaic.version = 11 : i64} {
  func.func @_bn_add_kernel(%arg0: i32, %arg1: memref<128x128xf32, #tpu.memory_space<vmem>>, %arg2: memref<1x128xf32, #tpu.memory_space<vmem>>, %arg3: memref<1x128xf32, #tpu.memory_space<vmem>>, %arg4: memref<128x128xbf16, #tpu.memory_space<vmem>>, %arg5: memref<128x128xbf16, #tpu.memory_space<vmem>>) attributes {dimension_semantics = [#tpu.dimension_semantics<parallel>], iteration_bounds = array<i64: 1>, scalar_prefetch = 0 : i64, scratch_operands = 0 : i64, tpu.core_type = #tpu.core_type<tc>, window_params = [{transform_indices = @transform_0, window_bounds = array<i64: 128, 128>}, {pipeline_mode = #tpu.pipeline_mode<synchronous>, transform_indices = @transform_1, window_bounds = array<i64: 1, 128>}, {pipeline_mode = #tpu.pipeline_mode<synchronous>, transform_indices = @transform_2, window_bounds = array<i64: 1, 128>}, {transform_indices = @transform_3, window_bounds = array<i64: 128, 128>}, {transform_indices = @transform_4, window_bounds = array<i64: 128, 128>}]} {
    %c0 = arith.constant 0 : index
    %c0_0 = arith.constant 0 : index
    %0 = vector.load %arg1[%c0, %c0_0] : memref<128x128xf32, #tpu.memory_space<vmem>>, vector<128x128xf32>
    %c0_1 = arith.constant 0 : index
    %c0_2 = arith.constant 0 : index
    %1 = vector.load %arg2[%c0_1, %c0_2] : memref<1x128xf32, #tpu.memory_space<vmem>>, vector<1x128xf32>
    %2 = vector.broadcast %1 : vector<1x128xf32> to vector<128x128xf32>
    %3 = arith.mulf %0, %2 : vector<128x128xf32>
    %c0_3 = arith.constant 0 : index
    %c0_4 = arith.constant 0 : index
    %4 = vector.load %arg3[%c0_3, %c0_4] : memref<1x128xf32, #tpu.memory_space<vmem>>, vector<1x128xf32>
    %5 = vector.broadcast %4 : vector<1x128xf32> to vector<128x128xf32>
    %6 = arith.addf %3, %5 : vector<128x128xf32>
    %c0_5 = arith.constant 0 : index
    %c0_6 = arith.constant 0 : index
    %7 = vector.load %arg4[%c0_5, %c0_6] : memref<128x128xbf16, #tpu.memory_space<vmem>>, vector<128x128xbf16>
    %8 = arith.extf %7 : vector<128x128xbf16> to vector<128x128xf32>
    %9 = arith.addf %6, %8 : vector<128x128xf32>
    %10 = arith.truncf %9 : vector<128x128xf32> to vector<128x128xbf16>
    %c0_7 = arith.constant 0 : index
    %c0_8 = arith.constant 0 : index
    %11 = vector.load %arg5[%c0_7, %c0_8] : memref<128x128xbf16, #tpu.memory_space<vmem>>, vector<128x128xbf16>
    tpu.vector_store %arg5[%c0_7, %c0_8], %10 {strides = array<i32>} : memref<128x128xbf16, #tpu.memory_space<vmem>>, vector<128x128xbf16>,
    return
  }
  func.func @transform_0(%arg0: i32) -> (i32, i32) {
    %c0_i32 = arith.constant 0 : i32
    %c0_i32_0 = arith.constant 0 : i32
    return %arg0, %c0_i32 : i32, i32
  }
  func.func @transform_1(%arg0: i32) -> (i32, i32) {
    %c0_i32 = arith.constant 0 : i32
    %c0_i32_0 = arith.constant 0 : i32
    %c0_i32_1 = arith.constant 0 : i32
    return %c0_i32, %c0_i32_0 : i32, i32
  }
  func.func @transform_2(%arg0: i32) -> (i32, i32) {
    %c0_i32 = arith.constant 0 : i32
    %c0_i32_0 = arith.constant 0 : i32
    %c0_i32_1 = arith.constant 0 : i32
    return %c0_i32, %c0_i32_0 : i32, i32
  }
  func.func @transform_3(%arg0: i32) -> (i32, i32) {
    %c0_i32 = arith.constant 0 : i32
    %c0_i32_0 = arith.constant 0 : i32
    return %arg0, %c0_i32 : i32, i32
  }
  func.func @transform_4(%arg0: i32) -> (i32, i32) {
    %c0_i32 = arith.constant 0 : i32
    %c0_i32_0 = arith.constant 0 : i32
    return %arg0, %c0_i32 : i32, i32
  }
}

module attributes {stable_mosaic.version = 11 : i64} {
  func.func @_bmm_bias_stats_kernel(%arg0: i32, %arg1: i32, %arg2: memref<1x128x512xbf16, #tpu.memory_space<vmem>>, %arg3: memref<1x512x64xbf16, #tpu.memory_space<vmem>>, %arg4: memref<1x64xf32, #tpu.memory_space<vmem>>, %arg5: memref<1x128x64xf32, #tpu.memory_space<vmem>>, %arg6: memref<1x1x1x64xf32, #tpu.memory_space<vmem>>, %arg7: memref<1x1x1x64xf32, #tpu.memory_space<vmem>>) attributes {dimension_semantics = [#tpu.dimension_semantics<parallel>, #tpu.dimension_semantics<parallel>], iteration_bounds = array<i64: 4, 1>, scalar_prefetch = 0 : i64, scratch_operands = 0 : i64, tpu.core_type = #tpu.core_type<tc>, window_params = [{transform_indices = @transform_0, window_bounds = array<i64: 1, 128, 512>}, {transform_indices = @transform_1, window_bounds = array<i64: 1, 512, 64>}, {pipeline_mode = #tpu.pipeline_mode<synchronous>, transform_indices = @transform_2, window_bounds = array<i64: 1, 64>}, {transform_indices = @transform_3, window_bounds = array<i64: 1, 128, 64>}, {transform_indices = @transform_4, window_bounds = array<i64: 1, 1, 1, 64>}, {transform_indices = @transform_5, window_bounds = array<i64: 1, 1, 1, 64>}]} {
    %c0 = arith.constant 0 : index
    %c0_0 = arith.constant 0 : index
    %c0_1 = arith.constant 0 : index
    %0 = vector.load %arg2[%c0, %c0_0, %c0_1] : memref<1x128x512xbf16, #tpu.memory_space<vmem>>, vector<1x128x512xbf16>
    %1 = vector.shape_cast %0 : vector<1x128x512xbf16> to vector<128x512xbf16>
    %c0_2 = arith.constant 0 : index
    %c0_3 = arith.constant 0 : index
    %c0_4 = arith.constant 0 : index
    %2 = vector.load %arg3[%c0_2, %c0_3, %c0_4] : memref<1x512x64xbf16, #tpu.memory_space<vmem>>, vector<1x512x64xbf16>
    %3 = vector.shape_cast %2 : vector<1x512x64xbf16> to vector<512x64xbf16>
    %cst = arith.constant dense<0.000000e+00> : vector<128x64xf32>
    %4 = tpu.matmul %1, %3, %cst {dimension_numbers = #tpu.dot_dimension_numbers<[1], [0], [0], [1], [0, 0, 1, 1], [], []>} : vector<128x512xbf16>, vector<512x64xbf16>, vector<128x64xf32> -> vector<128x64xf32>
    %c0_5 = arith.constant 0 : index
    %c0_6 = arith.constant 0 : index
    %5 = vector.load %arg4[%c0_5, %c0_6] : memref<1x64xf32, #tpu.memory_space<vmem>>, vector<1x64xf32>
    %6 = vector.broadcast %5 : vector<1x64xf32> to vector<128x64xf32>
    %7 = arith.addf %4, %6 : vector<128x64xf32>
    %c0_7 = arith.constant 0 : index
    %c0_8 = arith.constant 0 : index
    %c0_9 = arith.constant 0 : index
    %8 = vector.load %arg5[%c0_7, %c0_8, %c0_9] : memref<1x128x64xf32, #tpu.memory_space<vmem>>, vector<1x128x64xf32>
    %9 = vector.shape_cast %8 : vector<1x128x64xf32> to vector<128x64xf32>
    %10 = vector.shape_cast %7 : vector<128x64xf32> to vector<1x128x64xf32>
    tpu.vector_store %arg5[%c0_7, %c0_8, %c0_9], %10 {strides = array<i32>} : memref<1x128x64xf32, #tpu.memory_space<vmem>>, vector<1x128x64xf32>,
    %cst_10 = arith.constant dense<0.000000e+00> : vector<64xf32>
    %11 = vector.multi_reduction <add>, %7, %cst_10 [0] : vector<128x64xf32> to vector<64xf32>
    %12 = vector.shape_cast %11 : vector<64xf32> to vector<1x1x1x64xf32>
    %c0_11 = arith.constant 0 : index
    %c0_12 = arith.constant 0 : index
    %c0_13 = arith.constant 0 : index
    %c0_14 = arith.constant 0 : index
    %13 = vector.load %arg6[%c0_11, %c0_12, %c0_13, %c0_14] : memref<1x1x1x64xf32, #tpu.memory_space<vmem>>, vector<1x1x1x64xf32>
    tpu.vector_store %arg6[%c0_11, %c0_12, %c0_13, %c0_14], %12 {strides = array<i32>} : memref<1x1x1x64xf32, #tpu.memory_space<vmem>>, vector<1x1x1x64xf32>,
    %14 = arith.mulf %7, %7 : vector<128x64xf32>
    %cst_15 = arith.constant dense<0.000000e+00> : vector<64xf32>
    %15 = vector.multi_reduction <add>, %14, %cst_15 [0] : vector<128x64xf32> to vector<64xf32>
    %16 = vector.shape_cast %15 : vector<64xf32> to vector<1x1x1x64xf32>
    %c0_16 = arith.constant 0 : index
    %c0_17 = arith.constant 0 : index
    %c0_18 = arith.constant 0 : index
    %c0_19 = arith.constant 0 : index
    %17 = vector.load %arg7[%c0_16, %c0_17, %c0_18, %c0_19] : memref<1x1x1x64xf32, #tpu.memory_space<vmem>>, vector<1x1x1x64xf32>
    tpu.vector_store %arg7[%c0_16, %c0_17, %c0_18, %c0_19], %16 {strides = array<i32>} : memref<1x1x1x64xf32, #tpu.memory_space<vmem>>, vector<1x1x1x64xf32>,
    return
  }
  func.func @transform_0(%arg0: i32, %arg1: i32) -> (i32, i32, i32) {
    %c0_i32 = arith.constant 0 : i32
    %c0_i32_0 = arith.constant 0 : i32
    return %arg0, %arg1, %c0_i32 : i32, i32, i32
  }
  func.func @transform_1(%arg0: i32, %arg1: i32) -> (i32, i32, i32) {
    %c0_i32 = arith.constant 0 : i32
    %c0_i32_0 = arith.constant 0 : i32
    %c0_i32_1 = arith.constant 0 : i32
    return %arg0, %c0_i32, %c0_i32_0 : i32, i32, i32
  }
  func.func @transform_2(%arg0: i32, %arg1: i32) -> (i32, i32) {
    %c0_i32 = arith.constant 0 : i32
    %c0_i32_0 = arith.constant 0 : i32
    %c0_i32_1 = arith.constant 0 : i32
    return %c0_i32, %c0_i32_0 : i32, i32
  }
  func.func @transform_3(%arg0: i32, %arg1: i32) -> (i32, i32, i32) {
    %c0_i32 = arith.constant 0 : i32
    %c0_i32_0 = arith.constant 0 : i32
    return %arg0, %arg1, %c0_i32 : i32, i32, i32
  }
  func.func @transform_4(%arg0: i32, %arg1: i32) -> (i32, i32, i32, i32) {
    %c0_i32 = arith.constant 0 : i32
    %c0_i32_0 = arith.constant 0 : i32
    %c0_i32_1 = arith.constant 0 : i32
    return %arg0, %arg1, %c0_i32, %c0_i32_0 : i32, i32, i32, i32
  }
  func.func @transform_5(%arg0: i32, %arg1: i32) -> (i32, i32, i32, i32) {
    %c0_i32 = arith.constant 0 : i32
    %c0_i32_0 = arith.constant 0 : i32
    %c0_i32_1 = arith.constant 0 : i32
    return %arg0, %arg1, %c0_i32, %c0_i32_0 : i32, i32, i32, i32
  }
}

module attributes {stable_mosaic.version = 11 : i64} {
  func.func @_bn_act_kernel(%arg0: i32, %arg1: memref<512x64xf32, #tpu.memory_space<vmem>>, %arg2: memref<1x64xf32, #tpu.memory_space<vmem>>, %arg3: memref<1x64xf32, #tpu.memory_space<vmem>>, %arg4: memref<512x64xbf16, #tpu.memory_space<vmem>>) attributes {dimension_semantics = [#tpu.dimension_semantics<parallel>], iteration_bounds = array<i64: 1>, scalar_prefetch = 0 : i64, scratch_operands = 0 : i64, tpu.core_type = #tpu.core_type<tc>, window_params = [{transform_indices = @transform_0, window_bounds = array<i64: 512, 64>}, {pipeline_mode = #tpu.pipeline_mode<synchronous>, transform_indices = @transform_1, window_bounds = array<i64: 1, 64>}, {pipeline_mode = #tpu.pipeline_mode<synchronous>, transform_indices = @transform_2, window_bounds = array<i64: 1, 64>}, {transform_indices = @transform_3, window_bounds = array<i64: 512, 64>}]} {
    %c0 = arith.constant 0 : index
    %c0_0 = arith.constant 0 : index
    %0 = vector.load %arg1[%c0, %c0_0] : memref<512x64xf32, #tpu.memory_space<vmem>>, vector<512x64xf32>
    %c0_1 = arith.constant 0 : index
    %c0_2 = arith.constant 0 : index
    %1 = vector.load %arg2[%c0_1, %c0_2] : memref<1x64xf32, #tpu.memory_space<vmem>>, vector<1x64xf32>
    %2 = vector.broadcast %1 : vector<1x64xf32> to vector<512x64xf32>
    %3 = arith.mulf %0, %2 : vector<512x64xf32>
    %c0_3 = arith.constant 0 : index
    %c0_4 = arith.constant 0 : index
    %4 = vector.load %arg3[%c0_3, %c0_4] : memref<1x64xf32, #tpu.memory_space<vmem>>, vector<1x64xf32>
    %5 = vector.broadcast %4 : vector<1x64xf32> to vector<512x64xf32>
    %6 = arith.addf %3, %5 : vector<512x64xf32>
    %cst = arith.constant 0.000000e+00 : f32
    %7 = vector.broadcast %cst : f32 to vector<512x64xf32>
    %8 = arith.maximumf %6, %7 : vector<512x64xf32>
    %9 = arith.truncf %8 : vector<512x64xf32> to vector<512x64xbf16>
    %c0_5 = arith.constant 0 : index
    %c0_6 = arith.constant 0 : index
    %10 = vector.load %arg4[%c0_5, %c0_6] : memref<512x64xbf16, #tpu.memory_space<vmem>>, vector<512x64xbf16>
    tpu.vector_store %arg4[%c0_5, %c0_6], %9 {strides = array<i32>} : memref<512x64xbf16, #tpu.memory_space<vmem>>, vector<512x64xbf16>,
    return
  }
  func.func @transform_0(%arg0: i32) -> (i32, i32) {
    %c0_i32 = arith.constant 0 : i32
    %c0_i32_0 = arith.constant 0 : i32
    return %arg0, %c0_i32 : i32, i32
  }
  func.func @transform_1(%arg0: i32) -> (i32, i32) {
    %c0_i32 = arith.constant 0 : i32
    %c0_i32_0 = arith.constant 0 : i32
    %c0_i32_1 = arith.constant 0 : i32
    return %c0_i32, %c0_i32_0 : i32, i32
  }
  func.func @transform_2(%arg0: i32) -> (i32, i32) {
    %c0_i32 = arith.constant 0 : i32
    %c0_i32_0 = arith.constant 0 : i32
    %c0_i32_1 = arith.constant 0 : i32
    return %c0_i32, %c0_i32_0 : i32, i32
  }
  func.func @transform_3(%arg0: i32) -> (i32, i32) {
    %c0_i32 = arith.constant 0 : i32
    %c0_i32_0 = arith.constant 0 : i32
    return %arg0, %c0_i32 : i32, i32
  }
}

module attributes {stable_mosaic.version = 11 : i64} {
  func.func @_bmm_bias_stats_kernel(%arg0: i32, %arg1: i32, %arg2: memref<1x256x640xbf16, #tpu.memory_space<vmem>>, %arg3: memref<1x640x64xbf16, #tpu.memory_space<vmem>>, %arg4: memref<1x64xf32, #tpu.memory_space<vmem>>, %arg5: memref<1x256x64xf32, #tpu.memory_space<vmem>>, %arg6: memref<1x1x1x64xf32, #tpu.memory_space<vmem>>, %arg7: memref<1x1x1x64xf32, #tpu.memory_space<vmem>>) attributes {dimension_semantics = [#tpu.dimension_semantics<parallel>, #tpu.dimension_semantics<parallel>], iteration_bounds = array<i64: 1, 2>, scalar_prefetch = 0 : i64, scratch_operands = 0 : i64, tpu.core_type = #tpu.core_type<tc>, window_params = [{transform_indices = @transform_0, window_bounds = array<i64: 1, 256, 640>}, {transform_indices = @transform_1, window_bounds = array<i64: 1, 640, 64>}, {pipeline_mode = #tpu.pipeline_mode<synchronous>, transform_indices = @transform_2, window_bounds = array<i64: 1, 64>}, {transform_indices = @transform_3, window_bounds = array<i64: 1, 256, 64>}, {transform_indices = @transform_4, window_bounds = array<i64: 1, 1, 1, 64>}, {transform_indices = @transform_5, window_bounds = array<i64: 1, 1, 1, 64>}]} {
    %c0 = arith.constant 0 : index
    %c0_0 = arith.constant 0 : index
    %c0_1 = arith.constant 0 : index
    %0 = vector.load %arg2[%c0, %c0_0, %c0_1] : memref<1x256x640xbf16, #tpu.memory_space<vmem>>, vector<1x256x640xbf16>
    %1 = vector.shape_cast %0 : vector<1x256x640xbf16> to vector<256x640xbf16>
    %c0_2 = arith.constant 0 : index
    %c0_3 = arith.constant 0 : index
    %c0_4 = arith.constant 0 : index
    %2 = vector.load %arg3[%c0_2, %c0_3, %c0_4] : memref<1x640x64xbf16, #tpu.memory_space<vmem>>, vector<1x640x64xbf16>
    %3 = vector.shape_cast %2 : vector<1x640x64xbf16> to vector<640x64xbf16>
    %cst = arith.constant dense<0.000000e+00> : vector<256x64xf32>
    %4 = tpu.matmul %1, %3, %cst {dimension_numbers = #tpu.dot_dimension_numbers<[1], [0], [0], [1], [0, 0, 1, 1], [], []>} : vector<256x640xbf16>, vector<640x64xbf16>, vector<256x64xf32> -> vector<256x64xf32>
    %c0_5 = arith.constant 0 : index
    %c0_6 = arith.constant 0 : index
    %5 = vector.load %arg4[%c0_5, %c0_6] : memref<1x64xf32, #tpu.memory_space<vmem>>, vector<1x64xf32>
    %6 = vector.broadcast %5 : vector<1x64xf32> to vector<256x64xf32>
    %7 = arith.addf %4, %6 : vector<256x64xf32>
    %c0_7 = arith.constant 0 : index
    %c0_8 = arith.constant 0 : index
    %c0_9 = arith.constant 0 : index
    %8 = vector.load %arg5[%c0_7, %c0_8, %c0_9] : memref<1x256x64xf32, #tpu.memory_space<vmem>>, vector<1x256x64xf32>
    %9 = vector.shape_cast %8 : vector<1x256x64xf32> to vector<256x64xf32>
    %10 = vector.shape_cast %7 : vector<256x64xf32> to vector<1x256x64xf32>
    tpu.vector_store %arg5[%c0_7, %c0_8, %c0_9], %10 {strides = array<i32>} : memref<1x256x64xf32, #tpu.memory_space<vmem>>, vector<1x256x64xf32>,
    %cst_10 = arith.constant dense<0.000000e+00> : vector<64xf32>
    %11 = vector.multi_reduction <add>, %7, %cst_10 [0] : vector<256x64xf32> to vector<64xf32>
    %12 = vector.shape_cast %11 : vector<64xf32> to vector<1x1x1x64xf32>
    %c0_11 = arith.constant 0 : index
    %c0_12 = arith.constant 0 : index
    %c0_13 = arith.constant 0 : index
    %c0_14 = arith.constant 0 : index
    %13 = vector.load %arg6[%c0_11, %c0_12, %c0_13, %c0_14] : memref<1x1x1x64xf32, #tpu.memory_space<vmem>>, vector<1x1x1x64xf32>
    tpu.vector_store %arg6[%c0_11, %c0_12, %c0_13, %c0_14], %12 {strides = array<i32>} : memref<1x1x1x64xf32, #tpu.memory_space<vmem>>, vector<1x1x1x64xf32>,
    %14 = arith.mulf %7, %7 : vector<256x64xf32>
    %cst_15 = arith.constant dense<0.000000e+00> : vector<64xf32>
    %15 = vector.multi_reduction <add>, %14, %cst_15 [0] : vector<256x64xf32> to vector<64xf32>
    %16 = vector.shape_cast %15 : vector<64xf32> to vector<1x1x1x64xf32>
    %c0_16 = arith.constant 0 : index
    %c0_17 = arith.constant 0 : index
    %c0_18 = arith.constant 0 : index
    %c0_19 = arith.constant 0 : index
    %17 = vector.load %arg7[%c0_16, %c0_17, %c0_18, %c0_19] : memref<1x1x1x64xf32, #tpu.memory_space<vmem>>, vector<1x1x1x64xf32>
    tpu.vector_store %arg7[%c0_16, %c0_17, %c0_18, %c0_19], %16 {strides = array<i32>} : memref<1x1x1x64xf32, #tpu.memory_space<vmem>>, vector<1x1x1x64xf32>,
    return
  }
  func.func @transform_0(%arg0: i32, %arg1: i32) -> (i32, i32, i32) {
    %c0_i32 = arith.constant 0 : i32
    %c0_i32_0 = arith.constant 0 : i32
    return %arg0, %arg1, %c0_i32 : i32, i32, i32
  }
  func.func @transform_1(%arg0: i32, %arg1: i32) -> (i32, i32, i32) {
    %c0_i32 = arith.constant 0 : i32
    %c0_i32_0 = arith.constant 0 : i32
    %c0_i32_1 = arith.constant 0 : i32
    return %arg0, %c0_i32, %c0_i32_0 : i32, i32, i32
  }
  func.func @transform_2(%arg0: i32, %arg1: i32) -> (i32, i32) {
    %c0_i32 = arith.constant 0 : i32
    %c0_i32_0 = arith.constant 0 : i32
    %c0_i32_1 = arith.constant 0 : i32
    return %c0_i32, %c0_i32_0 : i32, i32
  }
  func.func @transform_3(%arg0: i32, %arg1: i32) -> (i32, i32, i32) {
    %c0_i32 = arith.constant 0 : i32
    %c0_i32_0 = arith.constant 0 : i32
    return %arg0, %arg1, %c0_i32 : i32, i32, i32
  }
  func.func @transform_4(%arg0: i32, %arg1: i32) -> (i32, i32, i32, i32) {
    %c0_i32 = arith.constant 0 : i32
    %c0_i32_0 = arith.constant 0 : i32
    %c0_i32_1 = arith.constant 0 : i32
    return %arg0, %arg1, %c0_i32, %c0_i32_0 : i32, i32, i32, i32
  }
  func.func @transform_5(%arg0: i32, %arg1: i32) -> (i32, i32, i32, i32) {
    %c0_i32 = arith.constant 0 : i32
    %c0_i32_0 = arith.constant 0 : i32
    %c0_i32_1 = arith.constant 0 : i32
    return %arg0, %arg1, %c0_i32, %c0_i32_0 : i32, i32, i32, i32
  }
}

module attributes {stable_mosaic.version = 11 : i64} {
  func.func @_bn_add_kernel(%arg0: i32, %arg1: memref<512x64xf32, #tpu.memory_space<vmem>>, %arg2: memref<1x64xf32, #tpu.memory_space<vmem>>, %arg3: memref<1x64xf32, #tpu.memory_space<vmem>>, %arg4: memref<512x64xbf16, #tpu.memory_space<vmem>>, %arg5: memref<512x64xbf16, #tpu.memory_space<vmem>>) attributes {dimension_semantics = [#tpu.dimension_semantics<parallel>], iteration_bounds = array<i64: 1>, scalar_prefetch = 0 : i64, scratch_operands = 0 : i64, tpu.core_type = #tpu.core_type<tc>, window_params = [{transform_indices = @transform_0, window_bounds = array<i64: 512, 64>}, {pipeline_mode = #tpu.pipeline_mode<synchronous>, transform_indices = @transform_1, window_bounds = array<i64: 1, 64>}, {pipeline_mode = #tpu.pipeline_mode<synchronous>, transform_indices = @transform_2, window_bounds = array<i64: 1, 64>}, {transform_indices = @transform_3, window_bounds = array<i64: 512, 64>}, {transform_indices = @transform_4, window_bounds = array<i64: 512, 64>}]} {
    %c0 = arith.constant 0 : index
    %c0_0 = arith.constant 0 : index
    %0 = vector.load %arg1[%c0, %c0_0] : memref<512x64xf32, #tpu.memory_space<vmem>>, vector<512x64xf32>
    %c0_1 = arith.constant 0 : index
    %c0_2 = arith.constant 0 : index
    %1 = vector.load %arg2[%c0_1, %c0_2] : memref<1x64xf32, #tpu.memory_space<vmem>>, vector<1x64xf32>
    %2 = vector.broadcast %1 : vector<1x64xf32> to vector<512x64xf32>
    %3 = arith.mulf %0, %2 : vector<512x64xf32>
    %c0_3 = arith.constant 0 : index
    %c0_4 = arith.constant 0 : index
    %4 = vector.load %arg3[%c0_3, %c0_4] : memref<1x64xf32, #tpu.memory_space<vmem>>, vector<1x64xf32>
    %5 = vector.broadcast %4 : vector<1x64xf32> to vector<512x64xf32>
    %6 = arith.addf %3, %5 : vector<512x64xf32>
    %c0_5 = arith.constant 0 : index
    %c0_6 = arith.constant 0 : index
    %7 = vector.load %arg4[%c0_5, %c0_6] : memref<512x64xbf16, #tpu.memory_space<vmem>>, vector<512x64xbf16>
    %8 = arith.extf %7 : vector<512x64xbf16> to vector<512x64xf32>
    %9 = arith.addf %6, %8 : vector<512x64xf32>
    %10 = arith.truncf %9 : vector<512x64xf32> to vector<512x64xbf16>
    %c0_7 = arith.constant 0 : index
    %c0_8 = arith.constant 0 : index
    %11 = vector.load %arg5[%c0_7, %c0_8] : memref<512x64xbf16, #tpu.memory_space<vmem>>, vector<512x64xbf16>
    tpu.vector_store %arg5[%c0_7, %c0_8], %10 {strides = array<i32>} : memref<512x64xbf16, #tpu.memory_space<vmem>>, vector<512x64xbf16>,
    return
  }
  func.func @transform_0(%arg0: i32) -> (i32, i32) {
    %c0_i32 = arith.constant 0 : i32
    %c0_i32_0 = arith.constant 0 : i32
    return %arg0, %c0_i32 : i32, i32
  }
  func.func @transform_1(%arg0: i32) -> (i32, i32) {
    %c0_i32 = arith.constant 0 : i32
    %c0_i32_0 = arith.constant 0 : i32
    %c0_i32_1 = arith.constant 0 : i32
    return %c0_i32, %c0_i32_0 : i32, i32
  }
  func.func @transform_2(%arg0: i32) -> (i32, i32) {
    %c0_i32 = arith.constant 0 : i32
    %c0_i32_0 = arith.constant 0 : i32
    %c0_i32_1 = arith.constant 0 : i32
    return %c0_i32, %c0_i32_0 : i32, i32
  }
  func.func @transform_3(%arg0: i32) -> (i32, i32) {
    %c0_i32 = arith.constant 0 : i32
    %c0_i32_0 = arith.constant 0 : i32
    return %arg0, %c0_i32 : i32, i32
  }
  func.func @transform_4(%arg0: i32) -> (i32, i32) {
    %c0_i32 = arith.constant 0 : i32
    %c0_i32_0 = arith.constant 0 : i32
    return %arg0, %c0_i32 : i32, i32
  }
}

module attributes {stable_mosaic.version = 11 : i64} {
  func.func @_bmm_bias_tanh_kernel(%arg0: i32, %arg1: i32, %arg2: memref<1x256x256xbf16, #tpu.memory_space<vmem>>, %arg3: memref<1x256x128xbf16, #tpu.memory_space<vmem>>, %arg4: memref<1x128xf32, #tpu.memory_space<vmem>>, %arg5: memref<1x256x128xf32, #tpu.memory_space<vmem>>) attributes {dimension_semantics = [#tpu.dimension_semantics<parallel>, #tpu.dimension_semantics<parallel>], iteration_bounds = array<i64: 4, 2>, scalar_prefetch = 0 : i64, scratch_operands = 0 : i64, tpu.core_type = #tpu.core_type<tc>, window_params = [{transform_indices = @transform_0, window_bounds = array<i64: 1, 256, 256>}, {transform_indices = @transform_1, window_bounds = array<i64: 1, 256, 128>}, {pipeline_mode = #tpu.pipeline_mode<synchronous>, transform_indices = @transform_2, window_bounds = array<i64: 1, 128>}, {transform_indices = @transform_3, window_bounds = array<i64: 1, 256, 128>}]} {
    %c0 = arith.constant 0 : index
    %c0_0 = arith.constant 0 : index
    %c0_1 = arith.constant 0 : index
    %0 = vector.load %arg2[%c0, %c0_0, %c0_1] : memref<1x256x256xbf16, #tpu.memory_space<vmem>>, vector<1x256x256xbf16>
    %1 = vector.shape_cast %0 : vector<1x256x256xbf16> to vector<256x256xbf16>
    %c0_2 = arith.constant 0 : index
    %c0_3 = arith.constant 0 : index
    %c0_4 = arith.constant 0 : index
    %2 = vector.load %arg3[%c0_2, %c0_3, %c0_4] : memref<1x256x128xbf16, #tpu.memory_space<vmem>>, vector<1x256x128xbf16>
    %3 = vector.shape_cast %2 : vector<1x256x128xbf16> to vector<256x128xbf16>
    %cst = arith.constant dense<0.000000e+00> : vector<256x128xf32>
    %4 = tpu.matmul %1, %3, %cst {dimension_numbers = #tpu.dot_dimension_numbers<[1], [0], [0], [1], [0, 0, 1, 1], [], []>} : vector<256x256xbf16>, vector<256x128xbf16>, vector<256x128xf32> -> vector<256x128xf32>
    %c0_5 = arith.constant 0 : index
    %c0_6 = arith.constant 0 : index
    %5 = vector.load %arg4[%c0_5, %c0_6] : memref<1x128xf32, #tpu.memory_space<vmem>>, vector<1x128xf32>
    %6 = vector.broadcast %5 : vector<1x128xf32> to vector<256x128xf32>
    %7 = arith.addf %4, %6 : vector<256x128xf32>
    %8 = math.tanh %7 : vector<256x128xf32>
    %c0_7 = arith.constant 0 : index
    %c0_8 = arith.constant 0 : index
    %c0_9 = arith.constant 0 : index
    %9 = vector.load %arg5[%c0_7, %c0_8, %c0_9] : memref<1x256x128xf32, #tpu.memory_space<vmem>>, vector<1x256x128xf32>
    %10 = vector.shape_cast %9 : vector<1x256x128xf32> to vector<256x128xf32>
    %11 = vector.shape_cast %8 : vector<256x128xf32> to vector<1x256x128xf32>
    tpu.vector_store %arg5[%c0_7, %c0_8, %c0_9], %11 {strides = array<i32>} : memref<1x256x128xf32, #tpu.memory_space<vmem>>, vector<1x256x128xf32>,
    return
  }
  func.func @transform_0(%arg0: i32, %arg1: i32) -> (i32, i32, i32) {
    %c0_i32 = arith.constant 0 : i32
    %c0_i32_0 = arith.constant 0 : i32
    return %arg0, %arg1, %c0_i32 : i32, i32, i32
  }
  func.func @transform_1(%arg0: i32, %arg1: i32) -> (i32, i32, i32) {
    %c0_i32 = arith.constant 0 : i32
    %c0_i32_0 = arith.constant 0 : i32
    %c0_i32_1 = arith.constant 0 : i32
    return %arg0, %c0_i32, %c0_i32_0 : i32, i32, i32
  }
  func.func @transform_2(%arg0: i32, %arg1: i32) -> (i32, i32) {
    %c0_i32 = arith.constant 0 : i32
    %c0_i32_0 = arith.constant 0 : i32
    %c0_i32_1 = arith.constant 0 : i32
    return %c0_i32, %c0_i32_0 : i32, i32
  }
  func.func @transform_3(%arg0: i32, %arg1: i32) -> (i32, i32, i32) {
    %c0_i32 = arith.constant 0 : i32
    %c0_i32_0 = arith.constant 0 : i32
    return %arg0, %arg1, %c0_i32 : i32, i32, i32
  }
}

</mosaic_0001>

<bundles_post_ra>
// kernel: rc_generator_forward.20
= control target key start
LH: loop header
LB: loop body
LE: loop exit
PB: predicated region body
PF: predicated region fallthrough
CT: control target
= control target key end

     0   :  { %v24_v0 = vlaneseq  ;;  %s172_s1 = inlined_call_operand.vmem [shape: f32[1,256], index: 1, kind: input, shape index: {}]   ;;  %s173_s2 = inlined_call_operand.vmem [shape: f32[1,256], index: 2, kind: input, shape index: {}]   ;;  %s174_s0 = inlined_call_operand.vmem [shape: f32[32,256], index: 0, kind: input, shape index: {}]   ;;  %s175_s3 = inlined_call_operand.vmem [shape: bf16[32,256], index: 3, kind: output, shape index: {}]  }
   0x1   :  { %v22_v2 = vld [vmem:[%s172_s1] sm:$0x3]  ;;  %v15_v5 = vld [vmem:[%s174_s0 + $0x8] sm:$0xff]  ;;  %v16_v8 = vld [vmem:[%s174_s0 + $0x10] sm:$0xff] }
   0x2   :  { %v25_v1 = vshrl.u32 %v24_v0, 7  ;;  %v42_v3 = vld [vmem:[%s173_s2] sm:$0x3]  ;;  %v17_v9 = vld [vmem:[%s174_s0 + $0x18] sm:$0xff]  ;;  %v19_v15 = vld [vmem:[%s174_s0 + $0x28] sm:$0xff] }
   0x3   :  { %v14_v4 = vld [vmem:[%s174_s0] sm:$0xff]  ;;  %v20_v16 = vld [vmem:[%s174_s0 + $0x30] sm:$0xff]  ;;  %v21_v17 = vld [vmem:[%s174_s0 + $0x38] sm:$0xff] }
   0x4   :  { %v26_v6 = vsub.s32 0, %v25_v1  ;;  %v30_v7 = vsub.s32 1, %v25_v1  ;;  %v18_v10 = vld [vmem:[%s174_s0 + $0x20] sm:$0xff] }
   0x6   :  { %v27_v11 = vrot.slane %v22_v2, %v26_v6  ;;  %v31_v12 = vrot.slane %v22_v2, %v30_v7  ;;  %v47_v13 = vrot.slane %v42_v3, %v26_v6  ;;  %v51_v14 = vrot.slane %v42_v3, %v30_v7 }
   0x8   :  { %v34_v18 = vmul.f32 %v27_v11, %v14_v4  ;;  %v35_v19 = vmul.f32 %v31_v12, %v15_v5  ;;  %v36_v20 = vmul.f32 %v27_v11, %v16_v8  ;;  %v37_v21 = vmul.f32 %v31_v12, %v17_v9 }
   0x9   :  { %v38_v22 = vmul.f32 %v27_v11, %v18_v10  ;;  %v39_v23 = vmul.f32 %v31_v12, %v19_v15  ;;  %v40_v24 = vmul.f32 %v27_v11, %v20_v16  ;;  %v41_v25 = vmul.f32 %v31_v12, %v21_v17 }
   0xa   :  { %v54_v26 = vadd.f32 %v47_v13, %v34_v18  ;;  %v55_v27 = vadd.f32 %v51_v14, %v35_v19  ;;  %v56_v28 = vadd.f32 %v47_v13, %v36_v20  ;;  %v57_v29 = vadd.f32 %v51_v14, %v37_v21 }
   0xb   :  { %v58_v30 = vadd.f32 %v47_v13, %v38_v22  ;;  %v59_v31 = vadd.f32 %v51_v14, %v39_v23  ;;  %v60_v32 = vadd.f32 %v47_v13, %v40_v24  ;;  %v61_v33 = vadd.f32 %v51_v14, %v41_v25 }
   0xc   :  { %v62_v34 = vmax.f32 %v54_v26, 0.0  ;;  %v63_v35 = vmax.f32 %v55_v27, 0.0  ;;  %v64_v36 = vmax.f32 %v56_v28, 0.0  ;;  %v65_v37 = vmax.f32 %v57_v29, 0.0 }
   0xd   :  { %v66_v38 = vmax.f32 %v58_v30, 0.0  ;;  %v67_v39 = vmax.f32 %v59_v31, 0.0  ;;  %v68_v40 = vmax.f32 %v60_v32, 0.0  ;;  %v69_v41 = vmax.f32 %v61_v33, 0.0 }
   0xe   :  { %v106_v42 = vpack.c.bf16 %v63_v35, %v62_v34  ;;  %v107_v43 = vpack.c.bf16 %v65_v37, %v64_v36 }
   0xf   :  { %v108_v44 = vpack.c.bf16 %v67_v39, %v66_v38  ;;  %v109_v45 = vpack.c.bf16 %v69_v41, %v68_v40 }
  0x10   :  { %94 = vst [vmem:[%s175_s3] sm:$0xff] %v106_v42  ;;  %95 = vst [vmem:[%s175_s3 + $0x8] sm:$0xff] %v107_v43 }
  0x11   :  { %96 = vst [vmem:[%s175_s3 + $0x10] sm:$0xff] %v108_v44  ;;  %97 = vst [vmem:[%s175_s3 + $0x18] sm:$0xff] %v109_v45 }

// kernel: rc_generator_forward.19
= control target key start
LH: loop header
LB: loop body
LE: loop exit
PB: predicated region body
PF: predicated region fallthrough
CT: control target
= control target key end

     0   :  { %11 = vsyncpa [#allocation3], 0  ;;  %s1279_s0 = inlined_call_operand.vmem [shape: bf16[16,2,128], index: 0, kind: input, shape index: {}]   ;;  %s1280_s1 = inlined_call_operand.hbm [shape: bf16[16,128,256], index: 1, kind: input, shape index: {}]   ;;  %s1281_s2 = inlined_call_operand.hbm [shape: f32[1,256], index: 2, kind: input, shape index: {}]   ;;  %s1282_s3 = inlined_call_operand.vmem [shape: f32[16,2,256], index: 3, kind: output, shape index: {0}]   ;;  %s1283_s4 = inlined_call_operand.vmem [shape: f32[16,1,1,256], index: 4, kind: output, shape index: {1}]   ;;  %s1284_s5 = inlined_call_operand.vmem [shape: f32[16,1,1,256], index: 5, kind: output, shape index: {2}]  }
   0x1   :  { %13 = vsyncpa [#allocation3 + $0x1], 0 }
   0x2   :  { %14 = vsyncpa [#allocation5], 0  ;;  %s1073_s18 = smov 0   ;;  %s1075_s19 = smov 0  }
   0x3   :  { %s1077_s20 = smov 0   ;;  %s1079_s21 = smov 0  }
   0x4   :  { %s1081_s22 = smov 0   ;;  %s1083_s23 = smov 0  }
   0x5 LB: > { %s793_s24 = sadd.s32 4294967295, %s1035_s23   ;;  %s67_s25 = sadd.s32 1, %s1023_s20  ;;  %s1035_s23 = sphi %s1083_s23, %s20_s23   ;;  %s1031_s22 = sphi %s1081_s22, %s1305_s22   ;;  %s1027_s21 = sphi %s1079_s21, %s1304_s21   ;;  %s1023_s20 = sphi %s1077_s20, %s1303_s20   ;;  %s1019_s19 = sphi %s1075_s19, %s1302_s19   ;;  %s1015_s18 = sphi %s1073_s18, %s1301_s18  }
   0x6   : > { %p74_p0 = scmp.ne.s32.totalorder %s1023_s20, %s1019_s19  ;;  %p75_p1 = scmp.eq.s32.totalorder %s1035_s23, 0 }
   0x7   : > { %p80_p2 = scmp.ne.s32.totalorder %s1019_s19, %s1015_s18  ;;  %p1107_p3 = scmp.eq.s32.totalorder %s793_s24, 0 }
   0x8   : > { %p76_p4 = por %p75_p1, %p74_p0  ;;  %p795_p5 = scmp.ge.s32.totalorder %s1035_s23, 1 }
   0x9   : > { %s1290_s26 = scalar_select %p1107_p3, 1, 0 }
   0xa   : > { %p1114_p6 = por %p1107_p3, %p80_p2  ;;  %p196_p7 = scmp.lt.s32.totalorder %s1035_s23, 17 }
   0xb   : > { %s1037_s29 = smov [#allocation4]   ;;  %p844_p10 = scmp.lt.s32.totalorder %s1035_s23, 16 }
   0xc   : > { %s1291_s27 = scalar_select %p1114_p6, 1, 0 }
   0xd   : > { %p1119_p8 = pnand %p795_p5, %p196_p7  ;;  %s209_s30 = sshll.u32 %s1037_s29, 4  ;;  %s210_s30 = int_to_ptr.vmem [resolvable:$true] %s209_s30 }
   0xe   : > { %s229_s6 = sand.u32 1, %s1023_s20   ;;  %p1133_p12 = pnand %p844_p10, %p76_p4 }
   0xf   : > { %s1292_s28 = scalar_select %p1119_p8, 1, 0 }
  0x10   : > { %p835_p9 = pneg %p1119_p8  ;;  %s923_s11 = scalar_lea.hbm %s1281_s2, 32 }
  0x11   : > { %s1294_s8 = scalar_select %p1133_p12, 1, 0 }
  0x12   : > { %p1129_p11 = pnand %p835_p9, %p1107_p3  ;;  %p924_p13 = scmp.ne.s32.totalorder %s1281_s2, %s923_s11 }
  0x13   : > { %p930_p5 = scmp.lt.u32.totalorder %s923_s11, %s1281_s2 }
  0x14   : > { %p925_p0 = pneg %p1129_p11 }
  0x16   : > { %p926_p1 = pnand %p925_p0, %p924_p13 }
  0x18   : > { %p927_p2 = pneg %p926_p1 }
  0x1a   : > { %p932_p4 = pnand %p930_p5, %p927_p2 }
  0x1c   : > { %935 = shalt.err (!%p932_p4)
}
  0x1d   : > { %s936_s16 = scalar_lea.vmem %s210_s30, 32  ;;  %p944_p3 = scmp.lt.s32.totalorder %s210_s30, %s210_s30 }
  0x1e   : > { %p937_p7 = scmp.ne.s32.totalorder %s210_s30, %s936_s16  ;;  %p945_p6 = scmp.lt.s32.totalorder %s936_s16, %s936_s16 }
  0x20   : > { %p939_p9 = pnand %p937_p7, %p925_p0  ;;  %p946_p8 = por %p945_p6, %p944_p3 }
  0x22   : > { %p940_p10 = pneg %p939_p9 }
  0x24   : > { %p947_p12 = pnand %p946_p8, %p940_p10 }
  0x26   : > { %950 = shalt.err (!%p947_p12)
}
  0x27   : > { %838 = dma.hbm_to_vmem [thread:$0]  (!%p1129_p11), %s1281_s2, 32, %s210_s30, [#allocation5]  }
  0x28   : > { %s32_s24 = sadd.s32 1, %s1031_s22  ;;  %s798_s29 = sshll.u32 %s229_s6, 7 }
  0x29   : > { %p34_p13 = scmp.ge.s32.totalorder %s32_s24, 16  ;;  %s827_s9 = sshll.u32 %s1031_s22, 11 }
  0x2a   : > { %s233_s10 = scalar_lea.vmem [#allocation2], %s798_s29  ;;  %s1162_s13 = scalar_lea.hbm %s1280_s1, %s827_s9 }
  0x2b   : > { %s240_s11 = sshll.u32 %s233_s10, 4  ;;  %s1307_s24 = smov (%p34_p13, %s32_s24), 0  ;;  %s1164_s11 = int_to_ptr.vmem [resolvable:$true] %s240_s11 }
  0x2c   : > { %s64_s30 = ssub.s32 %s1031_s22, %s1307_s24  ;;  %s1174_s15 = scalar_lea.sflag [#allocation3], %s229_s6 }
  0x2d   : > { %p1168_p3 = scmp.eq.s32.totalorder %s64_s30, 0  ;;  %s951_s16 = scalar_lea.hbm %s1162_s13, 2048 }
  0x2e   : > { %p952_p6 = scmp.ne.s32.totalorder %s1162_s13, %s951_s16  ;;  %p1296_p8 = scmp.ne.s32.totalorder %s1294_s8, 0 }
  0x2f   : > { %s956_s29 = scalar_lea.hbm %s1280_s1, 32768  ;;  %p957_p1 = scmp.lt.u32.totalorder %s1162_s13, %s1280_s1 }
  0x30   : > { %p953_p11 = pneg %p1296_p8  ;;  %p958_p2 = scmp.lt.u32.totalorder %s956_s29, %s951_s16 }
  0x31   : > { %p960_p4 = scmp.lt.u32.totalorder %s951_s16, %s1162_s13 }
  0x32   : > { %p954_p12 = pnand %p953_p11, %p952_p6  ;;  %p959_p5 = por %p958_p2, %p957_p1 }
  0x34   : > { %p955_p0 = pneg %p954_p12  ;;  %p961_p7 = por %p960_p4, %p959_p5 }
  0x36   : > { %p962_p9 = pnand %p961_p7, %p955_p0 }
  0x38   : > { %965 = shalt.err (!%p962_p9)
}
  0x39   : > { %s966_s6 = scalar_lea.vmem %s1164_s11, 2048  ;;  %s1038_s7 = smov [#allocation2]  }
  0x3a   : > { %p967_p10 = scmp.ne.s32.totalorder %s1164_s11, %s966_s6  ;;  %s971_s12 = sshll.u32 %s1038_s7, 4  ;;  %s972_s12 = int_to_ptr.vmem [resolvable:$false] %s971_s12 }
  0x3b   : > { %s973_s30 = scalar_lea.vmem %s972_s12, 4096  ;;  %p974_p12 = scmp.lt.s32.totalorder %s1164_s11, %s972_s12 }
  0x3c   : > { %p969_p13 = pnand %p967_p10, %p953_p11  ;;  %p975_p1 = scmp.lt.s32.totalorder %s973_s30, %s966_s6 }
  0x3e   : > { %p970_p6 = pneg %p969_p13  ;;  %p976_p2 = por %p975_p1, %p974_p12 }
  0x40   : > { %p977_p5 = pnand %p976_p2, %p970_p6 }
  0x42   : > { %980 = shalt.err (!%p977_p5)
}
  0x43   : > { %s1039_s16 = smov 128   ;;  %s1040_s17 = smov 8  }
  0x44   : > { %842 = dma.hbm_to_vmem [thread:$0]  (!%p1296_p8), %s1162_s13, 2048, %s1164_s11, %s1174_s15, %s1039_s16, %s1039_s16, %s1040_s17  }
  0x45   : > { %s1207_s18 = scalar_select %p1168_p3, %s1023_s20, %s67_s25  }
  0x46   : > { %p1297_p11 = scmp.ne.s32.totalorder %s1292_s28, 0 }
  0x47   : > { %s254_s29 = sand.u32 (!%p1297_p11), 1, %s1019_s19   ;;  %p1298_p0 = scmp.ne.s32.totalorder (!%p1297_p11), %s1291_s27, 0 }
  0x48   : > { %252 = sbr.rel (%p1297_p11) target bundleno = 353 (0x161), region = 32  ;;  %s802_s9 = sshll.u32 (!%p1297_p11), %s254_s29, 7 }
  0x49   : > { %s255_s10 = scalar_lea.sflag (!%p1297_p11), [#allocation3], %s254_s29  ;;  %s1212_s6 = scalar_lea.vmem (!%p1297_p11), [#allocation2], %s802_s9 }
  0x4f   : > { %1006 = dma.done.wait (%p1298_p0), %s255_s10, 2048  }
  0x50   : > { %1008 = vsyncadd (%p1298_p0), %s255_s10, 4294965248  ;;  %p1299_p8 = scmp.ne.s32.totalorder %s1290_s26, 0 }
  0x52   : > { %1010 = dma.done.wait (%p1299_p8), [#allocation5], 32  }
  0x53   : > { %1012 = vsyncadd (%p1299_p8), [#allocation5], 4294967264  ;;  %v1041_v0 = vmov 0   ;;  %v899_v1 = vld [vmem:[%s1212_s6 + $0x4] ss:$8 sps:$4 sm:$0xff]   ;;  %p315_p3 = scmp.lt.s32.totalorder %s1027_s21, 15  ;;  %v366_v18 = vlaneseq }
  0x54   : > { %488 = vmatprep.mubr.bf16.mxu0 %v1041_v0  ;;  %v901_v2 = vld [vmem:[%s1212_s6] ss:$8 sps:$4 sm:$0xff]   ;;  %456 = vmatprep.subr.bf16.mxu0 %v899_v1  ;;  %v902_v3 = vld [vmem:[%s1212_s6 + $0x14] ss:$8 sps:$4 sm:$0xff]   ;;  %v904_v4 = vld [vmem:[%s1212_s6 + $0x10] ss:$8 sps:$4 sm:$0xff]  }
  0x55   : > { %457 = vmatpush1.bf16.msra.mxu0 %v901_v2  ;;  %v905_v5 = vld [vmem:[%s1212_s6 + $0x24] ss:$8 sps:$4 sm:$0xff]   ;;  %v907_v6 = vld [vmem:[%s1212_s6 + $0x20] ss:$8 sps:$4 sm:$0xff]   ;;  %v908_v7 = vld [vmem:[%s1212_s6 + $0x34] ss:$8 sps:$4 sm:$0xff]  }
  0x56   : > { %458 = vmatprep.subr.bf16.mxu0 %v902_v3  ;;  %v910_v8 = vld [vmem:[%s1212_s6 + $0x30] ss:$8 sps:$4 sm:$0xff]   ;;  %v911_v9 = vld [vmem:[%s1212_s6 + $0x44] ss:$8 sps:$4 sm:$0xff]   ;;  %v913_v10 = vld [vmem:[%s1212_s6 + $0x40] ss:$8 sps:$4 sm:$0xff]  }
  0x57   : > { %v914_v11 = vld [vmem:[%s1212_s6 + $0x54] ss:$8 sps:$4 sm:$0xff]   ;;  %v916_v12 = vld [vmem:[%s1212_s6 + $0x50] ss:$8 sps:$4 sm:$0xff]   ;;  %v917_v13 = vld [vmem:[%s1212_s6 + $0x64] ss:$8 sps:$4 sm:$0xff]  }
  0x58   : > { %v919_v14 = vld [vmem:[%s1212_s6 + $0x60] ss:$8 sps:$4 sm:$0xff]   ;;  %v920_v15 = vld [vmem:[%s1212_s6 + $0x74] ss:$8 sps:$4 sm:$0xff]   ;;  %s1309_s21 = smov (!%p315_p3, %s1027_s21), 15  ;;  %v367_v19 = vshrl.u32 %v366_v18, 7 }
  0x59   : > { %459 = vmatpush1.bf16.msra.mxu0 %v904_v4  ;;  %v922_v16 = vld [vmem:[%s1212_s6 + $0x70] ss:$8 sps:$4 sm:$0xff]   ;;  %s320_s27 = scalar_lea.vmem %s1279_s0, %s1309_s21  ;;  %v364_v21 = vld [vmem:[#allocation4] sm:$0x3]  ;;  %s828_s28 = sshll.u32 %s1309_s21, 2  ;;  %vm509_vm0 = vcmask 1041408  }
  0x5a   : > { %460 = vmatprep.subr.bf16.mxu0 %v905_v5  ;;  %v347_v17 = vld [vmem:[%s320_s27] sm:$0x1]  ;;  %v368_v20 = vsub.s32 0, %v367_v19  ;;  %v372_v22 = vsub.s32 1, %v367_v19  ;;  %s329_s13 = scalar_lea.vmem %s1282_s3, %s828_s28  ;;  %v1042_v42 = vmov 1966171168  }
  0x5b   : > { %v528_v43 = vunpack.c.l.s4 %v1042_v42  ;;  %s806_s14 = sshll.u32 %s1309_s21, 1  ;;  %vm544_vm1 = vcmp.lt.s32.totalorder %v366_v18, 256 }
  0x5c   : > { %v369_v23 = vrot.slane %v364_v21, %v368_v20  ;;  %v373_v24 = vrot.slane %v364_v21, %v372_v22  ;;  %s337_s12 = scalar_lea.vmem %s1283_s4, %s806_s14  ;;  %s345_s17 = scalar_lea.vmem %s1284_s5, %s806_s14 }
  0x5d   : > { %461 = vmatpush1.bf16.msra.mxu0 %v907_v6  ;;  %v529_v52 = vunpack.c.0.s8 %v528_v43 }
  0x5e   : > { %462 = vmatprep.subr.bf16.mxu0 %v908_v7 }
  0x5f   : > { %v532_v61 = vsub.s32 %v529_v52, %v367_v19 }
  0x61   : > { %463 = vmatpush1.bf16.msra.mxu0 %v910_v8 }
  0x62   : > { %464 = vmatprep.subr.bf16.mxu0 %v911_v9 }
  0x65   : > { %465 = vmatpush1.bf16.msra.mxu0 %v913_v10 }
  0x66   : > { %466 = vmatprep.subr.bf16.mxu0 %v914_v11 }
  0x69   : > { %467 = vmatpush1.bf16.msra.mxu0 %v916_v12 }
  0x6a   : > { %468 = vmatprep.subr.bf16.mxu0 %v917_v13 }
  0x6d   : > { %469 = vmatpush1.bf16.msra.mxu0 %v919_v14 }
  0x6e   : > { %470 = vmatprep.subr.bf16.mxu0 %v920_v15 }
  0x71   : > { %471 = vmatpush1.bf16.msra.mxu0 %v922_v16 }
  0x74   : > { %489 = vmatmul.mubr.bf16.vlgmr.msra.gmra.mrb[0].mxu0 %v347_v17 }
 0x147   : > { %v490_v25 = vpop.f32.mrb[0].mxu0 }
 0x148   : > { %v491_v26 = vadd.f32 %v490_v25, %v369_v23  ;;  %v492_v27 = vpop.f32.mrb[1].mxu0 }
 0x149   : > { %v493_v28 = vadd.f32 %v492_v27, %v373_v24  ;;  %v494_v29 = vpop.f32.mrb[2].mxu0 }
 0x14a   : > { %v510_v30 = vsel %vm509_vm0, %v491_v26, 0.0  ;;  %v547_v31 = vmul.f32 %v491_v26, %v491_v26  ;;  %v495_v32 = vpop.f32.mrb[3].mxu0 }
 0x14b   : > { %v511_v33 = vrot.slane %v510_v30, 4  ;;  %v499_v34 = vcombine.low %v491_v26, %v493_v28  ;;  %v517_v35 = vsel %vm509_vm0, %v493_v28, 0.0  ;;  %v548_v36 = vmul.f32 %v493_v28, %v493_v28 }
 0x14c   : > { %v549_v37 = vsel %vm509_vm0, %v547_v31, 0.0  ;;  %v518_v38 = vrot.slane %v517_v35, 4 }
 0x14d   : > { %v512_v39 = vadd.f32 %v511_v33, %v510_v30  ;;  %v550_v40 = vrot.slane %v549_v37, 4  ;;  %824 = vst.sshfl [vmem:[%s329_s13] sm:$0x33 pattern:$0x76325410] %v499_v34  ;;  %v556_v41 = vsel %vm509_vm0, %v548_v36, 0.0 }
 0x14e   : > { %v519_v44 = vadd.f32 %v518_v38, %v517_v35  ;;  %v557_v45 = vrot.slane %v556_v41, 4 }
 0x14f   : > { %v513_v46 = vrot.slane %v512_v39, 2  ;;  %v551_v47 = vadd.f32 %v550_v40, %v549_v37 }
 0x150   : > { %v520_v48 = vrot.slane %v519_v44, 2  ;;  %v558_v49 = vadd.f32 %v557_v45, %v556_v41 }
 0x151   : > { %v514_v50 = vadd.f32 %v513_v46, %v512_v39  ;;  %v552_v51 = vrot.slane %v551_v47, 2 }
 0x152   : > { %v521_v53 = vadd.f32 %v520_v48, %v519_v44  ;;  %v559_v54 = vrot.slane %v558_v49, 2 }
 0x153   : > { %v515_v55 = vrot.slane %v514_v50, 1  ;;  %v553_v56 = vadd.f32 %v552_v51, %v551_v47 }
 0x154   : > { %v522_v57 = vrot.slane %v521_v53, 1  ;;  %v560_v58 = vadd.f32 %v559_v54, %v558_v49 }
 0x155   : > { %v516_v59 = vadd.f32 %v515_v55, %v514_v50  ;;  %v554_v60 = vrot.slane %v553_v56, 1 }
 0x156   : > { %v523_v62 = vadd.f32 %v522_v57, %v521_v53  ;;  %v561_v63 = vrot.slane %v560_v58, 1 }
 0x157   : > { %v555_v0 = vadd.f32 %v554_v60, %v553_v56 }
 0x158   : > { %v526_v1 = vcombine.low %v516_v59, %v523_v62  ;;  %v562_v2 = vadd.f32 %v561_v63, %v560_v58 }
 0x15a   : > { %v533_v3 = vrot.slane %v526_v1, %v532_v61  ;;  %v565_v4 = vcombine.low %v555_v0, %v562_v2 }
 0x15c   : > { %v540_v5 = vrot.slane %v533_v3, %v532_v61  ;;  %v572_v6 = vrot.slane %v565_v4, %v532_v61 }
 0x15e   : > { %546 = vst.msk [vmem:[%s337_s12] sm:$0x3] %vm544_vm1, %v540_v5  ;;  %v579_v7 = vrot.slane %v572_v6, %v532_v61 }
 0x160   : > { %581 = vst.msk [vmem:[%s345_s17] sm:$0x3] %vm544_vm1, %v579_v7 }
 0x161 PF: > { %s20_s23 = sadd.s32 1, %s1035_s23   ;;  %s1300_s21 = smov %s1207_s18 }
 0x162   : > { %p17_p4 = scmp.ge.s32.totalorder %s20_s23, 18   ;;  %s1301_s18 = smov %s1019_s19 }
 0x163   : > { %s1302_s19 = smov %s1023_s20  ;;  %s1303_s20 = smov %s1300_s21 }
 0x164   : > { %s1304_s21 = smov %s1031_s22  ;;  %s1305_s22 = smov %s1307_s24 }
 0x165   :  { %19 = sbr.rel (!%p17_p4) target bundleno = 5 (0x5), region = 103 }
 0x16c   :  { %655 = vsyncpa [#allocation3], 1 }
 0x16d   :  { %657 = vsyncpa [#allocation3 + $0x1], 1 }
 0x16e   :  { %658 = vsyncpa [#allocation5], 1 }

// kernel: rc_generator_forward.24
= control target key start
LH: loop header
LB: loop body
LE: loop exit
PB: predicated region body
PF: predicated region fallthrough
CT: control target
= control target key end

     0   :  { %v27_v0 = vlaneseq  ;;  %s204_s0 = inlined_call_operand.vmem [shape: f32[32,256], index: 0, kind: input, shape index: {}]   ;;  %s205_s1 = inlined_call_operand.vmem [shape: f32[1,256], index: 1, kind: input, shape index: {}]   ;;  %s206_s2 = inlined_call_operand.vmem [shape: f32[1,256], index: 2, kind: input, shape index: {}]   ;;  %s207_s3 = inlined_call_operand.vmem [shape: bf16[32,256], index: 3, kind: input, shape index: {}]   ;;  %s208_s4 = inlined_call_operand.vmem [shape: bf16[32,256], index: 4, kind: output, shape index: {}]  }
   0x1   :  { %v65_v2 = vld [vmem:[%s207_s3] sm:$0xff]  ;;  %v66_v6 = vld [vmem:[%s207_s3 + $0x8] sm:$0xff]  ;;  %v19_v10 = vld [vmem:[%s204_s0 + $0x10] sm:$0xff] }
   0x2   :  { %v28_v1 = vshrl.u32 %v27_v0, 7  ;;  %v17_v3 = vld [vmem:[%s204_s0] sm:$0xff]  ;;  %v18_v7 = vld [vmem:[%s204_s0 + $0x8] sm:$0xff]  ;;  %v67_v11 = vld [vmem:[%s207_s3 + $0x10] sm:$0xff]  ;;  %v69_v12 = vunpack.c.l.bf16 %v65_v2  ;;  %v70_v13 = vunpack.c.h.bf16 %v65_v2  ;;  %v71_v15 = vunpack.c.l.bf16 %v66_v6 }
   0x3   :  { %v25_v4 = vld [vmem:[%s205_s1] sm:$0x3]  ;;  %v20_v14 = vld [vmem:[%s204_s0 + $0x18] sm:$0xff]  ;;  %v72_v16 = vunpack.c.h.bf16 %v66_v6  ;;  %v22_v23 = vld [vmem:[%s204_s0 + $0x28] sm:$0xff]  ;;  %v73_v26 = vunpack.c.l.bf16 %v67_v11  ;;  %v74_v27 = vunpack.c.h.bf16 %v67_v11 }
   0x4   :  { %v45_v5 = vld [vmem:[%s206_s2] sm:$0x3]  ;;  %v29_v8 = vsub.s32 0, %v28_v1  ;;  %v33_v9 = vsub.s32 1, %v28_v1  ;;  %v68_v18 = vld [vmem:[%s207_s3 + $0x18] sm:$0xff]  ;;  %v23_v24 = vld [vmem:[%s204_s0 + $0x30] sm:$0xff] }
   0x5   :  { %v21_v17 = vld [vmem:[%s204_s0 + $0x20] sm:$0xff]  ;;  %v24_v25 = vld [vmem:[%s204_s0 + $0x38] sm:$0xff]  ;;  %v75_v28 = vunpack.c.l.bf16 %v68_v18  ;;  %v76_v29 = vunpack.c.h.bf16 %v68_v18 }
   0x6   :  { %v30_v19 = vrot.slane %v25_v4, %v29_v8  ;;  %v34_v20 = vrot.slane %v25_v4, %v33_v9  ;;  %v50_v21 = vrot.slane %v45_v5, %v29_v8  ;;  %v54_v22 = vrot.slane %v45_v5, %v33_v9 }
   0x8   :  { %v37_v30 = vmul.f32 %v30_v19, %v17_v3  ;;  %v38_v31 = vmul.f32 %v34_v20, %v18_v7  ;;  %v39_v32 = vmul.f32 %v30_v19, %v19_v10  ;;  %v40_v33 = vmul.f32 %v34_v20, %v20_v14 }
   0x9   :  { %v41_v34 = vmul.f32 %v30_v19, %v21_v17  ;;  %v42_v35 = vmul.f32 %v34_v20, %v22_v23  ;;  %v43_v36 = vmul.f32 %v30_v19, %v23_v24  ;;  %v44_v37 = vmul.f32 %v34_v20, %v24_v25 }
   0xa   :  { %v57_v38 = vadd.f32 %v50_v21, %v37_v30  ;;  %v58_v39 = vadd.f32 %v54_v22, %v38_v31  ;;  %v59_v40 = vadd.f32 %v50_v21, %v39_v32  ;;  %v60_v41 = vadd.f32 %v54_v22, %v40_v33 }
   0xb   :  { %v61_v42 = vadd.f32 %v50_v21, %v41_v34  ;;  %v62_v43 = vadd.f32 %v54_v22, %v42_v35  ;;  %v63_v44 = vadd.f32 %v50_v21, %v43_v36  ;;  %v64_v45 = vadd.f32 %v54_v22, %v44_v37 }
   0xc   :  { %v77_v46 = vadd.f32 %v69_v12, %v57_v38  ;;  %v78_v47 = vadd.f32 %v70_v13, %v58_v39  ;;  %v79_v48 = vadd.f32 %v71_v15, %v59_v40  ;;  %v80_v49 = vadd.f32 %v72_v16, %v60_v41 }
   0xd   :  { %v81_v50 = vadd.f32 %v73_v26, %v61_v42  ;;  %v82_v51 = vadd.f32 %v74_v27, %v62_v43  ;;  %v83_v52 = vadd.f32 %v75_v28, %v63_v44  ;;  %v84_v53 = vadd.f32 %v76_v29, %v64_v45 }
   0xe   :  { %v121_v54 = vpack.c.bf16 %v78_v47, %v77_v46  ;;  %v122_v55 = vpack.c.bf16 %v80_v49, %v79_v48 }
   0xf   :  { %v123_v56 = vpack.c.bf16 %v82_v51, %v81_v50  ;;  %v124_v57 = vpack.c.bf16 %v84_v53, %v83_v52 }
  0x10   :  { %109 = vst [vmem:[%s208_s4] sm:$0xff] %v121_v54  ;;  %110 = vst [vmem:[%s208_s4 + $0x8] sm:$0xff] %v122_v55 }
  0x11   :  { %111 = vst [vmem:[%s208_s4 + $0x10] sm:$0xff] %v123_v56  ;;  %112 = vst [vmem:[%s208_s4 + $0x18] sm:$0xff] %v124_v57 }

// kernel: rc_generator_forward.21
= control target key start
LH: loop header
LB: loop body
LE: loop exit
PB: predicated region body
PF: predicated region fallthrough
CT: control target
= control target key end

     0   :  { %s4514_s1 = inlined_call_operand.vmem [shape: bf16[1,2304,256], index: 1, kind: input, shape index: {}]   ;;  %s4515_s0 = inlined_call_operand.vmem [shape: bf16[1,32,2304], index: 0, kind: input, shape index: {}]   ;;  %s4516_s2 = inlined_call_operand.vmem [shape: f32[1,256], index: 2, kind: input, shape index: {}]   ;;  %s4517_s3 = inlined_call_operand.vmem [shape: f32[1,32,256], index: 3, kind: output, shape index: {0}]   ;;  %s4518_s4 = inlined_call_operand.vmem [shape: f32[1,1,1,256], index: 4, kind: output, shape index: {1}]   ;;  %s4519_s5 = inlined_call_operand.vmem [shape: f32[1,1,1,256], index: 5, kind: output, shape index: {2}]  }
   0x1   :  { %v2985_v0 = vld [vmem:[%s4514_s1 + $0x4] ss:$8 sps:$4 sm:$0xff]   ;;  %v2989_v2 = vld [vmem:[%s4514_s1] ss:$8 sps:$4 sm:$0xff]   ;;  %v2991_v4 = vld [vmem:[%s4514_s1 + $0x14] ss:$8 sps:$4 sm:$0xff]  }
   0x2   :  { %v2987_v1 = vld [vmem:[%s4514_s1 + $0x404] ss:$8 sps:$4 sm:$0xff]   ;;  %1973 = vmatprep.subr.bf16.mxu1 %v2985_v0  ;;  %v2990_v3 = vld [vmem:[%s4514_s1 + $0x400] ss:$8 sps:$4 sm:$0xff]   ;;  %v2993_v5 = vld [vmem:[%s4514_s1 + $0x414] ss:$8 sps:$4 sm:$0xff]  }
   0x3   :  { %2185 = vmatprep.subr.bf16.mxu0 %v2987_v1  ;;  %1974 = vmatpush1.bf16.msra.mxu1 %v2989_v2  ;;  %v2995_v6 = vld [vmem:[%s4514_s1 + $0x10] ss:$8 sps:$4 sm:$0xff]   ;;  %v2997_v8 = vld [vmem:[%s4514_s1 + $0x24] ss:$8 sps:$4 sm:$0xff]   ;;  %v3001_v10 = vld [vmem:[%s4514_s1 + $0x20] ss:$8 sps:$4 sm:$0xff]  }
   0x4   :  { %2186 = vmatpush1.bf16.msra.mxu0 %v2990_v3  ;;  %1975 = vmatprep.subr.bf16.mxu1 %v2991_v4  ;;  %v2996_v7 = vld [vmem:[%s4514_s1 + $0x410] ss:$8 sps:$4 sm:$0xff]   ;;  %v2999_v9 = vld [vmem:[%s4514_s1 + $0x424] ss:$8 sps:$4 sm:$0xff]   ;;  %v3002_v11 = vld [vmem:[%s4514_s1 + $0x420] ss:$8 sps:$4 sm:$0xff]  }
   0x5   :  { %2187 = vmatprep.subr.bf16.mxu0 %v2993_v5  ;;  %v3003_v12 = vld [vmem:[%s4514_s1 + $0x34] ss:$8 sps:$4 sm:$0xff]   ;;  %v3007_v14 = vld [vmem:[%s4514_s1 + $0x30] ss:$8 sps:$4 sm:$0xff]   ;;  %v3009_v16 = vld [vmem:[%s4514_s1 + $0x44] ss:$8 sps:$4 sm:$0xff]  }
   0x6   :  { %v3005_v13 = vld [vmem:[%s4514_s1 + $0x434] ss:$8 sps:$4 sm:$0xff]   ;;  %v3008_v15 = vld [vmem:[%s4514_s1 + $0x430] ss:$8 sps:$4 sm:$0xff]   ;;  %v3011_v17 = vld [vmem:[%s4514_s1 + $0x444] ss:$8 sps:$4 sm:$0xff]  }
   0x7   :  { %1976 = vmatpush1.bf16.msra.mxu1 %v2995_v6  ;;  %v3013_v18 = vld [vmem:[%s4514_s1 + $0x40] ss:$8 sps:$4 sm:$0xff]   ;;  %v3015_v20 = vld [vmem:[%s4514_s1 + $0x54] ss:$8 sps:$4 sm:$0xff]   ;;  %v3019_v22 = vld [vmem:[%s4514_s1 + $0x50] ss:$8 sps:$4 sm:$0xff]  }
   0x8   :  { %2188 = vmatpush1.bf16.msra.mxu0 %v2996_v7  ;;  %1977 = vmatprep.subr.bf16.mxu1 %v2997_v8  ;;  %v3014_v19 = vld [vmem:[%s4514_s1 + $0x440] ss:$8 sps:$4 sm:$0xff]   ;;  %v3017_v21 = vld [vmem:[%s4514_s1 + $0x454] ss:$8 sps:$4 sm:$0xff]   ;;  %v3020_v23 = vld [vmem:[%s4514_s1 + $0x450] ss:$8 sps:$4 sm:$0xff]  }
   0x9   :  { %2189 = vmatprep.subr.bf16.mxu0 %v2999_v9  ;;  %v3021_v24 = vld [vmem:[%s4514_s1 + $0x64] ss:$8 sps:$4 sm:$0xff]   ;;  %v3025_v26 = vld [vmem:[%s4514_s1 + $0x60] ss:$8 sps:$4 sm:$0xff]   ;;  %v3027_v28 = vld [vmem:[%s4514_s1 + $0x74] ss:$8 sps:$4 sm:$0xff]  }
   0xa   :  { %v3023_v25 = vld [vmem:[%s4514_s1 + $0x464] ss:$8 sps:$4 sm:$0xff]   ;;  %v3026_v27 = vld [vmem:[%s4514_s1 + $0x460] ss:$8 sps:$4 sm:$0xff]   ;;  %v3029_v29 = vld [vmem:[%s4514_s1 + $0x474] ss:$8 sps:$4 sm:$0xff]  }
   0xb   :  { %1978 = vmatpush1.bf16.msra.mxu1 %v3001_v10  ;;  %v3031_v30 = vld [vmem:[%s4514_s1 + $0x70] ss:$8 sps:$4 sm:$0xff]   ;;  %v3033_v32 = vld [vmem:[%s4514_s1 + $0x84] ss:$8 sps:$4 sm:$0xff]   ;;  %v3037_v34 = vld [vmem:[%s4514_s1 + $0x80] ss:$8 sps:$4 sm:$0xff]  }
   0xc   :  { %2190 = vmatpush1.bf16.msra.mxu0 %v3002_v11  ;;  %1979 = vmatprep.subr.bf16.mxu1 %v3003_v12  ;;  %v3032_v31 = vld [vmem:[%s4514_s1 + $0x470] ss:$8 sps:$4 sm:$0xff]   ;;  %v3035_v33 = vld [vmem:[%s4514_s1 + $0x484] ss:$8 sps:$4 sm:$0xff]   ;;  %v3038_v35 = vld [vmem:[%s4514_s1 + $0x480] ss:$8 sps:$4 sm:$0xff]  }
   0xd   :  { %2191 = vmatprep.subr.bf16.mxu0 %v3005_v13  ;;  %v3039_v36 = vld [vmem:[%s4514_s1 + $0x94] ss:$8 sps:$4 sm:$0xff]   ;;  %v3043_v38 = vld [vmem:[%s4514_s1 + $0x90] ss:$8 sps:$4 sm:$0xff]   ;;  %v3045_v40 = vld [vmem:[%s4514_s1 + $0xa4] ss:$8 sps:$4 sm:$0xff]  }
   0xe   :  { %v3041_v37 = vld [vmem:[%s4514_s1 + $0x494] ss:$8 sps:$4 sm:$0xff]   ;;  %v3044_v39 = vld [vmem:[%s4514_s1 + $0x490] ss:$8 sps:$4 sm:$0xff]   ;;  %v3047_v41 = vld [vmem:[%s4514_s1 + $0x4a4] ss:$8 sps:$4 sm:$0xff]  }
   0xf   :  { %1980 = vmatpush1.bf16.msra.mxu1 %v3007_v14  ;;  %v3049_v42 = vld [vmem:[%s4514_s1 + $0xa0] ss:$8 sps:$4 sm:$0xff]   ;;  %v3051_v44 = vld [vmem:[%s4514_s1 + $0xb4] ss:$8 sps:$4 sm:$0xff]   ;;  %v3055_v46 = vld [vmem:[%s4514_s1 + $0xb0] ss:$8 sps:$4 sm:$0xff]  }
  0x10   :  { %2192 = vmatpush1.bf16.msra.mxu0 %v3008_v15  ;;  %1981 = vmatprep.subr.bf16.mxu1 %v3009_v16  ;;  %v3050_v43 = vld [vmem:[%s4514_s1 + $0x4a0] ss:$8 sps:$4 sm:$0xff]   ;;  %v3053_v45 = vld [vmem:[%s4514_s1 + $0x4b4] ss:$8 sps:$4 sm:$0xff]   ;;  %v3056_v47 = vld [vmem:[%s4514_s1 + $0x4b0] ss:$8 sps:$4 sm:$0xff]  }
  0x11   :  { %2193 = vmatprep.subr.bf16.mxu0 %v3011_v17  ;;  %v3083_v48 = vld [vmem:[%s4515_s0 + $0x4] ss:$72 sps:$4 sm:$0xff]   ;;  %v3061_v52 = vld [vmem:[%s4514_s1 + $0xc0] ss:$8 sps:$4 sm:$0xff]   ;;  %v3063_v54 = vld [vmem:[%s4514_s1 + $0xd4] ss:$8 sps:$4 sm:$0xff]  }
  0x12   :  { %v3057_v49 = vld [vmem:[%s4514_s1 + $0xc4] ss:$8 sps:$4 sm:$0xff]   ;;  %2005 = vmatprep.mubr.bf16.mxu1 %v3083_v48  ;;  %v3062_v53 = vld [vmem:[%s4514_s1 + $0x4c0] ss:$8 sps:$4 sm:$0xff]   ;;  %v3065_v55 = vld [vmem:[%s4514_s1 + $0x4d4] ss:$8 sps:$4 sm:$0xff]  }
  0x13   :  { %1982 = vmatpush1.bf16.msra.mxu1 %v3013_v18  ;;  %v3059_v50 = vld [vmem:[%s4514_s1 + $0x4c4] ss:$8 sps:$4 sm:$0xff]   ;;  %v3067_v56 = vld [vmem:[%s4514_s1 + $0xd0] ss:$8 sps:$4 sm:$0xff]   ;;  %v3073_v60 = vld [vmem:[%s4514_s1 + $0xe0] ss:$8 sps:$4 sm:$0xff]  }
  0x14   :  { %2194 = vmatpush1.bf16.msra.mxu0 %v3014_v19  ;;  %1983 = vmatprep.subr.bf16.mxu1 %v3015_v20  ;;  %v3089_v51 = vld [vmem:[%s4515_s0 + $0x24] ss:$72 sps:$4 sm:$0xff]   ;;  %v3068_v57 = vld [vmem:[%s4514_s1 + $0x4d0] ss:$8 sps:$4 sm:$0xff]   ;;  %v3074_v61 = vld [vmem:[%s4514_s1 + $0x4e0] ss:$8 sps:$4 sm:$0xff]  }
  0x15   :  { %2195 = vmatprep.subr.bf16.mxu0 %v3017_v21  ;;  %2217 = vmatprep.mubr.bf16.mxu0 %v3089_v51  ;;  %v3069_v58 = vld [vmem:[%s4514_s1 + $0xe4] ss:$8 sps:$4 sm:$0xff]   ;;  %v3075_v62 = vld [vmem:[%s4514_s1 + $0xf4] ss:$8 sps:$4 sm:$0xff]   ;;  %v3079_v0 = vld [vmem:[%s4514_s1 + $0xf0] ss:$8 sps:$4 sm:$0xff]  }
  0x16   :  { %v3071_v59 = vld [vmem:[%s4514_s1 + $0x4e4] ss:$8 sps:$4 sm:$0xff]   ;;  %v3077_v63 = vld [vmem:[%s4514_s1 + $0x4f4] ss:$8 sps:$4 sm:$0xff]   ;;  %v3080_v1 = vld [vmem:[%s4514_s1 + $0x4f0] ss:$8 sps:$4 sm:$0xff]  }
  0x17   :  { %1984 = vmatpush1.bf16.msra.mxu1 %v3019_v22  ;;  %v3086_v2 = vld [vmem:[%s4514_s1 + $0x104] ss:$8 sps:$4 sm:$0xff]   ;;  %v3081_v4 = vld [vmem:[%s4515_s0] ss:$72 sps:$4 sm:$0xff]   ;;  %v3095_v8 = vld [vmem:[%s4514_s1 + $0x114] ss:$8 sps:$4 sm:$0xff]  }
  0x18   :  { %2196 = vmatpush1.bf16.msra.mxu0 %v3020_v23  ;;  %1985 = vmatprep.subr.bf16.mxu1 %v3021_v24  ;;  %v3092_v3 = vld [vmem:[%s4514_s1 + $0x504] ss:$8 sps:$4 sm:$0xff]   ;;  %v3084_v5 = vld [vmem:[%s4514_s1 + $0x100] ss:$8 sps:$4 sm:$0xff]   ;;  %v3098_v9 = vld [vmem:[%s4514_s1 + $0x514] ss:$8 sps:$4 sm:$0xff]  }
  0x19   :  { %2197 = vmatprep.subr.bf16.mxu0 %v3023_v25  ;;  %v3087_v6 = vld [vmem:[%s4515_s0 + $0x20] ss:$72 sps:$4 sm:$0xff]   ;;  %v3093_v10 = vld [vmem:[%s4514_s1 + $0x110] ss:$8 sps:$4 sm:$0xff]   ;;  %v3101_v12 = vld [vmem:[%s4514_s1 + $0x124] ss:$8 sps:$4 sm:$0xff]  }
  0x1a   :  { %v3090_v7 = vld [vmem:[%s4514_s1 + $0x500] ss:$8 sps:$4 sm:$0xff]   ;;  %v3096_v11 = vld [vmem:[%s4514_s1 + $0x510] ss:$8 sps:$4 sm:$0xff]   ;;  %v3104_v13 = vld [vmem:[%s4514_s1 + $0x524] ss:$8 sps:$4 sm:$0xff]  }
  0x1b   :  { %1986 = vmatpush1.bf16.msra.mxu1 %v3025_v26  ;;  %v3099_v14 = vld [vmem:[%s4514_s1 + $0x120] ss:$8 sps:$4 sm:$0xff]   ;;  %v3107_v16 = vld [vmem:[%s4514_s1 + $0x134] ss:$8 sps:$4 sm:$0xff]   ;;  %v3105_v18 = vld [vmem:[%s4514_s1 + $0x130] ss:$8 sps:$4 sm:$0xff]  }
  0x1c   :  { %2198 = vmatpush1.bf16.msra.mxu0 %v3026_v27  ;;  %1987 = vmatprep.subr.bf16.mxu1 %v3027_v28  ;;  %v3102_v15 = vld [vmem:[%s4514_s1 + $0x520] ss:$8 sps:$4 sm:$0xff]   ;;  %v3110_v17 = vld [vmem:[%s4514_s1 + $0x534] ss:$8 sps:$4 sm:$0xff]   ;;  %v3108_v19 = vld [vmem:[%s4514_s1 + $0x530] ss:$8 sps:$4 sm:$0xff]  }
  0x1d   :  { %2199 = vmatprep.subr.bf16.mxu0 %v3029_v29  ;;  %v3113_v20 = vld [vmem:[%s4514_s1 + $0x144] ss:$8 sps:$4 sm:$0xff]   ;;  %v3111_v22 = vld [vmem:[%s4514_s1 + $0x140] ss:$8 sps:$4 sm:$0xff]   ;;  %v3119_v24 = vld [vmem:[%s4514_s1 + $0x154] ss:$8 sps:$4 sm:$0xff]  }
  0x1e   :  { %v3116_v21 = vld [vmem:[%s4514_s1 + $0x544] ss:$8 sps:$4 sm:$0xff]   ;;  %v3114_v23 = vld [vmem:[%s4514_s1 + $0x540] ss:$8 sps:$4 sm:$0xff]   ;;  %v3122_v25 = vld [vmem:[%s4514_s1 + $0x554] ss:$8 sps:$4 sm:$0xff]  }
  0x1f   :  { %1988 = vmatpush1.bf16.msra.mxu1 %v3031_v30  ;;  %v3117_v26 = vld [vmem:[%s4514_s1 + $0x150] ss:$8 sps:$4 sm:$0xff]   ;;  %v3171_v28 = vld [vmem:[%s4515_s0 + $0x94] ss:$72 sps:$4 sm:$0xff]   ;;  %v3125_v29 = vld [vmem:[%s4514_s1 + $0x164] ss:$8 sps:$4 sm:$0xff]  }
  0x20   :  { %2200 = vmatpush1.bf16.msra.mxu0 %v3032_v31  ;;  %1989 = vmatprep.subr.bf16.mxu1 %v3033_v32  ;;  %v3120_v27 = vld [vmem:[%s4514_s1 + $0x550] ss:$8 sps:$4 sm:$0xff]   ;;  %v3128_v30 = vld [vmem:[%s4514_s1 + $0x564] ss:$8 sps:$4 sm:$0xff]   ;;  %v3176_v31 = vld [vmem:[%s4515_s0 + $0xb4] ss:$72 sps:$4 sm:$0xff]  }
  0x21   :  { %2201 = vmatprep.subr.bf16.mxu0 %v3035_v33  ;;  %v3123_v32 = vld [vmem:[%s4514_s1 + $0x160] ss:$8 sps:$4 sm:$0xff]   ;;  %v3141_v48 = vld [vmem:[%s4514_s1 + $0x190] ss:$8 sps:$4 sm:$0xff]   ;;  %v3152_v51 = vld [vmem:[%s4514_s1 + $0x5a4] ss:$8 sps:$4 sm:$0xff]  }
  0x22   :  { %v3126_v33 = vld [vmem:[%s4514_s1 + $0x560] ss:$8 sps:$4 sm:$0xff]  }
  0x23   :  { %1990 = vmatpush1.bf16.msra.mxu1 %v3037_v34  ;;  %v3181_v34 = vld [vmem:[%s4515_s0 + $0x90] ss:$72 sps:$4 sm:$0xff]  }
  0x24   :  { %2202 = vmatpush1.bf16.msra.mxu0 %v3038_v35  ;;  %1991 = vmatprep.subr.bf16.mxu1 %v3039_v36  ;;  %v3182_v35 = vld [vmem:[%s4515_s0 + $0xb0] ss:$72 sps:$4 sm:$0xff]   ;;  %v3131_v36 = vld [vmem:[%s4514_s1 + $0x174] ss:$8 sps:$4 sm:$0xff]  }
  0x25   :  { %2203 = vmatprep.subr.bf16.mxu0 %v3041_v37  ;;  %v3134_v37 = vld [vmem:[%s4514_s1 + $0x574] ss:$8 sps:$4 sm:$0xff]  }
  0x27   :  { %1992 = vmatpush1.bf16.msra.mxu1 %v3043_v38  ;;  %v3129_v38 = vld [vmem:[%s4514_s1 + $0x170] ss:$8 sps:$4 sm:$0xff]  }
  0x28   :  { %2204 = vmatpush1.bf16.msra.mxu0 %v3044_v39  ;;  %1993 = vmatprep.subr.bf16.mxu1 %v3045_v40  ;;  %v3132_v39 = vld [vmem:[%s4514_s1 + $0x570] ss:$8 sps:$4 sm:$0xff]   ;;  %v3191_v40 = vld [vmem:[%s4515_s0 + $0xc] ss:$72 sps:$4 sm:$0xff]  }
  0x29   :  { %2205 = vmatprep.subr.bf16.mxu0 %v3047_v41  ;;  %v3137_v41 = vld [vmem:[%s4514_s1 + $0x184] ss:$8 sps:$4 sm:$0xff]  }
  0x2b   :  { %1994 = vmatpush1.bf16.msra.mxu1 %v3049_v42  ;;  %v3140_v42 = vld [vmem:[%s4514_s1 + $0x584] ss:$8 sps:$4 sm:$0xff]  }
  0x2c   :  { %2206 = vmatpush1.bf16.msra.mxu0 %v3050_v43  ;;  %1995 = vmatprep.subr.bf16.mxu1 %v3051_v44  ;;  %v3197_v43 = vld [vmem:[%s4515_s0 + $0x2c] ss:$72 sps:$4 sm:$0xff]   ;;  %v3135_v44 = vld [vmem:[%s4514_s1 + $0x180] ss:$8 sps:$4 sm:$0xff]  }
  0x2d   :  { %2207 = vmatprep.subr.bf16.mxu0 %v3053_v45  ;;  %v3138_v45 = vld [vmem:[%s4514_s1 + $0x580] ss:$8 sps:$4 sm:$0xff]  }
  0x2f   :  { %1996 = vmatpush1.bf16.msra.mxu1 %v3055_v46  ;;  %v3143_v46 = vld [vmem:[%s4514_s1 + $0x194] ss:$8 sps:$4 sm:$0xff]  }
  0x30   :  { %2208 = vmatpush1.bf16.msra.mxu0 %v3056_v47  ;;  %1997 = vmatprep.subr.bf16.mxu1 %v3057_v49  ;;  %v3146_v47 = vld [vmem:[%s4514_s1 + $0x594] ss:$8 sps:$4 sm:$0xff]   ;;  %v3144_v49 = vld [vmem:[%s4514_s1 + $0x590] ss:$8 sps:$4 sm:$0xff]  }
  0x31   :  { %2209 = vmatprep.subr.bf16.mxu0 %v3059_v50  ;;  %v3149_v50 = vld [vmem:[%s4514_s1 + $0x1a4] ss:$8 sps:$4 sm:$0xff]  }
  0x33   :  { %1998 = vmatpush1.bf16.msra.mxu1 %v3061_v52  ;;  %v3147_v52 = vld [vmem:[%s4514_s1 + $0x1a0] ss:$8 sps:$4 sm:$0xff]  }
  0x34   :  { %2210 = vmatpush1.bf16.msra.mxu0 %v3062_v53  ;;  %1999 = vmatprep.subr.bf16.mxu1 %v3063_v54  ;;  %v3150_v53 = vld [vmem:[%s4514_s1 + $0x5a0] ss:$8 sps:$4 sm:$0xff]   ;;  %v3155_v54 = vld [vmem:[%s4514_s1 + $0x1b4] ss:$8 sps:$4 sm:$0xff]  }
  0x35   :  { %2211 = vmatprep.subr.bf16.mxu0 %v3065_v55  ;;  %v3158_v55 = vld [vmem:[%s4514_s1 + $0x5b4] ss:$8 sps:$4 sm:$0xff]  }
  0x37   :  { %2000 = vmatpush1.bf16.msra.mxu1 %v3067_v56  ;;  %v3153_v56 = vld [vmem:[%s4514_s1 + $0x1b0] ss:$8 sps:$4 sm:$0xff]  }
  0x38   :  { %2212 = vmatpush1.bf16.msra.mxu0 %v3068_v57  ;;  %2001 = vmatprep.subr.bf16.mxu1 %v3069_v58  ;;  %v3156_v57 = vld [vmem:[%s4514_s1 + $0x5b0] ss:$8 sps:$4 sm:$0xff]   ;;  %v3161_v58 = vld [vmem:[%s4514_s1 + $0x1c4] ss:$8 sps:$4 sm:$0xff]  }
  0x39   :  { %2213 = vmatprep.subr.bf16.mxu0 %v3071_v59  ;;  %v3164_v59 = vld [vmem:[%s4514_s1 + $0x5c4] ss:$8 sps:$4 sm:$0xff]  }
  0x3b   :  { %2002 = vmatpush1.bf16.msra.mxu1 %v3073_v60  ;;  %v3159_v60 = vld [vmem:[%s4514_s1 + $0x1c0] ss:$8 sps:$4 sm:$0xff]  }
  0x3c   :  { %2214 = vmatpush1.bf16.msra.mxu0 %v3074_v61  ;;  %2003 = vmatprep.subr.bf16.mxu1 %v3075_v62  ;;  %v3162_v61 = vld [vmem:[%s4514_s1 + $0x5c0] ss:$8 sps:$4 sm:$0xff]   ;;  %v3167_v62 = vld [vmem:[%s4514_s1 + $0x1d4] ss:$8 sps:$4 sm:$0xff]  }
  0x3d   :  { %2215 = vmatprep.subr.bf16.mxu0 %v3077_v63  ;;  %v3170_v63 = vld [vmem:[%s4514_s1 + $0x5d4] ss:$8 sps:$4 sm:$0xff]  }
  0x3f   :  { %2004 = vmatpush1.bf16.msra.mxu1 %v3079_v0  ;;  %v3165_v0 = vld [vmem:[%s4514_s1 + $0x1d0] ss:$8 sps:$4 sm:$0xff]  }
  0x40   :  { %2216 = vmatpush1.bf16.msra.mxu0 %v3080_v1  ;;  %2026 = vmatprep.subr.bf16.mxu1 %v3086_v2  ;;  %v3168_v1 = vld [vmem:[%s4514_s1 + $0x5d0] ss:$8 sps:$4 sm:$0xff]   ;;  %v3175_v2 = vld [vmem:[%s4514_s1 + $0x1e4] ss:$8 sps:$4 sm:$0xff]  }
  0x41   :  { %2238 = vmatprep.subr.bf16.mxu0 %v3092_v3  ;;  %v3180_v3 = vld [vmem:[%s4514_s1 + $0x5e4] ss:$8 sps:$4 sm:$0xff]  }
  0x42   :  { %2006 = vmatmul.mubr.bf16.vlgmr.msra.gmra.mrb[0].mxu1 %v3081_v4  ;;  %v3173_v4 = vld [vmem:[%s4514_s1 + $0x1e0] ss:$8 sps:$4 sm:$0xff]  }
  0x43   :  { %2218 = vmatmul.mubr.bf16.vlgmr.msra.gmra.mrb[0].mxu0 %v3087_v6  ;;  %2027 = vmatpush1.bf16.msra.mxu1 %v3084_v5  ;;  %v3178_v5 = vld [vmem:[%s4514_s1 + $0x5e0] ss:$8 sps:$4 sm:$0xff]   ;;  %v3185_v6 = vld [vmem:[%s4514_s1 + $0x1f4] ss:$8 sps:$4 sm:$0xff]  }
  0x44   :  { %2239 = vmatpush1.bf16.msra.mxu0 %v3090_v7  ;;  %2028 = vmatprep.subr.bf16.mxu1 %v3095_v8  ;;  %v3188_v7 = vld [vmem:[%s4514_s1 + $0x5f4] ss:$8 sps:$4 sm:$0xff]   ;;  %v3183_v8 = vld [vmem:[%s4514_s1 + $0x1f0] ss:$8 sps:$4 sm:$0xff]  }
  0x45   :  { %2240 = vmatprep.subr.bf16.mxu0 %v3098_v9  ;;  %2015 = vmatprep.mubr.bf16.mxu1 %v3171_v28  ;;  %v3186_v9 = vld [vmem:[%s4514_s1 + $0x5f0] ss:$8 sps:$4 sm:$0xff]   ;;  %v3215_v28 = vld [vmem:[%s4514_s1 + $0x234] ss:$8 sps:$4 sm:$0xff]  }
  0x46   :  { %2227 = vmatprep.mubr.bf16.mxu0 %v3176_v31  ;;  %v3216_v31 = vld [vmem:[%s4514_s1 + $0x630] ss:$8 sps:$4 sm:$0xff]  }
  0x47   :  { %2029 = vmatpush1.bf16.msra.mxu1 %v3093_v10  ;;  %v3194_v10 = vld [vmem:[%s4514_s1 + $0x204] ss:$8 sps:$4 sm:$0xff]  }
  0x48   :  { %2241 = vmatpush1.bf16.msra.mxu0 %v3096_v11  ;;  %2030 = vmatprep.subr.bf16.mxu1 %v3101_v12  ;;  %v3200_v11 = vld [vmem:[%s4514_s1 + $0x604] ss:$8 sps:$4 sm:$0xff]   ;;  %v3189_v12 = vld [vmem:[%s4515_s0 + $0x8] ss:$72 sps:$4 sm:$0xff]  }
  0x49   :  { %2242 = vmatprep.subr.bf16.mxu0 %v3104_v13  ;;  %v3192_v13 = vld [vmem:[%s4514_s1 + $0x200] ss:$8 sps:$4 sm:$0xff]  }
  0x4a   :  { %2016 = vmatmul.mubr.bf16.gmra.mrb[4].mxu1 %v3181_v34  ;;  %v3224_v34 = vld [vmem:[%s4514_s1 + $0x644] ss:$8 sps:$4 sm:$0xff]  }
  0x4b   :  { %2031 = vmatpush1.bf16.msra.mxu1 %v3099_v14  ;;  %2228 = vmatmul.mubr.bf16.gmra.mrb[4].mxu0 %v3182_v35  ;;  %v3195_v14 = vld [vmem:[%s4515_s0 + $0x28] ss:$72 sps:$4 sm:$0xff]   ;;  %v3305_v35 = vld [vmem:[%s4515_s0 + $0x34] ss:$72 sps:$4 sm:$0xff]  }
  0x4c   :  { %2243 = vmatpush1.bf16.msra.mxu0 %v3102_v15  ;;  %2032 = vmatprep.subr.bf16.mxu1 %v3107_v16  ;;  %v3198_v15 = vld [vmem:[%s4514_s1 + $0x600] ss:$8 sps:$4 sm:$0xff]   ;;  %v3203_v16 = vld [vmem:[%s4514_s1 + $0x214] ss:$8 sps:$4 sm:$0xff]  }
  0x4d   :  { %2244 = vmatprep.subr.bf16.mxu0 %v3110_v17  ;;  %2058 = vmatprep.mubr.bf16.mxu1 %v3191_v40  ;;  %v3206_v17 = vld [vmem:[%s4514_s1 + $0x614] ss:$8 sps:$4 sm:$0xff]   ;;  %v3225_v40 = vld [vmem:[%s4514_s1 + $0x250] ss:$8 sps:$4 sm:$0xff]  }
  0x4e   :  { %2270 = vmatprep.mubr.bf16.mxu0 %v3197_v43  ;;  %v3236_v43 = vld [vmem:[%s4514_s1 + $0x664] ss:$8 sps:$4 sm:$0xff]  }
  0x4f   :  { %2033 = vmatpush1.bf16.msra.mxu1 %v3105_v18  ;;  %v3201_v18 = vld [vmem:[%s4514_s1 + $0x210] ss:$8 sps:$4 sm:$0xff]  }
  0x50   :  { %2245 = vmatpush1.bf16.msra.mxu0 %v3108_v19  ;;  %2034 = vmatprep.subr.bf16.mxu1 %v3113_v20  ;;  %v3204_v19 = vld [vmem:[%s4514_s1 + $0x610] ss:$8 sps:$4 sm:$0xff]   ;;  %v3279_v20 = vld [vmem:[%s4515_s0 + $0x9c] ss:$72 sps:$4 sm:$0xff]  }
  0x51   :  { %2246 = vmatprep.subr.bf16.mxu0 %v3116_v21  ;;  %v3209_v21 = vld [vmem:[%s4514_s1 + $0x224] ss:$8 sps:$4 sm:$0xff]  }
  0x53   :  { %2035 = vmatpush1.bf16.msra.mxu1 %v3111_v22  ;;  %v3212_v22 = vld [vmem:[%s4514_s1 + $0x624] ss:$8 sps:$4 sm:$0xff]  }
  0x54   :  { %2247 = vmatpush1.bf16.msra.mxu0 %v3114_v23  ;;  %2036 = vmatprep.subr.bf16.mxu1 %v3119_v24  ;;  %v3284_v23 = vld [vmem:[%s4515_s0 + $0xbc] ss:$72 sps:$4 sm:$0xff]   ;;  %v3207_v24 = vld [vmem:[%s4514_s1 + $0x220] ss:$8 sps:$4 sm:$0xff]  }
  0x55   :  { %2248 = vmatprep.subr.bf16.mxu0 %v3122_v25  ;;  %v3210_v25 = vld [vmem:[%s4514_s1 + $0x620] ss:$8 sps:$4 sm:$0xff]  }
  0x57   :  { %2037 = vmatpush1.bf16.msra.mxu1 %v3117_v26  ;;  %v3289_v26 = vld [vmem:[%s4515_s0 + $0x98] ss:$72 sps:$4 sm:$0xff]  }
  0x58   :  { %2249 = vmatpush1.bf16.msra.mxu0 %v3120_v27  ;;  %2038 = vmatprep.subr.bf16.mxu1 %v3125_v29  ;;  %v3290_v27 = vld [vmem:[%s4515_s0 + $0xb8] ss:$72 sps:$4 sm:$0xff]   ;;  %v3218_v29 = vld [vmem:[%s4514_s1 + $0x634] ss:$8 sps:$4 sm:$0xff]  }
  0x59   :  { %2250 = vmatprep.subr.bf16.mxu0 %v3128_v30  ;;  %v3213_v30 = vld [vmem:[%s4514_s1 + $0x230] ss:$8 sps:$4 sm:$0xff]  }
  0x5b   :  { %2039 = vmatpush1.bf16.msra.mxu1 %v3123_v32  ;;  %v3299_v32 = vld [vmem:[%s4515_s0 + $0x14] ss:$72 sps:$4 sm:$0xff]  }
  0x5c   :  { %2251 = vmatpush1.bf16.msra.mxu0 %v3126_v33  ;;  %2040 = vmatprep.subr.bf16.mxu1 %v3131_v36  ;;  %v3221_v33 = vld [vmem:[%s4514_s1 + $0x244] ss:$8 sps:$4 sm:$0xff]   ;;  %v3219_v36 = vld [vmem:[%s4514_s1 + $0x240] ss:$8 sps:$4 sm:$0xff]  }
  0x5d   :  { %2252 = vmatprep.subr.bf16.mxu0 %v3134_v37  ;;  %v3222_v37 = vld [vmem:[%s4514_s1 + $0x640] ss:$8 sps:$4 sm:$0xff]  }
  0x5f   :  { %2041 = vmatpush1.bf16.msra.mxu1 %v3129_v38  ;;  %v3227_v38 = vld [vmem:[%s4514_s1 + $0x254] ss:$8 sps:$4 sm:$0xff]  }
  0x60   :  { %2253 = vmatpush1.bf16.msra.mxu0 %v3132_v39  ;;  %2042 = vmatprep.subr.bf16.mxu1 %v3137_v41  ;;  %v3230_v39 = vld [vmem:[%s4514_s1 + $0x654] ss:$8 sps:$4 sm:$0xff]   ;;  %v3228_v41 = vld [vmem:[%s4514_s1 + $0x650] ss:$8 sps:$4 sm:$0xff]  }
  0x61   :  { %2254 = vmatprep.subr.bf16.mxu0 %v3140_v42  ;;  %v3233_v42 = vld [vmem:[%s4514_s1 + $0x264] ss:$8 sps:$4 sm:$0xff]  }
  0x63   :  { %2043 = vmatpush1.bf16.msra.mxu1 %v3135_v44  ;;  %v3231_v44 = vld [vmem:[%s4514_s1 + $0x260] ss:$8 sps:$4 sm:$0xff]  }
  0x64   :  { %2255 = vmatpush1.bf16.msra.mxu0 %v3138_v45  ;;  %2044 = vmatprep.subr.bf16.mxu1 %v3143_v46  ;;  %v3234_v45 = vld [vmem:[%s4514_s1 + $0x660] ss:$8 sps:$4 sm:$0xff]   ;;  %v3239_v46 = vld [vmem:[%s4514_s1 + $0x274] ss:$8 sps:$4 sm:$0xff]  }
  0x65   :  { %2256 = vmatprep.subr.bf16.mxu0 %v3146_v47  ;;  %v3242_v47 = vld [vmem:[%s4514_s1 + $0x674] ss:$8 sps:$4 sm:$0xff]  }
  0x67   :  { %2045 = vmatpush1.bf16.msra.mxu1 %v3141_v48  ;;  %v3237_v48 = vld [vmem:[%s4514_s1 + $0x270] ss:$8 sps:$4 sm:$0xff]  }
  0x68   :  { %2257 = vmatpush1.bf16.msra.mxu0 %v3144_v49  ;;  %2046 = vmatprep.subr.bf16.mxu1 %v3149_v50  ;;  %v3240_v49 = vld [vmem:[%s4514_s1 + $0x670] ss:$8 sps:$4 sm:$0xff]   ;;  %v3245_v50 = vld [vmem:[%s4514_s1 + $0x284] ss:$8 sps:$4 sm:$0xff]  }
  0x69   :  { %2258 = vmatprep.subr.bf16.mxu0 %v3152_v51  ;;  %v3248_v51 = vld [vmem:[%s4514_s1 + $0x684] ss:$8 sps:$4 sm:$0xff]  }
  0x6b   :  { %2047 = vmatpush1.bf16.msra.mxu1 %v3147_v52  ;;  %v3243_v52 = vld [vmem:[%s4514_s1 + $0x280] ss:$8 sps:$4 sm:$0xff]  }
  0x6c   :  { %2259 = vmatpush1.bf16.msra.mxu0 %v3150_v53  ;;  %2048 = vmatprep.subr.bf16.mxu1 %v3155_v54  ;;  %v3246_v53 = vld [vmem:[%s4514_s1 + $0x680] ss:$8 sps:$4 sm:$0xff]   ;;  %v3251_v54 = vld [vmem:[%s4514_s1 + $0x294] ss:$8 sps:$4 sm:$0xff]  }
  0x6d   :  { %2260 = vmatprep.subr.bf16.mxu0 %v3158_v55  ;;  %v3254_v55 = vld [vmem:[%s4514_s1 + $0x694] ss:$8 sps:$4 sm:$0xff]  }
  0x6f   :  { %2049 = vmatpush1.bf16.msra.mxu1 %v3153_v56  ;;  %v3249_v56 = vld [vmem:[%s4514_s1 + $0x290] ss:$8 sps:$4 sm:$0xff]  }
  0x70   :  { %2261 = vmatpush1.bf16.msra.mxu0 %v3156_v57  ;;  %2050 = vmatprep.subr.bf16.mxu1 %v3161_v58  ;;  %v3252_v57 = vld [vmem:[%s4514_s1 + $0x690] ss:$8 sps:$4 sm:$0xff]   ;;  %v3257_v58 = vld [vmem:[%s4514_s1 + $0x2a4] ss:$8 sps:$4 sm:$0xff]  }
  0x71   :  { %2262 = vmatprep.subr.bf16.mxu0 %v3164_v59  ;;  %v3260_v59 = vld [vmem:[%s4514_s1 + $0x6a4] ss:$8 sps:$4 sm:$0xff]  }
  0x73   :  { %2051 = vmatpush1.bf16.msra.mxu1 %v3159_v60  ;;  %v3255_v60 = vld [vmem:[%s4514_s1 + $0x2a0] ss:$8 sps:$4 sm:$0xff]  }
  0x74   :  { %2263 = vmatpush1.bf16.msra.mxu0 %v3162_v61  ;;  %2052 = vmatprep.subr.bf16.mxu1 %v3167_v62  ;;  %v3258_v61 = vld [vmem:[%s4514_s1 + $0x6a0] ss:$8 sps:$4 sm:$0xff]   ;;  %v3263_v62 = vld [vmem:[%s4514_s1 + $0x2b4] ss:$8 sps:$4 sm:$0xff]  }
  0x75   :  { %2264 = vmatprep.subr.bf16.mxu0 %v3170_v63  ;;  %v3266_v63 = vld [vmem:[%s4514_s1 + $0x6b4] ss:$8 sps:$4 sm:$0xff]  }
  0x77   :  { %2053 = vmatpush1.bf16.msra.mxu1 %v3165_v0  ;;  %v3261_v0 = vld [vmem:[%s4514_s1 + $0x2b0] ss:$8 sps:$4 sm:$0xff]  }
  0x78   :  { %2265 = vmatpush1.bf16.msra.mxu0 %v3168_v1  ;;  %2054 = vmatprep.subr.bf16.mxu1 %v3175_v2  ;;  %v3264_v1 = vld [vmem:[%s4514_s1 + $0x6b0] ss:$8 sps:$4 sm:$0xff]   ;;  %v3269_v2 = vld [vmem:[%s4514_s1 + $0x2c4] ss:$8 sps:$4 sm:$0xff]  }
  0x79   :  { %2266 = vmatprep.subr.bf16.mxu0 %v3180_v3  ;;  %v3272_v3 = vld [vmem:[%s4514_s1 + $0x6c4] ss:$8 sps:$4 sm:$0xff]  }
  0x7b   :  { %2055 = vmatpush1.bf16.msra.mxu1 %v3173_v4  ;;  %v3267_v4 = vld [vmem:[%s4514_s1 + $0x2c0] ss:$8 sps:$4 sm:$0xff]  }
  0x7c   :  { %2267 = vmatpush1.bf16.msra.mxu0 %v3178_v5  ;;  %2056 = vmatprep.subr.bf16.mxu1 %v3185_v6  ;;  %v3270_v5 = vld [vmem:[%s4514_s1 + $0x6c0] ss:$8 sps:$4 sm:$0xff]   ;;  %v3275_v6 = vld [vmem:[%s4514_s1 + $0x2d4] ss:$8 sps:$4 sm:$0xff]  }
  0x7d   :  { %2268 = vmatprep.subr.bf16.mxu0 %v3188_v7  ;;  %v3278_v7 = vld [vmem:[%s4514_s1 + $0x6d4] ss:$8 sps:$4 sm:$0xff]  }
  0x7f   :  { %2057 = vmatpush1.bf16.msra.mxu1 %v3183_v8  ;;  %v3273_v8 = vld [vmem:[%s4514_s1 + $0x2d0] ss:$8 sps:$4 sm:$0xff]  }
  0x80   :  { %2269 = vmatpush1.bf16.msra.mxu0 %v3186_v9  ;;  %2079 = vmatprep.subr.bf16.mxu1 %v3194_v10  ;;  %v3276_v9 = vld [vmem:[%s4514_s1 + $0x6d0] ss:$8 sps:$4 sm:$0xff]   ;;  %v3283_v10 = vld [vmem:[%s4514_s1 + $0x2e4] ss:$8 sps:$4 sm:$0xff]  }
  0x81   :  { %2291 = vmatprep.subr.bf16.mxu0 %v3200_v11  ;;  %v3288_v11 = vld [vmem:[%s4514_s1 + $0x6e4] ss:$8 sps:$4 sm:$0xff]  }
  0x82   :  { %2059 = vmatmul.mubr.bf16.vlgmr.msra.gmra.mrb[0].mxu1 %v3189_v12  ;;  %v3281_v12 = vld [vmem:[%s4514_s1 + $0x2e0] ss:$8 sps:$4 sm:$0xff]  }
  0x83   :  { %2271 = vmatmul.mubr.bf16.vlgmr.msra.gmra.mrb[0].mxu0 %v3195_v14  ;;  %2080 = vmatpush1.bf16.msra.mxu1 %v3192_v13  ;;  %v3286_v13 = vld [vmem:[%s4514_s1 + $0x6e0] ss:$8 sps:$4 sm:$0xff]   ;;  %v3293_v14 = vld [vmem:[%s4514_s1 + $0x2f4] ss:$8 sps:$4 sm:$0xff]  }
  0x84   :  { %2292 = vmatpush1.bf16.msra.mxu0 %v3198_v15  ;;  %2081 = vmatprep.subr.bf16.mxu1 %v3203_v16  ;;  %v3296_v15 = vld [vmem:[%s4514_s1 + $0x6f4] ss:$8 sps:$4 sm:$0xff]   ;;  %v3291_v16 = vld [vmem:[%s4514_s1 + $0x2f0] ss:$8 sps:$4 sm:$0xff]  }
  0x85   :  { %2293 = vmatprep.subr.bf16.mxu0 %v3206_v17  ;;  %2068 = vmatprep.mubr.bf16.mxu1 %v3279_v20  ;;  %v3294_v17 = vld [vmem:[%s4514_s1 + $0x6f0] ss:$8 sps:$4 sm:$0xff]  }
  0x86   :  { %2280 = vmatprep.mubr.bf16.mxu0 %v3284_v23  ;;  %v3297_v20 = vld [vmem:[%s4515_s0 + $0x10] ss:$72 sps:$4 sm:$0xff]   ;;  %v3306_v23 = vld [vmem:[%s4514_s1 + $0x700] ss:$8 sps:$4 sm:$0xff]  }
  0x87   :  { %2082 = vmatpush1.bf16.msra.mxu1 %v3201_v18  ;;  %v3302_v18 = vld [vmem:[%s4514_s1 + $0x304] ss:$8 sps:$4 sm:$0xff]  }
  0x88   :  { %2294 = vmatpush1.bf16.msra.mxu0 %v3204_v19  ;;  %2083 = vmatprep.subr.bf16.mxu1 %v3209_v21  ;;  %v3308_v19 = vld [vmem:[%s4514_s1 + $0x704] ss:$8 sps:$4 sm:$0xff]   ;;  %v3300_v21 = vld [vmem:[%s4514_s1 + $0x300] ss:$8 sps:$4 sm:$0xff]  }
  0x89   :  { %2295 = vmatprep.subr.bf16.mxu0 %v3212_v22  ;;  %v3303_v22 = vld [vmem:[%s4515_s0 + $0x30] ss:$72 sps:$4 sm:$0xff]  }
  0x8a   :  { %2069 = vmatmul.mubr.bf16.gmra.mrb[4].mxu1 %v3289_v26  ;;  %v3387_v26 = vld [vmem:[%s4515_s0 + $0xa4] ss:$72 sps:$4 sm:$0xff]  }
  0x8b   :  { %2281 = vmatmul.mubr.bf16.gmra.mrb[4].mxu0 %v3290_v27  ;;  %2084 = vmatpush1.bf16.msra.mxu1 %v3207_v24  ;;  %v3311_v24 = vld [vmem:[%s4514_s1 + $0x314] ss:$8 sps:$4 sm:$0xff]   ;;  %v3389_v27 = vld [vmem:[%s4515_s0 + $0xc4] ss:$72 sps:$4 sm:$0xff]  }
  0x8c   :  { %2296 = vmatpush1.bf16.msra.mxu0 %v3210_v25  ;;  %2085 = vmatprep.subr.bf16.mxu1 %v3215_v28  ;;  %v3314_v25 = vld [vmem:[%s4514_s1 + $0x714] ss:$8 sps:$4 sm:$0xff]   ;;  %v3309_v28 = vld [vmem:[%s4514_s1 + $0x310] ss:$8 sps:$4 sm:$0xff]  }
  0x8d   :  { %2297 = vmatprep.subr.bf16.mxu0 %v3218_v29  ;;  %2111 = vmatprep.mubr.bf16.mxu1 %v3299_v32  ;;  %v3312_v29 = vld [vmem:[%s4514_s1 + $0x710] ss:$8 sps:$4 sm:$0xff]   ;;  %v3315_v32 = vld [vmem:[%s4514_s1 + $0x320] ss:$8 sps:$4 sm:$0xff]  }
  0x8e   :  { %2323 = vmatprep.mubr.bf16.mxu0 %v3305_v35  ;;  %v3395_v35 = vld [vmem:[%s4515_s0 + $0xc0] ss:$72 sps:$4 sm:$0xff]  }
  0x8f   :  { %2086 = vmatpush1.bf16.msra.mxu1 %v3213_v30  ;;  %v3317_v30 = vld [vmem:[%s4514_s1 + $0x324] ss:$8 sps:$4 sm:$0xff]  }
  0x90   :  { %2298 = vmatpush1.bf16.msra.mxu0 %v3216_v31  ;;  %2087 = vmatprep.subr.bf16.mxu1 %v3221_v33  ;;  %v3320_v31 = vld [vmem:[%s4514_s1 + $0x724] ss:$8 sps:$4 sm:$0xff]   ;;  %v3318_v33 = vld [vmem:[%s4514_s1 + $0x720] ss:$8 sps:$4 sm:$0xff]  }
  0x91   :  { %2299 = vmatprep.subr.bf16.mxu0 %v3224_v34  ;;  %v3391_v34 = vld [vmem:[%s4515_s0 + $0xa0] ss:$72 sps:$4 sm:$0xff]  }
  0x93   :  { %2088 = vmatpush1.bf16.msra.mxu1 %v3219_v36  ;;  %v3323_v36 = vld [vmem:[%s4514_s1 + $0x334] ss:$8 sps:$4 sm:$0xff]  }
  0x94   :  { %2300 = vmatpush1.bf16.msra.mxu0 %v3222_v37  ;;  %2089 = vmatprep.subr.bf16.mxu1 %v3227_v38  ;;  %v3326_v37 = vld [vmem:[%s4514_s1 + $0x734] ss:$8 sps:$4 sm:$0xff]  }
  0x95   :  { %2301 = vmatprep.subr.bf16.mxu0 %v3230_v39  ;;  %v3407_v38 = vld [vmem:[%s4515_s0 + $0x1c] ss:$72 sps:$4 sm:$0xff]  }
  0x96   :  { %v3410_v39 = vld [vmem:[%s4515_s0 + $0x3c] ss:$72 sps:$4 sm:$0xff]  }
  0x97   :  { %2090 = vmatpush1.bf16.msra.mxu1 %v3225_v40  ;;  %v3321_v40 = vld [vmem:[%s4514_s1 + $0x330] ss:$8 sps:$4 sm:$0xff]  }
  0x98   :  { %2302 = vmatpush1.bf16.msra.mxu0 %v3228_v41  ;;  %2091 = vmatprep.subr.bf16.mxu1 %v3233_v42  ;;  %v3324_v41 = vld [vmem:[%s4514_s1 + $0x730] ss:$8 sps:$4 sm:$0xff]   ;;  %v3329_v42 = vld [vmem:[%s4514_s1 + $0x344] ss:$8 sps:$4 sm:$0xff]  }
  0x99   :  { %2303 = vmatprep.subr.bf16.mxu0 %v3236_v43  ;;  %v3332_v43 = vld [vmem:[%s4514_s1 + $0x744] ss:$8 sps:$4 sm:$0xff]  }
  0x9b   :  { %2092 = vmatpush1.bf16.msra.mxu1 %v3231_v44  ;;  %v3327_v44 = vld [vmem:[%s4514_s1 + $0x340] ss:$8 sps:$4 sm:$0xff]  }
  0x9c   :  { %2304 = vmatpush1.bf16.msra.mxu0 %v3234_v45  ;;  %2093 = vmatprep.subr.bf16.mxu1 %v3239_v46  ;;  %v3330_v45 = vld [vmem:[%s4514_s1 + $0x740] ss:$8 sps:$4 sm:$0xff]   ;;  %v3335_v46 = vld [vmem:[%s4514_s1 + $0x354] ss:$8 sps:$4 sm:$0xff]  }
  0x9d   :  { %2305 = vmatprep.subr.bf16.mxu0 %v3242_v47  ;;  %v3338_v47 = vld [vmem:[%s4514_s1 + $0x754] ss:$8 sps:$4 sm:$0xff]  }
  0x9f   :  { %2094 = vmatpush1.bf16.msra.mxu1 %v3237_v48  ;;  %v3333_v48 = vld [vmem:[%s4514_s1 + $0x350] ss:$8 sps:$4 sm:$0xff]  }
  0xa0   :  { %2306 = vmatpush1.bf16.msra.mxu0 %v3240_v49  ;;  %2095 = vmatprep.subr.bf16.mxu1 %v3245_v50  ;;  %v3336_v49 = vld [vmem:[%s4514_s1 + $0x750] ss:$8 sps:$4 sm:$0xff]   ;;  %v3341_v50 = vld [vmem:[%s4514_s1 + $0x364] ss:$8 sps:$4 sm:$0xff]  }
  0xa1   :  { %2307 = vmatprep.subr.bf16.mxu0 %v3248_v51  ;;  %v3344_v51 = vld [vmem:[%s4514_s1 + $0x764] ss:$8 sps:$4 sm:$0xff]  }
  0xa3   :  { %2096 = vmatpush1.bf16.msra.mxu1 %v3243_v52  ;;  %v3339_v52 = vld [vmem:[%s4514_s1 + $0x360] ss:$8 sps:$4 sm:$0xff]  }
  0xa4   :  { %2308 = vmatpush1.bf16.msra.mxu0 %v3246_v53  ;;  %2097 = vmatprep.subr.bf16.mxu1 %v3251_v54  ;;  %v3342_v53 = vld [vmem:[%s4514_s1 + $0x760] ss:$8 sps:$4 sm:$0xff]   ;;  %v3347_v54 = vld [vmem:[%s4514_s1 + $0x374] ss:$8 sps:$4 sm:$0xff]  }
  0xa5   :  { %2309 = vmatprep.subr.bf16.mxu0 %v3254_v55  ;;  %v3350_v55 = vld [vmem:[%s4514_s1 + $0x774] ss:$8 sps:$4 sm:$0xff]  }
  0xa7   :  { %2098 = vmatpush1.bf16.msra.mxu1 %v3249_v56  ;;  %v3345_v56 = vld [vmem:[%s4514_s1 + $0x370] ss:$8 sps:$4 sm:$0xff]  }
  0xa8   :  { %2310 = vmatpush1.bf16.msra.mxu0 %v3252_v57  ;;  %2099 = vmatprep.subr.bf16.mxu1 %v3257_v58  ;;  %v3348_v57 = vld [vmem:[%s4514_s1 + $0x770] ss:$8 sps:$4 sm:$0xff]   ;;  %v3353_v58 = vld [vmem:[%s4514_s1 + $0x384] ss:$8 sps:$4 sm:$0xff]  }
  0xa9   :  { %2311 = vmatprep.subr.bf16.mxu0 %v3260_v59  ;;  %v3356_v59 = vld [vmem:[%s4514_s1 + $0x784] ss:$8 sps:$4 sm:$0xff]  }
  0xab   :  { %2100 = vmatpush1.bf16.msra.mxu1 %v3255_v60  ;;  %v3351_v60 = vld [vmem:[%s4514_s1 + $0x380] ss:$8 sps:$4 sm:$0xff]  }
  0xac   :  { %2312 = vmatpush1.bf16.msra.mxu0 %v3258_v61  ;;  %2101 = vmatprep.subr.bf16.mxu1 %v3263_v62  ;;  %v3354_v61 = vld [vmem:[%s4514_s1 + $0x780] ss:$8 sps:$4 sm:$0xff]   ;;  %v3359_v62 = vld [vmem:[%s4514_s1 + $0x394] ss:$8 sps:$4 sm:$0xff]  }
  0xad   :  { %2313 = vmatprep.subr.bf16.mxu0 %v3266_v63  ;;  %v3362_v63 = vld [vmem:[%s4514_s1 + $0x794] ss:$8 sps:$4 sm:$0xff]  }
  0xaf   :  { %2102 = vmatpush1.bf16.msra.mxu1 %v3261_v0  ;;  %v3357_v0 = vld [vmem:[%s4514_s1 + $0x390] ss:$8 sps:$4 sm:$0xff]  }
  0xb0   :  { %2314 = vmatpush1.bf16.msra.mxu0 %v3264_v1  ;;  %2103 = vmatprep.subr.bf16.mxu1 %v3269_v2  ;;  %v3360_v1 = vld [vmem:[%s4514_s1 + $0x790] ss:$8 sps:$4 sm:$0xff]   ;;  %v3365_v2 = vld [vmem:[%s4514_s1 + $0x3a4] ss:$8 sps:$4 sm:$0xff]  }
  0xb1   :  { %2315 = vmatprep.subr.bf16.mxu0 %v3272_v3  ;;  %v3368_v3 = vld [vmem:[%s4514_s1 + $0x7a4] ss:$8 sps:$4 sm:$0xff]  }
  0xb3   :  { %2104 = vmatpush1.bf16.msra.mxu1 %v3267_v4  ;;  %v3363_v4 = vld [vmem:[%s4514_s1 + $0x3a0] ss:$8 sps:$4 sm:$0xff]  }
  0xb4   :  { %2316 = vmatpush1.bf16.msra.mxu0 %v3270_v5  ;;  %2105 = vmatprep.subr.bf16.mxu1 %v3275_v6  ;;  %v3366_v5 = vld [vmem:[%s4514_s1 + $0x7a0] ss:$8 sps:$4 sm:$0xff]   ;;  %v3371_v6 = vld [vmem:[%s4514_s1 + $0x3b4] ss:$8 sps:$4 sm:$0xff]  }
  0xb5   :  { %2317 = vmatprep.subr.bf16.mxu0 %v3278_v7  ;;  %v3374_v7 = vld [vmem:[%s4514_s1 + $0x7b4] ss:$8 sps:$4 sm:$0xff]  }
  0xb7   :  { %2106 = vmatpush1.bf16.msra.mxu1 %v3273_v8  ;;  %v3369_v8 = vld [vmem:[%s4514_s1 + $0x3b0] ss:$8 sps:$4 sm:$0xff]  }
  0xb8   :  { %2318 = vmatpush1.bf16.msra.mxu0 %v3276_v9  ;;  %2107 = vmatprep.subr.bf16.mxu1 %v3283_v10  ;;  %v3372_v9 = vld [vmem:[%s4514_s1 + $0x7b0] ss:$8 sps:$4 sm:$0xff]   ;;  %v3377_v10 = vld [vmem:[%s4514_s1 + $0x3c4] ss:$8 sps:$4 sm:$0xff]  }
  0xb9   :  { %2319 = vmatprep.subr.bf16.mxu0 %v3288_v11  ;;  %v3380_v11 = vld [vmem:[%s4514_s1 + $0x7c4] ss:$8 sps:$4 sm:$0xff]  }
  0xbb   :  { %2108 = vmatpush1.bf16.msra.mxu1 %v3281_v12  ;;  %v3375_v12 = vld [vmem:[%s4514_s1 + $0x3c0] ss:$8 sps:$4 sm:$0xff]  }
  0xbc   :  { %2320 = vmatpush1.bf16.msra.mxu0 %v3286_v13  ;;  %2109 = vmatprep.subr.bf16.mxu1 %v3293_v14  ;;  %v3378_v13 = vld [vmem:[%s4514_s1 + $0x7c0] ss:$8 sps:$4 sm:$0xff]   ;;  %v3383_v14 = vld [vmem:[%s4514_s1 + $0x3d4] ss:$8 sps:$4 sm:$0xff]  }
  0xbd   :  { %2321 = vmatprep.subr.bf16.mxu0 %v3296_v15  ;;  %v3386_v15 = vld [vmem:[%s4514_s1 + $0x7d4] ss:$8 sps:$4 sm:$0xff]  }
  0xbf   :  { %2110 = vmatpush1.bf16.msra.mxu1 %v3291_v16  ;;  %v3381_v16 = vld [vmem:[%s4514_s1 + $0x3d0] ss:$8 sps:$4 sm:$0xff]  }
  0xc0   :  { %2322 = vmatpush1.bf16.msra.mxu0 %v3294_v17  ;;  %2132 = vmatprep.subr.bf16.mxu1 %v3302_v18  ;;  %v3384_v17 = vld [vmem:[%s4514_s1 + $0x7d0] ss:$8 sps:$4 sm:$0xff]   ;;  %v3394_v18 = vld [vmem:[%s4514_s1 + $0x3e4] ss:$8 sps:$4 sm:$0xff]  }
  0xc1   :  { %2344 = vmatprep.subr.bf16.mxu0 %v3308_v19  ;;  %v3398_v19 = vld [vmem:[%s4514_s1 + $0x7e4] ss:$8 sps:$4 sm:$0xff]  }
  0xc2   :  { %2112 = vmatmul.mubr.bf16.vlgmr.msra.gmra.mrb[0].mxu1 %v3297_v20  ;;  %v3392_v20 = vld [vmem:[%s4514_s1 + $0x3e0] ss:$8 sps:$4 sm:$0xff]  }
  0xc3   :  { %2324 = vmatmul.mubr.bf16.vlgmr.msra.gmra.mrb[0].mxu0 %v3303_v22  ;;  %2133 = vmatpush1.bf16.msra.mxu1 %v3300_v21  ;;  %v3396_v21 = vld [vmem:[%s4514_s1 + $0x7e0] ss:$8 sps:$4 sm:$0xff]   ;;  %v3401_v22 = vld [vmem:[%s4514_s1 + $0x3f4] ss:$8 sps:$4 sm:$0xff]  }
  0xc4   :  { %2345 = vmatpush1.bf16.msra.mxu0 %v3306_v23  ;;  %2134 = vmatprep.subr.bf16.mxu1 %v3311_v24  ;;  %v3404_v23 = vld [vmem:[%s4514_s1 + $0x7f4] ss:$8 sps:$4 sm:$0xff]   ;;  %v3399_v24 = vld [vmem:[%s4514_s1 + $0x3f0] ss:$8 sps:$4 sm:$0xff]  }
  0xc5   :  { %2346 = vmatprep.subr.bf16.mxu0 %v3314_v25  ;;  %2121 = vmatprep.mubr.bf16.mxu1 %v3387_v26  ;;  %v3402_v25 = vld [vmem:[%s4514_s1 + $0x7f0] ss:$8 sps:$4 sm:$0xff]   ;;  %v3413_v26 = vld [vmem:[%s4514_s1 + $0x804] ss:$8 sps:$4 sm:$0xff]  }
  0xc6   :  { %2333 = vmatprep.mubr.bf16.mxu0 %v3389_v27  ;;  %v3405_v27 = vld [vmem:[%s4515_s0 + $0x18] ss:$72 sps:$4 sm:$0xff]  }
  0xc7   :  { %2135 = vmatpush1.bf16.msra.mxu1 %v3309_v28  ;;  %v3408_v28 = vld [vmem:[%s4515_s0 + $0x38] ss:$72 sps:$4 sm:$0xff]  }
  0xc8   :  { %2347 = vmatpush1.bf16.msra.mxu0 %v3312_v29  ;;  %2136 = vmatprep.subr.bf16.mxu1 %v3317_v30  ;;  %v3411_v29 = vld [vmem:[%s4514_s1 + $0x800] ss:$8 sps:$4 sm:$0xff]   ;;  %v3416_v30 = vld [vmem:[%s4514_s1 + $0x814] ss:$8 sps:$4 sm:$0xff]  }
  0xc9   :  { %2348 = vmatprep.subr.bf16.mxu0 %v3320_v31  ;;  %v3417_v31 = vld [vmem:[%s4515_s0 + $0xac] ss:$72 sps:$4 sm:$0xff]  }
  0xca   :  { %2122 = vmatmul.mubr.bf16.gmra.mrb[4].mxu1 %v3391_v34  ;;  %v3425_v34 = vld [vmem:[%s4514_s1 + $0x824] ss:$8 sps:$4 sm:$0xff]  }
  0xcb   :  { %2334 = vmatmul.mubr.bf16.gmra.mrb[4].mxu0 %v3395_v35  ;;  %2137 = vmatpush1.bf16.msra.mxu1 %v3315_v32  ;;  %v3419_v32 = vld [vmem:[%s4515_s0 + $0xcc] ss:$72 sps:$4 sm:$0xff]   ;;  %v3421_v35 = vld [vmem:[%s4515_s0 + $0xa8] ss:$72 sps:$4 sm:$0xff]  }
  0xcc   :  { %2349 = vmatpush1.bf16.msra.mxu0 %v3318_v33  ;;  %2138 = vmatprep.subr.bf16.mxu1 %v3323_v36  ;;  %v3414_v33 = vld [vmem:[%s4514_s1 + $0x810] ss:$8 sps:$4 sm:$0xff]  }
  0xcd   :  { %2350 = vmatprep.subr.bf16.mxu0 %v3326_v37  ;;  %2164 = vmatprep.mubr.bf16.mxu1 %v3407_v38  ;;  %v3422_v36 = vld [vmem:[%s4515_s0 + $0xc8] ss:$72 sps:$4 sm:$0xff]   ;;  %v3428_v38 = vld [vmem:[%s4514_s1 + $0x834] ss:$8 sps:$4 sm:$0xff]  }
  0xce   :  { %2376 = vmatprep.mubr.bf16.mxu0 %v3410_v39  ;;  %v3423_v37 = vld [vmem:[%s4514_s1 + $0x820] ss:$8 sps:$4 sm:$0xff]   ;;  %v3467_v39 = vld [vmem:[%s4515_s0 + $0x44] ss:$72 sps:$4 sm:$0xff]  }
  0xcf   :  { %2139 = vmatpush1.bf16.msra.mxu1 %v3321_v40  ;;  %v3470_v40 = vld [vmem:[%s4515_s0 + $0xd4] ss:$72 sps:$4 sm:$0xff]  }
  0xd0   :  { %2351 = vmatpush1.bf16.msra.mxu0 %v3324_v41  ;;  %2140 = vmatprep.subr.bf16.mxu1 %v3329_v42  ;;  %v3426_v41 = vld [vmem:[%s4514_s1 + $0x830] ss:$8 sps:$4 sm:$0xff]   ;;  %v3431_v42 = vld [vmem:[%s4514_s1 + $0x844] ss:$8 sps:$4 sm:$0xff]  }
  0xd1   :  { %2352 = vmatprep.subr.bf16.mxu0 %v3332_v43  ;;  %v3429_v43 = vld [vmem:[%s4514_s1 + $0x840] ss:$8 sps:$4 sm:$0xff]  }
  0xd3   :  { %2141 = vmatpush1.bf16.msra.mxu1 %v3327_v44  ;;  %v3434_v44 = vld [vmem:[%s4514_s1 + $0x854] ss:$8 sps:$4 sm:$0xff]  }
  0xd4   :  { %2353 = vmatpush1.bf16.msra.mxu0 %v3330_v45  ;;  %2142 = vmatprep.subr.bf16.mxu1 %v3335_v46  ;;  %v3432_v45 = vld [vmem:[%s4514_s1 + $0x850] ss:$8 sps:$4 sm:$0xff]   ;;  %v3437_v46 = vld [vmem:[%s4514_s1 + $0x864] ss:$8 sps:$4 sm:$0xff]  }
  0xd5   :  { %2354 = vmatprep.subr.bf16.mxu0 %v3338_v47  ;;  %v3435_v47 = vld [vmem:[%s4514_s1 + $0x860] ss:$8 sps:$4 sm:$0xff]  }
  0xd7   :  { %2143 = vmatpush1.bf16.msra.mxu1 %v3333_v48  ;;  %v3440_v48 = vld [vmem:[%s4514_s1 + $0x874] ss:$8 sps:$4 sm:$0xff]  }
  0xd8   :  { %2355 = vmatpush1.bf16.msra.mxu0 %v3336_v49  ;;  %2144 = vmatprep.subr.bf16.mxu1 %v3341_v50  ;;  %v3438_v49 = vld [vmem:[%s4514_s1 + $0x870] ss:$8 sps:$4 sm:$0xff]   ;;  %v3443_v50 = vld [vmem:[%s4514_s1 + $0x884] ss:$8 sps:$4 sm:$0xff]  }
  0xd9   :  { %2356 = vmatprep.subr.bf16.mxu0 %v3344_v51  ;;  %v3441_v51 = vld [vmem:[%s4514_s1 + $0x880] ss:$8 sps:$4 sm:$0xff]  }
  0xdb   :  { %2145 = vmatpush1.bf16.msra.mxu1 %v3339_v52  ;;  %v3446_v52 = vld [vmem:[%s4514_s1 + $0x894] ss:$8 sps:$4 sm:$0xff]  }
  0xdc   :  { %2357 = vmatpush1.bf16.msra.mxu0 %v3342_v53  ;;  %2146 = vmatprep.subr.bf16.mxu1 %v3347_v54  ;;  %v3444_v53 = vld [vmem:[%s4514_s1 + $0x890] ss:$8 sps:$4 sm:$0xff]   ;;  %v3449_v54 = vld [vmem:[%s4514_s1 + $0x8a4] ss:$8 sps:$4 sm:$0xff]  }
  0xdd   :  { %2358 = vmatprep.subr.bf16.mxu0 %v3350_v55  ;;  %v3447_v55 = vld [vmem:[%s4514_s1 + $0x8a0] ss:$8 sps:$4 sm:$0xff]  }
  0xdf   :  { %2147 = vmatpush1.bf16.msra.mxu1 %v3345_v56  ;;  %v3452_v56 = vld [vmem:[%s4514_s1 + $0x8b4] ss:$8 sps:$4 sm:$0xff]  }
  0xe0   :  { %2359 = vmatpush1.bf16.msra.mxu0 %v3348_v57  ;;  %2148 = vmatprep.subr.bf16.mxu1 %v3353_v58  ;;  %v3450_v57 = vld [vmem:[%s4514_s1 + $0x8b0] ss:$8 sps:$4 sm:$0xff]   ;;  %v3455_v58 = vld [vmem:[%s4514_s1 + $0x8c4] ss:$8 sps:$4 sm:$0xff]  }
  0xe1   :  { %2360 = vmatprep.subr.bf16.mxu0 %v3356_v59  ;;  %v3453_v59 = vld [vmem:[%s4514_s1 + $0x8c0] ss:$8 sps:$4 sm:$0xff]  }
  0xe3   :  { %2149 = vmatpush1.bf16.msra.mxu1 %v3351_v60  ;;  %v3458_v60 = vld [vmem:[%s4514_s1 + $0x8d4] ss:$8 sps:$4 sm:$0xff]  }
  0xe4   :  { %2361 = vmatpush1.bf16.msra.mxu0 %v3354_v61  ;;  %2150 = vmatprep.subr.bf16.mxu1 %v3359_v62  ;;  %v3456_v61 = vld [vmem:[%s4514_s1 + $0x8d0] ss:$8 sps:$4 sm:$0xff]   ;;  %v3461_v62 = vld [vmem:[%s4514_s1 + $0x8e4] ss:$8 sps:$4 sm:$0xff]  }
  0xe5   :  { %2362 = vmatprep.subr.bf16.mxu0 %v3362_v63  ;;  %v3459_v63 = vld [vmem:[%s4514_s1 + $0x8e0] ss:$8 sps:$4 sm:$0xff]  }
  0xe7   :  { %2151 = vmatpush1.bf16.msra.mxu1 %v3357_v0  ;;  %v3464_v0 = vld [vmem:[%s4514_s1 + $0x8f4] ss:$8 sps:$4 sm:$0xff]  }
  0xe8   :  { %2363 = vmatpush1.bf16.msra.mxu0 %v3360_v1  ;;  %2152 = vmatprep.subr.bf16.mxu1 %v3365_v2  ;;  %v3462_v1 = vld [vmem:[%s4514_s1 + $0x8f0] ss:$8 sps:$4 sm:$0xff]   ;;  %v3465_v2 = vld [vmem:[%s4515_s0 + $0x40] ss:$72 sps:$4 sm:$0xff]  }
  0xe9   :  { %2364 = vmatprep.subr.bf16.mxu0 %v3368_v3  ;;  %v3468_v3 = vld [vmem:[%s4515_s0 + $0xd0] ss:$72 sps:$4 sm:$0xff]  }
  0xeb   :  { %2153 = vmatpush1.bf16.msra.mxu1 %v3363_v4  ;;  %v343_v4 = vlaneseq }
  0xec   :  { %2365 = vmatpush1.bf16.msra.mxu0 %v3366_v5  ;;  %2154 = vmatprep.subr.bf16.mxu1 %v3371_v6 }
  0xed   :  { %2366 = vmatprep.subr.bf16.mxu0 %v3374_v7  ;;  %v4475_v5 = vshrl.u32 %v343_v4, 7  ;;  %vm2496_vm0 = vcmp.lt.s32.totalorder %v343_v4, 256 }
  0xef   :  { %2155 = vmatpush1.bf16.msra.mxu1 %v3369_v8 }
  0xf0   :  { %2367 = vmatpush1.bf16.msra.mxu0 %v3372_v9  ;;  %2156 = vmatprep.subr.bf16.mxu1 %v3377_v10  ;;  %v345_v9 = vsub.s32 0, %v4475_v5 }
  0xf1   :  { %2368 = vmatprep.subr.bf16.mxu0 %v3380_v11  ;;  %v341_v11 = vld [vmem:[%s4516_s2] sm:$0x3] }
  0xf3   :  { %2157 = vmatpush1.bf16.msra.mxu1 %v3375_v12  ;;  %v349_v12 = vsub.s32 1, %v4475_v5 }
  0xf4   :  { %2369 = vmatpush1.bf16.msra.mxu0 %v3378_v13  ;;  %2158 = vmatprep.subr.bf16.mxu1 %v3383_v14  ;;  %v346_v13 = vrot.slane %v341_v11, %v345_v9 }
  0xf5   :  { %2370 = vmatprep.subr.bf16.mxu0 %v3386_v15  ;;  %v350_v14 = vrot.slane %v341_v11, %v349_v12 }
  0xf7   :  { %2159 = vmatpush1.bf16.msra.mxu1 %v3381_v16 }
  0xf8   :  { %2371 = vmatpush1.bf16.msra.mxu0 %v3384_v17  ;;  %2160 = vmatprep.subr.bf16.mxu1 %v3394_v18 }
  0xf9   :  { %2372 = vmatprep.subr.bf16.mxu0 %v3398_v19 }
  0xfb   :  { %2161 = vmatpush1.bf16.msra.mxu1 %v3392_v20 }
  0xfc   :  { %2373 = vmatpush1.bf16.msra.mxu0 %v3396_v21  ;;  %2162 = vmatprep.subr.bf16.mxu1 %v3401_v22 }
  0xfd   :  { %2374 = vmatprep.subr.bf16.mxu0 %v3404_v23 }
  0xff   :  { %2163 = vmatpush1.bf16.msra.mxu1 %v3399_v24 }
 0x100   :  { %2375 = vmatpush1.bf16.msra.mxu0 %v3402_v25  ;;  %2880 = vmatprep.subr.bf16.mxu1 %v3413_v26 }
 0x101   :  { %2397 = vmatprep.subr.bf16.mxu0 %v3413_v26 }
 0x102   :  { %2165 = vmatmul.mubr.bf16.vlgmr.msra.gmra.mrb[0].mxu1 %v3405_v27 }
 0x103   :  { %2377 = vmatmul.mubr.bf16.vlgmr.msra.gmra.mrb[0].mxu0 %v3408_v28  ;;  %2896 = vmatpush1.bf16.msra.mxu1 %v3411_v29 }
 0x104   :  { %2398 = vmatpush1.bf16.msra.mxu0 %v3411_v29  ;;  %2881 = vmatprep.subr.bf16.mxu1 %v3416_v30 }
 0x105   :  { %2399 = vmatprep.subr.bf16.mxu0 %v3416_v30  ;;  %2174 = vmatprep.mubr.bf16.mxu1 %v3417_v31 }
 0x106   :  { %2386 = vmatprep.mubr.bf16.mxu0 %v3419_v32 }
 0x107   :  { %2897 = vmatpush1.bf16.msra.mxu1 %v3414_v33 }
 0x108   :  { %2400 = vmatpush1.bf16.msra.mxu0 %v3414_v33  ;;  %2882 = vmatprep.subr.bf16.mxu1 %v3425_v34 }
 0x109   :  { %2401 = vmatprep.subr.bf16.mxu0 %v3425_v34 }
 0x10a   :  { %2175 = vmatmul.mubr.bf16.gmra.mrb[4].mxu1 %v3421_v35 }
 0x10b   :  { %2387 = vmatmul.mubr.bf16.gmra.mrb[4].mxu0 %v3422_v36  ;;  %2898 = vmatpush1.bf16.msra.mxu1 %v3423_v37 }
 0x10c   :  { %2402 = vmatpush1.bf16.msra.mxu0 %v3423_v37  ;;  %2883 = vmatprep.subr.bf16.mxu1 %v3428_v38 }
 0x10d   :  { %2403 = vmatprep.subr.bf16.mxu0 %v3428_v38  ;;  %2429 = vmatprep.mubr.bf16.mxu0 %v3467_v39 }
 0x10e   :  { %2439 = vmatprep.mubr.bf16.mxu1 %v3470_v40 }
 0x10f   :  { %2899 = vmatpush1.bf16.msra.mxu1 %v3426_v41 }
 0x110   :  { %2404 = vmatpush1.bf16.msra.mxu0 %v3426_v41  ;;  %2884 = vmatprep.subr.bf16.mxu1 %v3431_v42 }
 0x111   :  { %2405 = vmatprep.subr.bf16.mxu0 %v3431_v42 }
 0x113   :  { %2900 = vmatpush1.bf16.msra.mxu1 %v3429_v43 }
 0x114   :  { %2406 = vmatpush1.bf16.msra.mxu0 %v3429_v43  ;;  %2885 = vmatprep.subr.bf16.mxu1 %v3434_v44 }
 0x115   :  { %2407 = vmatprep.subr.bf16.mxu0 %v3434_v44 }
 0x117   :  { %2901 = vmatpush1.bf16.msra.mxu1 %v3432_v45 }
 0x118   :  { %2408 = vmatpush1.bf16.msra.mxu0 %v3432_v45  ;;  %2886 = vmatprep.subr.bf16.mxu1 %v3437_v46 }
 0x119   :  { %2409 = vmatprep.subr.bf16.mxu0 %v3437_v46 }
 0x11b   :  { %2902 = vmatpush1.bf16.msra.mxu1 %v3435_v47 }
 0x11c   :  { %2410 = vmatpush1.bf16.msra.mxu0 %v3435_v47  ;;  %2887 = vmatprep.subr.bf16.mxu1 %v3440_v48 }
 0x11d   :  { %2411 = vmatprep.subr.bf16.mxu0 %v3440_v48 }
 0x11f   :  { %2903 = vmatpush1.bf16.msra.mxu1 %v3438_v49 }
 0x120   :  { %2412 = vmatpush1.bf16.msra.mxu0 %v3438_v49  ;;  %2888 = vmatprep.subr.bf16.mxu1 %v3443_v50 }
 0x121   :  { %2413 = vmatprep.subr.bf16.mxu0 %v3443_v50 }
 0x123   :  { %2904 = vmatpush1.bf16.msra.mxu1 %v3441_v51 }
 0x124   :  { %2414 = vmatpush1.bf16.msra.mxu0 %v3441_v51  ;;  %2889 = vmatprep.subr.bf16.mxu1 %v3446_v52 }
 0x125   :  { %2415 = vmatprep.subr.bf16.mxu0 %v3446_v52 }
 0x127   :  { %2905 = vmatpush1.bf16.msra.mxu1 %v3444_v53 }
 0x128   :  { %2416 = vmatpush1.bf16.msra.mxu0 %v3444_v53  ;;  %2890 = vmatprep.subr.bf16.mxu1 %v3449_v54 }
 0x129   :  { %2417 = vmatprep.subr.bf16.mxu0 %v3449_v54 }
 0x12b   :  { %2906 = vmatpush1.bf16.msra.mxu1 %v3447_v55 }
 0x12c   :  { %2418 = vmatpush1.bf16.msra.mxu0 %v3447_v55  ;;  %2891 = vmatprep.subr.bf16.mxu1 %v3452_v56 }
 0x12d   :  { %2419 = vmatprep.subr.bf16.mxu0 %v3452_v56 }
 0x12f   :  { %2907 = vmatpush1.bf16.msra.mxu1 %v3450_v57 }
 0x130   :  { %2420 = vmatpush1.bf16.msra.mxu0 %v3450_v57  ;;  %2892 = vmatprep.subr.bf16.mxu1 %v3455_v58 }
 0x131   :  { %2421 = vmatprep.subr.bf16.mxu0 %v3455_v58 }
 0x133   :  { %2908 = vmatpush1.bf16.msra.mxu1 %v3453_v59 }
 0x134   :  { %2422 = vmatpush1.bf16.msra.mxu0 %v3453_v59  ;;  %2893 = vmatprep.subr.bf16.mxu1 %v3458_v60 }
 0x135   :  { %2423 = vmatprep.subr.bf16.mxu0 %v3458_v60 }
 0x137   :  { %2909 = vmatpush1.bf16.msra.mxu1 %v3456_v61 }
 0x138   :  { %2424 = vmatpush1.bf16.msra.mxu0 %v3456_v61  ;;  %2894 = vmatprep.subr.bf16.mxu1 %v3461_v62 }
 0x139   :  { %2425 = vmatprep.subr.bf16.mxu0 %v3461_v62 }
 0x13b   :  { %2910 = vmatpush1.bf16.msra.mxu1 %v3459_v63 }
 0x13c   :  { %2426 = vmatpush1.bf16.msra.mxu0 %v3459_v63  ;;  %2895 = vmatprep.subr.bf16.mxu1 %v3464_v0 }
 0x13d   :  { %2427 = vmatprep.subr.bf16.mxu0 %v3464_v0 }
 0x13f   :  { %2911 = vmatpush1.bf16.msra.mxu1 %v3462_v1 }
 0x140   :  { %2428 = vmatpush1.bf16.msra.mxu0 %v3462_v1 }
 0x142   :  { %2440 = vmatmul.mubr.bf16.vlgmr.msra.gmra.mrb[8].mxu1 %v3468_v3 }
 0x143   :  { %2430 = vmatmul.mubr.bf16.vlgmr.msra.gmra.mrb[0].mxu0 %v3465_v2 }
 0x1d5   :  { %v2166_v6 = vpop.f32.mrb[0].mxu1 }
 0x1d6   :  { %v2168_v7 = vpop.f32.mrb[1].mxu1  ;;  %v2912_v31 = vadd.f32 %v2166_v6, %v346_v13 }
 0x1d7   :  { %v2170_v8 = vpop.f32.mrb[2].mxu1  ;;  %v2914_v32 = vadd.f32 %v2168_v7, %v350_v14 }
 0x1d8   :  { %v2172_v10 = vpop.f32.mrb[3].mxu1  ;;  %v2916_v35 = vadd.f32 %v2170_v8, %v346_v13 }
 0x1d9   :  { %v2918_v40 = vadd.f32 %v2172_v10, %v350_v14 }
 0x1dd   :  { %v2176_v15 = vpop.f32.mrb[4].mxu1 }
 0x1de   :  { %v2388_v16 = vpop.f32.mrb[4].mxu0  ;;  %v2920_v17 = vadd.f32 %v2176_v15, %v346_v13  ;;  %v2178_v18 = vpop.f32.mrb[5].mxu1 }
 0x1df   :  { %v2390_v19 = vpop.f32.mrb[5].mxu0  ;;  %v2923_v20 = vadd.f32 %v2178_v18, %v350_v14  ;;  %v2180_v21 = vpop.f32.mrb[6].mxu1 }
 0x1e0   :  { %v2392_v22 = vpop.f32.mrb[6].mxu0  ;;  %v2921_v23 = vadd.f32 %v2920_v17, %v2388_v16  ;;  %v2926_v24 = vadd.f32 %v2180_v21, %v346_v13  ;;  %v2182_v25 = vpop.f32.mrb[7].mxu1  ;;  %v3471_v13 = vmov 1966171168  }
 0x1e1   :  { %v2394_v26 = vpop.f32.mrb[7].mxu0  ;;  %v2924_v27 = vadd.f32 %v2923_v20, %v2390_v19  ;;  %v2929_v28 = vadd.f32 %v2182_v25, %v350_v14  ;;  %v2480_v14 = vunpack.c.l.s4 %v3471_v13 }
 0x1e2   :  { %v2927_v29 = vadd.f32 %v2926_v24, %v2392_v22 }
 0x1e3   :  { %v2930_v30 = vadd.f32 %v2929_v28, %v2394_v26 }
 0x215   :  { %v2441_v34 = vpop.f32.mrb[8].mxu1 }
 0x216   :  { %v2431_v33 = vpop.f32.mrb[0].mxu0  ;;  %v2922_v37 = vadd.f32 %v2921_v23, %v2441_v34  ;;  %v2443_v39 = vpop.f32.mrb[9].mxu1  ;;  %v2481_v23 = vunpack.c.0.s8 %v2480_v14 }
 0x217   :  { %v2913_v36 = vadd.f32 %v2912_v31, %v2431_v33  ;;  %v2433_v38 = vpop.f32.mrb[1].mxu0  ;;  %v2925_v42 = vadd.f32 %v2924_v27, %v2443_v39  ;;  %v2445_v44 = vpop.f32.mrb[10].mxu1 }
 0x218   :  { %v2915_v41 = vadd.f32 %v2914_v32, %v2433_v38  ;;  %v2435_v43 = vpop.f32.mrb[2].mxu0  ;;  %2454 = vst [vmem:[%s4517_s3 + $0x20] sm:$0xff] %v2922_v37  ;;  %v2928_v46 = vadd.f32 %v2927_v29, %v2445_v44  ;;  %v2447_v48 = vpop.f32.mrb[11].mxu1  ;;  %v2503_v57 = vmul.f32 %v2922_v37, %v2922_v37  ;;  %v2484_v32 = vsub.s32 %v2481_v23, %v4475_v5 }
 0x219   :  { %2450 = vst [vmem:[%s4517_s3] sm:$0xff] %v2913_v36  ;;  %v2917_v45 = vadd.f32 %v2916_v35, %v2435_v43  ;;  %v2437_v47 = vpop.f32.mrb[3].mxu0  ;;  %2455 = vst [vmem:[%s4517_s3 + $0x28] sm:$0xff] %v2925_v42  ;;  %v2931_v50 = vadd.f32 %v2930_v30, %v2447_v48  ;;  %v2499_v51 = vmul.f32 %v2913_v36, %v2913_v36 }
 0x21a   :  { %2451 = vst [vmem:[%s4517_s3 + $0x8] sm:$0xff] %v2915_v41  ;;  %v2919_v49 = vadd.f32 %v2918_v40, %v2437_v47  ;;  %2456 = vst [vmem:[%s4517_s3 + $0x30] sm:$0xff] %v2928_v46  ;;  %v2500_v54 = vmul.f32 %v2915_v41, %v2915_v41  ;;  %v2504_v60 = vmul.f32 %v2925_v42, %v2925_v42 }
 0x21b   :  { %2452 = vst [vmem:[%s4517_s3 + $0x10] sm:$0xff] %v2917_v45  ;;  %v2458_v52 = vadd.f32 %v2917_v45, %v2913_v36  ;;  %v2501_v53 = vmul.f32 %v2917_v45, %v2917_v45  ;;  %2457 = vst [vmem:[%s4517_s3 + $0x38] sm:$0xff] %v2931_v50  ;;  %v2505_v0 = vmul.f32 %v2928_v46, %v2928_v46 }
 0x21c   :  { %2453 = vst [vmem:[%s4517_s3 + $0x18] sm:$0xff] %v2919_v49  ;;  %v2467_v55 = vadd.f32 %v2919_v49, %v2915_v41  ;;  %v2502_v56 = vmul.f32 %v2919_v49, %v2919_v49  ;;  %v2506_v3 = vmul.f32 %v2931_v50, %v2931_v50 }
 0x21d   :  { %v2507_v58 = vadd.f32 %v2501_v53, %v2499_v51  ;;  %v2459_v59 = vadd.f32 %v2922_v37, %v2458_v52 }
 0x21e   :  { %v2516_v61 = vadd.f32 %v2502_v56, %v2500_v54  ;;  %v2468_v62 = vadd.f32 %v2925_v42, %v2467_v55 }
 0x21f   :  { %v2460_v63 = vadd.f32 %v2928_v46, %v2459_v59  ;;  %v2508_v1 = vadd.f32 %v2507_v58, %v2503_v57 }
 0x220   :  { %v2469_v2 = vadd.f32 %v2931_v50, %v2468_v62  ;;  %v2517_v6 = vadd.f32 %v2516_v61, %v2504_v60 }
 0x221   :  { %v2461_v7 = vrot.slane %v2460_v63, 4  ;;  %v2509_v8 = vadd.f32 %v2508_v1, %v2505_v0 }
 0x222   :  { %v2470_v9 = vrot.slane %v2469_v2, 4  ;;  %v2518_v10 = vadd.f32 %v2517_v6, %v2506_v3 }
 0x223   :  { %v2462_v11 = vadd.f32 %v2461_v7, %v2460_v63  ;;  %v2510_v12 = vrot.slane %v2509_v8, 4 }
 0x224   :  { %v2471_v15 = vadd.f32 %v2470_v9, %v2469_v2  ;;  %v2519_v16 = vrot.slane %v2518_v10, 4 }
 0x225   :  { %v2463_v17 = vrot.slane %v2462_v11, 2  ;;  %v2511_v18 = vadd.f32 %v2510_v12, %v2509_v8 }
 0x226   :  { %v2472_v19 = vrot.slane %v2471_v15, 2  ;;  %v2520_v20 = vadd.f32 %v2519_v16, %v2518_v10 }
 0x227   :  { %v2464_v21 = vadd.f32 %v2463_v17, %v2462_v11  ;;  %v2512_v22 = vrot.slane %v2511_v18, 2 }
 0x228   :  { %v2473_v24 = vadd.f32 %v2472_v19, %v2471_v15  ;;  %v2521_v25 = vrot.slane %v2520_v20, 2 }
 0x229   :  { %v2465_v26 = vrot.slane %v2464_v21, 1  ;;  %v2513_v27 = vadd.f32 %v2512_v22, %v2511_v18 }
 0x22a   :  { %v2474_v28 = vrot.slane %v2473_v24, 1  ;;  %v2522_v29 = vadd.f32 %v2521_v25, %v2520_v20 }
 0x22b   :  { %v2466_v30 = vadd.f32 %v2465_v26, %v2464_v21  ;;  %v2514_v31 = vrot.slane %v2513_v27, 1 }
 0x22c   :  { %v2475_v33 = vadd.f32 %v2474_v28, %v2473_v24  ;;  %v2523_v34 = vrot.slane %v2522_v29, 1 }
 0x22d   :  { %v2515_v35 = vadd.f32 %v2514_v31, %v2513_v27 }
 0x22e   :  { %v2478_v36 = vcombine.low %v2466_v30, %v2475_v33  ;;  %v2524_v37 = vadd.f32 %v2523_v34, %v2522_v29 }
 0x230   :  { %v2485_v38 = vrot.slane %v2478_v36, %v2484_v32  ;;  %v2527_v39 = vcombine.low %v2515_v35, %v2524_v37 }
 0x232   :  { %v2492_v40 = vrot.slane %v2485_v38, %v2484_v32  ;;  %v2534_v41 = vrot.slane %v2527_v39, %v2484_v32 }
 0x234   :  { %2498 = vst.msk [vmem:[%s4518_s4] sm:$0x3] %vm2496_vm0, %v2492_v40  ;;  %v2541_v42 = vrot.slane %v2534_v41, %v2484_v32 }
 0x236   :  { %2543 = vst.msk [vmem:[%s4519_s5] sm:$0x3] %vm2496_vm0, %v2541_v42 }

// kernel: rc_generator_forward.25
= control target key start
LH: loop header
LB: loop body
LE: loop exit
PB: predicated region body
PF: predicated region fallthrough
CT: control target
= control target key end

     0   :  { %s1683_s18 = smov 0   ;;  %s1685_s19 = smov 0   ;;  %s1819_s0 = inlined_call_operand.vmem [shape: bf16[4,32,1024], index: 0, kind: input, shape index: {}]   ;;  %s1820_s1 = inlined_call_operand.vmem [shape: bf16[4,1024,128], index: 1, kind: input, shape index: {}]   ;;  %s1821_s2 = inlined_call_operand.vmem [shape: f32[1,128], index: 2, kind: input, shape index: {}]   ;;  %s1822_s3 = inlined_call_operand.vmem [shape: f32[4,32,128], index: 3, kind: output, shape index: {0}]   ;;  %s1823_s4 = inlined_call_operand.vmem [shape: f32[4,1,1,128], index: 4, kind: output, shape index: {1}]   ;;  %s1824_s5 = inlined_call_operand.vmem [shape: f32[4,1,1,128], index: 5, kind: output, shape index: {2}]  }
   0x1   :  { %s1687_s20 = smov 0  }
   0x2 LB: > { %s28_s21 = sadd.s32 1, %s1647_s19  ;;  %p1336_p0 = scmp.ge.s32.totalorder %s1651_s20, 1  ;;  %s1651_s20 = sphi %s1687_s20, %s16_s20   ;;  %s1647_s19 = sphi %s1685_s19, %s1826_s19   ;;  %s1643_s18 = sphi %s1683_s18, %s1825_s18  }
   0x3   : > { %p30_p1 = scmp.ge.s32.totalorder %s28_s21, 4  ;;  %p228_p2 = scmp.lt.s32.totalorder %s1651_s20, 5 }
   0x5   : > { %s1828_s21 = smov (%p30_p1, %s28_s21), 0  ;;  %p229_p3 = pnand %p1336_p0, %p228_p2 }
   0x6   : > { %p283_p4 = scmp.lt.s32.totalorder (!%p229_p3), %s1643_s18, 3 }
   0x7   : > { %232 = sbr.rel (%p229_p3) target bundleno = 329 (0x149), region = 32 }
   0xe   : > { %s1830_s18 = smov (!%p283_p4, %s1643_s18), 3 }
   0xf   : > { %s1427_s22 = sshll.u32 %s1830_s18, 9  ;;  %s1426_s26 = sshll.u32 %s1830_s18, 7 }
  0x10   : > { %s1707_s25 = scalar_lea.vmem %s1820_s1, %s1427_s22  ;;  %s1743_s29 = scalar_lea.vmem %s1819_s0, %s1426_s26 }
  0x11   : > { %v1565_v0 = vld [vmem:[%s1707_s25 + $0x40] sm:$0xff]   ;;  %v1569_v4 = vld [vmem:[%s1707_s25 + $0x48] sm:$0xff]   ;;  %v1573_v8 = vld [vmem:[%s1707_s25 + $0x50] sm:$0xff]   ;;  %s1428_s7 = sshll.u32 %s1830_s18, 5  ;;  %s313_s13 = scalar_lea.vmem %s1823_s4, %s1830_s18 }
  0x12   : > { %v1566_v1 = vld [vmem:[%s1707_s25 + $0xc0] sm:$0xff]   ;;  %1429 = vmatprep.subr.bf16.mxu0 %v1565_v0  ;;  %v1570_v5 = vld [vmem:[%s1707_s25 + $0xc8] sm:$0xff]   ;;  %v1574_v9 = vld [vmem:[%s1707_s25 + $0xd0] sm:$0xff]   ;;  %s306_s10 = scalar_lea.vmem %s1822_s3, %s1428_s7  ;;  %s319_s16 = scalar_lea.vmem %s1824_s5, %s1830_s18 }
  0x13   : > { %v1567_v2 = vld [vmem:[%s1707_s25] sm:$0xff]   ;;  %1457 = vmatprep.subr.bf16.mxu1 %v1566_v1  ;;  %v1571_v6 = vld [vmem:[%s1707_s25 + $0x8] sm:$0xff]   ;;  %v1575_v10 = vld [vmem:[%s1707_s25 + $0x10] sm:$0xff]  }
  0x14   : > { %v1568_v3 = vld [vmem:[%s1707_s25 + $0x80] sm:$0xff]   ;;  %1430 = vmatpush3.bf16.msra.mxu0 %v1567_v2  ;;  %v1572_v7 = vld [vmem:[%s1707_s25 + $0x88] sm:$0xff]   ;;  %v1576_v11 = vld [vmem:[%s1707_s25 + $0x90] sm:$0xff]  }
  0x15   : > { %1458 = vmatpush3.bf16.msra.mxu1 %v1568_v3  ;;  %1431 = vmatprep.subr.bf16.mxu0 %v1569_v4  ;;  %v1577_v12 = vld [vmem:[%s1707_s25 + $0x58] sm:$0xff]   ;;  %v1581_v16 = vld [vmem:[%s1707_s25 + $0x60] sm:$0xff]   ;;  %v1585_v20 = vld [vmem:[%s1707_s25 + $0x68] sm:$0xff]  }
  0x16   : > { %1459 = vmatprep.subr.bf16.mxu1 %v1570_v5  ;;  %v1578_v13 = vld [vmem:[%s1707_s25 + $0xd8] sm:$0xff]   ;;  %v1582_v17 = vld [vmem:[%s1707_s25 + $0xe0] sm:$0xff]   ;;  %v1586_v21 = vld [vmem:[%s1707_s25 + $0xe8] sm:$0xff]  }
  0x17   : > { %v1579_v14 = vld [vmem:[%s1707_s25 + $0x18] sm:$0xff]   ;;  %v1583_v18 = vld [vmem:[%s1707_s25 + $0x20] sm:$0xff]   ;;  %v1587_v22 = vld [vmem:[%s1707_s25 + $0x28] sm:$0xff]  }
  0x18   : > { %1432 = vmatpush3.bf16.msra.mxu0 %v1571_v6  ;;  %v1580_v15 = vld [vmem:[%s1707_s25 + $0x98] sm:$0xff]   ;;  %v1584_v19 = vld [vmem:[%s1707_s25 + $0xa0] sm:$0xff]   ;;  %v1588_v23 = vld [vmem:[%s1707_s25 + $0xa8] sm:$0xff]  }
  0x19   : > { %1460 = vmatpush3.bf16.msra.mxu1 %v1572_v7  ;;  %1433 = vmatprep.subr.bf16.mxu0 %v1573_v8  ;;  %v1589_v24 = vld [vmem:[%s1707_s25 + $0x70] sm:$0xff]   ;;  %v1593_v28 = vld [vmem:[%s1707_s25 + $0x78] sm:$0xff]   ;;  %v321_v32 = vld [vmem:[%s1743_s29] sm:$0xff] }
  0x1a   : > { %1461 = vmatprep.subr.bf16.mxu1 %v1574_v9  ;;  %v1590_v25 = vld [vmem:[%s1707_s25 + $0xf0] sm:$0xff]   ;;  %v1594_v29 = vld [vmem:[%s1707_s25 + $0xf8] sm:$0xff]   ;;  %v325_v33 = vld [vmem:[%s1743_s29 + $0x20] sm:$0xff] }
  0x1b   : > { %v1591_v26 = vld [vmem:[%s1707_s25 + $0x30] sm:$0xff]   ;;  %v1595_v30 = vld [vmem:[%s1707_s25 + $0x38] sm:$0xff]   ;;  %v322_v34 = vld [vmem:[%s1743_s29 + $0x8] sm:$0xff]  ;;  %v1344_v35 = vcombine.low %v321_v32, %v325_v33  ;;  %v1345_v36 = vcombine.high %v321_v32, %v325_v33 }
  0x1c   : > { %1434 = vmatpush3.bf16.msra.mxu0 %v1575_v10  ;;  %v1592_v27 = vld [vmem:[%s1707_s25 + $0xb0] sm:$0xff]   ;;  %v1596_v31 = vld [vmem:[%s1707_s25 + $0xb8] sm:$0xff]   ;;  %v326_v37 = vld [vmem:[%s1743_s29 + $0x28] sm:$0xff] }
  0x1d   : > { %1462 = vmatpush3.bf16.msra.mxu1 %v1576_v11  ;;  %1435 = vmatprep.subr.bf16.mxu0 %v1577_v12  ;;  %v1346_v38 = vcombine.low %v322_v34, %v326_v37  ;;  %v1347_v39 = vcombine.high %v322_v34, %v326_v37  ;;  %v1597_v40 = vld [vmem:[%s1707_s25 + $0x140] sm:$0xff]   ;;  %v1601_v44 = vld [vmem:[%s1707_s25 + $0x148] sm:$0xff]   ;;  %v1605_v48 = vld [vmem:[%s1707_s25 + $0x150] sm:$0xff]  }
  0x1e   : > { %1463 = vmatprep.subr.bf16.mxu1 %v1578_v13  ;;  %968 = vmatprep.mubr.bf16.mxu0 %v1345_v36  ;;  %v1598_v41 = vld [vmem:[%s1707_s25 + $0x1c0] sm:$0xff]   ;;  %v1602_v45 = vld [vmem:[%s1707_s25 + $0x1c8] sm:$0xff]   ;;  %v1606_v49 = vld [vmem:[%s1707_s25 + $0x1d0] sm:$0xff]  }
  0x1f   : > { %1017 = vmatprep.mubr.bf16.mxu1 %v1347_v39  ;;  %v1599_v42 = vld [vmem:[%s1707_s25 + $0x100] sm:$0xff]   ;;  %v1603_v46 = vld [vmem:[%s1707_s25 + $0x108] sm:$0xff]   ;;  %v1607_v50 = vld [vmem:[%s1707_s25 + $0x110] sm:$0xff]  }
  0x20   : > { %1436 = vmatpush3.bf16.msra.mxu0 %v1579_v14  ;;  %v1600_v43 = vld [vmem:[%s1707_s25 + $0x180] sm:$0xff]   ;;  %v1604_v47 = vld [vmem:[%s1707_s25 + $0x188] sm:$0xff]   ;;  %v1608_v51 = vld [vmem:[%s1707_s25 + $0x190] sm:$0xff]  }
  0x21   : > { %1464 = vmatpush3.bf16.msra.mxu1 %v1580_v15  ;;  %1437 = vmatprep.subr.bf16.mxu0 %v1581_v16  ;;  %v1609_v52 = vld [vmem:[%s1707_s25 + $0x158] sm:$0xff]   ;;  %v1613_v56 = vld [vmem:[%s1707_s25 + $0x160] sm:$0xff]   ;;  %v1617_v63 = vld [vmem:[%s1707_s25 + $0x168] sm:$0xff]  }
  0x22   : > { %1465 = vmatprep.subr.bf16.mxu1 %v1582_v17  ;;  %v1610_v53 = vld [vmem:[%s1707_s25 + $0x1d8] sm:$0xff]   ;;  %v1614_v57 = vld [vmem:[%s1707_s25 + $0x1e0] sm:$0xff]   ;;  %v1618_v1 = vld [vmem:[%s1707_s25 + $0x1e8] sm:$0xff]  }
  0x23   : > { %v1611_v54 = vld [vmem:[%s1707_s25 + $0x118] sm:$0xff]   ;;  %v1615_v58 = vld [vmem:[%s1707_s25 + $0x120] sm:$0xff]   ;;  %v1619_v2 = vld [vmem:[%s1707_s25 + $0x128] sm:$0xff]  }
  0x24   : > { %1438 = vmatpush3.bf16.msra.mxu0 %v1583_v18  ;;  %v1612_v55 = vld [vmem:[%s1707_s25 + $0x198] sm:$0xff]   ;;  %v1616_v59 = vld [vmem:[%s1707_s25 + $0x1a0] sm:$0xff]   ;;  %v1620_v3 = vld [vmem:[%s1707_s25 + $0x1a8] sm:$0xff]  }
  0x25   : > { %1466 = vmatpush3.bf16.msra.mxu1 %v1584_v19  ;;  %1439 = vmatprep.subr.bf16.mxu0 %v1585_v20  ;;  %v329_v60 = vld [vmem:[%s1743_s29 + $0x40] sm:$0xff]  ;;  %v330_v4 = vld [vmem:[%s1743_s29 + $0x48] sm:$0xff]  ;;  %v1621_v8 = vld [vmem:[%s1707_s25 + $0x170] sm:$0xff]  }
  0x26   : > { %1467 = vmatprep.subr.bf16.mxu1 %v1586_v21  ;;  %v333_v61 = vld [vmem:[%s1743_s29 + $0x60] sm:$0xff]  ;;  %v334_v5 = vld [vmem:[%s1743_s29 + $0x68] sm:$0xff]  ;;  %v1622_v9 = vld [vmem:[%s1707_s25 + $0x1f0] sm:$0xff]  }
  0x27   : > { %v1353_v62 = vcombine.high %v329_v60, %v333_v61  ;;  %v1352_v0 = vcombine.low %v329_v60, %v333_v61  ;;  %v1355_v6 = vcombine.high %v330_v4, %v334_v5  ;;  %v1354_v7 = vcombine.low %v330_v4, %v334_v5  ;;  %v1623_v10 = vld [vmem:[%s1707_s25 + $0x130] sm:$0xff]   ;;  %v1625_v12 = vld [vmem:[%s1707_s25 + $0x178] sm:$0xff]   ;;  %v1343_v34 = vld [vmem:[%s1821_s2] ss:$0 sm:$0xff] }
  0x28   : > { %1440 = vmatpush3.bf16.msra.mxu0 %v1587_v22  ;;  %v1624_v11 = vld [vmem:[%s1707_s25 + $0x1b0] sm:$0xff]   ;;  %v1626_v13 = vld [vmem:[%s1707_s25 + $0x1f8] sm:$0xff]  }
  0x29   : > { %1468 = vmatpush3.bf16.msra.mxu1 %v1588_v23  ;;  %1441 = vmatprep.subr.bf16.mxu0 %v1589_v24  ;;  %v1627_v14 = vld [vmem:[%s1707_s25 + $0x138] sm:$0xff]   ;;  %v323_v16 = vld [vmem:[%s1743_s29 + $0x10] sm:$0xff] }
  0x2a   : > { %1469 = vmatprep.subr.bf16.mxu1 %v1590_v25  ;;  %v1628_v15 = vld [vmem:[%s1707_s25 + $0x1b8] sm:$0xff]   ;;  %v327_v17 = vld [vmem:[%s1743_s29 + $0x30] sm:$0xff] }
  0x2b   : > { %v324_v18 = vld [vmem:[%s1743_s29 + $0x18] sm:$0xff]  ;;  %v1348_v20 = vcombine.low %v323_v16, %v327_v17  ;;  %v1349_v21 = vcombine.high %v323_v16, %v327_v17  ;;  %v331_v24 = vld [vmem:[%s1743_s29 + $0x50] sm:$0xff] }
  0x2c   : > { %1442 = vmatpush3.bf16.msra.mxu0 %v1591_v26  ;;  %v328_v19 = vld [vmem:[%s1743_s29 + $0x38] sm:$0xff]  ;;  %v335_v25 = vld [vmem:[%s1743_s29 + $0x70] sm:$0xff] }
  0x2d   : > { %1470 = vmatpush3.bf16.msra.mxu1 %v1592_v27  ;;  %1443 = vmatprep.subr.bf16.mxu0 %v1593_v28  ;;  %v1350_v22 = vcombine.low %v324_v18, %v328_v19  ;;  %v1351_v23 = vcombine.high %v324_v18, %v328_v19  ;;  %v332_v26 = vld [vmem:[%s1743_s29 + $0x58] sm:$0xff]  ;;  %v1357_v27 = vcombine.high %v331_v24, %v335_v25 }
  0x2e   : > { %1471 = vmatprep.subr.bf16.mxu1 %v1594_v29  ;;  %v336_v28 = vld [vmem:[%s1743_s29 + $0x78] sm:$0xff] }
  0x2f   : > { %v1359_v29 = vcombine.high %v332_v26, %v336_v28 }
  0x30   : > { %1444 = vmatpush3.bf16.msra.mxu0 %v1595_v30  ;;  %v1356_v30 = vcombine.low %v331_v24, %v335_v25 }
  0x31   : > { %1472 = vmatpush3.bf16.msra.mxu1 %v1596_v31  ;;  %1485 = vmatprep.subr.bf16.mxu0 %v1597_v40  ;;  %v1358_v31 = vcombine.low %v332_v26, %v336_v28 }
  0x32   : > { %1513 = vmatprep.subr.bf16.mxu1 %v1598_v41 }
  0x33   : > { %969 = vmatmul.mubr.bf16.vlgmr.msra.gmra.mrb[0].mxu0 %v1344_v35 }
  0x34   : > { %1018 = vmatmul.mubr.bf16.vlgmr.msra.gmra.mrb[0].mxu1 %v1346_v38  ;;  %1486 = vmatpush3.bf16.msra.mxu0 %v1599_v42 }
  0x35   : > { %1514 = vmatpush3.bf16.msra.mxu1 %v1600_v43  ;;  %1487 = vmatprep.subr.bf16.mxu0 %v1601_v44 }
  0x36   : > { %1515 = vmatprep.subr.bf16.mxu1 %v1602_v45  ;;  %976 = vmatprep.mubr.bf16.mxu0 %v1353_v62 }
  0x37   : > { %1025 = vmatprep.mubr.bf16.mxu1 %v1355_v6 }
  0x38   : > { %1488 = vmatpush3.bf16.msra.mxu0 %v1603_v46 }
  0x39   : > { %1516 = vmatpush3.bf16.msra.mxu1 %v1604_v47  ;;  %1489 = vmatprep.subr.bf16.mxu0 %v1605_v48 }
  0x3a   : > { %1517 = vmatprep.subr.bf16.mxu1 %v1606_v49 }
  0x3b   : > { %977 = vmatmul.mubr.bf16.gmra.mrb[4].mxu0 %v1352_v0 }
  0x3c   : > { %1490 = vmatpush3.bf16.msra.mxu0 %v1607_v50  ;;  %1026 = vmatmul.mubr.bf16.gmra.mrb[4].mxu1 %v1354_v7 }
  0x3d   : > { %1518 = vmatpush3.bf16.msra.mxu1 %v1608_v51  ;;  %1491 = vmatprep.subr.bf16.mxu0 %v1609_v52 }
  0x3e   : > { %1519 = vmatprep.subr.bf16.mxu1 %v1610_v53  ;;  %1066 = vmatprep.mubr.bf16.mxu0 %v1349_v21 }
  0x3f   : > { %1115 = vmatprep.mubr.bf16.mxu1 %v1351_v23 }
  0x40   : > { %1492 = vmatpush3.bf16.msra.mxu0 %v1611_v54 }
  0x41   : > { %1520 = vmatpush3.bf16.msra.mxu1 %v1612_v55  ;;  %1493 = vmatprep.subr.bf16.mxu0 %v1613_v56 }
  0x42   : > { %1521 = vmatprep.subr.bf16.mxu1 %v1614_v57 }
  0x44   : > { %1494 = vmatpush3.bf16.msra.mxu0 %v1615_v58 }
  0x45   : > { %1522 = vmatpush3.bf16.msra.mxu1 %v1616_v59  ;;  %1495 = vmatprep.subr.bf16.mxu0 %v1617_v63 }
  0x46   : > { %1523 = vmatprep.subr.bf16.mxu1 %v1618_v1 }
  0x48   : > { %1496 = vmatpush3.bf16.msra.mxu0 %v1619_v2 }
  0x49   : > { %1524 = vmatpush3.bf16.msra.mxu1 %v1620_v3  ;;  %1497 = vmatprep.subr.bf16.mxu0 %v1621_v8 }
  0x4a   : > { %1525 = vmatprep.subr.bf16.mxu1 %v1622_v9 }
  0x4c   : > { %1498 = vmatpush3.bf16.msra.mxu0 %v1623_v10 }
  0x4d   : > { %1526 = vmatpush3.bf16.msra.mxu1 %v1624_v11  ;;  %1499 = vmatprep.subr.bf16.mxu0 %v1625_v12 }
  0x4e   : > { %1527 = vmatprep.subr.bf16.mxu1 %v1626_v13 }
  0x50   : > { %1500 = vmatpush3.bf16.msra.mxu0 %v1627_v14 }
  0x51   : > { %1528 = vmatpush3.bf16.msra.mxu1 %v1628_v15 }
  0x53   : > { %1067 = vmatmul.mubr.bf16.vlgmr.msra.gmra.mrb[8].mxu0 %v1348_v20 }
  0x54   : > { %1116 = vmatmul.mubr.bf16.vlgmr.msra.gmra.mrb[8].mxu1 %v1350_v22  ;;  %1074 = vmatprep.mubr.bf16.mxu0 %v1357_v27 }
  0x55   : > { %1123 = vmatprep.mubr.bf16.mxu1 %v1359_v29 }
  0x5b   : > { %1075 = vmatmul.mubr.bf16.gmra.mrb[12].mxu0 %v1356_v30 }
  0x5c   : > { %1124 = vmatmul.mubr.bf16.gmra.mrb[12].mxu1 %v1358_v31 }
 0x106   : > { %v1445_v32 = vpop.f32.mrb[0].mxu0 }
 0x107   : > { %v1473_v33 = vpop.f32.mrb[0].mxu1  ;;  %v1446_v35 = vpop.f32.mrb[1].mxu0 }
 0x108   : > { %v1447_v36 = vadd.f32 %v1446_v35, %v1445_v32  ;;  %v1474_v37 = vpop.f32.mrb[1].mxu1  ;;  %v1448_v38 = vpop.f32.mrb[2].mxu0 }
 0x109   : > { %v1475_v39 = vadd.f32 %v1474_v37, %v1473_v33  ;;  %v1476_v40 = vpop.f32.mrb[2].mxu1  ;;  %v1449_v41 = vpop.f32.mrb[3].mxu0 }
 0x10a   : > { %v971_v42 = vadd.f32 %v1447_v36, %v1343_v34  ;;  %v1450_v43 = vadd.f32 %v1449_v41, %v1448_v38  ;;  %v1477_v44 = vpop.f32.mrb[3].mxu1 }
 0x10b   : > { %v1478_v45 = vadd.f32 %v1477_v44, %v1476_v40 }
 0x10c   : > { %v1020_v46 = vadd.f32 %v1475_v39, %v971_v42  ;;  %v974_v47 = vadd.f32 %v1450_v43, %v1343_v34 }
 0x10e   : > { %v1023_v48 = vadd.f32 %v1478_v45, %v974_v47  ;;  %v1451_v49 = vpop.f32.mrb[4].mxu0 }
 0x10f   : > { %v1452_v50 = vpop.f32.mrb[5].mxu0  ;;  %v1479_v56 = vpop.f32.mrb[4].mxu1 }
 0x110   : > { %v1453_v51 = vadd.f32 %v1452_v50, %v1451_v49  ;;  %v1454_v52 = vpop.f32.mrb[6].mxu0  ;;  %v1480_v57 = vpop.f32.mrb[5].mxu1 }
 0x111   : > { %v1455_v53 = vpop.f32.mrb[7].mxu0  ;;  %v1481_v59 = vadd.f32 %v1480_v57, %v1479_v56  ;;  %v1482_v60 = vpop.f32.mrb[6].mxu1 }
 0x112   : > { %v1456_v54 = vadd.f32 %v1455_v53, %v1454_v52  ;;  %v979_v55 = vadd.f32 %v1453_v51, %v1343_v34  ;;  %v1483_v61 = vpop.f32.mrb[7].mxu1 }
 0x113   : > { %v1484_v63 = vadd.f32 %v1483_v61, %v1482_v60 }
 0x114   : > { %v982_v58 = vadd.f32 %v1456_v54, %v1343_v34  ;;  %v1028_v62 = vadd.f32 %v1481_v59, %v979_v55 }
 0x116   : > { %v1031_v0 = vadd.f32 %v1484_v63, %v982_v58 }
 0x126   : > { %v1501_v1 = vpop.f32.mrb[8].mxu0 }
 0x127   : > { %v1529_v2 = vpop.f32.mrb[8].mxu1  ;;  %v1502_v3 = vpop.f32.mrb[9].mxu0 }
 0x128   : > { %v1530_v4 = vpop.f32.mrb[9].mxu1  ;;  %v1503_v5 = vadd.f32 %v1502_v3, %v1501_v1  ;;  %v1504_v7 = vpop.f32.mrb[10].mxu0 }
 0x129   : > { %v1531_v6 = vadd.f32 %v1530_v4, %v1529_v2  ;;  %v1532_v8 = vpop.f32.mrb[10].mxu1  ;;  %v1505_v9 = vpop.f32.mrb[11].mxu0 }
 0x12a   : > { %v1533_v10 = vpop.f32.mrb[11].mxu1  ;;  %v1069_v11 = vadd.f32 %v1503_v5, %v1020_v46  ;;  %v1506_v12 = vadd.f32 %v1505_v9, %v1504_v7 }
 0x12b   : > { %v1534_v13 = vadd.f32 %v1533_v10, %v1532_v8 }
 0x12c   : > { %v1118_v14 = vadd.f32 %v1531_v6, %v1069_v11  ;;  %v1072_v15 = vadd.f32 %v1506_v12, %v1023_v48 }
 0x12e   : > { %1132 = vst [vmem:[%s306_s10] sm:$0xff] %v1118_v14  ;;  %v1121_v16 = vadd.f32 %v1534_v13, %v1072_v15  ;;  %v1507_v17 = vpop.f32.mrb[12].mxu0  ;;  %v1146_v19 = vmul.f32 %v1118_v14, %v1118_v14 }
 0x12f   : > { %v1535_v18 = vpop.f32.mrb[12].mxu1  ;;  %v1508_v20 = vpop.f32.mrb[13].mxu0 }
 0x130   : > { %v1536_v21 = vpop.f32.mrb[13].mxu1  ;;  %1133 = vst [vmem:[%s306_s10 + $0x8] sm:$0xff] %v1121_v16  ;;  %v1136_v22 = vadd.f32 %v1121_v16, %v1118_v14  ;;  %v1147_v23 = vmul.f32 %v1121_v16, %v1121_v16  ;;  %v1509_v24 = vadd.f32 %v1508_v20, %v1507_v17  ;;  %v1510_v26 = vpop.f32.mrb[14].mxu0 }
 0x131   : > { %v1537_v25 = vadd.f32 %v1536_v21, %v1535_v18  ;;  %v1538_v27 = vpop.f32.mrb[14].mxu1  ;;  %v1511_v28 = vpop.f32.mrb[15].mxu0 }
 0x132   : > { %v1539_v29 = vpop.f32.mrb[15].mxu1  ;;  %v1150_v30 = vadd.f32 %v1147_v23, %v1146_v19  ;;  %v1077_v31 = vadd.f32 %v1509_v24, %v1028_v62  ;;  %v1512_v32 = vadd.f32 %v1511_v28, %v1510_v26 }
 0x133   : > { %v1540_v33 = vadd.f32 %v1539_v29, %v1538_v27 }
 0x134   : > { %v1126_v34 = vadd.f32 %v1537_v25, %v1077_v31  ;;  %v1080_v35 = vadd.f32 %v1512_v32, %v1031_v0 }
 0x136   : > { %1134 = vst [vmem:[%s306_s10 + $0x10] sm:$0xff] %v1126_v34  ;;  %v1137_v36 = vadd.f32 %v1136_v22, %v1126_v34  ;;  %v1148_v37 = vmul.f32 %v1126_v34, %v1126_v34  ;;  %v1129_v38 = vadd.f32 %v1540_v33, %v1080_v35 }
 0x138   : > { %v1151_v39 = vadd.f32 %v1150_v30, %v1148_v37  ;;  %1135 = vst [vmem:[%s306_s10 + $0x18] sm:$0xff] %v1129_v38  ;;  %v1138_v40 = vadd.f32 %v1137_v36, %v1129_v38  ;;  %v1149_v41 = vmul.f32 %v1129_v38, %v1129_v38 }
 0x13a   : > { %v1139_v42 = vrot.slane %v1138_v40, 4  ;;  %v1152_v43 = vadd.f32 %v1151_v39, %v1149_v41 }
 0x13c   : > { %v1140_v44 = vadd.f32 %v1139_v42, %v1138_v40  ;;  %v1153_v45 = vrot.slane %v1152_v43, 4 }
 0x13e   : > { %v1141_v46 = vrot.slane %v1140_v44, 2  ;;  %v1154_v47 = vadd.f32 %v1153_v45, %v1152_v43 }
 0x140   : > { %v1142_v48 = vadd.f32 %v1141_v46, %v1140_v44  ;;  %v1155_v49 = vrot.slane %v1154_v47, 2 }
 0x142   : > { %v1143_v50 = vrot.slane %v1142_v48, 1  ;;  %v1156_v51 = vadd.f32 %v1155_v49, %v1154_v47 }
 0x144   : > { %v1144_v52 = vadd.f32 %v1143_v50, %v1142_v48  ;;  %v1157_v53 = vrot.slane %v1156_v51, 1 }
 0x146   : > { %1145 = vst [vmem:[%s313_s13] sm:$0x1] %v1144_v52  ;;  %v1158_v54 = vadd.f32 %v1157_v53, %v1156_v51 }
 0x148   : > { %1159 = vst [vmem:[%s319_s16] sm:$0x1] %v1158_v54 }
 0x149 PF: > { %s16_s20 = sadd.s32 1, %s1651_s20   ;;  %s1825_s18 = smov %s1647_s19 }
 0x14a   : > { %p13_p5 = scmp.ge.s32.totalorder %s16_s20, 6   ;;  %s1826_s19 = smov %s1828_s21 }
 0x14c   :  { %15 = sbr.rel (!%p13_p5) target bundleno = 2 (0x2), region = 89 }

// kernel: rc_generator_forward.26
= control target key start
LH: loop header
LB: loop body
LE: loop exit
PB: predicated region body
PF: predicated region fallthrough
CT: control target
= control target key end

     0   :  { %s391_s0 = inlined_call_operand.vmem [shape: f32[128,128], index: 0, kind: input, shape index: {}]   ;;  %s392_s1 = inlined_call_operand.vmem [shape: f32[1,128], index: 1, kind: input, shape index: {}]   ;;  %s393_s2 = inlined_call_operand.vmem [shape: f32[1,128], index: 2, kind: input, shape index: {}]   ;;  %s394_s3 = inlined_call_operand.vmem [shape: bf16[128,128], index: 3, kind: output, shape index: {}]  }
   0x1   :  { %v14_v0 = vld [vmem:[%s391_s0] sm:$0xff]  ;;  %v15_v1 = vld [vmem:[%s391_s0 + $0x8] sm:$0xff]  ;;  %v16_v6 = vld [vmem:[%s391_s0 + $0x10] sm:$0xff] }
   0x2   :  { %v286_v2 = vld [vmem:[%s392_s1] ss:$0 sm:$0xff]  ;;  %v17_v7 = vld [vmem:[%s391_s0 + $0x18] sm:$0xff]  ;;  %v19_v11 = vld [vmem:[%s391_s0 + $0x28] sm:$0xff] }
   0x3   :  { %v37_v3 = vmul.f32 %v286_v2, %v14_v0  ;;  %v38_v4 = vmul.f32 %v286_v2, %v15_v1  ;;  %v293_v5 = vld [vmem:[%s393_s2] ss:$0 sm:$0xff]  ;;  %v39_v8 = vmul.f32 %v286_v2, %v16_v6  ;;  %v40_v9 = vmul.f32 %v286_v2, %v17_v7  ;;  %v20_v12 = vld [vmem:[%s391_s0 + $0x30] sm:$0xff]  ;;  %v21_v17 = vld [vmem:[%s391_s0 + $0x38] sm:$0xff] }
   0x4   :  { %v18_v10 = vld [vmem:[%s391_s0 + $0x20] sm:$0xff]  ;;  %v42_v16 = vmul.f32 %v286_v2, %v19_v11  ;;  %v43_v20 = vmul.f32 %v286_v2, %v20_v12  ;;  %v44_v21 = vmul.f32 %v286_v2, %v21_v17  ;;  %v23_v27 = vld [vmem:[%s391_s0 + $0x48] sm:$0xff]  ;;  %v24_v32 = vld [vmem:[%s391_s0 + $0x50] sm:$0xff] }
   0x5   :  { %v60_v13 = vadd.f32 %v293_v5, %v37_v3  ;;  %v61_v14 = vadd.f32 %v293_v5, %v38_v4  ;;  %v41_v15 = vmul.f32 %v286_v2, %v18_v10  ;;  %v62_v18 = vadd.f32 %v293_v5, %v39_v8  ;;  %v22_v22 = vld [vmem:[%s391_s0 + $0x40] sm:$0xff]  ;;  %v25_v33 = vld [vmem:[%s391_s0 + $0x58] sm:$0xff]  ;;  %v27_v39 = vld [vmem:[%s391_s0 + $0x68] sm:$0xff] }
   0x6   :  { %v63_v19 = vadd.f32 %v293_v5, %v40_v9  ;;  %v65_v26 = vadd.f32 %v293_v5, %v42_v16  ;;  %v66_v30 = vadd.f32 %v293_v5, %v43_v20  ;;  %v67_v31 = vadd.f32 %v293_v5, %v44_v21  ;;  %v26_v38 = vld [vmem:[%s391_s0 + $0x60] sm:$0xff]  ;;  %v28_v44 = vld [vmem:[%s391_s0 + $0x70] sm:$0xff]  ;;  %v29_v49 = vld [vmem:[%s391_s0 + $0x78] sm:$0xff] }
   0x7   :  { %v76_v23 = vmax.f32 %v60_v13, 0.0  ;;  %v77_v24 = vmax.f32 %v61_v14, 0.0  ;;  %v64_v25 = vadd.f32 %v293_v5, %v41_v15  ;;  %v78_v28 = vmax.f32 %v62_v18, 0.0 }
   0x8   :  { %v79_v29 = vmax.f32 %v63_v19, 0.0  ;;  %v81_v36 = vmax.f32 %v65_v26, 0.0  ;;  %v45_v37 = vmul.f32 %v286_v2, %v22_v22  ;;  %v82_v41 = vmax.f32 %v66_v30, 0.0 }
   0x9   :  { %v213_v34 = vpack.c.bf16 %v77_v24, %v76_v23  ;;  %v80_v35 = vmax.f32 %v64_v25, 0.0  ;;  %v83_v42 = vmax.f32 %v67_v31, 0.0  ;;  %v46_v43 = vmul.f32 %v286_v2, %v23_v27 }
   0xa   :  { %v218_v40 = vpack.c.bf16 %v79_v29, %v78_v28  ;;  %v68_v46 = vadd.f32 %v293_v5, %v45_v37  ;;  %v47_v47 = vmul.f32 %v286_v2, %v24_v32  ;;  %v48_v48 = vmul.f32 %v286_v2, %v25_v33 }
   0xb   :  { %214 = vst [vmem:[%s394_s3] sm:$0xff] %v213_v34   ;;  %v223_v45 = vpack.c.bf16 %v81_v36, %v80_v35  ;;  %v228_v50 = vpack.c.bf16 %v83_v42, %v82_v41  ;;  %v69_v51 = vadd.f32 %v293_v5, %v46_v43  ;;  %v49_v52 = vmul.f32 %v286_v2, %v26_v38 }
   0xc   :  { %250 = vst [vmem:[%s394_s3 + $0x8] sm:$0xff] %v218_v40   ;;  %v50_v53 = vmul.f32 %v286_v2, %v27_v39  ;;  %v84_v54 = vmax.f32 %v68_v46, 0.0  ;;  %v70_v55 = vadd.f32 %v293_v5, %v47_v47  ;;  %v71_v56 = vadd.f32 %v293_v5, %v48_v48 }
   0xd   :  { %251 = vst [vmem:[%s394_s3 + $0x10] sm:$0xff] %v223_v45   ;;  %v51_v57 = vmul.f32 %v286_v2, %v28_v44  ;;  %252 = vst [vmem:[%s394_s3 + $0x18] sm:$0xff] %v228_v50   ;;  %v85_v58 = vmax.f32 %v69_v51, 0.0  ;;  %v72_v59 = vadd.f32 %v293_v5, %v49_v52  ;;  %v52_v61 = vmul.f32 %v286_v2, %v29_v49 }
   0xe   :  { %v73_v60 = vadd.f32 %v293_v5, %v50_v53  ;;  %v86_v62 = vmax.f32 %v70_v55, 0.0  ;;  %v87_v63 = vmax.f32 %v71_v56, 0.0 }
   0xf   :  { %v74_v0 = vadd.f32 %v293_v5, %v51_v57  ;;  %v233_v1 = vpack.c.bf16 %v85_v58, %v84_v54  ;;  %v88_v3 = vmax.f32 %v72_v59, 0.0  ;;  %v75_v6 = vadd.f32 %v293_v5, %v52_v61 }
  0x10   :  { %v89_v4 = vmax.f32 %v73_v60, 0.0  ;;  %v238_v7 = vpack.c.bf16 %v87_v63, %v86_v62 }
  0x11   :  { %v90_v8 = vmax.f32 %v74_v0, 0.0  ;;  %253 = vst [vmem:[%s394_s3 + $0x20] sm:$0xff] %v233_v1   ;;  %v91_v10 = vmax.f32 %v75_v6, 0.0 }
  0x12   :  { %v243_v9 = vpack.c.bf16 %v89_v4, %v88_v3  ;;  %254 = vst [vmem:[%s394_s3 + $0x28] sm:$0xff] %v238_v7  }
  0x13   :  { %v248_v2 = vpack.c.bf16 %v91_v10, %v90_v8 }
  0x14   :  { %255 = vst [vmem:[%s394_s3 + $0x30] sm:$0xff] %v243_v9  }
  0x15   :  { %256 = vst [vmem:[%s394_s3 + $0x38] sm:$0xff] %v248_v2  }

// kernel: rc_generator_forward.27
= control target key start
LH: loop header
LB: loop body
LE: loop exit
PB: predicated region body
PF: predicated region fallthrough
CT: control target
= control target key end

     0   :  { %s2890_s1 = inlined_call_operand.vmem [shape: bf16[1,1152,128], index: 1, kind: input, shape index: {}]   ;;  %s2891_s0 = inlined_call_operand.vmem [shape: bf16[1,128,1152], index: 0, kind: input, shape index: {}]   ;;  %s2892_s2 = inlined_call_operand.vmem [shape: f32[1,128], index: 2, kind: input, shape index: {}]   ;;  %s2893_s3 = inlined_call_operand.vmem [shape: f32[1,128,128], index: 3, kind: output, shape index: {0}]   ;;  %s2894_s4 = inlined_call_operand.vmem [shape: f32[1,1,1,128], index: 4, kind: output, shape index: {1}]   ;;  %s2895_s5 = inlined_call_operand.vmem [shape: f32[1,1,1,128], index: 5, kind: output, shape index: {2}]  }
   0x1   :  { %v2087_v0 = vld [vmem:[%s2890_s1 + $0x40] sm:$0xff]   ;;  %v2091_v4 = vld [vmem:[%s2890_s1 + $0x48] sm:$0xff]   ;;  %v2095_v8 = vld [vmem:[%s2890_s1 + $0x50] sm:$0xff]  }
   0x2   :  { %v2088_v1 = vld [vmem:[%s2890_s1 + $0xc0] sm:$0xff]   ;;  %1767 = vmatprep.subr.bf16.mxu0 %v2087_v0  ;;  %v2092_v5 = vld [vmem:[%s2890_s1 + $0xc8] sm:$0xff]   ;;  %v2096_v9 = vld [vmem:[%s2890_s1 + $0xd0] sm:$0xff]  }
   0x3   :  { %v2089_v2 = vld [vmem:[%s2890_s1] sm:$0xff]   ;;  %1831 = vmatprep.subr.bf16.mxu1 %v2088_v1  ;;  %v2093_v6 = vld [vmem:[%s2890_s1 + $0x8] sm:$0xff]   ;;  %v2097_v10 = vld [vmem:[%s2890_s1 + $0x10] sm:$0xff]  }
   0x4   :  { %v2090_v3 = vld [vmem:[%s2890_s1 + $0x80] sm:$0xff]   ;;  %1768 = vmatpush3.bf16.msra.mxu0 %v2089_v2  ;;  %v2094_v7 = vld [vmem:[%s2890_s1 + $0x88] sm:$0xff]   ;;  %v2098_v11 = vld [vmem:[%s2890_s1 + $0x90] sm:$0xff]  }
   0x5   :  { %1832 = vmatpush3.bf16.msra.mxu1 %v2090_v3  ;;  %1769 = vmatprep.subr.bf16.mxu0 %v2091_v4  ;;  %v2099_v12 = vld [vmem:[%s2890_s1 + $0x58] sm:$0xff]   ;;  %v2103_v16 = vld [vmem:[%s2890_s1 + $0x60] sm:$0xff]   ;;  %v2107_v20 = vld [vmem:[%s2890_s1 + $0x68] sm:$0xff]  }
   0x6   :  { %1833 = vmatprep.subr.bf16.mxu1 %v2092_v5  ;;  %v2100_v13 = vld [vmem:[%s2890_s1 + $0xd8] sm:$0xff]   ;;  %v2104_v17 = vld [vmem:[%s2890_s1 + $0xe0] sm:$0xff]   ;;  %v2108_v21 = vld [vmem:[%s2890_s1 + $0xe8] sm:$0xff]  }
   0x7   :  { %v2101_v14 = vld [vmem:[%s2890_s1 + $0x18] sm:$0xff]   ;;  %v2105_v18 = vld [vmem:[%s2890_s1 + $0x20] sm:$0xff]   ;;  %v2109_v22 = vld [vmem:[%s2890_s1 + $0x28] sm:$0xff]  }
   0x8   :  { %1770 = vmatpush3.bf16.msra.mxu0 %v2093_v6  ;;  %v2102_v15 = vld [vmem:[%s2890_s1 + $0x98] sm:$0xff]   ;;  %v2106_v19 = vld [vmem:[%s2890_s1 + $0xa0] sm:$0xff]   ;;  %v2110_v23 = vld [vmem:[%s2890_s1 + $0xa8] sm:$0xff]  }
   0x9   :  { %1834 = vmatpush3.bf16.msra.mxu1 %v2094_v7  ;;  %1771 = vmatprep.subr.bf16.mxu0 %v2095_v8  ;;  %v2111_v24 = vld [vmem:[%s2890_s1 + $0x70] sm:$0xff]   ;;  %v2115_v28 = vld [vmem:[%s2890_s1 + $0x78] sm:$0xff]   ;;  %v2119_v32 = vld [vmem:[%s2891_s0] ss:$36 sps:$4 sm:$0xff]  }
   0xa   :  { %1835 = vmatprep.subr.bf16.mxu1 %v2096_v9  ;;  %v2112_v25 = vld [vmem:[%s2890_s1 + $0xf0] sm:$0xff]   ;;  %v2116_v29 = vld [vmem:[%s2890_s1 + $0xf8] sm:$0xff]   ;;  %v2121_v33 = vld [vmem:[%s2891_s0 + $0x4] ss:$36 sps:$4 sm:$0xff]  }
   0xb   :  { %v2113_v26 = vld [vmem:[%s2890_s1 + $0x30] sm:$0xff]   ;;  %v2117_v30 = vld [vmem:[%s2890_s1 + $0x38] sm:$0xff]   ;;  %v2122_v34 = vld [vmem:[%s2891_s0 + $0x8] ss:$36 sps:$4 sm:$0xff]   ;;  %1081 = vmatprep.mubr.bf16.mxu0 %v2121_v33 }
   0xc   :  { %1772 = vmatpush3.bf16.msra.mxu0 %v2097_v10  ;;  %v2114_v27 = vld [vmem:[%s2890_s1 + $0xb0] sm:$0xff]   ;;  %v2118_v31 = vld [vmem:[%s2890_s1 + $0xb8] sm:$0xff]   ;;  %v2125_v36 = vld [vmem:[%s2890_s1 + $0x140] sm:$0xff]  }
   0xd   :  { %1836 = vmatpush3.bf16.msra.mxu1 %v2098_v11  ;;  %1773 = vmatprep.subr.bf16.mxu0 %v2099_v12  ;;  %v2124_v35 = vld [vmem:[%s2891_s0 + $0xc] ss:$36 sps:$4 sm:$0xff]   ;;  %v2126_v37 = vld [vmem:[%s2890_s1 + $0x100] sm:$0xff]   ;;  %v2129_v39 = vld [vmem:[%s2891_s0 + $0x54] ss:$36 sps:$4 sm:$0xff]  }
   0xe   :  { %1837 = vmatprep.subr.bf16.mxu1 %v2100_v13  ;;  %1178 = vmatprep.mubr.bf16.mxu1 %v2124_v35  ;;  %v2127_v38 = vld [vmem:[%s2891_s0 + $0x4c] ss:$36 sps:$4 sm:$0xff]   ;;  %v2135_v44 = vld [vmem:[%s2891_s0 + $0x94] ss:$36 sps:$4 sm:$0xff]   ;;  %v2137_v45 = vld [vmem:[%s2891_s0 + $0x9c] ss:$36 sps:$4 sm:$0xff]  }
   0xf   :  { %v2131_v40 = vld [vmem:[%s2891_s0 + $0x48] ss:$36 sps:$4 sm:$0xff]   ;;  %v2132_v41 = vld [vmem:[%s2891_s0 + $0x50] ss:$36 sps:$4 sm:$0xff]   ;;  %v2142_v47 = vld [vmem:[%s2890_s1 + $0x1c0] sm:$0xff]  }
  0x10   :  { %1774 = vmatpush3.bf16.msra.mxu0 %v2101_v14  ;;  %v2133_v42 = vld [vmem:[%s2890_s1 + $0x148] sm:$0xff]   ;;  %v2141_v46 = vld [vmem:[%s2890_s1 + $0x150] sm:$0xff]   ;;  %v2144_v50 = vld [vmem:[%s2890_s1 + $0x180] sm:$0xff]  }
  0x11   :  { %1838 = vmatpush3.bf16.msra.mxu1 %v2102_v15  ;;  %1775 = vmatprep.subr.bf16.mxu0 %v2103_v16  ;;  %v2134_v43 = vld [vmem:[%s2890_s1 + $0x108] sm:$0xff]   ;;  %v2139_v48 = vld [vmem:[%s2891_s0 + $0x90] ss:$36 sps:$4 sm:$0xff]   ;;  %v2140_v51 = vld [vmem:[%s2891_s0 + $0x98] ss:$36 sps:$4 sm:$0xff]  }
  0x12   :  { %1839 = vmatprep.subr.bf16.mxu1 %v2104_v17  ;;  %v2143_v49 = vld [vmem:[%s2890_s1 + $0x110] sm:$0xff]   ;;  %v2145_v52 = vld [vmem:[%s2891_s0 + $0xdc] ss:$36 sps:$4 sm:$0xff]   ;;  %v2147_v53 = vld [vmem:[%s2891_s0 + $0xe4] ss:$36 sps:$4 sm:$0xff]  }
  0x13   :  { %v2151_v54 = vld [vmem:[%s2890_s1 + $0x158] sm:$0xff]   ;;  %v2152_v55 = vld [vmem:[%s2890_s1 + $0x1c8] sm:$0xff]   ;;  %v2150_v59 = vld [vmem:[%s2891_s0 + $0xe0] ss:$36 sps:$4 sm:$0xff]  }
  0x14   :  { %1776 = vmatpush3.bf16.msra.mxu0 %v2105_v18  ;;  %v2153_v56 = vld [vmem:[%s2890_s1 + $0x118] sm:$0xff]   ;;  %v2154_v57 = vld [vmem:[%s2890_s1 + $0x188] sm:$0xff]   ;;  %v2161_v62 = vld [vmem:[%s2890_s1 + $0x160] sm:$0xff]  }
  0x15   :  { %1840 = vmatpush3.bf16.msra.mxu1 %v2106_v19  ;;  %1777 = vmatprep.subr.bf16.mxu0 %v2107_v20  ;;  %v2149_v58 = vld [vmem:[%s2891_s0 + $0xd8] ss:$36 sps:$4 sm:$0xff]   ;;  %v2155_v60 = vld [vmem:[%s2891_s0 + $0x124] ss:$36 sps:$4 sm:$0xff]   ;;  %v2157_v61 = vld [vmem:[%s2891_s0 + $0x12c] ss:$36 sps:$4 sm:$0xff]  }
  0x16   :  { %1841 = vmatprep.subr.bf16.mxu1 %v2108_v21  ;;  %v2162_v63 = vld [vmem:[%s2890_s1 + $0x1d0] sm:$0xff]   ;;  %v2163_v0 = vld [vmem:[%s2890_s1 + $0x120] sm:$0xff]   ;;  %v2160_v3 = vld [vmem:[%s2891_s0 + $0x128] ss:$36 sps:$4 sm:$0xff]  }
  0x17   :  { %v2164_v1 = vld [vmem:[%s2890_s1 + $0x190] sm:$0xff]   ;;  %v2159_v2 = vld [vmem:[%s2891_s0 + $0x120] ss:$36 sps:$4 sm:$0xff]   ;;  %v2171_v6 = vld [vmem:[%s2890_s1 + $0x168] sm:$0xff]  }
  0x18   :  { %1778 = vmatpush3.bf16.msra.mxu0 %v2109_v22  ;;  %v2165_v4 = vld [vmem:[%s2891_s0 + $0x16c] ss:$36 sps:$4 sm:$0xff]   ;;  %v2167_v5 = vld [vmem:[%s2891_s0 + $0x174] ss:$36 sps:$4 sm:$0xff]   ;;  %v2177_v14 = vld [vmem:[%s2891_s0 + $0x1bc] ss:$36 sps:$4 sm:$0xff]  }
  0x19   :  { %1842 = vmatpush3.bf16.msra.mxu1 %v2110_v23  ;;  %1779 = vmatprep.subr.bf16.mxu0 %v2111_v24  ;;  %v2172_v7 = vld [vmem:[%s2890_s1 + $0x1d8] sm:$0xff]   ;;  %v2173_v8 = vld [vmem:[%s2890_s1 + $0x128] sm:$0xff]   ;;  %v2170_v11 = vld [vmem:[%s2891_s0 + $0x170] ss:$36 sps:$4 sm:$0xff]  }
  0x1a   :  { %1843 = vmatprep.subr.bf16.mxu1 %v2112_v25  ;;  %v2174_v9 = vld [vmem:[%s2890_s1 + $0x198] sm:$0xff]   ;;  %v2169_v10 = vld [vmem:[%s2891_s0 + $0x168] ss:$36 sps:$4 sm:$0xff]   ;;  %v2181_v13 = vld [vmem:[%s2890_s1 + $0x170] sm:$0xff]  }
  0x1b   :  { %v2175_v12 = vld [vmem:[%s2891_s0 + $0x1b4] ss:$36 sps:$4 sm:$0xff]   ;;  %v2182_v15 = vld [vmem:[%s2890_s1 + $0x1e0] sm:$0xff]   ;;  %v2185_v18 = vld [vmem:[%s2890_s1 + $0x1e8] sm:$0xff]  }
  0x1c   :  { %1780 = vmatpush3.bf16.msra.mxu0 %v2113_v26  ;;  %v2183_v16 = vld [vmem:[%s2890_s1 + $0x130] sm:$0xff]   ;;  %v2184_v17 = vld [vmem:[%s2890_s1 + $0x1a0] sm:$0xff]   ;;  %v2186_v19 = vld [vmem:[%s2890_s1 + $0x1a8] sm:$0xff]  }
  0x1d   :  { %1844 = vmatpush3.bf16.msra.mxu1 %v2114_v27  ;;  %1781 = vmatprep.subr.bf16.mxu0 %v2115_v28  ;;  %v2179_v20 = vld [vmem:[%s2891_s0 + $0x1b0] ss:$36 sps:$4 sm:$0xff]   ;;  %v2180_v21 = vld [vmem:[%s2891_s0 + $0x1b8] ss:$36 sps:$4 sm:$0xff]   ;;  %v2189_v23 = vld [vmem:[%s2891_s0 + $0x204] ss:$36 sps:$4 sm:$0xff]  }
  0x1e   :  { %1845 = vmatprep.subr.bf16.mxu1 %v2116_v29  ;;  %v2187_v22 = vld [vmem:[%s2891_s0 + $0x1fc] ss:$36 sps:$4 sm:$0xff]   ;;  %v2194_v25 = vld [vmem:[%s2890_s1 + $0x1f0] sm:$0xff]  }
  0x1f   :  { %v2193_v24 = vld [vmem:[%s2890_s1 + $0x178] sm:$0xff]   ;;  %v2196_v27 = vld [vmem:[%s2890_s1 + $0x1b0] sm:$0xff]  }
  0x20   :  { %1782 = vmatpush3.bf16.msra.mxu0 %v2117_v30  ;;  %v2195_v26 = vld [vmem:[%s2890_s1 + $0x138] sm:$0xff]   ;;  %v2192_v30 = vld [vmem:[%s2891_s0 + $0x200] ss:$36 sps:$4 sm:$0xff]   ;;  %v2199_v35 = vld [vmem:[%s2891_s0 + $0x10] ss:$36 sps:$4 sm:$0xff]  }
  0x21   :  { %1846 = vmatpush3.bf16.msra.mxu1 %v2118_v31  ;;  %1895 = vmatprep.subr.bf16.mxu0 %v2125_v36  ;;  %v2197_v28 = vld [vmem:[%s2890_s1 + $0x1f8] sm:$0xff]  }
  0x22   :  { %1959 = vmatprep.subr.bf16.mxu1 %v2142_v47  ;;  %v2191_v29 = vld [vmem:[%s2891_s0 + $0x1f8] ss:$36 sps:$4 sm:$0xff]   ;;  %v2217_v47 = vld [vmem:[%s2891_s0 + $0xa0] ss:$36 sps:$4 sm:$0xff]  }
  0x23   :  { %1082 = vmatmul.mubr.bf16.vlgmr.msra.gmra.mrb[0].mxu0 %v2119_v32  ;;  %v2198_v31 = vld [vmem:[%s2890_s1 + $0x1b8] sm:$0xff]   ;;  %v2205_v32 = vld [vmem:[%s2890_s1 + $0x200] sm:$0xff]  }
  0x24   :  { %1179 = vmatmul.mubr.bf16.vlgmr.msra.gmra.mrb[0].mxu1 %v2122_v34  ;;  %1896 = vmatpush3.bf16.msra.mxu0 %v2126_v37  ;;  %v2201_v33 = vld [vmem:[%s2891_s0 + $0x14] ss:$36 sps:$4 sm:$0xff]   ;;  %v2204_v34 = vld [vmem:[%s2891_s0 + $0x1c] ss:$36 sps:$4 sm:$0xff]  }
  0x25   :  { %1089 = vmatprep.mubr.bf16.mxu0 %v2127_v38  ;;  %1186 = vmatprep.mubr.bf16.mxu1 %v2129_v39  ;;  %v2202_v36 = vld [vmem:[%s2891_s0 + $0x18] ss:$36 sps:$4 sm:$0xff]   ;;  %v2208_v38 = vld [vmem:[%s2891_s0 + $0x64] ss:$36 sps:$4 sm:$0xff]  }
  0x26   :  { %1897 = vmatprep.subr.bf16.mxu0 %v2133_v42  ;;  %1960 = vmatpush3.bf16.msra.mxu1 %v2144_v50  ;;  %v2206_v37 = vld [vmem:[%s2891_s0 + $0x5c] ss:$36 sps:$4 sm:$0xff]   ;;  %v2212_v39 = vld [vmem:[%s2890_s1 + $0x208] sm:$0xff]   ;;  %v2222_v50 = vld [vmem:[%s2891_s0 + $0xf4] ss:$36 sps:$4 sm:$0xff]  }
  0x27   :  { %1961 = vmatprep.subr.bf16.mxu1 %v2152_v55  ;;  %v2211_v42 = vld [vmem:[%s2891_s0 + $0x60] ss:$36 sps:$4 sm:$0xff]   ;;  %v2227_v55 = vld [vmem:[%s2891_s0 + $0x134] ss:$36 sps:$4 sm:$0xff]  }
  0x28   :  { %1898 = vmatpush3.bf16.msra.mxu0 %v2134_v43  ;;  %v2213_v43 = vld [vmem:[%s2891_s0 + $0xa4] ss:$36 sps:$4 sm:$0xff]  }
  0x29   :  { %1899 = vmatprep.subr.bf16.mxu0 %v2141_v46  ;;  %v2233_v46 = vld [vmem:[%s2890_s1 + $0x220] sm:$0xff]  }
  0x2a   :  { %1962 = vmatpush3.bf16.msra.mxu1 %v2154_v57  ;;  %v2254_v57 = vld [vmem:[%s2890_s1 + $0x238] sm:$0xff]  }
  0x2b   :  { %1090 = vmatmul.mubr.bf16.gmra.mrb[4].mxu0 %v2131_v40  ;;  %1963 = vmatprep.subr.bf16.mxu1 %v2162_v63  ;;  %v2219_v40 = vld [vmem:[%s2890_s1 + $0x210] sm:$0xff]   ;;  %v2239_v63 = vld [vmem:[%s2891_s0 + $0x180] ss:$36 sps:$4 sm:$0xff]  }
  0x2c   :  { %1187 = vmatmul.mubr.bf16.gmra.mrb[4].mxu1 %v2132_v41  ;;  %1097 = vmatprep.mubr.bf16.mxu0 %v2135_v44  ;;  %v2210_v41 = vld [vmem:[%s2891_s0 + $0x58] ss:$36 sps:$4 sm:$0xff]   ;;  %v2215_v44 = vld [vmem:[%s2891_s0 + $0xac] ss:$36 sps:$4 sm:$0xff]  }
  0x2d   :  { %1194 = vmatprep.mubr.bf16.mxu1 %v2137_v45  ;;  %1900 = vmatpush3.bf16.msra.mxu0 %v2143_v49  ;;  %v2226_v45 = vld [vmem:[%s2890_s1 + $0x218] sm:$0xff]   ;;  %v2220_v49 = vld [vmem:[%s2891_s0 + $0xec] ss:$36 sps:$4 sm:$0xff]  }
  0x2e   :  { %1901 = vmatprep.subr.bf16.mxu0 %v2151_v54  ;;  %1964 = vmatpush3.bf16.msra.mxu1 %v2164_v1  ;;  %v2225_v54 = vld [vmem:[%s2891_s0 + $0xf0] ss:$36 sps:$4 sm:$0xff]  }
  0x2f   :  { %1965 = vmatprep.subr.bf16.mxu1 %v2172_v7  ;;  %v2243_v1 = vld [vmem:[%s2891_s0 + $0x1cc] ss:$36 sps:$4 sm:$0xff]  }
  0x30   :  { %v2253_v7 = vld [vmem:[%s2891_s0 + $0x210] ss:$36 sps:$4 sm:$0xff]  }
  0x31   :  { %1902 = vmatpush3.bf16.msra.mxu0 %v2153_v56  ;;  %v2229_v56 = vld [vmem:[%s2891_s0 + $0x13c] ss:$36 sps:$4 sm:$0xff]  }
  0x32   :  { %1903 = vmatprep.subr.bf16.mxu0 %v2161_v62  ;;  %1966 = vmatpush3.bf16.msra.mxu1 %v2174_v9  ;;  %v2238_v62 = vld [vmem:[%s2891_s0 + $0x178] ss:$36 sps:$4 sm:$0xff]   ;;  %v2256_v9 = vld [vmem:[%s2891_s0 + $0x140] ss:$36 sps:$4 sm:$0xff]  }
  0x33   :  { %1098 = vmatmul.mubr.bf16.gmra.mrb[8].mxu0 %v2139_v48  ;;  %1967 = vmatprep.subr.bf16.mxu1 %v2182_v15  ;;  %v2218_v48 = vld [vmem:[%s2891_s0 + $0xa8] ss:$36 sps:$4 sm:$0xff]   ;;  %v2262_v15 = vld [vmem:[%s2891_s0 + $0x218] ss:$36 sps:$4 sm:$0xff]  }
  0x34   :  { %1195 = vmatmul.mubr.bf16.gmra.mrb[8].mxu1 %v2140_v51  ;;  %1105 = vmatprep.mubr.bf16.mxu0 %v2145_v52  ;;  %v2240_v51 = vld [vmem:[%s2890_s1 + $0x228] sm:$0xff]  }
  0x35   :  { %1202 = vmatprep.mubr.bf16.mxu1 %v2147_v53  ;;  %1904 = vmatpush3.bf16.msra.mxu0 %v2163_v0  ;;  %v2224_v52 = vld [vmem:[%s2891_s0 + $0xe8] ss:$36 sps:$4 sm:$0xff]   ;;  %v2247_v53 = vld [vmem:[%s2890_s1 + $0x230] sm:$0xff]  }
  0x36   :  { %1905 = vmatprep.subr.bf16.mxu0 %v2171_v6  ;;  %1968 = vmatpush3.bf16.msra.mxu1 %v2184_v17  ;;  %v2241_v0 = vld [vmem:[%s2891_s0 + $0x1c4] ss:$36 sps:$4 sm:$0xff]   ;;  %v2728_v17 = vld [vmem:[%s2892_s2] ss:$0 sm:$0xff] }
  0x37   :  { %1969 = vmatprep.subr.bf16.mxu1 %v2185_v18  ;;  %v2252_v6 = vld [vmem:[%s2891_s0 + $0x208] ss:$36 sps:$4 sm:$0xff]  }
  0x39   :  { %1906 = vmatpush3.bf16.msra.mxu0 %v2173_v8  ;;  %v2255_v8 = vld [vmem:[%s2891_s0 + $0x20] ss:$36 sps:$4 sm:$0xff]  }
  0x3a   :  { %1907 = vmatprep.subr.bf16.mxu0 %v2181_v13  ;;  %1970 = vmatpush3.bf16.msra.mxu1 %v2186_v19  ;;  %v2260_v13 = vld [vmem:[%s2891_s0 + $0x1d0] ss:$36 sps:$4 sm:$0xff]  }
  0x3b   :  { %1106 = vmatmul.mubr.bf16.gmra.mrb[12].mxu0 %v2149_v58  ;;  %1971 = vmatprep.subr.bf16.mxu1 %v2194_v25  ;;  %v2231_v58 = vld [vmem:[%s2891_s0 + $0x130] ss:$36 sps:$4 sm:$0xff]  }
  0x3c   :  { %1203 = vmatmul.mubr.bf16.gmra.mrb[12].mxu1 %v2150_v59  ;;  %1113 = vmatprep.mubr.bf16.mxu0 %v2155_v60  ;;  %v2232_v59 = vld [vmem:[%s2891_s0 + $0x138] ss:$36 sps:$4 sm:$0xff]  }
  0x3d   :  { %1210 = vmatprep.mubr.bf16.mxu1 %v2157_v61  ;;  %1908 = vmatpush3.bf16.msra.mxu0 %v2183_v16  ;;  %v2234_v60 = vld [vmem:[%s2891_s0 + $0x17c] ss:$36 sps:$4 sm:$0xff]   ;;  %v2236_v61 = vld [vmem:[%s2891_s0 + $0x184] ss:$36 sps:$4 sm:$0xff]  }
  0x3e   :  { %1909 = vmatprep.subr.bf16.mxu0 %v2193_v24  ;;  %1972 = vmatpush3.bf16.msra.mxu1 %v2196_v27 }
  0x3f   :  { %1973 = vmatprep.subr.bf16.mxu1 %v2197_v28 }
  0x41   :  { %1910 = vmatpush3.bf16.msra.mxu0 %v2195_v26 }
  0x42   :  { %2039 = vmatprep.subr.bf16.mxu0 %v2205_v32  ;;  %1974 = vmatpush3.bf16.msra.mxu1 %v2198_v31 }
  0x43   :  { %1114 = vmatmul.mubr.bf16.gmra.mrb[16].mxu0 %v2159_v2  ;;  %2071 = vmatprep.subr.bf16.mxu1 %v2205_v32  ;;  %v2245_v2 = vld [vmem:[%s2891_s0 + $0x1c0] ss:$36 sps:$4 sm:$0xff]  }
  0x44   :  { %1211 = vmatmul.mubr.bf16.gmra.mrb[16].mxu1 %v2160_v3  ;;  %1121 = vmatprep.mubr.bf16.mxu0 %v2165_v4  ;;  %v2246_v3 = vld [vmem:[%s2891_s0 + $0x1c8] ss:$36 sps:$4 sm:$0xff]  }
  0x45   :  { %1218 = vmatprep.mubr.bf16.mxu1 %v2167_v5  ;;  %v2248_v4 = vld [vmem:[%s2891_s0 + $0x20c] ss:$36 sps:$4 sm:$0xff]   ;;  %v2250_v5 = vld [vmem:[%s2891_s0 + $0x214] ss:$36 sps:$4 sm:$0xff]  }
  0x4b   :  { %1122 = vmatmul.mubr.bf16.gmra.mrb[20].mxu0 %v2169_v10  ;;  %v2257_v10 = vld [vmem:[%s2891_s0 + $0x68] ss:$36 sps:$4 sm:$0xff]  }
  0x4c   :  { %1219 = vmatmul.mubr.bf16.gmra.mrb[20].mxu1 %v2170_v11  ;;  %1129 = vmatprep.mubr.bf16.mxu0 %v2175_v12  ;;  %v2258_v11 = vld [vmem:[%s2891_s0 + $0x188] ss:$36 sps:$4 sm:$0xff]   ;;  %v2259_v12 = vld [vmem:[%s2891_s0 + $0xb0] ss:$36 sps:$4 sm:$0xff]  }
  0x4d   :  { %1226 = vmatprep.mubr.bf16.mxu1 %v2177_v14  ;;  %v2261_v14 = vld [vmem:[%s2891_s0 + $0xf8] ss:$36 sps:$4 sm:$0xff]  }
  0x53   :  { %1130 = vmatmul.mubr.bf16.gmra.mrb[24].mxu0 %v2179_v20 }
  0x54   :  { %1227 = vmatmul.mubr.bf16.gmra.mrb[24].mxu1 %v2180_v21  ;;  %1137 = vmatprep.mubr.bf16.mxu0 %v2187_v22 }
  0x55   :  { %1234 = vmatprep.mubr.bf16.mxu1 %v2189_v23 }
  0x5b   :  { %1138 = vmatmul.mubr.bf16.gmra.mrb[28].mxu0 %v2191_v29 }
  0x5c   :  { %1235 = vmatmul.mubr.bf16.gmra.mrb[28].mxu1 %v2192_v30  ;;  %1275 = vmatprep.mubr.bf16.mxu0 %v2201_v33 }
  0x5d   :  { %1372 = vmatprep.mubr.bf16.mxu1 %v2204_v34 }
  0x63   :  { %1276 = vmatmul.mubr.bf16.vlgmr.msra.gmra.mrb[32].mxu0 %v2199_v35 }
  0x64   :  { %1373 = vmatmul.mubr.bf16.vlgmr.msra.gmra.mrb[32].mxu1 %v2202_v36  ;;  %2040 = vmatpush3.bf16.msra.mxu0 %v2205_v32 }
  0x65   :  { %1283 = vmatprep.mubr.bf16.mxu0 %v2206_v37  ;;  %1380 = vmatprep.mubr.bf16.mxu1 %v2208_v38 }
  0x66   :  { %2041 = vmatprep.subr.bf16.mxu0 %v2212_v39  ;;  %2079 = vmatpush3.bf16.msra.mxu1 %v2205_v32 }
  0x67   :  { %2072 = vmatprep.subr.bf16.mxu1 %v2212_v39 }
  0x68   :  { %2042 = vmatpush3.bf16.msra.mxu0 %v2212_v39 }
  0x69   :  { %2043 = vmatprep.subr.bf16.mxu0 %v2219_v40 }
  0x6a   :  { %2080 = vmatpush3.bf16.msra.mxu1 %v2212_v39 }
  0x6b   :  { %1284 = vmatmul.mubr.bf16.gmra.mrb[36].mxu0 %v2210_v41  ;;  %2073 = vmatprep.subr.bf16.mxu1 %v2219_v40 }
  0x6c   :  { %1381 = vmatmul.mubr.bf16.gmra.mrb[36].mxu1 %v2211_v42  ;;  %1291 = vmatprep.mubr.bf16.mxu0 %v2213_v43 }
  0x6d   :  { %1388 = vmatprep.mubr.bf16.mxu1 %v2215_v44  ;;  %2044 = vmatpush3.bf16.msra.mxu0 %v2219_v40 }
  0x6e   :  { %2045 = vmatprep.subr.bf16.mxu0 %v2226_v45  ;;  %2081 = vmatpush3.bf16.msra.mxu1 %v2219_v40 }
  0x6f   :  { %2074 = vmatprep.subr.bf16.mxu1 %v2226_v45 }
  0x71   :  { %2046 = vmatpush3.bf16.msra.mxu0 %v2226_v45 }
  0x72   :  { %2047 = vmatprep.subr.bf16.mxu0 %v2233_v46  ;;  %2082 = vmatpush3.bf16.msra.mxu1 %v2226_v45 }
  0x73   :  { %1292 = vmatmul.mubr.bf16.gmra.mrb[40].mxu0 %v2217_v47  ;;  %2075 = vmatprep.subr.bf16.mxu1 %v2233_v46 }
  0x74   :  { %1389 = vmatmul.mubr.bf16.gmra.mrb[40].mxu1 %v2218_v48  ;;  %1299 = vmatprep.mubr.bf16.mxu0 %v2220_v49 }
  0x75   :  { %1396 = vmatprep.mubr.bf16.mxu1 %v2222_v50  ;;  %2048 = vmatpush3.bf16.msra.mxu0 %v2233_v46 }
  0x76   :  { %2049 = vmatprep.subr.bf16.mxu0 %v2240_v51  ;;  %2083 = vmatpush3.bf16.msra.mxu1 %v2233_v46 }
  0x77   :  { %2076 = vmatprep.subr.bf16.mxu1 %v2240_v51 }
  0x79   :  { %2050 = vmatpush3.bf16.msra.mxu0 %v2240_v51 }
  0x7a   :  { %2051 = vmatprep.subr.bf16.mxu0 %v2247_v53  ;;  %2084 = vmatpush3.bf16.msra.mxu1 %v2240_v51 }
  0x7b   :  { %1300 = vmatmul.mubr.bf16.gmra.mrb[44].mxu0 %v2224_v52  ;;  %2077 = vmatprep.subr.bf16.mxu1 %v2247_v53 }
  0x7c   :  { %1397 = vmatmul.mubr.bf16.gmra.mrb[44].mxu1 %v2225_v54  ;;  %1307 = vmatprep.mubr.bf16.mxu0 %v2227_v55 }
  0x7d   :  { %1404 = vmatprep.mubr.bf16.mxu1 %v2229_v56  ;;  %2052 = vmatpush3.bf16.msra.mxu0 %v2247_v53 }
  0x7e   :  { %2053 = vmatprep.subr.bf16.mxu0 %v2254_v57  ;;  %2085 = vmatpush3.bf16.msra.mxu1 %v2247_v53 }
  0x7f   :  { %2078 = vmatprep.subr.bf16.mxu1 %v2254_v57 }
  0x81   :  { %2054 = vmatpush3.bf16.msra.mxu0 %v2254_v57 }
  0x82   :  { %2086 = vmatpush3.bf16.msra.mxu1 %v2254_v57 }
  0x83   :  { %1308 = vmatmul.mubr.bf16.gmra.mrb[48].mxu0 %v2231_v58 }
  0x84   :  { %1405 = vmatmul.mubr.bf16.gmra.mrb[48].mxu1 %v2232_v59  ;;  %1315 = vmatprep.mubr.bf16.mxu0 %v2234_v60 }
  0x85   :  { %1412 = vmatprep.mubr.bf16.mxu1 %v2236_v61 }
  0x8b   :  { %1316 = vmatmul.mubr.bf16.gmra.mrb[52].mxu0 %v2238_v62 }
  0x8c   :  { %1413 = vmatmul.mubr.bf16.gmra.mrb[52].mxu1 %v2239_v63  ;;  %1323 = vmatprep.mubr.bf16.mxu0 %v2241_v0 }
  0x8d   :  { %1420 = vmatprep.mubr.bf16.mxu1 %v2243_v1 }
  0x93   :  { %1324 = vmatmul.mubr.bf16.gmra.mrb[56].mxu0 %v2245_v2 }
  0x94   :  { %1421 = vmatmul.mubr.bf16.gmra.mrb[56].mxu1 %v2246_v3  ;;  %1331 = vmatprep.mubr.bf16.mxu0 %v2248_v4 }
  0x95   :  { %1428 = vmatprep.mubr.bf16.mxu1 %v2250_v5 }
  0x9b   :  { %1332 = vmatmul.mubr.bf16.gmra.mrb[60].mxu0 %v2252_v6 }
  0x9c   :  { %1429 = vmatmul.mubr.bf16.gmra.mrb[60].mxu1 %v2253_v7  ;;  %2055 = vmatprep.mubr.bf16.mxu0 %v2255_v8 }
  0x9d   :  { %2063 = vmatprep.mubr.bf16.mxu1 %v2256_v9 }
  0xa3   :  { %2056 = vmatmul.mubr.bf16.vlgmr.msra.gmra.mrb[64].mxu0 %v2257_v10 }
  0xa4   :  { %2064 = vmatmul.mubr.bf16.vlgmr.msra.gmra.mrb[64].mxu1 %v2258_v11  ;;  %2059 = vmatprep.mubr.bf16.mxu0 %v2259_v12 }
  0xa5   :  { %2067 = vmatprep.mubr.bf16.mxu1 %v2260_v13 }
  0xab   :  { %2060 = vmatmul.mubr.bf16.gmra.mrb[68].mxu0 %v2261_v14 }
  0xac   :  { %2068 = vmatmul.mubr.bf16.gmra.mrb[68].mxu1 %v2262_v15 }
  0xf6   :  { %v1783_v16 = vpop.f32.mrb[0].mxu0 }
  0xf7   :  { %v1784_v18 = vpop.f32.mrb[1].mxu0  ;;  %v1847_v19 = vpop.f32.mrb[0].mxu1 }
  0xf8   :  { %v1785_v20 = vadd.f32 %v1784_v18, %v1783_v16  ;;  %v1786_v21 = vpop.f32.mrb[2].mxu0  ;;  %v1848_v22 = vpop.f32.mrb[1].mxu1 }
  0xf9   :  { %v1787_v23 = vpop.f32.mrb[3].mxu0  ;;  %v1849_v24 = vadd.f32 %v1848_v22, %v1847_v19  ;;  %v1850_v25 = vpop.f32.mrb[2].mxu1 }
  0xfa   :  { %v1084_v26 = vadd.f32 %v1785_v20, %v2728_v17  ;;  %v1788_v27 = vadd.f32 %v1787_v23, %v1786_v21  ;;  %v1851_v28 = vpop.f32.mrb[3].mxu1 }
  0xfb   :  { %v1852_v29 = vadd.f32 %v1851_v28, %v1850_v25 }
  0xfc   :  { %v1087_v30 = vadd.f32 %v1788_v27, %v2728_v17  ;;  %v2732_v31 = vadd.f32 %v1849_v24, %v1084_v26 }
  0xfe   :  { %v2734_v32 = vadd.f32 %v1852_v29, %v1087_v30  ;;  %v1789_v33 = vpop.f32.mrb[4].mxu0 }
  0xff   :  { %v1790_v34 = vpop.f32.mrb[5].mxu0  ;;  %v1853_v35 = vpop.f32.mrb[4].mxu1 }
 0x100   :  { %v1791_v36 = vadd.f32 %v1790_v34, %v1789_v33  ;;  %v1792_v37 = vpop.f32.mrb[6].mxu0  ;;  %v1854_v38 = vpop.f32.mrb[5].mxu1 }
 0x101   :  { %v1793_v39 = vpop.f32.mrb[7].mxu0  ;;  %v1855_v40 = vadd.f32 %v1854_v38, %v1853_v35  ;;  %v1856_v41 = vpop.f32.mrb[6].mxu1 }
 0x102   :  { %v1092_v42 = vadd.f32 %v1791_v36, %v2728_v17  ;;  %v1794_v43 = vadd.f32 %v1793_v39, %v1792_v37  ;;  %v1857_v44 = vpop.f32.mrb[7].mxu1 }
 0x103   :  { %v1858_v45 = vadd.f32 %v1857_v44, %v1856_v41 }
 0x104   :  { %v1095_v46 = vadd.f32 %v1794_v43, %v2728_v17  ;;  %v2738_v47 = vadd.f32 %v1855_v40, %v1092_v42 }
 0x106   :  { %v2740_v48 = vadd.f32 %v1858_v45, %v1095_v46  ;;  %v1795_v49 = vpop.f32.mrb[8].mxu0 }
 0x107   :  { %v1796_v50 = vpop.f32.mrb[9].mxu0  ;;  %v1859_v51 = vpop.f32.mrb[8].mxu1 }
 0x108   :  { %v1797_v52 = vadd.f32 %v1796_v50, %v1795_v49  ;;  %v1798_v53 = vpop.f32.mrb[10].mxu0  ;;  %v1860_v54 = vpop.f32.mrb[9].mxu1 }
 0x109   :  { %v1799_v55 = vpop.f32.mrb[11].mxu0  ;;  %v1861_v56 = vadd.f32 %v1860_v54, %v1859_v51  ;;  %v1862_v57 = vpop.f32.mrb[10].mxu1 }
 0x10a   :  { %v1100_v58 = vadd.f32 %v1797_v52, %v2728_v17  ;;  %v1800_v59 = vadd.f32 %v1799_v55, %v1798_v53  ;;  %v1863_v60 = vpop.f32.mrb[11].mxu1 }
 0x10b   :  { %v1864_v61 = vadd.f32 %v1863_v60, %v1862_v57 }
 0x10c   :  { %v1103_v62 = vadd.f32 %v1800_v59, %v2728_v17  ;;  %v2744_v63 = vadd.f32 %v1861_v56, %v1100_v58 }
 0x10e   :  { %v2746_v0 = vadd.f32 %v1864_v61, %v1103_v62  ;;  %v1801_v1 = vpop.f32.mrb[12].mxu0 }
 0x10f   :  { %v1802_v2 = vpop.f32.mrb[13].mxu0  ;;  %v1865_v3 = vpop.f32.mrb[12].mxu1 }
 0x110   :  { %v1803_v4 = vadd.f32 %v1802_v2, %v1801_v1  ;;  %v1804_v5 = vpop.f32.mrb[14].mxu0  ;;  %v1866_v6 = vpop.f32.mrb[13].mxu1 }
 0x111   :  { %v1805_v7 = vpop.f32.mrb[15].mxu0  ;;  %v1867_v8 = vadd.f32 %v1866_v6, %v1865_v3  ;;  %v1868_v9 = vpop.f32.mrb[14].mxu1 }
 0x112   :  { %v1108_v10 = vadd.f32 %v1803_v4, %v2728_v17  ;;  %v1806_v11 = vadd.f32 %v1805_v7, %v1804_v5  ;;  %v1869_v12 = vpop.f32.mrb[15].mxu1 }
 0x113   :  { %v1870_v13 = vadd.f32 %v1869_v12, %v1868_v9 }
 0x114   :  { %v1111_v14 = vadd.f32 %v1806_v11, %v2728_v17  ;;  %v2750_v15 = vadd.f32 %v1867_v8, %v1108_v10 }
 0x116   :  { %v2752_v16 = vadd.f32 %v1870_v13, %v1111_v14  ;;  %v1807_v18 = vpop.f32.mrb[16].mxu0 }
 0x117   :  { %v1808_v19 = vpop.f32.mrb[17].mxu0  ;;  %v1871_v20 = vpop.f32.mrb[16].mxu1 }
 0x118   :  { %v1809_v21 = vadd.f32 %v1808_v19, %v1807_v18  ;;  %v1810_v22 = vpop.f32.mrb[18].mxu0  ;;  %v1872_v23 = vpop.f32.mrb[17].mxu1 }
 0x119   :  { %v1811_v24 = vpop.f32.mrb[19].mxu0  ;;  %v1873_v25 = vadd.f32 %v1872_v23, %v1871_v20  ;;  %v1874_v26 = vpop.f32.mrb[18].mxu1 }
 0x11a   :  { %v1116_v27 = vadd.f32 %v1809_v21, %v2728_v17  ;;  %v1812_v28 = vadd.f32 %v1811_v24, %v1810_v22  ;;  %v1875_v29 = vpop.f32.mrb[19].mxu1 }
 0x11b   :  { %v1876_v30 = vadd.f32 %v1875_v29, %v1874_v26 }
 0x11c   :  { %v1119_v33 = vadd.f32 %v1812_v28, %v2728_v17  ;;  %v2756_v34 = vadd.f32 %v1873_v25, %v1116_v27 }
 0x11e   :  { %v2758_v35 = vadd.f32 %v1876_v30, %v1119_v33  ;;  %v1813_v36 = vpop.f32.mrb[20].mxu0 }
 0x11f   :  { %v1814_v37 = vpop.f32.mrb[21].mxu0  ;;  %v1877_v38 = vpop.f32.mrb[20].mxu1 }
 0x120   :  { %v1815_v39 = vadd.f32 %v1814_v37, %v1813_v36  ;;  %v1816_v40 = vpop.f32.mrb[22].mxu0  ;;  %v1878_v41 = vpop.f32.mrb[21].mxu1 }
 0x121   :  { %v1817_v42 = vpop.f32.mrb[23].mxu0  ;;  %v1879_v43 = vadd.f32 %v1878_v41, %v1877_v38  ;;  %v1880_v44 = vpop.f32.mrb[22].mxu1 }
 0x122   :  { %v1124_v45 = vadd.f32 %v1815_v39, %v2728_v17  ;;  %v1818_v46 = vadd.f32 %v1817_v42, %v1816_v40  ;;  %v1881_v49 = vpop.f32.mrb[23].mxu1 }
 0x123   :  { %v1882_v50 = vadd.f32 %v1881_v49, %v1880_v44 }
 0x124   :  { %v1127_v51 = vadd.f32 %v1818_v46, %v2728_v17  ;;  %v2762_v52 = vadd.f32 %v1879_v43, %v1124_v45 }
 0x126   :  { %v2764_v53 = vadd.f32 %v1882_v50, %v1127_v51  ;;  %v1819_v54 = vpop.f32.mrb[24].mxu0 }
 0x127   :  { %v1820_v55 = vpop.f32.mrb[25].mxu0  ;;  %v1883_v56 = vpop.f32.mrb[24].mxu1 }
 0x128   :  { %v1821_v57 = vadd.f32 %v1820_v55, %v1819_v54  ;;  %v1822_v58 = vpop.f32.mrb[26].mxu0  ;;  %v1884_v59 = vpop.f32.mrb[25].mxu1 }
 0x129   :  { %v1823_v60 = vpop.f32.mrb[27].mxu0  ;;  %v1885_v61 = vadd.f32 %v1884_v59, %v1883_v56  ;;  %v1886_v62 = vpop.f32.mrb[26].mxu1 }
 0x12a   :  { %v1132_v1 = vadd.f32 %v1821_v57, %v2728_v17  ;;  %v1824_v2 = vadd.f32 %v1823_v60, %v1822_v58  ;;  %v1887_v3 = vpop.f32.mrb[27].mxu1 }
 0x12b   :  { %v1888_v4 = vadd.f32 %v1887_v3, %v1886_v62 }
 0x12c   :  { %v1135_v5 = vadd.f32 %v1824_v2, %v2728_v17  ;;  %v2768_v6 = vadd.f32 %v1885_v61, %v1132_v1 }
 0x12e   :  { %v2770_v7 = vadd.f32 %v1888_v4, %v1135_v5  ;;  %v1825_v8 = vpop.f32.mrb[28].mxu0 }
 0x12f   :  { %v1826_v9 = vpop.f32.mrb[29].mxu0  ;;  %v1889_v10 = vpop.f32.mrb[28].mxu1 }
 0x130   :  { %v1827_v11 = vadd.f32 %v1826_v9, %v1825_v8  ;;  %v1828_v12 = vpop.f32.mrb[30].mxu0  ;;  %v1890_v13 = vpop.f32.mrb[29].mxu1 }
 0x131   :  { %v1829_v14 = vpop.f32.mrb[31].mxu0  ;;  %v1891_v18 = vadd.f32 %v1890_v13, %v1889_v10  ;;  %v1892_v19 = vpop.f32.mrb[30].mxu1 }
 0x132   :  { %v1140_v20 = vadd.f32 %v1827_v11, %v2728_v17  ;;  %v1830_v21 = vadd.f32 %v1829_v14, %v1828_v12  ;;  %v1893_v22 = vpop.f32.mrb[31].mxu1 }
 0x133   :  { %v1894_v23 = vadd.f32 %v1893_v22, %v1892_v19 }
 0x134   :  { %v1143_v24 = vadd.f32 %v1830_v21, %v2728_v17  ;;  %v2774_v25 = vadd.f32 %v1891_v18, %v1140_v20 }
 0x136   :  { %v2776_v26 = vadd.f32 %v1894_v23, %v1143_v24  ;;  %v1911_v27 = vpop.f32.mrb[32].mxu0 }
 0x137   :  { %v1912_v28 = vpop.f32.mrb[33].mxu0  ;;  %v1975_v29 = vpop.f32.mrb[32].mxu1 }
 0x138   :  { %v1913_v30 = vadd.f32 %v1912_v28, %v1911_v27  ;;  %v1914_v33 = vpop.f32.mrb[34].mxu0  ;;  %v1976_v36 = vpop.f32.mrb[33].mxu1 }
 0x139   :  { %v1915_v37 = vpop.f32.mrb[35].mxu0  ;;  %v1977_v38 = vadd.f32 %v1976_v36, %v1975_v29  ;;  %v1978_v39 = vpop.f32.mrb[34].mxu1 }
 0x13a   :  { %v1278_v40 = vadd.f32 %v1913_v30, %v2732_v31  ;;  %v1916_v41 = vadd.f32 %v1915_v37, %v1914_v33  ;;  %v1979_v42 = vpop.f32.mrb[35].mxu1 }
 0x13b   :  { %v1980_v43 = vadd.f32 %v1979_v42, %v1978_v39 }
 0x13c   :  { %v1281_v17 = vadd.f32 %v1916_v41, %v2734_v32  ;;  %v2780_v44 = vadd.f32 %v1977_v38, %v1278_v40 }
 0x13e   :  { %v1917_v45 = vpop.f32.mrb[36].mxu0  ;;  %v2782_v46 = vadd.f32 %v1980_v43, %v1281_v17 }
 0x13f   :  { %v1918_v49 = vpop.f32.mrb[37].mxu0  ;;  %v1981_v50 = vpop.f32.mrb[36].mxu1 }
 0x140   :  { %v1919_v51 = vadd.f32 %v1918_v49, %v1917_v45  ;;  %v1920_v54 = vpop.f32.mrb[38].mxu0  ;;  %v1982_v55 = vpop.f32.mrb[37].mxu1 }
 0x141   :  { %v1921_v56 = vpop.f32.mrb[39].mxu0  ;;  %v1983_v57 = vadd.f32 %v1982_v55, %v1981_v50  ;;  %v1984_v58 = vpop.f32.mrb[38].mxu1 }
 0x142   :  { %v1286_v31 = vadd.f32 %v1919_v51, %v2738_v47  ;;  %v1922_v59 = vadd.f32 %v1921_v56, %v1920_v54  ;;  %v1985_v60 = vpop.f32.mrb[39].mxu1 }
 0x143   :  { %v1986_v61 = vadd.f32 %v1985_v60, %v1984_v58 }
 0x144   :  { %v1289_v32 = vadd.f32 %v1922_v59, %v2740_v48  ;;  %v2786_v62 = vadd.f32 %v1983_v57, %v1286_v31 }
 0x146   :  { %v1923_v1 = vpop.f32.mrb[40].mxu0  ;;  %v2788_v2 = vadd.f32 %v1986_v61, %v1289_v32 }
 0x147   :  { %v1924_v3 = vpop.f32.mrb[41].mxu0  ;;  %v1987_v4 = vpop.f32.mrb[40].mxu1 }
 0x148   :  { %v1925_v5 = vadd.f32 %v1924_v3, %v1923_v1  ;;  %v1926_v8 = vpop.f32.mrb[42].mxu0  ;;  %v1988_v9 = vpop.f32.mrb[41].mxu1 }
 0x149   :  { %v1927_v10 = vpop.f32.mrb[43].mxu0  ;;  %v1989_v11 = vadd.f32 %v1988_v9, %v1987_v4  ;;  %v1990_v12 = vpop.f32.mrb[42].mxu1 }
 0x14a   :  { %v1294_v47 = vadd.f32 %v1925_v5, %v2744_v63  ;;  %v1928_v13 = vadd.f32 %v1927_v10, %v1926_v8  ;;  %v1991_v14 = vpop.f32.mrb[43].mxu1 }
 0x14b   :  { %v1992_v18 = vadd.f32 %v1991_v14, %v1990_v12 }
 0x14c   :  { %v1297_v48 = vadd.f32 %v1928_v13, %v2746_v0  ;;  %v2792_v19 = vadd.f32 %v1989_v11, %v1294_v47 }
 0x14e   :  { %v1929_v20 = vpop.f32.mrb[44].mxu0  ;;  %v2794_v21 = vadd.f32 %v1992_v18, %v1297_v48 }
 0x14f   :  { %v1930_v22 = vpop.f32.mrb[45].mxu0  ;;  %v1993_v23 = vpop.f32.mrb[44].mxu1 }
 0x150   :  { %v1931_v24 = vadd.f32 %v1930_v22, %v1929_v20  ;;  %v1932_v27 = vpop.f32.mrb[46].mxu0  ;;  %v1994_v28 = vpop.f32.mrb[45].mxu1 }
 0x151   :  { %v1933_v29 = vpop.f32.mrb[47].mxu0  ;;  %v1995_v30 = vadd.f32 %v1994_v28, %v1993_v23  ;;  %v1996_v33 = vpop.f32.mrb[46].mxu1 }
 0x152   :  { %v1302_v63 = vadd.f32 %v1931_v24, %v2750_v15  ;;  %v1934_v36 = vadd.f32 %v1933_v29, %v1932_v27  ;;  %v1997_v37 = vpop.f32.mrb[47].mxu1 }
 0x153   :  { %v1998_v38 = vadd.f32 %v1997_v37, %v1996_v33 }
 0x154   :  { %v1305_v0 = vadd.f32 %v1934_v36, %v2752_v16  ;;  %v2798_v39 = vadd.f32 %v1995_v30, %v1302_v63 }
 0x156   :  { %v1935_v40 = vpop.f32.mrb[48].mxu0  ;;  %v2800_v41 = vadd.f32 %v1998_v38, %v1305_v0 }
 0x157   :  { %v1936_v42 = vpop.f32.mrb[49].mxu0  ;;  %v1999_v43 = vpop.f32.mrb[48].mxu1 }
 0x158   :  { %v1937_v17 = vadd.f32 %v1936_v42, %v1935_v40  ;;  %v1938_v45 = vpop.f32.mrb[50].mxu0  ;;  %v2000_v49 = vpop.f32.mrb[49].mxu1 }
 0x159   :  { %v1939_v50 = vpop.f32.mrb[51].mxu0  ;;  %v2001_v51 = vadd.f32 %v2000_v49, %v1999_v43  ;;  %v2002_v54 = vpop.f32.mrb[50].mxu1 }
 0x15a   :  { %v1310_v15 = vadd.f32 %v1937_v17, %v2756_v34  ;;  %v1940_v55 = vadd.f32 %v1939_v50, %v1938_v45  ;;  %v2003_v56 = vpop.f32.mrb[51].mxu1 }
 0x15b   :  { %v2004_v57 = vadd.f32 %v2003_v56, %v2002_v54 }
 0x15c   :  { %v1313_v16 = vadd.f32 %v1940_v55, %v2758_v35  ;;  %v1407_v58 = vadd.f32 %v2001_v51, %v1310_v15 }
 0x15e   :  { %v1941_v31 = vpop.f32.mrb[52].mxu0  ;;  %v2804_v59 = vadd.f32 %v2004_v57, %v1313_v16 }
 0x15f   :  { %v1942_v60 = vpop.f32.mrb[53].mxu0  ;;  %v2005_v61 = vpop.f32.mrb[52].mxu1 }
 0x160   :  { %v1943_v32 = vadd.f32 %v1942_v60, %v1941_v31  ;;  %v1944_v1 = vpop.f32.mrb[54].mxu0  ;;  %v2006_v3 = vpop.f32.mrb[53].mxu1 }
 0x161   :  { %v1945_v4 = vpop.f32.mrb[55].mxu0  ;;  %v2007_v5 = vadd.f32 %v2006_v3, %v2005_v61  ;;  %v2008_v8 = vpop.f32.mrb[54].mxu1 }
 0x162   :  { %v1318_v9 = vadd.f32 %v1943_v32, %v2762_v52  ;;  %v1946_v34 = vadd.f32 %v1945_v4, %v1944_v1  ;;  %v2009_v10 = vpop.f32.mrb[55].mxu1 }
 0x163   :  { %v2010_v11 = vadd.f32 %v2009_v10, %v2008_v8 }
 0x164   :  { %v1321_v12 = vadd.f32 %v1946_v34, %v2764_v53  ;;  %v1415_v35 = vadd.f32 %v2007_v5, %v1318_v9 }
 0x166   :  { %v1947_v47 = vpop.f32.mrb[56].mxu0  ;;  %v1418_v13 = vadd.f32 %v2010_v11, %v1321_v12 }
 0x167   :  { %v1948_v14 = vpop.f32.mrb[57].mxu0  ;;  %v2011_v18 = vpop.f32.mrb[56].mxu1 }
 0x168   :  { %v1949_v48 = vadd.f32 %v1948_v14, %v1947_v47  ;;  %v1950_v20 = vpop.f32.mrb[58].mxu0  ;;  %v2012_v22 = vpop.f32.mrb[57].mxu1 }
 0x169   :  { %v1951_v23 = vpop.f32.mrb[59].mxu0  ;;  %v2013_v24 = vadd.f32 %v2012_v22, %v2011_v18  ;;  %v2014_v27 = vpop.f32.mrb[58].mxu1 }
 0x16a   :  { %v1326_v28 = vadd.f32 %v1949_v48, %v2768_v6  ;;  %v1952_v29 = vadd.f32 %v1951_v23, %v1950_v20  ;;  %v2015_v52 = vpop.f32.mrb[59].mxu1 }
 0x16b   :  { %v2016_v30 = vadd.f32 %v2015_v52, %v2014_v27 }
 0x16c   :  { %v1329_v33 = vadd.f32 %v1952_v29, %v2770_v7  ;;  %v1423_v63 = vadd.f32 %v2013_v24, %v1326_v28 }
 0x16e   :  { %v1953_v53 = vpop.f32.mrb[60].mxu0  ;;  %v2810_v36 = vadd.f32 %v2016_v30, %v1329_v33 }
 0x16f   :  { %v1954_v37 = vpop.f32.mrb[61].mxu0  ;;  %v2017_v38 = vpop.f32.mrb[60].mxu1 }
 0x170   :  { %v1955_v0 = vadd.f32 %v1954_v37, %v1953_v53  ;;  %v1956_v40 = vpop.f32.mrb[62].mxu0  ;;  %v2018_v42 = vpop.f32.mrb[61].mxu1 }
 0x171   :  { %v1957_v43 = vpop.f32.mrb[63].mxu0  ;;  %v2019_v17 = vadd.f32 %v2018_v42, %v2017_v38  ;;  %v2020_v45 = vpop.f32.mrb[62].mxu1 }
 0x172   :  { %v1334_v49 = vadd.f32 %v1955_v0, %v2774_v25  ;;  %v1958_v6 = vadd.f32 %v1957_v43, %v1956_v40  ;;  %v2021_v50 = vpop.f32.mrb[63].mxu1 }
 0x173   :  { %v2022_v51 = vadd.f32 %v2021_v50, %v2020_v45 }
 0x174   :  { %v1337_v54 = vadd.f32 %v1958_v6, %v2776_v26  ;;  %v1431_v7 = vadd.f32 %v2019_v17, %v1334_v49 }
 0x176   :  { %v2057_v15 = vpop.f32.mrb[64].mxu0  ;;  %v1434_v55 = vadd.f32 %v2022_v51, %v1337_v54 }
 0x177   :  { %v1480_v56 = vadd.f32 %v2057_v15, %v2786_v62  ;;  %v2065_v57 = vpop.f32.mrb[64].mxu1  ;;  %v1471_v16 = vpop.f32.mrb[65].mxu0 }
 0x178   :  { %v2815_v31 = vadd.f32 %v2065_v57, %v1415_v35  ;;  %v1472_v60 = vadd.f32 %v1471_v16, %v2780_v44  ;;  %v1503_v61 = vpop.f32.mrb[65].mxu1  ;;  %v2058_v32 = vpop.f32.mrb[66].mxu0 }
 0x179   :  { %1536 = vst [vmem:[%s2893_s3 + $0x10] sm:$0xff] %v1480_v56  ;;  %v1504_v25 = vadd.f32 %v1503_v61, %v1407_v58  ;;  %v1483_v26 = vadd.f32 %v2058_v32, %v2788_v2  ;;  %v2066_v1 = vpop.f32.mrb[66].mxu1  ;;  %v1474_v3 = vpop.f32.mrb[67].mxu0  ;;  %v1574_v8 = vmul.f32 %v1480_v56, %v1480_v56 }
 0x17a   :  { %1544 = vst [vmem:[%s2893_s3 + $0x50] sm:$0xff] %v2815_v31  ;;  %1534 = vst [vmem:[%s2893_s3] sm:$0xff] %v1472_v60  ;;  %v2829_v44 = vadd.f32 %v2066_v1, %v1418_v13  ;;  %v1475_v62 = vadd.f32 %v1474_v3, %v2782_v46  ;;  %v1506_v4 = vpop.f32.mrb[67].mxu1  ;;  %v1572_v58 = vmul.f32 %v1472_v60, %v1472_v60 }
 0x17b   :  { %1542 = vst [vmem:[%s2893_s3 + $0x40] sm:$0xff] %v1504_v25  ;;  %1537 = vst [vmem:[%s2893_s3 + $0x18] sm:$0xff] %v1483_v26  ;;  %v1507_v2 = vadd.f32 %v1506_v4, %v2804_v59  ;;  %v1575_v10 = vmul.f32 %v1483_v26, %v1483_v26  ;;  %v1580_v42 = vmul.f32 %v1504_v25, %v1504_v25 }
 0x17c   :  { %1545 = vst [vmem:[%s2893_s3 + $0x58] sm:$0xff] %v2829_v44  ;;  %1535 = vst [vmem:[%s2893_s3 + $0x8] sm:$0xff] %v1475_v62  ;;  %v1550_v46 = vadd.f32 %v1475_v62, %v1472_v60  ;;  %v1573_v5 = vmul.f32 %v1475_v62, %v1475_v62  ;;  %v1582_v50 = vmul.f32 %v2815_v31, %v2815_v31 }
 0x17d   :  { %1543 = vst [vmem:[%s2893_s3 + $0x48] sm:$0xff] %v1507_v2  ;;  %v1581_v45 = vmul.f32 %v1507_v2, %v1507_v2 }
 0x17e   :  { %v1551_v9 = vadd.f32 %v1550_v46, %v1480_v56  ;;  %v1588_v34 = vadd.f32 %v1573_v5, %v1572_v58  ;;  %v2061_v59 = vpop.f32.mrb[68].mxu0 }
 0x17f   :  { %v1496_v11 = vadd.f32 %v2061_v59, %v2798_v39  ;;  %v2069_v12 = vpop.f32.mrb[68].mxu1  ;;  %v1487_v35 = vpop.f32.mrb[69].mxu0 }
 0x180   :  { %v1589_v47 = vadd.f32 %v1588_v34, %v1574_v8  ;;  %v1528_v13 = vadd.f32 %v2069_v12, %v1431_v7  ;;  %v1488_v14 = vadd.f32 %v1487_v35, %v2792_v19  ;;  %v1552_v18 = vadd.f32 %v1551_v9, %v1483_v26  ;;  %v1519_v48 = vpop.f32.mrb[69].mxu1  ;;  %v2062_v20 = vpop.f32.mrb[70].mxu0 }
 0x181   :  { %1540 = vst [vmem:[%s2893_s3 + $0x30] sm:$0xff] %v1496_v11  ;;  %v1520_v22 = vadd.f32 %v1519_v48, %v1423_v63  ;;  %v1499_v23 = vadd.f32 %v2062_v20, %v2800_v41  ;;  %v2070_v24 = vpop.f32.mrb[70].mxu1  ;;  %v1490_v27 = vpop.f32.mrb[71].mxu0  ;;  %v1578_v37 = vmul.f32 %v1496_v11, %v1496_v11  ;;  %v1583_v7 = vmul.f32 %v2829_v44, %v2829_v44 }
 0x182   :  { %1548 = vst [vmem:[%s2893_s3 + $0x70] sm:$0xff] %v1528_v13  ;;  %1538 = vst [vmem:[%s2893_s3 + $0x20] sm:$0xff] %v1488_v14  ;;  %v1553_v19 = vadd.f32 %v1552_v18, %v1488_v14  ;;  %v1576_v39 = vmul.f32 %v1488_v14, %v1488_v14  ;;  %v1590_v28 = vadd.f32 %v1589_v47, %v1575_v10  ;;  %v1522_v29 = vpop.f32.mrb[71].mxu1 }
 0x183   :  { %1546 = vst [vmem:[%s2893_s3 + $0x60] sm:$0xff] %v1520_v22  ;;  %1541 = vst [vmem:[%s2893_s3 + $0x38] sm:$0xff] %v1499_v23  ;;  %v1531_v41 = vadd.f32 %v2070_v24, %v1434_v55  ;;  %v1491_v52 = vadd.f32 %v1490_v27, %v2794_v21  ;;  %v1523_v33 = vadd.f32 %v1522_v29, %v2810_v36 }
 0x184   :  { %v1591_v30 = vadd.f32 %v1590_v28, %v1576_v39  ;;  %v1579_v0 = vmul.f32 %v1499_v23, %v1499_v23  ;;  %v1584_v56 = vmul.f32 %v1520_v22, %v1520_v22 }
 0x185   :  { %1549 = vst [vmem:[%s2893_s3 + $0x78] sm:$0xff] %v1531_v41  ;;  %1539 = vst [vmem:[%s2893_s3 + $0x28] sm:$0xff] %v1491_v52  ;;  %v1554_v63 = vadd.f32 %v1553_v19, %v1491_v52  ;;  %v1577_v53 = vmul.f32 %v1491_v52, %v1491_v52  ;;  %v1585_v61 = vmul.f32 %v1523_v33, %v1523_v33 }
 0x186   :  { %1547 = vst [vmem:[%s2893_s3 + $0x68] sm:$0xff] %v1523_v33  ;;  %v1587_v3 = vmul.f32 %v1531_v41, %v1531_v41 }
 0x187   :  { %v1555_v38 = vadd.f32 %v1554_v63, %v1496_v11  ;;  %v1592_v21 = vadd.f32 %v1591_v30, %v1577_v53 }
 0x189   :  { %v1556_v40 = vadd.f32 %v1555_v38, %v1499_v23  ;;  %v1593_v36 = vadd.f32 %v1592_v21, %v1578_v37 }
 0x18b   :  { %v1557_v43 = vadd.f32 %v1556_v40, %v1504_v25  ;;  %v1594_v17 = vadd.f32 %v1593_v36, %v1579_v0  ;;  %v1586_v25 = vmul.f32 %v1528_v13, %v1528_v13 }
 0x18d   :  { %v1595_v49 = vadd.f32 %v1594_v17, %v1580_v42  ;;  %v1558_v6 = vadd.f32 %v1557_v43, %v1507_v2 }
 0x18f   :  { %v1559_v51 = vadd.f32 %v1558_v6, %v2815_v31  ;;  %v1596_v54 = vadd.f32 %v1595_v49, %v1581_v45 }
 0x191   :  { %v1560_v15 = vadd.f32 %v1559_v51, %v2829_v44  ;;  %v1597_v55 = vadd.f32 %v1596_v54, %v1582_v50 }
 0x193   :  { %v1561_v57 = vadd.f32 %v1560_v15, %v1520_v22  ;;  %v1598_v16 = vadd.f32 %v1597_v55, %v1583_v7 }
 0x195   :  { %v1562_v60 = vadd.f32 %v1561_v57, %v1523_v33  ;;  %v1599_v32 = vadd.f32 %v1598_v16, %v1584_v56 }
 0x197   :  { %v1563_v26 = vadd.f32 %v1562_v60, %v1528_v13  ;;  %v1600_v1 = vadd.f32 %v1599_v32, %v1585_v61 }
 0x199   :  { %v1564_v62 = vadd.f32 %v1563_v26, %v1531_v41  ;;  %v1601_v4 = vadd.f32 %v1600_v1, %v1586_v25 }
 0x19b   :  { %v1565_v31 = vrot.slane %v1564_v62, 4  ;;  %v1602_v2 = vadd.f32 %v1601_v4, %v1587_v3 }
 0x19d   :  { %v1566_v58 = vadd.f32 %v1565_v31, %v1564_v62  ;;  %v1603_v46 = vrot.slane %v1602_v2, 4 }
 0x19f   :  { %v1567_v5 = vrot.slane %v1566_v58, 2  ;;  %v1604_v8 = vadd.f32 %v1603_v46, %v1602_v2 }
 0x1a1   :  { %v1568_v44 = vadd.f32 %v1567_v5, %v1566_v58  ;;  %v1605_v9 = vrot.slane %v1604_v8, 2 }
 0x1a3   :  { %v1569_v34 = vrot.slane %v1568_v44, 1  ;;  %v1606_v59 = vadd.f32 %v1605_v9, %v1604_v8 }
 0x1a5   :  { %v1570_v10 = vadd.f32 %v1569_v34, %v1568_v44  ;;  %v1607_v11 = vrot.slane %v1606_v59, 1 }
 0x1a7   :  { %1571 = vst [vmem:[%s2894_s4] sm:$0x1] %v1570_v10  ;;  %v1608_v12 = vadd.f32 %v1607_v11, %v1606_v59 }
 0x1a9   :  { %1609 = vst [vmem:[%s2895_s5] sm:$0x1] %v1608_v12 }

// kernel: rc_generator_forward.30
= control target key start
LH: loop header
LB: loop body
LE: loop exit
PB: predicated region body
PF: predicated region fallthrough
CT: control target
= control target key end

     0   :  { %s494_s0 = inlined_call_operand.vmem [shape: f32[128,128], index: 0, kind: input, shape index: {}]   ;;  %s495_s1 = inlined_call_operand.vmem [shape: f32[1,128], index: 1, kind: input, shape index: {}]   ;;  %s496_s2 = inlined_call_operand.vmem [shape: f32[1,128], index: 2, kind: input, shape index: {}]   ;;  %s497_s3 = inlined_call_operand.vmem [shape: bf16[128,128], index: 3, kind: input, shape index: {}]   ;;  %s498_s4 = inlined_call_operand.vmem [shape: bf16[128,128], index: 4, kind: output, shape index: {}]  }
   0x1   :  { %v17_v0 = vld [vmem:[%s494_s0] sm:$0xff]  ;;  %v18_v1 = vld [vmem:[%s494_s0 + $0x8] sm:$0xff]  ;;  %v19_v7 = vld [vmem:[%s494_s0 + $0x10] sm:$0xff] }
   0x2   :  { %v365_v2 = vld [vmem:[%s495_s1] ss:$0 sm:$0xff]  ;;  %v20_v10 = vld [vmem:[%s494_s0 + $0x18] sm:$0xff]  ;;  %v317_v12 = vld [vmem:[%s497_s3 + $0x8] sm:$0xff]  }
   0x3   :  { %v40_v3 = vmul.f32 %v365_v2, %v17_v0  ;;  %v41_v4 = vmul.f32 %v365_v2, %v18_v1  ;;  %v372_v5 = vld [vmem:[%s496_s2] ss:$0 sm:$0xff]  ;;  %v42_v11 = vmul.f32 %v365_v2, %v19_v7  ;;  %v43_v16 = vmul.f32 %v365_v2, %v20_v10  ;;  %v22_v18 = vld [vmem:[%s494_s0 + $0x28] sm:$0xff]  ;;  %v318_v19 = vld [vmem:[%s497_s3 + $0x10] sm:$0xff]  }
   0x4   :  { %v246_v6 = vld [vmem:[%s497_s3] sm:$0xff]   ;;  %v251_v17 = vunpack.c.l.bf16 %v317_v12  ;;  %v252_v21 = vunpack.c.h.bf16 %v317_v12  ;;  %v45_v23 = vmul.f32 %v365_v2, %v22_v18  ;;  %v23_v24 = vld [vmem:[%s494_s0 + $0x30] sm:$0xff]  ;;  %v24_v25 = vld [vmem:[%s494_s0 + $0x38] sm:$0xff]  ;;  %v255_v29 = vunpack.c.l.bf16 %v318_v19 }
   0x5   :  { %v247_v8 = vunpack.c.l.bf16 %v246_v6  ;;  %v248_v9 = vunpack.c.h.bf16 %v246_v6  ;;  %v21_v13 = vld [vmem:[%s494_s0 + $0x20] sm:$0xff]  ;;  %v63_v14 = vadd.f32 %v372_v5, %v40_v3  ;;  %v64_v15 = vadd.f32 %v372_v5, %v41_v4  ;;  %v319_v30 = vld [vmem:[%s497_s3 + $0x18] sm:$0xff]   ;;  %v26_v40 = vld [vmem:[%s494_s0 + $0x48] sm:$0xff] }
   0x6   :  { %v65_v20 = vadd.f32 %v372_v5, %v42_v11  ;;  %v44_v22 = vmul.f32 %v365_v2, %v21_v13  ;;  %v66_v28 = vadd.f32 %v372_v5, %v43_v16  ;;  %v68_v33 = vadd.f32 %v372_v5, %v45_v23  ;;  %v25_v35 = vld [vmem:[%s494_s0 + $0x40] sm:$0xff]  ;;  %v27_v46 = vld [vmem:[%s494_s0 + $0x50] sm:$0xff]  ;;  %v28_v51 = vld [vmem:[%s494_s0 + $0x58] sm:$0xff] }
   0x7   :  { %v111_v26 = vadd.f32 %v247_v8, %v63_v14  ;;  %v112_v27 = vadd.f32 %v248_v9, %v64_v15  ;;  %v256_v34 = vunpack.c.h.bf16 %v318_v19  ;;  %v46_v38 = vmul.f32 %v365_v2, %v23_v24  ;;  %v320_v41 = vld [vmem:[%s497_s3 + $0x20] sm:$0xff]   ;;  %v321_v52 = vld [vmem:[%s497_s3 + $0x28] sm:$0xff]   ;;  %v322_v63 = vld [vmem:[%s497_s3 + $0x30] sm:$0xff]  }
   0x8   :  { %v113_v31 = vadd.f32 %v251_v17, %v65_v20  ;;  %v67_v32 = vadd.f32 %v372_v5, %v44_v22  ;;  %v114_v37 = vadd.f32 %v252_v21, %v66_v28  ;;  %v47_v39 = vmul.f32 %v365_v2, %v24_v25  ;;  %v29_v57 = vld [vmem:[%s494_s0 + $0x60] sm:$0xff]  ;;  %v30_v62 = vld [vmem:[%s494_s0 + $0x68] sm:$0xff]  ;;  %v31_v6 = vld [vmem:[%s494_s0 + $0x70] sm:$0xff] }
   0x9   :  { %v280_v36 = vpack.c.bf16 %v112_v27, %v111_v26  ;;  %v116_v43 = vadd.f32 %v256_v34, %v68_v33  ;;  %v259_v44 = vunpack.c.l.bf16 %v319_v30  ;;  %v260_v45 = vunpack.c.h.bf16 %v319_v30  ;;  %v32_v11 = vld [vmem:[%s494_s0 + $0x78] sm:$0xff] }
   0xa   :  { %v115_v42 = vadd.f32 %v255_v29, %v67_v32  ;;  %v285_v47 = vpack.c.bf16 %v114_v37, %v113_v31  ;;  %v69_v48 = vadd.f32 %v372_v5, %v46_v38  ;;  %v70_v49 = vadd.f32 %v372_v5, %v47_v39  ;;  %v323_v16 = vld [vmem:[%s497_s3 + $0x38] sm:$0xff]  }
   0xb   :  { %281 = vst [vmem:[%s498_s4] sm:$0xff] %v280_v36   ;;  %v48_v50 = vmul.f32 %v365_v2, %v25_v35  ;;  %v49_v54 = vmul.f32 %v365_v2, %v26_v40  ;;  %v263_v55 = vunpack.c.l.bf16 %v320_v41  ;;  %v264_v56 = vunpack.c.h.bf16 %v320_v41 }
   0xc   :  { %v290_v53 = vpack.c.bf16 %v116_v43, %v115_v42  ;;  %324 = vst [vmem:[%s498_s4 + $0x8] sm:$0xff] %v285_v47   ;;  %v117_v58 = vadd.f32 %v259_v44, %v69_v48  ;;  %v118_v59 = vadd.f32 %v260_v45, %v70_v49  ;;  %v50_v61 = vmul.f32 %v365_v2, %v27_v46 }
   0xd   :  { %v71_v60 = vadd.f32 %v372_v5, %v48_v50  ;;  %v72_v0 = vadd.f32 %v372_v5, %v49_v54  ;;  %v51_v1 = vmul.f32 %v365_v2, %v28_v51  ;;  %v267_v3 = vunpack.c.l.bf16 %v321_v52 }
   0xe   :  { %325 = vst [vmem:[%s498_s4 + $0x10] sm:$0xff] %v290_v53   ;;  %v268_v4 = vunpack.c.h.bf16 %v321_v52  ;;  %v295_v7 = vpack.c.bf16 %v118_v59, %v117_v58  ;;  %v73_v9 = vadd.f32 %v372_v5, %v50_v61  ;;  %v52_v10 = vmul.f32 %v365_v2, %v29_v57 }
   0xf   :  { %v119_v8 = vadd.f32 %v263_v55, %v71_v60  ;;  %v120_v12 = vadd.f32 %v264_v56, %v72_v0  ;;  %v74_v13 = vadd.f32 %v372_v5, %v51_v1  ;;  %v53_v14 = vmul.f32 %v365_v2, %v30_v62 }
  0x10   :  { %v271_v15 = vunpack.c.l.bf16 %v322_v63  ;;  %326 = vst [vmem:[%s498_s4 + $0x18] sm:$0xff] %v295_v7   ;;  %v121_v17 = vadd.f32 %v267_v3, %v73_v9  ;;  %v75_v18 = vadd.f32 %v372_v5, %v52_v10  ;;  %v272_v19 = vunpack.c.h.bf16 %v322_v63 }
  0x11   :  { %v54_v20 = vmul.f32 %v365_v2, %v31_v6  ;;  %v300_v21 = vpack.c.bf16 %v120_v12, %v119_v8  ;;  %v122_v22 = vadd.f32 %v268_v4, %v74_v13  ;;  %v76_v23 = vadd.f32 %v372_v5, %v53_v14 }
  0x12   :  { %v55_v24 = vmul.f32 %v365_v2, %v32_v11  ;;  %v123_v25 = vadd.f32 %v271_v15, %v75_v18  ;;  %v275_v27 = vunpack.c.l.bf16 %v323_v16  ;;  %v276_v28 = vunpack.c.h.bf16 %v323_v16 }
  0x13   :  { %v77_v26 = vadd.f32 %v372_v5, %v54_v20  ;;  %327 = vst [vmem:[%s498_s4 + $0x20] sm:$0xff] %v300_v21   ;;  %v305_v29 = vpack.c.bf16 %v122_v22, %v121_v17  ;;  %v124_v30 = vadd.f32 %v272_v19, %v76_v23 }
  0x14   :  { %v78_v31 = vadd.f32 %v372_v5, %v55_v24 }
  0x15   :  { %v125_v32 = vadd.f32 %v275_v27, %v77_v26  ;;  %328 = vst [vmem:[%s498_s4 + $0x28] sm:$0xff] %v305_v29   ;;  %v310_v33 = vpack.c.bf16 %v124_v30, %v123_v25 }
  0x16   :  { %v126_v2 = vadd.f32 %v276_v28, %v78_v31 }
  0x17   :  { %329 = vst [vmem:[%s498_s4 + $0x30] sm:$0xff] %v310_v33  }
  0x18   :  { %v315_v34 = vpack.c.bf16 %v126_v2, %v125_v32 }
  0x1a   :  { %330 = vst [vmem:[%s498_s4 + $0x38] sm:$0xff] %v315_v34  }

// kernel: rc_generator_forward.31
= control target key start
LH: loop header
LB: loop body
LE: loop exit
PB: predicated region body
PF: predicated region fallthrough
CT: control target
= control target key end

     0   :  { %s1619_s18 = smov 0   ;;  %s1621_s19 = smov 0   ;;  %s1826_s0 = inlined_call_operand.vmem [shape: bf16[4,128,512], index: 0, kind: input, shape index: {}]   ;;  %s1827_s1 = inlined_call_operand.vmem [shape: bf16[4,512,64], index: 1, kind: input, shape index: {}]   ;;  %s1828_s2 = inlined_call_operand.vmem [shape: f32[1,64], index: 2, kind: input, shape index: {}]   ;;  %s1829_s3 = inlined_call_operand.vmem [shape: f32[4,128,64], index: 3, kind: output, shape index: {0}]   ;;  %s1830_s4 = inlined_call_operand.vmem [shape: f32[4,1,1,64], index: 4, kind: output, shape index: {1}]   ;;  %s1831_s5 = inlined_call_operand.vmem [shape: f32[4,1,1,64], index: 5, kind: output, shape index: {2}]  }
   0x1   :  { %s1623_s20 = smov 0  }
   0x2 LB: > { %s28_s21 = sadd.s32 1, %s1583_s19  ;;  %p1256_p0 = scmp.ge.s32.totalorder %s1587_s20, 1  ;;  %s1587_s20 = sphi %s1623_s20, %s16_s20   ;;  %s1583_s19 = sphi %s1621_s19, %s1833_s19   ;;  %s1579_s18 = sphi %s1619_s18, %s1832_s18  }
   0x3   : > { %p30_p1 = scmp.ge.s32.totalorder %s28_s21, 4  ;;  %p228_p2 = scmp.lt.s32.totalorder %s1587_s20, 5 }
   0x5   : > { %s1835_s21 = smov (%p30_p1, %s28_s21), 0  ;;  %p229_p3 = pnand %p1256_p0, %p228_p2 }
   0x6   : > { %p283_p4 = scmp.lt.s32.totalorder (!%p229_p3), %s1579_s18, 3  ;;  %vm970_vm0 = vcmask (!%p229_p3), 523264   ;;  %vm1024_vm1 = vcmask (!%p229_p3), 516096  }
   0x7   : > { %232 = sbr.rel (%p229_p3) target bundleno = 346 (0x15a), region = 32 }
   0xe   : > { %s1837_s18 = smov (!%p283_p4, %s1579_s18), 3 }
   0xf   : > { %s1330_s22 = sshll.u32 %s1837_s18, 8  ;;  %s1332_s6 = sshll.u32 %s1837_s18, 7 }
  0x10   : > { %s1645_s25 = scalar_lea.vmem %s1827_s1, %s1330_s22  ;;  %s1682_s28 = scalar_lea.vmem %s1826_s0, %s1330_s22 }
  0x11   : > { %v1485_v0 = vld [vmem:[%s1645_s25 + $0x40] sm:$0xff]   ;;  %v1489_v4 = vld [vmem:[%s1645_s25 + $0x48] sm:$0xff]   ;;  %v1493_v8 = vld [vmem:[%s1645_s25 + $0x50] sm:$0xff]   ;;  %s1728_s9 = scalar_lea.vmem %s1829_s3, %s1332_s6  ;;  %s313_s12 = scalar_lea.vmem %s1830_s4, %s1837_s18 }
  0x12   : > { %v1486_v1 = vld [vmem:[%s1645_s25 + $0xc0] sm:$0xff]   ;;  %1333 = vmatprep.subr.bf16.mxu0 %v1485_v0  ;;  %v1490_v5 = vld [vmem:[%s1645_s25 + $0xc8] sm:$0xff]   ;;  %v1494_v9 = vld [vmem:[%s1645_s25 + $0xd0] sm:$0xff]   ;;  %s319_s15 = scalar_lea.vmem %s1831_s5, %s1837_s18 }
  0x13   : > { %v1487_v2 = vld [vmem:[%s1645_s25] sm:$0xff]   ;;  %1397 = vmatprep.subr.bf16.mxu1 %v1486_v1  ;;  %v1491_v6 = vld [vmem:[%s1645_s25 + $0x8] sm:$0xff]   ;;  %v1495_v10 = vld [vmem:[%s1645_s25 + $0x10] sm:$0xff]  }
  0x14   : > { %v1488_v3 = vld [vmem:[%s1645_s25 + $0x80] sm:$0xff]   ;;  %1334 = vmatpush3.bf16.msra.mxu0 %v1487_v2  ;;  %v1492_v7 = vld [vmem:[%s1645_s25 + $0x88] sm:$0xff]   ;;  %v1496_v11 = vld [vmem:[%s1645_s25 + $0x90] sm:$0xff]  }
  0x15   : > { %1398 = vmatpush3.bf16.msra.mxu1 %v1488_v3  ;;  %1335 = vmatprep.subr.bf16.mxu0 %v1489_v4  ;;  %v1497_v12 = vld [vmem:[%s1645_s25 + $0x58] sm:$0xff]   ;;  %v1501_v16 = vld [vmem:[%s1645_s25 + $0x60] sm:$0xff]   ;;  %v1505_v20 = vld [vmem:[%s1645_s25 + $0x68] sm:$0xff]  }
  0x16   : > { %1399 = vmatprep.subr.bf16.mxu1 %v1490_v5  ;;  %v1498_v13 = vld [vmem:[%s1645_s25 + $0xd8] sm:$0xff]   ;;  %v1502_v17 = vld [vmem:[%s1645_s25 + $0xe0] sm:$0xff]   ;;  %v1506_v21 = vld [vmem:[%s1645_s25 + $0xe8] sm:$0xff]  }
  0x17   : > { %v1499_v14 = vld [vmem:[%s1645_s25 + $0x18] sm:$0xff]   ;;  %v1503_v18 = vld [vmem:[%s1645_s25 + $0x20] sm:$0xff]   ;;  %v1507_v22 = vld [vmem:[%s1645_s25 + $0x28] sm:$0xff]  }
  0x18   : > { %1336 = vmatpush3.bf16.msra.mxu0 %v1491_v6  ;;  %v1500_v15 = vld [vmem:[%s1645_s25 + $0x98] sm:$0xff]   ;;  %v1504_v19 = vld [vmem:[%s1645_s25 + $0xa0] sm:$0xff]   ;;  %v1508_v23 = vld [vmem:[%s1645_s25 + $0xa8] sm:$0xff]  }
  0x19   : > { %1400 = vmatpush3.bf16.msra.mxu1 %v1492_v7  ;;  %1337 = vmatprep.subr.bf16.mxu0 %v1493_v8  ;;  %v1509_v24 = vld [vmem:[%s1645_s25 + $0x70] sm:$0xff]   ;;  %v1513_v28 = vld [vmem:[%s1645_s25 + $0x78] sm:$0xff]   ;;  %v1721_v2 = vld [vmem:[%s1828_s2] ss:$0 sm:$0xff] }
  0x1a   : > { %1401 = vmatprep.subr.bf16.mxu1 %v1494_v9  ;;  %v1510_v25 = vld [vmem:[%s1645_s25 + $0xf0] sm:$0xff]   ;;  %v1514_v29 = vld [vmem:[%s1645_s25 + $0xf8] sm:$0xff]  }
  0x1b   : > { %v1511_v26 = vld [vmem:[%s1645_s25 + $0x30] sm:$0xff]   ;;  %v1515_v30 = vld [vmem:[%s1645_s25 + $0x38] sm:$0xff]  }
  0x1c   : > { %1338 = vmatpush3.bf16.msra.mxu0 %v1495_v10  ;;  %v1512_v27 = vld [vmem:[%s1645_s25 + $0xb0] sm:$0xff]   ;;  %v1516_v31 = vld [vmem:[%s1645_s25 + $0xb8] sm:$0xff]  }
  0x1d   : > { %1402 = vmatpush3.bf16.msra.mxu1 %v1496_v11  ;;  %1339 = vmatprep.subr.bf16.mxu0 %v1497_v12  ;;  %v1517_v32 = vld [vmem:[%s1682_s28] ss:$16 sps:$4 sm:$0xff]   ;;  %v1519_v33 = vld [vmem:[%s1682_s28 + $0x4] ss:$16 sps:$4 sm:$0xff]   ;;  %v1520_v34 = vld [vmem:[%s1682_s28 + $0x8] ss:$16 sps:$4 sm:$0xff]  }
  0x1e   : > { %1403 = vmatprep.subr.bf16.mxu1 %v1498_v13  ;;  %v1522_v35 = vld [vmem:[%s1682_s28 + $0xc] ss:$16 sps:$4 sm:$0xff]   ;;  %808 = vmatprep.mubr.bf16.mxu0 %v1519_v33  ;;  %v1523_v36 = vld [vmem:[%s1682_s28 + $0x24] ss:$16 sps:$4 sm:$0xff]   ;;  %v1527_v38 = vld [vmem:[%s1682_s28 + $0x20] ss:$16 sps:$4 sm:$0xff]  }
  0x1f   : > { %905 = vmatprep.mubr.bf16.mxu1 %v1522_v35  ;;  %v1525_v37 = vld [vmem:[%s1682_s28 + $0x2c] ss:$16 sps:$4 sm:$0xff]   ;;  %v1528_v39 = vld [vmem:[%s1682_s28 + $0x28] ss:$16 sps:$4 sm:$0xff]   ;;  %v1529_v40 = vld [vmem:[%s1682_s28 + $0x44] ss:$16 sps:$4 sm:$0xff]  }
  0x20   : > { %1340 = vmatpush3.bf16.msra.mxu0 %v1499_v14  ;;  %v1531_v41 = vld [vmem:[%s1682_s28 + $0x4c] ss:$16 sps:$4 sm:$0xff]   ;;  %v1533_v42 = vld [vmem:[%s1682_s28 + $0x40] ss:$16 sps:$4 sm:$0xff]   ;;  %v1534_v43 = vld [vmem:[%s1682_s28 + $0x48] ss:$16 sps:$4 sm:$0xff]  }
  0x21   : > { %1404 = vmatpush3.bf16.msra.mxu1 %v1500_v15  ;;  %1341 = vmatprep.subr.bf16.mxu0 %v1501_v16  ;;  %v1535_v44 = vld [vmem:[%s1682_s28 + $0x64] ss:$16 sps:$4 sm:$0xff]   ;;  %v1537_v45 = vld [vmem:[%s1682_s28 + $0x6c] ss:$16 sps:$4 sm:$0xff]   ;;  %v1539_v46 = vld [vmem:[%s1682_s28 + $0x60] ss:$16 sps:$4 sm:$0xff]  }
  0x22   : > { %1405 = vmatprep.subr.bf16.mxu1 %v1502_v17  ;;  %v1540_v47 = vld [vmem:[%s1682_s28 + $0x68] ss:$16 sps:$4 sm:$0xff]   ;;  %v1541_v48 = vld [vmem:[%s1682_s28 + $0x84] ss:$16 sps:$4 sm:$0xff]   ;;  %v1543_v49 = vld [vmem:[%s1682_s28 + $0x8c] ss:$16 sps:$4 sm:$0xff]  }
  0x23   : > { %v1545_v50 = vld [vmem:[%s1682_s28 + $0x80] ss:$16 sps:$4 sm:$0xff]   ;;  %v1546_v51 = vld [vmem:[%s1682_s28 + $0x88] ss:$16 sps:$4 sm:$0xff]   ;;  %v1547_v52 = vld [vmem:[%s1682_s28 + $0xa4] ss:$16 sps:$4 sm:$0xff]  }
  0x24   : > { %1342 = vmatpush3.bf16.msra.mxu0 %v1503_v18  ;;  %v1549_v53 = vld [vmem:[%s1682_s28 + $0xac] ss:$16 sps:$4 sm:$0xff]   ;;  %v1551_v54 = vld [vmem:[%s1682_s28 + $0xa0] ss:$16 sps:$4 sm:$0xff]   ;;  %v1552_v55 = vld [vmem:[%s1682_s28 + $0xa8] ss:$16 sps:$4 sm:$0xff]  }
  0x25   : > { %1406 = vmatpush3.bf16.msra.mxu1 %v1504_v19  ;;  %1343 = vmatprep.subr.bf16.mxu0 %v1505_v20  ;;  %v1553_v56 = vld [vmem:[%s1682_s28 + $0xc4] ss:$16 sps:$4 sm:$0xff]   ;;  %v1555_v57 = vld [vmem:[%s1682_s28 + $0xcc] ss:$16 sps:$4 sm:$0xff]   ;;  %v1557_v58 = vld [vmem:[%s1682_s28 + $0xc0] ss:$16 sps:$4 sm:$0xff]  }
  0x26   : > { %1407 = vmatprep.subr.bf16.mxu1 %v1506_v21  ;;  %v1558_v59 = vld [vmem:[%s1682_s28 + $0xc8] ss:$16 sps:$4 sm:$0xff]   ;;  %v1559_v60 = vld [vmem:[%s1682_s28 + $0xe4] ss:$16 sps:$4 sm:$0xff]   ;;  %v1561_v61 = vld [vmem:[%s1682_s28 + $0xec] ss:$16 sps:$4 sm:$0xff]  }
  0x27   : > { %v1563_v62 = vld [vmem:[%s1682_s28 + $0xe0] ss:$16 sps:$4 sm:$0xff]   ;;  %v1564_v63 = vld [vmem:[%s1682_s28 + $0xe8] ss:$16 sps:$4 sm:$0xff]  }
  0x28   : > { %1344 = vmatpush3.bf16.msra.mxu0 %v1507_v22 }
  0x29   : > { %1408 = vmatpush3.bf16.msra.mxu1 %v1508_v23  ;;  %1345 = vmatprep.subr.bf16.mxu0 %v1509_v24 }
  0x2a   : > { %1409 = vmatprep.subr.bf16.mxu1 %v1510_v25 }
  0x2c   : > { %1346 = vmatpush3.bf16.msra.mxu0 %v1511_v26 }
  0x2d   : > { %1410 = vmatpush3.bf16.msra.mxu1 %v1512_v27  ;;  %1347 = vmatprep.subr.bf16.mxu0 %v1513_v28 }
  0x2e   : > { %1411 = vmatprep.subr.bf16.mxu1 %v1514_v29 }
  0x30   : > { %1348 = vmatpush3.bf16.msra.mxu0 %v1515_v30 }
  0x31   : > { %1412 = vmatpush3.bf16.msra.mxu1 %v1516_v31 }
  0x33   : > { %809 = vmatmul.mubr.bf16.vlgmr.msra.gmra.mrb[0].mxu0 %v1517_v32 }
  0x34   : > { %906 = vmatmul.mubr.bf16.vlgmr.msra.gmra.mrb[0].mxu1 %v1520_v34  ;;  %816 = vmatprep.mubr.bf16.mxu0 %v1523_v36 }
  0x35   : > { %913 = vmatprep.mubr.bf16.mxu1 %v1525_v37 }
  0x3b   : > { %817 = vmatmul.mubr.bf16.gmra.mrb[4].mxu0 %v1527_v38 }
  0x3c   : > { %914 = vmatmul.mubr.bf16.gmra.mrb[4].mxu1 %v1528_v39  ;;  %824 = vmatprep.mubr.bf16.mxu0 %v1529_v40 }
  0x3d   : > { %921 = vmatprep.mubr.bf16.mxu1 %v1531_v41 }
  0x43   : > { %825 = vmatmul.mubr.bf16.gmra.mrb[8].mxu0 %v1533_v42 }
  0x44   : > { %922 = vmatmul.mubr.bf16.gmra.mrb[8].mxu1 %v1534_v43  ;;  %832 = vmatprep.mubr.bf16.mxu0 %v1535_v44 }
  0x45   : > { %929 = vmatprep.mubr.bf16.mxu1 %v1537_v45 }
  0x4b   : > { %833 = vmatmul.mubr.bf16.gmra.mrb[12].mxu0 %v1539_v46 }
  0x4c   : > { %930 = vmatmul.mubr.bf16.gmra.mrb[12].mxu1 %v1540_v47  ;;  %840 = vmatprep.mubr.bf16.mxu0 %v1541_v48 }
  0x4d   : > { %937 = vmatprep.mubr.bf16.mxu1 %v1543_v49 }
  0x53   : > { %841 = vmatmul.mubr.bf16.gmra.mrb[16].mxu0 %v1545_v50 }
  0x54   : > { %938 = vmatmul.mubr.bf16.gmra.mrb[16].mxu1 %v1546_v51  ;;  %848 = vmatprep.mubr.bf16.mxu0 %v1547_v52 }
  0x55   : > { %945 = vmatprep.mubr.bf16.mxu1 %v1549_v53 }
  0x5b   : > { %849 = vmatmul.mubr.bf16.gmra.mrb[20].mxu0 %v1551_v54 }
  0x5c   : > { %946 = vmatmul.mubr.bf16.gmra.mrb[20].mxu1 %v1552_v55  ;;  %856 = vmatprep.mubr.bf16.mxu0 %v1553_v56 }
  0x5d   : > { %953 = vmatprep.mubr.bf16.mxu1 %v1555_v57 }
  0x63   : > { %857 = vmatmul.mubr.bf16.gmra.mrb[24].mxu0 %v1557_v58 }
  0x64   : > { %954 = vmatmul.mubr.bf16.gmra.mrb[24].mxu1 %v1558_v59  ;;  %864 = vmatprep.mubr.bf16.mxu0 %v1559_v60 }
  0x65   : > { %961 = vmatprep.mubr.bf16.mxu1 %v1561_v61 }
  0x6b   : > { %865 = vmatmul.mubr.bf16.gmra.mrb[28].mxu0 %v1563_v62 }
  0x6c   : > { %962 = vmatmul.mubr.bf16.gmra.mrb[28].mxu1 %v1564_v63 }
 0x106   : > { %v1349_v0 = vpop.f32.mrb[0].mxu0 }
 0x107   : > { %v1413_v1 = vpop.f32.mrb[0].mxu1  ;;  %v1350_v3 = vpop.f32.mrb[1].mxu0 }
 0x108   : > { %v1351_v4 = vadd.f32 %v1350_v3, %v1349_v0  ;;  %v1414_v5 = vpop.f32.mrb[1].mxu1  ;;  %v1352_v6 = vpop.f32.mrb[2].mxu0 }
 0x109   : > { %v1415_v7 = vadd.f32 %v1414_v5, %v1413_v1  ;;  %v1416_v8 = vpop.f32.mrb[2].mxu1  ;;  %v1353_v9 = vpop.f32.mrb[3].mxu0 }
 0x10a   : > { %v811_v10 = vadd.f32 %v1351_v4, %v1721_v2  ;;  %v1354_v11 = vadd.f32 %v1353_v9, %v1352_v6  ;;  %v1417_v12 = vpop.f32.mrb[3].mxu1 }
 0x10b   : > { %v1418_v13 = vadd.f32 %v1417_v12, %v1416_v8 }
 0x10c   : > { %v908_v14 = vadd.f32 %v1415_v7, %v811_v10  ;;  %v814_v15 = vadd.f32 %v1354_v11, %v1721_v2 }
 0x10e   : > { %971 = vst.msk [vmem:[%s1728_s9] sm:$0xff] %vm970_vm0, %v908_v14  ;;  %v1026_v16 = vmul.f32 %v908_v14, %v908_v14  ;;  %v911_v17 = vadd.f32 %v1418_v13, %v814_v15  ;;  %v1355_v18 = vpop.f32.mrb[4].mxu0  ;;  %v987_v21 = vsel %vm970_vm0, %v908_v14, 0.0 }
 0x10f   : > { %v1419_v19 = vpop.f32.mrb[4].mxu1  ;;  %v1356_v20 = vpop.f32.mrb[5].mxu0 }
 0x110   : > { %972 = vst.msk [vmem:[%s1728_s9 + $0x8] sm:$0xff] %vm970_vm0, %v911_v17  ;;  %v988_v22 = vsel %vm970_vm0, %v911_v17, 0.0  ;;  %v1027_v23 = vmul.f32 %v911_v17, %v911_v17  ;;  %v1357_v24 = vadd.f32 %v1356_v20, %v1355_v18  ;;  %v1420_v25 = vpop.f32.mrb[5].mxu1  ;;  %v1358_v26 = vpop.f32.mrb[6].mxu0  ;;  %v1042_v31 = vsel %vm970_vm0, %v1026_v16, 0.0 }
 0x111   : > { %v989_v27 = vadd.f32 %v988_v22, %v987_v21  ;;  %v1421_v28 = vadd.f32 %v1420_v25, %v1419_v19  ;;  %v1422_v29 = vpop.f32.mrb[6].mxu1  ;;  %v1359_v30 = vpop.f32.mrb[7].mxu0 }
 0x112   : > { %v1043_v32 = vsel %vm970_vm0, %v1027_v23, 0.0  ;;  %v819_v33 = vadd.f32 %v1357_v24, %v1721_v2  ;;  %v1360_v34 = vadd.f32 %v1359_v30, %v1358_v26  ;;  %v1423_v35 = vpop.f32.mrb[7].mxu1 }
 0x113   : > { %v1044_v36 = vadd.f32 %v1043_v32, %v1042_v31  ;;  %v1424_v37 = vadd.f32 %v1423_v35, %v1422_v29 }
 0x114   : > { %v916_v38 = vadd.f32 %v1421_v28, %v819_v33  ;;  %v822_v39 = vadd.f32 %v1360_v34, %v1721_v2 }
 0x116   : > { %973 = vst.msk [vmem:[%s1728_s9 + $0x10] sm:$0xff] %vm970_vm0, %v916_v38  ;;  %v990_v40 = vsel %vm970_vm0, %v916_v38, 0.0  ;;  %v1028_v41 = vmul.f32 %v916_v38, %v916_v38  ;;  %v919_v42 = vadd.f32 %v1424_v37, %v822_v39  ;;  %v1361_v43 = vpop.f32.mrb[8].mxu0 }
 0x117   : > { %v991_v44 = vadd.f32 %v990_v40, %v989_v27  ;;  %v1425_v45 = vpop.f32.mrb[8].mxu1  ;;  %v1362_v46 = vpop.f32.mrb[9].mxu0 }
 0x118   : > { %v1045_v47 = vsel %vm970_vm0, %v1028_v41, 0.0  ;;  %974 = vst.msk [vmem:[%s1728_s9 + $0x18] sm:$0xff] %vm970_vm0, %v919_v42  ;;  %v992_v48 = vsel %vm970_vm0, %v919_v42, 0.0  ;;  %v1029_v49 = vmul.f32 %v919_v42, %v919_v42  ;;  %v1363_v50 = vadd.f32 %v1362_v46, %v1361_v43  ;;  %v1426_v51 = vpop.f32.mrb[9].mxu1  ;;  %v1364_v52 = vpop.f32.mrb[10].mxu0 }
 0x119   : > { %v1046_v53 = vadd.f32 %v1045_v47, %v1044_v36  ;;  %v993_v54 = vadd.f32 %v992_v48, %v991_v44  ;;  %v1427_v55 = vadd.f32 %v1426_v51, %v1425_v45  ;;  %v1428_v56 = vpop.f32.mrb[10].mxu1  ;;  %v1365_v57 = vpop.f32.mrb[11].mxu0 }
 0x11a   : > { %v1047_v58 = vsel %vm970_vm0, %v1029_v49, 0.0  ;;  %v827_v59 = vadd.f32 %v1363_v50, %v1721_v2  ;;  %v1366_v60 = vadd.f32 %v1365_v57, %v1364_v52  ;;  %v1429_v61 = vpop.f32.mrb[11].mxu1 }
 0x11b   : > { %v1048_v62 = vadd.f32 %v1047_v58, %v1046_v53  ;;  %v1430_v63 = vadd.f32 %v1429_v61, %v1428_v56 }
 0x11c   : > { %v924_v0 = vadd.f32 %v1427_v55, %v827_v59  ;;  %v830_v1 = vadd.f32 %v1366_v60, %v1721_v2 }
 0x11e   : > { %975 = vst.msk [vmem:[%s1728_s9 + $0x20] sm:$0xff] %vm970_vm0, %v924_v0  ;;  %v994_v3 = vsel %vm970_vm0, %v924_v0, 0.0  ;;  %v1030_v4 = vmul.f32 %v924_v0, %v924_v0  ;;  %v927_v5 = vadd.f32 %v1430_v63, %v830_v1  ;;  %v1367_v6 = vpop.f32.mrb[12].mxu0 }
 0x11f   : > { %v995_v7 = vadd.f32 %v994_v3, %v993_v54  ;;  %v1431_v8 = vpop.f32.mrb[12].mxu1  ;;  %v1368_v9 = vpop.f32.mrb[13].mxu0 }
 0x120   : > { %v1049_v10 = vsel %vm970_vm0, %v1030_v4, 0.0  ;;  %976 = vst.msk [vmem:[%s1728_s9 + $0x28] sm:$0xff] %vm970_vm0, %v927_v5  ;;  %v996_v11 = vsel %vm970_vm0, %v927_v5, 0.0  ;;  %v1031_v12 = vmul.f32 %v927_v5, %v927_v5  ;;  %v1369_v13 = vadd.f32 %v1368_v9, %v1367_v6  ;;  %v1432_v14 = vpop.f32.mrb[13].mxu1  ;;  %v1370_v15 = vpop.f32.mrb[14].mxu0 }
 0x121   : > { %v1050_v16 = vadd.f32 %v1049_v10, %v1048_v62  ;;  %v997_v17 = vadd.f32 %v996_v11, %v995_v7  ;;  %v1433_v18 = vadd.f32 %v1432_v14, %v1431_v8  ;;  %v1434_v19 = vpop.f32.mrb[14].mxu1  ;;  %v1371_v20 = vpop.f32.mrb[15].mxu0 }
 0x122   : > { %v1051_v21 = vsel %vm970_vm0, %v1031_v12, 0.0  ;;  %v835_v22 = vadd.f32 %v1369_v13, %v1721_v2  ;;  %v1372_v23 = vadd.f32 %v1371_v20, %v1370_v15  ;;  %v1435_v24 = vpop.f32.mrb[15].mxu1 }
 0x123   : > { %v1052_v25 = vadd.f32 %v1051_v21, %v1050_v16  ;;  %v1436_v26 = vadd.f32 %v1435_v24, %v1434_v19 }
 0x124   : > { %v932_v27 = vadd.f32 %v1433_v18, %v835_v22  ;;  %v838_v28 = vadd.f32 %v1372_v23, %v1721_v2 }
 0x126   : > { %977 = vst.msk [vmem:[%s1728_s9 + $0x30] sm:$0xff] %vm970_vm0, %v932_v27  ;;  %v998_v29 = vsel %vm970_vm0, %v932_v27, 0.0  ;;  %v1032_v30 = vmul.f32 %v932_v27, %v932_v27  ;;  %v935_v31 = vadd.f32 %v1436_v26, %v838_v28  ;;  %v1373_v32 = vpop.f32.mrb[16].mxu0 }
 0x127   : > { %v999_v33 = vadd.f32 %v998_v29, %v997_v17  ;;  %v1437_v34 = vpop.f32.mrb[16].mxu1  ;;  %v1374_v35 = vpop.f32.mrb[17].mxu0 }
 0x128   : > { %v1053_v36 = vsel %vm970_vm0, %v1032_v30, 0.0  ;;  %978 = vst.msk [vmem:[%s1728_s9 + $0x38] sm:$0xff] %vm970_vm0, %v935_v31  ;;  %v1000_v37 = vsel %vm970_vm0, %v935_v31, 0.0  ;;  %v1033_v38 = vmul.f32 %v935_v31, %v935_v31  ;;  %v1375_v39 = vadd.f32 %v1374_v35, %v1373_v32  ;;  %v1438_v40 = vpop.f32.mrb[17].mxu1  ;;  %v1376_v41 = vpop.f32.mrb[18].mxu0 }
 0x129   : > { %v1054_v42 = vadd.f32 %v1053_v36, %v1052_v25  ;;  %v1001_v43 = vadd.f32 %v1000_v37, %v999_v33  ;;  %v1439_v44 = vadd.f32 %v1438_v40, %v1437_v34  ;;  %v1440_v45 = vpop.f32.mrb[18].mxu1  ;;  %v1377_v46 = vpop.f32.mrb[19].mxu0 }
 0x12a   : > { %v1055_v47 = vsel %vm970_vm0, %v1033_v38, 0.0  ;;  %v843_v48 = vadd.f32 %v1375_v39, %v1721_v2  ;;  %v1378_v49 = vadd.f32 %v1377_v46, %v1376_v41  ;;  %v1441_v50 = vpop.f32.mrb[19].mxu1 }
 0x12b   : > { %v1056_v51 = vadd.f32 %v1055_v47, %v1054_v42  ;;  %v1442_v52 = vadd.f32 %v1441_v50, %v1440_v45 }
 0x12c   : > { %v940_v53 = vadd.f32 %v1439_v44, %v843_v48  ;;  %v846_v54 = vadd.f32 %v1378_v49, %v1721_v2 }
 0x12e   : > { %979 = vst.msk [vmem:[%s1728_s9 + $0x40] sm:$0xff] %vm970_vm0, %v940_v53  ;;  %v1002_v55 = vsel %vm970_vm0, %v940_v53, 0.0  ;;  %v1034_v56 = vmul.f32 %v940_v53, %v940_v53  ;;  %v943_v57 = vadd.f32 %v1442_v52, %v846_v54  ;;  %v1379_v58 = vpop.f32.mrb[20].mxu0 }
 0x12f   : > { %v1003_v59 = vadd.f32 %v1002_v55, %v1001_v43  ;;  %v1443_v60 = vpop.f32.mrb[20].mxu1  ;;  %v1380_v61 = vpop.f32.mrb[21].mxu0 }
 0x130   : > { %v1057_v62 = vsel %vm970_vm0, %v1034_v56, 0.0  ;;  %980 = vst.msk [vmem:[%s1728_s9 + $0x48] sm:$0xff] %vm970_vm0, %v943_v57  ;;  %v1004_v63 = vsel %vm970_vm0, %v943_v57, 0.0  ;;  %v1035_v0 = vmul.f32 %v943_v57, %v943_v57  ;;  %v1381_v1 = vadd.f32 %v1380_v61, %v1379_v58  ;;  %v1444_v3 = vpop.f32.mrb[21].mxu1  ;;  %v1382_v4 = vpop.f32.mrb[22].mxu0 }
 0x131   : > { %v1058_v5 = vadd.f32 %v1057_v62, %v1056_v51  ;;  %v1005_v6 = vadd.f32 %v1004_v63, %v1003_v59  ;;  %v1445_v7 = vadd.f32 %v1444_v3, %v1443_v60  ;;  %v1446_v8 = vpop.f32.mrb[22].mxu1  ;;  %v1383_v9 = vpop.f32.mrb[23].mxu0 }
 0x132   : > { %v1059_v10 = vsel %vm970_vm0, %v1035_v0, 0.0  ;;  %v851_v11 = vadd.f32 %v1381_v1, %v1721_v2  ;;  %v1384_v12 = vadd.f32 %v1383_v9, %v1382_v4  ;;  %v1447_v13 = vpop.f32.mrb[23].mxu1 }
 0x133   : > { %v1060_v14 = vadd.f32 %v1059_v10, %v1058_v5  ;;  %v1448_v15 = vadd.f32 %v1447_v13, %v1446_v8 }
 0x134   : > { %v948_v16 = vadd.f32 %v1445_v7, %v851_v11  ;;  %v854_v17 = vadd.f32 %v1384_v12, %v1721_v2 }
 0x136   : > { %981 = vst.msk [vmem:[%s1728_s9 + $0x50] sm:$0xff] %vm970_vm0, %v948_v16  ;;  %v1006_v18 = vsel %vm970_vm0, %v948_v16, 0.0  ;;  %v1036_v19 = vmul.f32 %v948_v16, %v948_v16  ;;  %v951_v20 = vadd.f32 %v1448_v15, %v854_v17  ;;  %v1385_v21 = vpop.f32.mrb[24].mxu0 }
 0x137   : > { %v1007_v22 = vadd.f32 %v1006_v18, %v1005_v6  ;;  %v1449_v23 = vpop.f32.mrb[24].mxu1  ;;  %v1386_v24 = vpop.f32.mrb[25].mxu0 }
 0x138   : > { %v1061_v25 = vsel %vm970_vm0, %v1036_v19, 0.0  ;;  %982 = vst.msk [vmem:[%s1728_s9 + $0x58] sm:$0xff] %vm970_vm0, %v951_v20  ;;  %v1008_v26 = vsel %vm970_vm0, %v951_v20, 0.0  ;;  %v1037_v27 = vmul.f32 %v951_v20, %v951_v20  ;;  %v1387_v28 = vadd.f32 %v1386_v24, %v1385_v21  ;;  %v1450_v29 = vpop.f32.mrb[25].mxu1  ;;  %v1388_v30 = vpop.f32.mrb[26].mxu0 }
 0x139   : > { %v1062_v31 = vadd.f32 %v1061_v25, %v1060_v14  ;;  %v1009_v32 = vadd.f32 %v1008_v26, %v1007_v22  ;;  %v1451_v33 = vadd.f32 %v1450_v29, %v1449_v23  ;;  %v1452_v34 = vpop.f32.mrb[26].mxu1  ;;  %v1389_v35 = vpop.f32.mrb[27].mxu0 }
 0x13a   : > { %v1063_v36 = vsel %vm970_vm0, %v1037_v27, 0.0  ;;  %v859_v37 = vadd.f32 %v1387_v28, %v1721_v2  ;;  %v1390_v38 = vadd.f32 %v1389_v35, %v1388_v30  ;;  %v1453_v39 = vpop.f32.mrb[27].mxu1 }
 0x13b   : > { %v1064_v40 = vadd.f32 %v1063_v36, %v1062_v31  ;;  %v1454_v41 = vadd.f32 %v1453_v39, %v1452_v34 }
 0x13c   : > { %v956_v42 = vadd.f32 %v1451_v33, %v859_v37  ;;  %v862_v43 = vadd.f32 %v1390_v38, %v1721_v2 }
 0x13e   : > { %983 = vst.msk [vmem:[%s1728_s9 + $0x60] sm:$0xff] %vm970_vm0, %v956_v42  ;;  %v1010_v44 = vsel %vm970_vm0, %v956_v42, 0.0  ;;  %v1038_v45 = vmul.f32 %v956_v42, %v956_v42  ;;  %v959_v46 = vadd.f32 %v1454_v41, %v862_v43  ;;  %v1391_v47 = vpop.f32.mrb[28].mxu0 }
 0x13f   : > { %v1011_v48 = vadd.f32 %v1010_v44, %v1009_v32  ;;  %v1455_v49 = vpop.f32.mrb[28].mxu1  ;;  %v1392_v50 = vpop.f32.mrb[29].mxu0 }
 0x140   : > { %v1065_v51 = vsel %vm970_vm0, %v1038_v45, 0.0  ;;  %984 = vst.msk [vmem:[%s1728_s9 + $0x68] sm:$0xff] %vm970_vm0, %v959_v46  ;;  %v1012_v52 = vsel %vm970_vm0, %v959_v46, 0.0  ;;  %v1039_v53 = vmul.f32 %v959_v46, %v959_v46  ;;  %v1393_v54 = vadd.f32 %v1392_v50, %v1391_v47  ;;  %v1456_v55 = vpop.f32.mrb[29].mxu1  ;;  %v1394_v56 = vpop.f32.mrb[30].mxu0 }
 0x141   : > { %v1066_v57 = vadd.f32 %v1065_v51, %v1064_v40  ;;  %v1013_v58 = vadd.f32 %v1012_v52, %v1011_v48  ;;  %v1457_v59 = vadd.f32 %v1456_v55, %v1455_v49  ;;  %v1458_v60 = vpop.f32.mrb[30].mxu1  ;;  %v1395_v61 = vpop.f32.mrb[31].mxu0 }
 0x142   : > { %v1067_v62 = vsel %vm970_vm0, %v1039_v53, 0.0  ;;  %v867_v63 = vadd.f32 %v1393_v54, %v1721_v2  ;;  %v1396_v0 = vadd.f32 %v1395_v61, %v1394_v56  ;;  %v1459_v1 = vpop.f32.mrb[31].mxu1 }
 0x143   : > { %v1068_v3 = vadd.f32 %v1067_v62, %v1066_v57  ;;  %v1460_v4 = vadd.f32 %v1459_v1, %v1458_v60 }
 0x144   : > { %v964_v5 = vadd.f32 %v1457_v59, %v867_v63  ;;  %v870_v6 = vadd.f32 %v1396_v0, %v1721_v2 }
 0x146   : > { %985 = vst.msk [vmem:[%s1728_s9 + $0x70] sm:$0xff] %vm970_vm0, %v964_v5  ;;  %v1014_v7 = vsel %vm970_vm0, %v964_v5, 0.0  ;;  %v1040_v8 = vmul.f32 %v964_v5, %v964_v5  ;;  %v967_v9 = vadd.f32 %v1460_v4, %v870_v6 }
 0x147   : > { %v1015_v10 = vadd.f32 %v1014_v7, %v1013_v58 }
 0x148   : > { %v1069_v11 = vsel %vm970_vm0, %v1040_v8, 0.0  ;;  %986 = vst.msk [vmem:[%s1728_s9 + $0x78] sm:$0xff] %vm970_vm0, %v967_v9  ;;  %v1016_v12 = vsel %vm970_vm0, %v967_v9, 0.0  ;;  %v1041_v13 = vmul.f32 %v967_v9, %v967_v9 }
 0x149   : > { %v1070_v14 = vadd.f32 %v1069_v11, %v1068_v3  ;;  %v1017_v15 = vadd.f32 %v1016_v12, %v1015_v10 }
 0x14a   : > { %v1071_v2 = vsel %vm970_vm0, %v1041_v13, 0.0 }
 0x14b   : > { %v1018_v16 = vrot.slane %v1017_v15, 4  ;;  %v1072_v17 = vadd.f32 %v1071_v2, %v1070_v14 }
 0x14d   : > { %v1019_v18 = vadd.f32 %v1018_v16, %v1017_v15  ;;  %v1073_v19 = vrot.slane %v1072_v17, 4 }
 0x14f   : > { %v1020_v20 = vrot.slane %v1019_v18, 2  ;;  %v1074_v21 = vadd.f32 %v1073_v19, %v1072_v17 }
 0x151   : > { %v1021_v22 = vadd.f32 %v1020_v20, %v1019_v18  ;;  %v1075_v23 = vrot.slane %v1074_v21, 2 }
 0x153   : > { %v1022_v24 = vrot.slane %v1021_v22, 1  ;;  %v1076_v25 = vadd.f32 %v1075_v23, %v1074_v21 }
 0x155   : > { %v1023_v26 = vadd.f32 %v1022_v24, %v1021_v22  ;;  %v1077_v27 = vrot.slane %v1076_v25, 1 }
 0x157   : > { %1025 = vst.msk [vmem:[%s313_s12] sm:$0x1] %vm1024_vm1, %v1023_v26  ;;  %v1078_v28 = vadd.f32 %v1077_v27, %v1076_v25 }
 0x159   : > { %1079 = vst.msk [vmem:[%s319_s15] sm:$0x1] %vm1024_vm1, %v1078_v28 }
 0x15a PF: > { %s16_s20 = sadd.s32 1, %s1587_s20   ;;  %s1832_s18 = smov %s1583_s19 }
 0x15b   : > { %p13_p5 = scmp.ge.s32.totalorder %s16_s20, 6   ;;  %s1833_s19 = smov %s1835_s21 }
 0x15d   :  { %15 = sbr.rel (!%p13_p5) target bundleno = 2 (0x2), region = 89 }

// kernel: rc_generator_forward.32
= control target key start
LH: loop header
LB: loop body
LE: loop exit
PB: predicated region body
PF: predicated region fallthrough
CT: control target
= control target key end

     0   :  { %vm540_vm0 = vcmask 519168   ;;  %s1345_s0 = inlined_call_operand.vmem [shape: f32[512,64], index: 0, kind: input, shape index: {}]   ;;  %s1346_s1 = inlined_call_operand.vmem [shape: f32[1,64], index: 1, kind: input, shape index: {}]   ;;  %s1347_s2 = inlined_call_operand.vmem [shape: f32[1,64], index: 2, kind: input, shape index: {}]   ;;  %s1348_s3 = inlined_call_operand.vmem [shape: bf16[512,64], index: 3, kind: output, shape index: {}]  }
   0x1   :  { %v14_v0 = vld [vmem:[%s1345_s0] sm:$0xff]  ;;  %v15_v4 = vld [vmem:[%s1345_s0 + $0x8] sm:$0xff]  ;;  %v16_v5 = vld [vmem:[%s1345_s0 + $0x10] sm:$0xff] }
   0x2   :  { %v765_v1 = vld [vmem:[%s1346_s1] ss:$0 sm:$0xff]  ;;  %v17_v6 = vld [vmem:[%s1345_s0 + $0x18] sm:$0xff]  ;;  %v19_v11 = vld [vmem:[%s1345_s0 + $0x28] sm:$0xff] }
   0x3   :  { %v770_v2 = vld [vmem:[%s1347_s2] ss:$0 sm:$0xff]  ;;  %v85_v3 = vmul.f32 %v765_v1, %v14_v0  ;;  %v86_v7 = vmul.f32 %v765_v1, %v15_v4  ;;  %v87_v8 = vmul.f32 %v765_v1, %v16_v5  ;;  %v88_v9 = vmul.f32 %v765_v1, %v17_v6  ;;  %v20_v12 = vld [vmem:[%s1345_s0 + $0x30] sm:$0xff]  ;;  %v21_v17 = vld [vmem:[%s1345_s0 + $0x38] sm:$0xff] }
   0x4   :  { %v18_v10 = vld [vmem:[%s1345_s0 + $0x20] sm:$0xff]  ;;  %v90_v15 = vmul.f32 %v765_v1, %v19_v11  ;;  %v91_v16 = vmul.f32 %v765_v1, %v20_v12  ;;  %v92_v21 = vmul.f32 %v765_v1, %v21_v17  ;;  %v23_v35 = vld [vmem:[%s1345_s0 + $0x48] sm:$0xff]  ;;  %v24_v36 = vld [vmem:[%s1345_s0 + $0x50] sm:$0xff] }
   0x5   :  { %v156_v13 = vadd.f32 %v770_v2, %v85_v3  ;;  %v89_v14 = vmul.f32 %v765_v1, %v18_v10  ;;  %v157_v18 = vadd.f32 %v770_v2, %v86_v7  ;;  %v158_v19 = vadd.f32 %v770_v2, %v87_v8  ;;  %v22_v30 = vld [vmem:[%s1345_s0 + $0x40] sm:$0xff]  ;;  %v25_v37 = vld [vmem:[%s1345_s0 + $0x58] sm:$0xff]  ;;  %v27_v43 = vld [vmem:[%s1345_s0 + $0x68] sm:$0xff] }
   0x6   :  { %v159_v20 = vadd.f32 %v770_v2, %v88_v9  ;;  %v161_v24 = vadd.f32 %v770_v2, %v90_v15  ;;  %v162_v25 = vadd.f32 %v770_v2, %v91_v16  ;;  %v163_v29 = vadd.f32 %v770_v2, %v92_v21  ;;  %v26_v42 = vld [vmem:[%s1345_s0 + $0x60] sm:$0xff]  ;;  %v28_v44 = vld [vmem:[%s1345_s0 + $0x70] sm:$0xff]  ;;  %v29_v49 = vld [vmem:[%s1345_s0 + $0x78] sm:$0xff] }
   0x7   :  { %v220_v22 = vmax.f32 %v156_v13, 0.0  ;;  %v160_v23 = vadd.f32 %v770_v2, %v89_v14  ;;  %v221_v26 = vmax.f32 %v157_v18, 0.0  ;;  %v222_v27 = vmax.f32 %v158_v19, 0.0  ;;  %v30_v8 = vld [vmem:[%s1345_s0 + $0x80] sm:$0xff]  ;;  %v31_v13 = vld [vmem:[%s1345_s0 + $0x88] sm:$0xff]  ;;  %v32_v14 = vld [vmem:[%s1345_s0 + $0x90] sm:$0xff] }
   0x8   :  { %v223_v28 = vmax.f32 %v159_v20, 0.0  ;;  %v225_v33 = vmax.f32 %v161_v24, 0.0  ;;  %v226_v34 = vmax.f32 %v162_v25, 0.0  ;;  %v227_v41 = vmax.f32 %v163_v29, 0.0  ;;  %v33_v15 = vld [vmem:[%s1345_s0 + $0x98] sm:$0xff]  ;;  %v34_v20 = vld [vmem:[%s1345_s0 + $0xa0] sm:$0xff] }
   0x9   :  { %v675_v31 = vpack.c.bf16 %v220_v22, %v220_v22  ;;  %v224_v32 = vmax.f32 %v160_v23, 0.0  ;;  %v676_v38 = vpack.c.bf16 %v221_v26, %v221_v26  ;;  %v677_v39 = vpack.c.bf16 %v222_v27, %v222_v27  ;;  %v35_v21 = vld [vmem:[%s1345_s0 + $0xa8] sm:$0xff]  ;;  %v36_v22 = vld [vmem:[%s1345_s0 + $0xb0] sm:$0xff]  ;;  %v37_v27 = vld [vmem:[%s1345_s0 + $0xb8] sm:$0xff] }
   0xa   :  { %v678_v40 = vpack.c.bf16 %v223_v28, %v223_v28  ;;  %v680_v46 = vpack.c.bf16 %v225_v33, %v225_v33  ;;  %v681_v47 = vpack.c.bf16 %v226_v34, %v226_v34  ;;  %v93_v48 = vmul.f32 %v765_v1, %v22_v30 }
   0xb   :  { %541 = vst.msk [vmem:[%s1348_s3] sm:$0xf] %vm540_vm0, %v675_v31  ;;  %v679_v45 = vpack.c.bf16 %v224_v32, %v224_v32  ;;  %542 = vst.msk [vmem:[%s1348_s3 + $0x4] sm:$0xf] %vm540_vm0, %v676_v38  ;;  %v682_v50 = vpack.c.bf16 %v227_v41, %v227_v41  ;;  %v94_v51 = vmul.f32 %v765_v1, %v23_v35 }
   0xc   :  { %543 = vst.msk [vmem:[%s1348_s3 + $0x8] sm:$0xf] %vm540_vm0, %v677_v39  ;;  %544 = vst.msk [vmem:[%s1348_s3 + $0xc] sm:$0xf] %vm540_vm0, %v678_v40  ;;  %v95_v52 = vmul.f32 %v765_v1, %v24_v36  ;;  %v96_v53 = vmul.f32 %v765_v1, %v25_v37  ;;  %v164_v54 = vadd.f32 %v770_v2, %v93_v48  ;;  %v38_v48 = vld [vmem:[%s1345_s0 + $0xc0] sm:$0xff] }
   0xd   :  { %545 = vst.msk [vmem:[%s1348_s3 + $0x10] sm:$0xf] %vm540_vm0, %v679_v45  ;;  %546 = vst.msk [vmem:[%s1348_s3 + $0x14] sm:$0xf] %vm540_vm0, %v680_v46  ;;  %v97_v55 = vmul.f32 %v765_v1, %v26_v42  ;;  %v98_v56 = vmul.f32 %v765_v1, %v27_v43  ;;  %v99_v57 = vmul.f32 %v765_v1, %v28_v44 }
   0xe   :  { %547 = vst.msk [vmem:[%s1348_s3 + $0x18] sm:$0xf] %vm540_vm0, %v681_v47  ;;  %548 = vst.msk [vmem:[%s1348_s3 + $0x1c] sm:$0xf] %vm540_vm0, %v682_v50  ;;  %v165_v58 = vadd.f32 %v770_v2, %v94_v51  ;;  %v166_v59 = vadd.f32 %v770_v2, %v95_v52  ;;  %v167_v60 = vadd.f32 %v770_v2, %v96_v53  ;;  %v228_v62 = vmax.f32 %v164_v54, 0.0  ;;  %v39_v53 = vld [vmem:[%s1345_s0 + $0xc8] sm:$0xff] }
   0xf   :  { %v100_v61 = vmul.f32 %v765_v1, %v29_v49  ;;  %v168_v63 = vadd.f32 %v770_v2, %v97_v55  ;;  %v169_v0 = vadd.f32 %v770_v2, %v98_v56  ;;  %v170_v3 = vadd.f32 %v770_v2, %v99_v57  ;;  %v40_v54 = vld [vmem:[%s1345_s0 + $0xd0] sm:$0xff]  ;;  %v41_v55 = vld [vmem:[%s1345_s0 + $0xd8] sm:$0xff] }
  0x10   :  { %v229_v4 = vmax.f32 %v165_v58, 0.0  ;;  %v230_v5 = vmax.f32 %v166_v59, 0.0  ;;  %v231_v6 = vmax.f32 %v167_v60, 0.0  ;;  %v683_v9 = vpack.c.bf16 %v228_v62, %v228_v62  ;;  %v42_v60 = vld [vmem:[%s1345_s0 + $0xe0] sm:$0xff]  ;;  %v44_v62 = vld [vmem:[%s1345_s0 + $0xf0] sm:$0xff] }
  0x11   :  { %v171_v7 = vadd.f32 %v770_v2, %v100_v61  ;;  %v232_v10 = vmax.f32 %v168_v63, 0.0  ;;  %v233_v11 = vmax.f32 %v169_v0, 0.0  ;;  %v234_v12 = vmax.f32 %v170_v3, 0.0  ;;  %v43_v61 = vld [vmem:[%s1345_s0 + $0xe8] sm:$0xff] }
  0x12   :  { %v684_v16 = vpack.c.bf16 %v229_v4, %v229_v4  ;;  %v685_v17 = vpack.c.bf16 %v230_v5, %v230_v5  ;;  %v686_v18 = vpack.c.bf16 %v231_v6, %v231_v6  ;;  %549 = vst.msk [vmem:[%s1348_s3 + $0x20] sm:$0xf] %vm540_vm0, %v683_v9  ;;  %v101_v26 = vmul.f32 %v765_v1, %v30_v8  ;;  %v45_v5 = vld [vmem:[%s1345_s0 + $0xf8] sm:$0xff] }
  0x13   :  { %v235_v19 = vmax.f32 %v171_v7, 0.0  ;;  %v687_v23 = vpack.c.bf16 %v232_v10, %v232_v10  ;;  %v688_v24 = vpack.c.bf16 %v233_v11, %v233_v11  ;;  %v689_v25 = vpack.c.bf16 %v234_v12, %v234_v12 }
  0x14   :  { %550 = vst.msk [vmem:[%s1348_s3 + $0x24] sm:$0xf] %vm540_vm0, %v684_v16  ;;  %551 = vst.msk [vmem:[%s1348_s3 + $0x28] sm:$0xf] %vm540_vm0, %v685_v17  ;;  %v102_v29 = vmul.f32 %v765_v1, %v31_v13  ;;  %v103_v30 = vmul.f32 %v765_v1, %v32_v14  ;;  %v104_v31 = vmul.f32 %v765_v1, %v33_v15 }
  0x15   :  { %552 = vst.msk [vmem:[%s1348_s3 + $0x2c] sm:$0xf] %vm540_vm0, %v686_v18  ;;  %v690_v28 = vpack.c.bf16 %v235_v19, %v235_v19  ;;  %553 = vst.msk [vmem:[%s1348_s3 + $0x30] sm:$0xf] %vm540_vm0, %v687_v23  ;;  %v172_v32 = vadd.f32 %v770_v2, %v101_v26  ;;  %v105_v33 = vmul.f32 %v765_v1, %v34_v20  ;;  %v46_v26 = vld [vmem:[%s1345_s0 + $0x100] sm:$0xff] }
  0x16   :  { %554 = vst.msk [vmem:[%s1348_s3 + $0x34] sm:$0xf] %vm540_vm0, %v688_v24  ;;  %555 = vst.msk [vmem:[%s1348_s3 + $0x38] sm:$0xf] %vm540_vm0, %v689_v25  ;;  %v106_v34 = vmul.f32 %v765_v1, %v35_v21  ;;  %v107_v35 = vmul.f32 %v765_v1, %v36_v22  ;;  %v173_v36 = vadd.f32 %v770_v2, %v102_v29 }
  0x17   :  { %556 = vst.msk [vmem:[%s1348_s3 + $0x3c] sm:$0xf] %vm540_vm0, %v690_v28  ;;  %v174_v37 = vadd.f32 %v770_v2, %v103_v30  ;;  %v175_v38 = vadd.f32 %v770_v2, %v104_v31  ;;  %v108_v39 = vmul.f32 %v765_v1, %v37_v27  ;;  %v236_v40 = vmax.f32 %v172_v32, 0.0  ;;  %v47_v31 = vld [vmem:[%s1345_s0 + $0x108] sm:$0xff]  ;;  %v48_v32 = vld [vmem:[%s1345_s0 + $0x110] sm:$0xff] }
  0x18   :  { %v176_v41 = vadd.f32 %v770_v2, %v105_v33  ;;  %v177_v42 = vadd.f32 %v770_v2, %v106_v34  ;;  %v178_v43 = vadd.f32 %v770_v2, %v107_v35  ;;  %v237_v44 = vmax.f32 %v173_v36, 0.0  ;;  %v49_v33 = vld [vmem:[%s1345_s0 + $0x118] sm:$0xff] }
  0x19   :  { %v238_v45 = vmax.f32 %v174_v37, 0.0  ;;  %v239_v46 = vmax.f32 %v175_v38, 0.0  ;;  %v179_v47 = vadd.f32 %v770_v2, %v108_v39  ;;  %v691_v49 = vpack.c.bf16 %v236_v40, %v236_v40  ;;  %v50_v38 = vld [vmem:[%s1345_s0 + $0x120] sm:$0xff]  ;;  %v51_v39 = vld [vmem:[%s1345_s0 + $0x128] sm:$0xff]  ;;  %v52_v40 = vld [vmem:[%s1345_s0 + $0x130] sm:$0xff] }
  0x1a   :  { %v240_v50 = vmax.f32 %v176_v41, 0.0  ;;  %v241_v51 = vmax.f32 %v177_v42, 0.0  ;;  %v242_v52 = vmax.f32 %v178_v43, 0.0  ;;  %v692_v56 = vpack.c.bf16 %v237_v44, %v237_v44 }
  0x1b   :  { %v693_v57 = vpack.c.bf16 %v238_v45, %v238_v45  ;;  %v694_v58 = vpack.c.bf16 %v239_v46, %v239_v46  ;;  %v243_v59 = vmax.f32 %v179_v47, 0.0  ;;  %557 = vst.msk [vmem:[%s1348_s3 + $0x40] sm:$0xf] %vm540_vm0, %v691_v49  ;;  %v109_v4 = vmul.f32 %v765_v1, %v38_v48  ;;  %v53_v45 = vld [vmem:[%s1345_s0 + $0x138] sm:$0xff] }
  0x1c   :  { %v695_v63 = vpack.c.bf16 %v240_v50, %v240_v50  ;;  %v696_v0 = vpack.c.bf16 %v241_v51, %v241_v51  ;;  %v697_v3 = vpack.c.bf16 %v242_v52, %v242_v52  ;;  %558 = vst.msk [vmem:[%s1348_s3 + $0x44] sm:$0xf] %vm540_vm0, %v692_v56  ;;  %v110_v7 = vmul.f32 %v765_v1, %v39_v53 }
  0x1d   :  { %559 = vst.msk [vmem:[%s1348_s3 + $0x48] sm:$0xf] %vm540_vm0, %v693_v57  ;;  %560 = vst.msk [vmem:[%s1348_s3 + $0x4c] sm:$0xf] %vm540_vm0, %v694_v58  ;;  %v698_v6 = vpack.c.bf16 %v243_v59, %v243_v59  ;;  %v111_v8 = vmul.f32 %v765_v1, %v40_v54  ;;  %v112_v9 = vmul.f32 %v765_v1, %v41_v55 }
  0x1e   :  { %561 = vst.msk [vmem:[%s1348_s3 + $0x50] sm:$0xf] %vm540_vm0, %v695_v63  ;;  %562 = vst.msk [vmem:[%s1348_s3 + $0x54] sm:$0xf] %vm540_vm0, %v696_v0  ;;  %v180_v10 = vadd.f32 %v770_v2, %v109_v4  ;;  %v113_v11 = vmul.f32 %v765_v1, %v42_v60  ;;  %v114_v12 = vmul.f32 %v765_v1, %v43_v61  ;;  %v54_v4 = vld [vmem:[%s1345_s0 + $0x140] sm:$0xff] }
  0x1f   :  { %563 = vst.msk [vmem:[%s1348_s3 + $0x58] sm:$0xf] %vm540_vm0, %v697_v3  ;;  %v115_v13 = vmul.f32 %v765_v1, %v44_v62  ;;  %564 = vst.msk [vmem:[%s1348_s3 + $0x5c] sm:$0xf] %vm540_vm0, %v698_v6  ;;  %v181_v14 = vadd.f32 %v770_v2, %v110_v7  ;;  %v182_v15 = vadd.f32 %v770_v2, %v111_v8 }
  0x20   :  { %v183_v16 = vadd.f32 %v770_v2, %v112_v9  ;;  %v116_v17 = vmul.f32 %v765_v1, %v45_v5  ;;  %v244_v18 = vmax.f32 %v180_v10, 0.0  ;;  %v184_v19 = vadd.f32 %v770_v2, %v113_v11  ;;  %v55_v9 = vld [vmem:[%s1345_s0 + $0x148] sm:$0xff]  ;;  %v56_v10 = vld [vmem:[%s1345_s0 + $0x150] sm:$0xff]  ;;  %v57_v11 = vld [vmem:[%s1345_s0 + $0x158] sm:$0xff] }
  0x21   :  { %v185_v20 = vadd.f32 %v770_v2, %v114_v12  ;;  %v186_v21 = vadd.f32 %v770_v2, %v115_v13  ;;  %v245_v22 = vmax.f32 %v181_v14, 0.0  ;;  %v246_v23 = vmax.f32 %v182_v15, 0.0 }
  0x22   :  { %v247_v24 = vmax.f32 %v183_v16, 0.0  ;;  %v187_v25 = vadd.f32 %v770_v2, %v116_v17  ;;  %v699_v27 = vpack.c.bf16 %v244_v18, %v244_v18  ;;  %v248_v28 = vmax.f32 %v184_v19, 0.0  ;;  %v58_v16 = vld [vmem:[%s1345_s0 + $0x160] sm:$0xff]  ;;  %v59_v17 = vld [vmem:[%s1345_s0 + $0x168] sm:$0xff]  ;;  %v60_v18 = vld [vmem:[%s1345_s0 + $0x170] sm:$0xff] }
  0x23   :  { %v249_v29 = vmax.f32 %v185_v20, 0.0  ;;  %v250_v30 = vmax.f32 %v186_v21, 0.0  ;;  %v700_v34 = vpack.c.bf16 %v245_v22, %v245_v22  ;;  %v701_v35 = vpack.c.bf16 %v246_v23, %v246_v23  ;;  %v61_v23 = vld [vmem:[%s1345_s0 + $0x178] sm:$0xff] }
  0x24   :  { %v702_v36 = vpack.c.bf16 %v247_v24, %v247_v24  ;;  %v251_v37 = vmax.f32 %v187_v25, 0.0  ;;  %565 = vst.msk [vmem:[%s1348_s3 + $0x60] sm:$0xf] %vm540_vm0, %v699_v27  ;;  %v703_v41 = vpack.c.bf16 %v248_v28, %v248_v28  ;;  %v117_v44 = vmul.f32 %v765_v1, %v46_v26 }
  0x25   :  { %v704_v42 = vpack.c.bf16 %v249_v29, %v249_v29  ;;  %v705_v43 = vpack.c.bf16 %v250_v30, %v250_v30  ;;  %566 = vst.msk [vmem:[%s1348_s3 + $0x64] sm:$0xf] %vm540_vm0, %v700_v34  ;;  %567 = vst.msk [vmem:[%s1348_s3 + $0x68] sm:$0xf] %vm540_vm0, %v701_v35  ;;  %v118_v47 = vmul.f32 %v765_v1, %v47_v31 }
  0x26   :  { %568 = vst.msk [vmem:[%s1348_s3 + $0x6c] sm:$0xf] %vm540_vm0, %v702_v36  ;;  %v706_v46 = vpack.c.bf16 %v251_v37, %v251_v37  ;;  %v119_v48 = vmul.f32 %v765_v1, %v48_v32  ;;  %v120_v49 = vmul.f32 %v765_v1, %v49_v33  ;;  %569 = vst.msk [vmem:[%s1348_s3 + $0x70] sm:$0xf] %vm540_vm0, %v703_v41 }
  0x27   :  { %570 = vst.msk [vmem:[%s1348_s3 + $0x74] sm:$0xf] %vm540_vm0, %v704_v42  ;;  %571 = vst.msk [vmem:[%s1348_s3 + $0x78] sm:$0xf] %vm540_vm0, %v705_v43  ;;  %v188_v50 = vadd.f32 %v770_v2, %v117_v44  ;;  %v121_v51 = vmul.f32 %v765_v1, %v50_v38  ;;  %v122_v52 = vmul.f32 %v765_v1, %v51_v39  ;;  %v62_v44 = vld [vmem:[%s1345_s0 + $0x180] sm:$0xff] }
  0x28   :  { %v123_v53 = vmul.f32 %v765_v1, %v52_v40  ;;  %572 = vst.msk [vmem:[%s1348_s3 + $0x7c] sm:$0xf] %vm540_vm0, %v706_v46  ;;  %v189_v54 = vadd.f32 %v770_v2, %v118_v47  ;;  %v190_v55 = vadd.f32 %v770_v2, %v119_v48  ;;  %v191_v56 = vadd.f32 %v770_v2, %v120_v49  ;;  %v63_v49 = vld [vmem:[%s1345_s0 + $0x188] sm:$0xff] }
  0x29   :  { %v124_v57 = vmul.f32 %v765_v1, %v53_v45  ;;  %v252_v58 = vmax.f32 %v188_v50, 0.0  ;;  %v192_v59 = vadd.f32 %v770_v2, %v121_v51  ;;  %v193_v60 = vadd.f32 %v770_v2, %v122_v52  ;;  %v64_v50 = vld [vmem:[%s1345_s0 + $0x190] sm:$0xff]  ;;  %v65_v51 = vld [vmem:[%s1345_s0 + $0x198] sm:$0xff] }
  0x2a   :  { %v194_v61 = vadd.f32 %v770_v2, %v123_v53  ;;  %v253_v62 = vmax.f32 %v189_v54, 0.0  ;;  %v254_v63 = vmax.f32 %v190_v55, 0.0  ;;  %v255_v0 = vmax.f32 %v191_v56, 0.0  ;;  %v66_v56 = vld [vmem:[%s1345_s0 + $0x1a0] sm:$0xff] }
  0x2b   :  { %v195_v3 = vadd.f32 %v770_v2, %v124_v57  ;;  %v707_v5 = vpack.c.bf16 %v252_v58, %v252_v58  ;;  %v256_v6 = vmax.f32 %v192_v59, 0.0  ;;  %v257_v7 = vmax.f32 %v193_v60, 0.0  ;;  %v67_v57 = vld [vmem:[%s1345_s0 + $0x1a8] sm:$0xff]  ;;  %v68_v58 = vld [vmem:[%s1345_s0 + $0x1b0] sm:$0xff] }
  0x2c   :  { %v258_v8 = vmax.f32 %v194_v61, 0.0  ;;  %v708_v12 = vpack.c.bf16 %v253_v62, %v253_v62  ;;  %v709_v13 = vpack.c.bf16 %v254_v63, %v254_v63  ;;  %v710_v14 = vpack.c.bf16 %v255_v0, %v255_v0  ;;  %v69_v63 = vld [vmem:[%s1345_s0 + $0x1b8] sm:$0xff] }
  0x2d   :  { %v259_v15 = vmax.f32 %v195_v3, 0.0  ;;  %573 = vst.msk [vmem:[%s1348_s3 + $0x80] sm:$0xf] %vm540_vm0, %v707_v5  ;;  %v711_v19 = vpack.c.bf16 %v256_v6, %v256_v6  ;;  %v712_v20 = vpack.c.bf16 %v257_v7, %v257_v7  ;;  %v125_v22 = vmul.f32 %v765_v1, %v54_v4 }
  0x2e   :  { %v713_v21 = vpack.c.bf16 %v258_v8, %v258_v8  ;;  %574 = vst.msk [vmem:[%s1348_s3 + $0x84] sm:$0xf] %vm540_vm0, %v708_v12  ;;  %575 = vst.msk [vmem:[%s1348_s3 + $0x88] sm:$0xf] %vm540_vm0, %v709_v13  ;;  %v126_v25 = vmul.f32 %v765_v1, %v55_v9  ;;  %v127_v26 = vmul.f32 %v765_v1, %v56_v10 }
  0x2f   :  { %576 = vst.msk [vmem:[%s1348_s3 + $0x8c] sm:$0xf] %vm540_vm0, %v710_v14  ;;  %v714_v24 = vpack.c.bf16 %v259_v15, %v259_v15  ;;  %v128_v27 = vmul.f32 %v765_v1, %v57_v11  ;;  %577 = vst.msk [vmem:[%s1348_s3 + $0x90] sm:$0xf] %vm540_vm0, %v711_v19  ;;  %v196_v28 = vadd.f32 %v770_v2, %v125_v22  ;;  %v70_v22 = vld [vmem:[%s1345_s0 + $0x1c0] sm:$0xff] }
  0x30   :  { %578 = vst.msk [vmem:[%s1348_s3 + $0x94] sm:$0xf] %vm540_vm0, %v712_v20  ;;  %579 = vst.msk [vmem:[%s1348_s3 + $0x98] sm:$0xf] %vm540_vm0, %v713_v21  ;;  %v129_v29 = vmul.f32 %v765_v1, %v58_v16  ;;  %v130_v30 = vmul.f32 %v765_v1, %v59_v17  ;;  %v131_v31 = vmul.f32 %v765_v1, %v60_v18 }
  0x31   :  { %580 = vst.msk [vmem:[%s1348_s3 + $0x9c] sm:$0xf] %vm540_vm0, %v714_v24  ;;  %v197_v32 = vadd.f32 %v770_v2, %v126_v25  ;;  %v198_v33 = vadd.f32 %v770_v2, %v127_v26  ;;  %v199_v34 = vadd.f32 %v770_v2, %v128_v27  ;;  %v132_v35 = vmul.f32 %v765_v1, %v61_v23  ;;  %v71_v27 = vld [vmem:[%s1345_s0 + $0x1c8] sm:$0xff] }
  0x32   :  { %v260_v36 = vmax.f32 %v196_v28, 0.0  ;;  %v200_v37 = vadd.f32 %v770_v2, %v129_v29  ;;  %v201_v38 = vadd.f32 %v770_v2, %v130_v30  ;;  %v202_v39 = vadd.f32 %v770_v2, %v131_v31  ;;  %v72_v28 = vld [vmem:[%s1345_s0 + $0x1d0] sm:$0xff]  ;;  %v73_v29 = vld [vmem:[%s1345_s0 + $0x1d8] sm:$0xff] }
  0x33   :  { %v261_v40 = vmax.f32 %v197_v32, 0.0  ;;  %v262_v41 = vmax.f32 %v198_v33, 0.0  ;;  %v263_v42 = vmax.f32 %v199_v34, 0.0  ;;  %v203_v43 = vadd.f32 %v770_v2, %v132_v35  ;;  %v74_v34 = vld [vmem:[%s1345_s0 + $0x1e0] sm:$0xff]  ;;  %v75_v35 = vld [vmem:[%s1345_s0 + $0x1e8] sm:$0xff] }
  0x34   :  { %v715_v45 = vpack.c.bf16 %v260_v36, %v260_v36  ;;  %v264_v46 = vmax.f32 %v200_v37, 0.0  ;;  %v265_v47 = vmax.f32 %v201_v38, 0.0  ;;  %v266_v48 = vmax.f32 %v202_v39, 0.0  ;;  %v76_v36 = vld [vmem:[%s1345_s0 + $0x1f0] sm:$0xff] }
  0x35   :  { %v716_v52 = vpack.c.bf16 %v261_v40, %v261_v40  ;;  %v717_v53 = vpack.c.bf16 %v262_v41, %v262_v41  ;;  %v718_v54 = vpack.c.bf16 %v263_v42, %v263_v42  ;;  %v267_v55 = vmax.f32 %v203_v43, 0.0  ;;  %v77_v41 = vld [vmem:[%s1345_s0 + $0x1f8] sm:$0xff] }
  0x36   :  { %581 = vst.msk [vmem:[%s1348_s3 + $0xa0] sm:$0xf] %vm540_vm0, %v715_v45  ;;  %v719_v59 = vpack.c.bf16 %v264_v46, %v264_v46  ;;  %v720_v60 = vpack.c.bf16 %v265_v47, %v265_v47  ;;  %v721_v61 = vpack.c.bf16 %v266_v48, %v266_v48  ;;  %v133_v62 = vmul.f32 %v765_v1, %v62_v44 }
  0x37   :  { %582 = vst.msk [vmem:[%s1348_s3 + $0xa4] sm:$0xf] %vm540_vm0, %v716_v52  ;;  %583 = vst.msk [vmem:[%s1348_s3 + $0xa8] sm:$0xf] %vm540_vm0, %v717_v53  ;;  %v722_v0 = vpack.c.bf16 %v267_v55, %v267_v55  ;;  %v134_v3 = vmul.f32 %v765_v1, %v63_v49  ;;  %v135_v4 = vmul.f32 %v765_v1, %v64_v50 }
  0x38   :  { %584 = vst.msk [vmem:[%s1348_s3 + $0xac] sm:$0xf] %vm540_vm0, %v718_v54  ;;  %v136_v5 = vmul.f32 %v765_v1, %v65_v51  ;;  %585 = vst.msk [vmem:[%s1348_s3 + $0xb0] sm:$0xf] %vm540_vm0, %v719_v59  ;;  %v204_v6 = vadd.f32 %v770_v2, %v133_v62  ;;  %v137_v7 = vmul.f32 %v765_v1, %v66_v56 }
  0x39   :  { %586 = vst.msk [vmem:[%s1348_s3 + $0xb4] sm:$0xf] %vm540_vm0, %v720_v60  ;;  %587 = vst.msk [vmem:[%s1348_s3 + $0xb8] sm:$0xf] %vm540_vm0, %v721_v61  ;;  %v138_v8 = vmul.f32 %v765_v1, %v67_v57  ;;  %v139_v9 = vmul.f32 %v765_v1, %v68_v58  ;;  %v205_v10 = vadd.f32 %v770_v2, %v134_v3 }
  0x3a   :  { %588 = vst.msk [vmem:[%s1348_s3 + $0xbc] sm:$0xf] %vm540_vm0, %v722_v0  ;;  %v206_v11 = vadd.f32 %v770_v2, %v135_v4  ;;  %v207_v12 = vadd.f32 %v770_v2, %v136_v5  ;;  %v140_v13 = vmul.f32 %v765_v1, %v69_v63  ;;  %v268_v14 = vmax.f32 %v204_v6, 0.0 }
  0x3b   :  { %v208_v15 = vadd.f32 %v770_v2, %v137_v7  ;;  %v209_v16 = vadd.f32 %v770_v2, %v138_v8  ;;  %v210_v17 = vadd.f32 %v770_v2, %v139_v9  ;;  %v269_v18 = vmax.f32 %v205_v10, 0.0 }
  0x3c   :  { %v270_v19 = vmax.f32 %v206_v11, 0.0  ;;  %v271_v20 = vmax.f32 %v207_v12, 0.0  ;;  %v211_v21 = vadd.f32 %v770_v2, %v140_v13  ;;  %v723_v23 = vpack.c.bf16 %v268_v14, %v268_v14 }
  0x3d   :  { %v272_v24 = vmax.f32 %v208_v15, 0.0  ;;  %v273_v25 = vmax.f32 %v209_v16, 0.0  ;;  %v274_v26 = vmax.f32 %v210_v17, 0.0  ;;  %v724_v30 = vpack.c.bf16 %v269_v18, %v269_v18 }
  0x3e   :  { %v725_v31 = vpack.c.bf16 %v270_v19, %v270_v19  ;;  %v726_v32 = vpack.c.bf16 %v271_v20, %v271_v20  ;;  %v275_v33 = vmax.f32 %v211_v21, 0.0  ;;  %589 = vst.msk [vmem:[%s1348_s3 + $0xc0] sm:$0xf] %vm540_vm0, %v723_v23  ;;  %v141_v40 = vmul.f32 %v765_v1, %v70_v22 }
  0x3f   :  { %v727_v37 = vpack.c.bf16 %v272_v24, %v272_v24  ;;  %v728_v38 = vpack.c.bf16 %v273_v25, %v273_v25  ;;  %v729_v39 = vpack.c.bf16 %v274_v26, %v274_v26  ;;  %590 = vst.msk [vmem:[%s1348_s3 + $0xc4] sm:$0xf] %vm540_vm0, %v724_v30  ;;  %v142_v43 = vmul.f32 %v765_v1, %v71_v27 }
  0x40   :  { %591 = vst.msk [vmem:[%s1348_s3 + $0xc8] sm:$0xf] %vm540_vm0, %v725_v31  ;;  %592 = vst.msk [vmem:[%s1348_s3 + $0xcc] sm:$0xf] %vm540_vm0, %v726_v32  ;;  %v730_v42 = vpack.c.bf16 %v275_v33, %v275_v33  ;;  %v143_v44 = vmul.f32 %v765_v1, %v72_v28  ;;  %v144_v45 = vmul.f32 %v765_v1, %v73_v29 }
  0x41   :  { %593 = vst.msk [vmem:[%s1348_s3 + $0xd0] sm:$0xf] %vm540_vm0, %v727_v37  ;;  %594 = vst.msk [vmem:[%s1348_s3 + $0xd4] sm:$0xf] %vm540_vm0, %v728_v38  ;;  %v212_v46 = vadd.f32 %v770_v2, %v141_v40  ;;  %v145_v47 = vmul.f32 %v765_v1, %v74_v34  ;;  %v146_v48 = vmul.f32 %v765_v1, %v75_v35 }
  0x42   :  { %595 = vst.msk [vmem:[%s1348_s3 + $0xd8] sm:$0xf] %vm540_vm0, %v729_v39  ;;  %v147_v49 = vmul.f32 %v765_v1, %v76_v36  ;;  %596 = vst.msk [vmem:[%s1348_s3 + $0xdc] sm:$0xf] %vm540_vm0, %v730_v42  ;;  %v213_v50 = vadd.f32 %v770_v2, %v142_v43  ;;  %v214_v51 = vadd.f32 %v770_v2, %v143_v44 }
  0x43   :  { %v215_v52 = vadd.f32 %v770_v2, %v144_v45  ;;  %v148_v53 = vmul.f32 %v765_v1, %v77_v41  ;;  %v276_v54 = vmax.f32 %v212_v46, 0.0  ;;  %v216_v55 = vadd.f32 %v770_v2, %v145_v47 }
  0x44   :  { %v217_v56 = vadd.f32 %v770_v2, %v146_v48  ;;  %v218_v57 = vadd.f32 %v770_v2, %v147_v49  ;;  %v277_v58 = vmax.f32 %v213_v50, 0.0  ;;  %v278_v59 = vmax.f32 %v214_v51, 0.0 }
  0x45   :  { %v279_v60 = vmax.f32 %v215_v52, 0.0  ;;  %v219_v61 = vadd.f32 %v770_v2, %v148_v53  ;;  %v731_v62 = vpack.c.bf16 %v276_v54, %v276_v54  ;;  %v280_v63 = vmax.f32 %v216_v55, 0.0 }
  0x46   :  { %v281_v0 = vmax.f32 %v217_v56, 0.0  ;;  %v282_v3 = vmax.f32 %v218_v57, 0.0  ;;  %v732_v4 = vpack.c.bf16 %v277_v58, %v277_v58  ;;  %v733_v5 = vpack.c.bf16 %v278_v59, %v278_v59 }
  0x47   :  { %v734_v6 = vpack.c.bf16 %v279_v60, %v279_v60  ;;  %v283_v1 = vmax.f32 %v219_v61, 0.0  ;;  %597 = vst.msk [vmem:[%s1348_s3 + $0xe0] sm:$0xf] %vm540_vm0, %v731_v62  ;;  %v735_v7 = vpack.c.bf16 %v280_v63, %v280_v63 }
  0x48   :  { %v736_v8 = vpack.c.bf16 %v281_v0, %v281_v0  ;;  %v737_v9 = vpack.c.bf16 %v282_v3, %v282_v3  ;;  %598 = vst.msk [vmem:[%s1348_s3 + $0xe4] sm:$0xf] %vm540_vm0, %v732_v4  ;;  %599 = vst.msk [vmem:[%s1348_s3 + $0xe8] sm:$0xf] %vm540_vm0, %v733_v5 }
  0x49   :  { %600 = vst.msk [vmem:[%s1348_s3 + $0xec] sm:$0xf] %vm540_vm0, %v734_v6  ;;  %v738_v2 = vpack.c.bf16 %v283_v1, %v283_v1  ;;  %601 = vst.msk [vmem:[%s1348_s3 + $0xf0] sm:$0xf] %vm540_vm0, %v735_v7 }
  0x4a   :  { %602 = vst.msk [vmem:[%s1348_s3 + $0xf4] sm:$0xf] %vm540_vm0, %v736_v8  ;;  %603 = vst.msk [vmem:[%s1348_s3 + $0xf8] sm:$0xf] %vm540_vm0, %v737_v9 }
  0x4b   :  { %604 = vst.msk [vmem:[%s1348_s3 + $0xfc] sm:$0xf] %vm540_vm0, %v738_v2 }

// kernel: rc_generator_forward.33
= control target key start
LH: loop header
LB: loop body
LE: loop exit
PB: predicated region body
PF: predicated region fallthrough
CT: control target
= control target key end

     0   :  { %s2716_s18 = smov 0   ;;  %s2718_s19 = smov 0   ;;  %s3277_s0 = inlined_call_operand.vmem [shape: bf16[1,512,640], index: 0, kind: input, shape index: {}]   ;;  %s3278_s1 = inlined_call_operand.vmem [shape: bf16[1,640,64], index: 1, kind: input, shape index: {}]   ;;  %s3279_s2 = inlined_call_operand.vmem [shape: f32[1,64], index: 2, kind: input, shape index: {}]   ;;  %s3280_s3 = inlined_call_operand.vmem [shape: f32[1,512,64], index: 3, kind: output, shape index: {0}]   ;;  %s3281_s4 = inlined_call_operand.vmem [shape: f32[1,2,1,64], index: 4, kind: output, shape index: {1}]   ;;  %s3282_s5 = inlined_call_operand.vmem [shape: f32[1,2,1,64], index: 5, kind: output, shape index: {2}]  }
   0x1   :  { %s2720_s20 = smov 0  }
   0x2 LB: > { %s25_s21 = sadd.s32 1, %s2680_s19  ;;  %p2045_p0 = scmp.ge.s32.totalorder %s2684_s20, 1  ;;  %s2684_s20 = sphi %s2720_s20, %s16_s20   ;;  %s2680_s19 = sphi %s2718_s19, %s3284_s19   ;;  %s2676_s18 = sphi %s2716_s18, %s3283_s18  }
   0x3   : > { %p26_p1 = scmp.ge.s32.totalorder %s25_s21, 2  ;;  %p228_p2 = scmp.lt.s32.totalorder %s2684_s20, 3 }
   0x5   : > { %s3286_s21 = smov (%p26_p1, %s25_s21), 0  ;;  %p229_p3 = pnand %p2045_p0, %p228_p2 }
   0x6   : > { %v2510_v0 = vld [vmem:[%s3278_s1 + $0x40] sm:$0xff] (!%p229_p3)   ;;  %s2046_s24 = sshll.u32 (!%p229_p3), %s2676_s18, 5  ;;  %v2512_v2 = vld [vmem:[%s3278_s1 + $0x48] sm:$0xff] (!%p229_p3)   ;;  %v2514_v4 = vld [vmem:[%s3278_s1 + $0x50] sm:$0xff] (!%p229_p3)   ;;  %vm1647_vm0 = vcmask (!%p229_p3), 523264   ;;  %p312_p5 = scmp.lt.s32.totalorder (!%p229_p3), %s2676_s18, 1 }
   0x7   : > { %232 = sbr.rel (%p229_p3) target bundleno = 432 (0x1b0), region = 32  ;;  %v2511_v1 = vld [vmem:[%s3278_s1] sm:$0xff] (!%p229_p3)   ;;  %2173 = vmatprep.subr.bf16.mxu0 (!%p229_p3), %v2510_v0  ;;  %2469 = vmatprep.subr.bf16.mxu1 (!%p229_p3), %v2510_v0  ;;  %p287_p4 = scmp.lt.s32.totalorder (!%p229_p3), %s2046_s24, 63  ;;  %v2513_v3 = vld [vmem:[%s3278_s1 + $0x8] sm:$0xff] (!%p229_p3)   ;;  %v2515_v5 = vld [vmem:[%s3278_s1 + $0x10] sm:$0xff] (!%p229_p3)   ;;  %vm1749_vm1 = vcmask (!%p229_p3), 516096  }
   0x8   : > { %2174 = vmatpush3.bf16.msra.mxu0 (!%p229_p3), %v2511_v1  ;;  %2477 = vmatpush3.bf16.msra.mxu1 (!%p229_p3), %v2511_v1  ;;  %v2516_v6 = vld [vmem:[%s3278_s1 + $0x58] sm:$0xff] (!%p229_p3)   ;;  %v2518_v8 = vld [vmem:[%s3278_s1 + $0x60] sm:$0xff] (!%p229_p3)   ;;  %v2520_v10 = vld [vmem:[%s3278_s1 + $0x68] sm:$0xff] (!%p229_p3)  }
   0x9   : > { %2175 = vmatprep.subr.bf16.mxu0 (!%p229_p3), %v2512_v2  ;;  %2470 = vmatprep.subr.bf16.mxu1 (!%p229_p3), %v2512_v2  ;;  %v2517_v7 = vld [vmem:[%s3278_s1 + $0x18] sm:$0xff] (!%p229_p3)   ;;  %v2519_v9 = vld [vmem:[%s3278_s1 + $0x20] sm:$0xff] (!%p229_p3)   ;;  %v2521_v13 = vld [vmem:[%s3278_s1 + $0x28] sm:$0xff] (!%p229_p3)  }
   0xa   : > { %v2522_v14 = vld [vmem:[%s3278_s1 + $0x70] sm:$0xff] (!%p229_p3)   ;;  %v2524_v16 = vld [vmem:[%s3278_s1 + $0x78] sm:$0xff] (!%p229_p3)   ;;  %v2532_v18 = vld [vmem:[%s3278_s1 + $0xc0] sm:$0xff] (!%p229_p3)  }
   0xb   : > { %v2523_v15 = vld [vmem:[%s3278_s1 + $0x30] sm:$0xff] (!%p229_p3)   ;;  %v2525_v17 = vld [vmem:[%s3278_s1 + $0x38] sm:$0xff] (!%p229_p3)   ;;  %v2533_v20 = vld [vmem:[%s3278_s1 + $0x100] sm:$0xff] (!%p229_p3)  }
   0xc   : > { %2176 = vmatpush3.bf16.msra.mxu0 (!%p229_p3), %v2513_v3  ;;  %2478 = vmatpush3.bf16.msra.mxu1 (!%p229_p3), %v2513_v3  ;;  %v2534_v22 = vld [vmem:[%s3278_s1 + $0x80] sm:$0xff] (!%p229_p3)   ;;  %v2535_v23 = vld [vmem:[%s3278_s1 + $0xc8] sm:$0xff] (!%p229_p3)   ;;  %v2543_v29 = vld [vmem:[%s3278_s1 + $0xd0] sm:$0xff] (!%p229_p3)  }
   0xd   : > { %2177 = vmatprep.subr.bf16.mxu0 (!%p229_p3), %v2514_v4  ;;  %2471 = vmatprep.subr.bf16.mxu1 (!%p229_p3), %v2514_v4  ;;  %v2546_v26 = vld [vmem:[%s3278_s1 + $0x108] sm:$0xff] (!%p229_p3)   ;;  %v2544_v31 = vld [vmem:[%s3278_s1 + $0x90] sm:$0xff] (!%p229_p3)   ;;  %v2545_v33 = vld [vmem:[%s3278_s1 + $0xd8] sm:$0xff] (!%p229_p3)  }
   0xe   : > { %s3288_s24 = smov (!%p287_p4, %s2046_s24), 63  ;;  %v2536_v27 = vld [vmem:[%s3278_s1 + $0x88] sm:$0xff]   ;;  %v2565_v35 = vld [vmem:[%s3278_s1 + $0x110] sm:$0xff]   ;;  %v2547_v36 = vld [vmem:[%s3278_s1 + $0x98] sm:$0xff]   ;;  %s3290_s18 = smov (!%p312_p5, %s2676_s18), 1 }
   0xf   : > { %s2485_s12 = smul.u32 20, %s3288_s24  ;;  %v2554_v38 = vld [vmem:[%s3278_s1 + $0xe0] sm:$0xff]   ;;  %v2556_v41 = vld [vmem:[%s3278_s1 + $0xe8] sm:$0xff]   ;;  %v2575_v44 = vld [vmem:[%s3278_s1 + $0x118] sm:$0xff]   ;;  %s2049_s6 = sshll.u32 %s3288_s24, 3 }
  0x10   : > { %2178 = vmatpush3.bf16.msra.mxu0 %v2515_v5  ;;  %2479 = vmatpush3.bf16.msra.mxu1 %v2515_v5  ;;  %v2555_v40 = vld [vmem:[%s3278_s1 + $0xa0] sm:$0xff]   ;;  %v2557_v45 = vld [vmem:[%s3278_s1 + $0xa8] sm:$0xff]   ;;  %v2564_v48 = vld [vmem:[%s3278_s1 + $0xf0] sm:$0xff]   ;;  %s3058_s9 = scalar_lea.vmem %s3280_s3, %s2049_s6  ;;  %s316_s11 = scalar_lea.vmem %s3281_s4, %s3290_s18 }
  0x11   : > { %2179 = vmatprep.subr.bf16.mxu0 %v2516_v6  ;;  %2472 = vmatprep.subr.bf16.mxu1 %v2516_v6  ;;  %s2770_s23 = scalar_lea.vmem %s3277_s0, %s2485_s12  ;;  %v2566_v49 = vld [vmem:[%s3278_s1 + $0xb0] sm:$0xff]   ;;  %v2567_v50 = vld [vmem:[%s3278_s1 + $0xf8] sm:$0xff]   ;;  %v2588_v52 = vld [vmem:[%s3278_s1 + $0x120] sm:$0xff]   ;;  %s323_s14 = scalar_lea.vmem %s3282_s5, %s3290_s18 }
  0x12   : > { %v2528_v11 = vld [vmem:[%s2770_s23 + $0x4] ss:$20 sps:$4 sm:$0xff]   ;;  %v2526_v19 = vld [vmem:[%s2770_s23] ss:$20 sps:$4 sm:$0xff]   ;;  %v2541_v28 = vld [vmem:[%s2770_s23 + $0x28] ss:$20 sps:$4 sm:$0xff]  }
  0x13   : > { %v2531_v12 = vld [vmem:[%s2770_s23 + $0x1e4] ss:$20 sps:$4 sm:$0xff]   ;;  %1196 = vmatprep.mubr.bf16.mxu0 %v2528_v11  ;;  %v2529_v21 = vld [vmem:[%s2770_s23 + $0x1e0] ss:$20 sps:$4 sm:$0xff]   ;;  %v2542_v30 = vld [vmem:[%s2770_s23 + $0x208] ss:$20 sps:$4 sm:$0xff]  }
  0x14   : > { %2180 = vmatpush3.bf16.msra.mxu0 %v2517_v7  ;;  %2480 = vmatpush3.bf16.msra.mxu1 %v2517_v7  ;;  %v2537_v24 = vld [vmem:[%s2770_s23 + $0x2c] ss:$20 sps:$4 sm:$0xff]   ;;  %v2548_v32 = vld [vmem:[%s2770_s23 + $0x54] ss:$20 sps:$4 sm:$0xff]   ;;  %v2552_v37 = vld [vmem:[%s2770_s23 + $0x50] ss:$20 sps:$4 sm:$0xff]  }
  0x15   : > { %2181 = vmatprep.subr.bf16.mxu0 %v2518_v8  ;;  %2473 = vmatprep.subr.bf16.mxu1 %v2518_v8  ;;  %v2539_v25 = vld [vmem:[%s2770_s23 + $0x20c] ss:$20 sps:$4 sm:$0xff]   ;;  %v2550_v34 = vld [vmem:[%s2770_s23 + $0x234] ss:$20 sps:$4 sm:$0xff]   ;;  %v2553_v39 = vld [vmem:[%s2770_s23 + $0x230] ss:$20 sps:$4 sm:$0xff]  }
  0x16   : > { %1292 = vmatprep.mubr.bf16.mxu1 %v2531_v12  ;;  %v2558_v42 = vld [vmem:[%s2770_s23 + $0x7c] ss:$20 sps:$4 sm:$0xff]   ;;  %v2562_v46 = vld [vmem:[%s2770_s23 + $0x78] ss:$20 sps:$4 sm:$0xff]   ;;  %v2574_v57 = vld [vmem:[%s2770_s23 + $0xa0] ss:$20 sps:$4 sm:$0xff]  }
  0x17   : > { %v2560_v43 = vld [vmem:[%s2770_s23 + $0x25c] ss:$20 sps:$4 sm:$0xff]   ;;  %v2563_v47 = vld [vmem:[%s2770_s23 + $0x258] ss:$20 sps:$4 sm:$0xff]   ;;  %v2578_v59 = vld [vmem:[%s2770_s23 + $0x34] ss:$20 sps:$4 sm:$0xff]  }
  0x18   : > { %2182 = vmatpush3.bf16.msra.mxu0 %v2519_v9  ;;  %2481 = vmatpush3.bf16.msra.mxu1 %v2519_v9  ;;  %v2569_v51 = vld [vmem:[%s2770_s23 + $0xa4] ss:$20 sps:$4 sm:$0xff]   ;;  %v2573_v53 = vld [vmem:[%s2770_s23 + $0xc] ss:$20 sps:$4 sm:$0xff]   ;;  %v2571_v56 = vld [vmem:[%s2770_s23 + $0x8] ss:$20 sps:$4 sm:$0xff]  }
  0x19   : > { %2183 = vmatprep.subr.bf16.mxu0 %v2520_v10  ;;  %2474 = vmatprep.subr.bf16.mxu1 %v2520_v10  ;;  %v2568_v54 = vld [vmem:[%s3278_s1 + $0xb8] sm:$0xff]   ;;  %v2595_v55 = vld [vmem:[%s3278_s1 + $0x128] sm:$0xff]   ;;  %v2608_v60 = vld [vmem:[%s3278_s1 + $0x130] sm:$0xff]  }
  0x1a   : > { %v2576_v58 = vld [vmem:[%s2770_s23 + $0xcc] ss:$20 sps:$4 sm:$0xff]   ;;  %v2580_v61 = vld [vmem:[%s2770_s23 + $0xc8] ss:$20 sps:$4 sm:$0xff]   ;;  %v2581_v63 = vld [vmem:[%s2770_s23 + $0x30] ss:$20 sps:$4 sm:$0xff]  }
  0x1b   : > { %v2615_v62 = vld [vmem:[%s3278_s1 + $0x138] sm:$0xff]   ;;  %v2582_v0 = vld [vmem:[%s2770_s23 + $0xf4] ss:$20 sps:$4 sm:$0xff]   ;;  %v2586_v2 = vld [vmem:[%s2770_s23 + $0xf0] ss:$20 sps:$4 sm:$0xff]  }
  0x1c   : > { %2184 = vmatpush3.bf16.msra.mxu0 %v2521_v13  ;;  %2482 = vmatpush3.bf16.msra.mxu1 %v2521_v13  ;;  %v2584_v1 = vld [vmem:[%s2770_s23 + $0x5c] ss:$20 sps:$4 sm:$0xff]   ;;  %v2587_v3 = vld [vmem:[%s2770_s23 + $0x58] ss:$20 sps:$4 sm:$0xff]   ;;  %v2594_v7 = vld [vmem:[%s2770_s23 + $0x80] ss:$20 sps:$4 sm:$0xff]  }
  0x1d   : > { %2185 = vmatprep.subr.bf16.mxu0 %v2522_v14  ;;  %2475 = vmatprep.subr.bf16.mxu1 %v2522_v14  ;;  %v2589_v4 = vld [vmem:[%s2770_s23 + $0x11c] ss:$20 sps:$4 sm:$0xff]   ;;  %v2591_v5 = vld [vmem:[%s2770_s23 + $0x84] ss:$20 sps:$4 sm:$0xff]   ;;  %v2598_v9 = vld [vmem:[%s2770_s23 + $0xac] ss:$20 sps:$4 sm:$0xff]  }
  0x1e   : > { %v2593_v6 = vld [vmem:[%s2770_s23 + $0x118] ss:$20 sps:$4 sm:$0xff]   ;;  %v2600_v10 = vld [vmem:[%s2770_s23 + $0x140] ss:$20 sps:$4 sm:$0xff]   ;;  %v2601_v11 = vld [vmem:[%s2770_s23 + $0xa8] ss:$20 sps:$4 sm:$0xff]  }
  0x1f   : > { %v2596_v8 = vld [vmem:[%s2770_s23 + $0x144] ss:$20 sps:$4 sm:$0xff]   ;;  %v2602_v12 = vld [vmem:[%s2770_s23 + $0x16c] ss:$20 sps:$4 sm:$0xff]   ;;  %v2604_v13 = vld [vmem:[%s2770_s23 + $0xd4] ss:$20 sps:$4 sm:$0xff]  }
  0x20   : > { %2186 = vmatpush3.bf16.msra.mxu0 %v2523_v15  ;;  %2483 = vmatpush3.bf16.msra.mxu1 %v2523_v15  ;;  %v2606_v14 = vld [vmem:[%s2770_s23 + $0x168] ss:$20 sps:$4 sm:$0xff]   ;;  %v2607_v15 = vld [vmem:[%s2770_s23 + $0xd0] ss:$20 sps:$4 sm:$0xff]  }
  0x21   : > { %2187 = vmatprep.subr.bf16.mxu0 %v2524_v16  ;;  %2476 = vmatprep.subr.bf16.mxu1 %v2524_v16  ;;  %v2609_v16 = vld [vmem:[%s2770_s23 + $0x194] ss:$20 sps:$4 sm:$0xff]  }
  0x24   : > { %2188 = vmatpush3.bf16.msra.mxu0 %v2525_v17  ;;  %2484 = vmatpush3.bf16.msra.mxu1 %v2525_v17  ;;  %v2611_v17 = vld [vmem:[%s2770_s23 + $0xfc] ss:$20 sps:$4 sm:$0xff]  }
  0x25   : > { %2285 = vmatprep.subr.bf16.mxu1 %v2532_v18  ;;  %2421 = vmatprep.subr.bf16.mxu0 %v2533_v20  ;;  %v2613_v18 = vld [vmem:[%s2770_s23 + $0x190] ss:$20 sps:$4 sm:$0xff]  }
  0x27   : > { %1197 = vmatmul.mubr.bf16.vlgmr.msra.gmra.mrb[0].mxu0 %v2526_v19  ;;  %1293 = vmatmul.mubr.bf16.vlgmr.msra.gmra.mrb[0].mxu1 %v2529_v21  ;;  %v2614_v19 = vld [vmem:[%s2770_s23 + $0xf8] ss:$20 sps:$4 sm:$0xff]  }
  0x28   : > { %2286 = vmatpush3.bf16.msra.mxu1 %v2534_v22  ;;  %2422 = vmatpush3.bf16.msra.mxu0 %v2533_v20  ;;  %v2616_v20 = vld [vmem:[%s2770_s23 + $0x1bc] ss:$20 sps:$4 sm:$0xff]   ;;  %v2618_v21 = vld [vmem:[%s2770_s23 + $0x124] ss:$20 sps:$4 sm:$0xff]  }
  0x29   : > { %2287 = vmatprep.subr.bf16.mxu1 %v2535_v23  ;;  %1204 = vmatprep.mubr.bf16.mxu0 %v2537_v24  ;;  %v2620_v22 = vld [vmem:[%s2770_s23 + $0x1b8] ss:$20 sps:$4 sm:$0xff]   ;;  %v2621_v23 = vld [vmem:[%s2770_s23 + $0x120] ss:$20 sps:$4 sm:$0xff]  }
  0x2a   : > { %1300 = vmatprep.mubr.bf16.mxu1 %v2539_v25  ;;  %2423 = vmatprep.subr.bf16.mxu0 %v2546_v26  ;;  %v2622_v24 = vld [vmem:[%s2770_s23 + $0x14c] ss:$20 sps:$4 sm:$0xff]   ;;  %v2624_v25 = vld [vmem:[%s2770_s23 + $0x10] ss:$20 sps:$4 sm:$0xff]  }
  0x2c   : > { %2288 = vmatpush3.bf16.msra.mxu1 %v2536_v27  ;;  %2424 = vmatpush3.bf16.msra.mxu0 %v2546_v26  ;;  %v2625_v26 = vld [vmem:[%s2770_s23 + $0x148] ss:$20 sps:$4 sm:$0xff]   ;;  %v2626_v27 = vld [vmem:[%s2770_s23 + $0x38] ss:$20 sps:$4 sm:$0xff]  }
  0x2d   : > { %2289 = vmatprep.subr.bf16.mxu1 %v2543_v29  ;;  %2425 = vmatprep.subr.bf16.mxu0 %v2565_v35  ;;  %v2629_v29 = vld [vmem:[%s2770_s23 + $0x60] ss:$20 sps:$4 sm:$0xff]  }
  0x2f   : > { %1205 = vmatmul.mubr.bf16.gmra.mrb[4].mxu0 %v2541_v28  ;;  %1301 = vmatmul.mubr.bf16.gmra.mrb[4].mxu1 %v2542_v30  ;;  %v2627_v28 = vld [vmem:[%s2770_s23 + $0x174] ss:$20 sps:$4 sm:$0xff]   ;;  %v2630_v30 = vld [vmem:[%s2770_s23 + $0x170] ss:$20 sps:$4 sm:$0xff]  }
  0x30   : > { %2290 = vmatpush3.bf16.msra.mxu1 %v2544_v31  ;;  %1212 = vmatprep.mubr.bf16.mxu0 %v2548_v32  ;;  %v2631_v31 = vld [vmem:[%s2770_s23 + $0x88] ss:$20 sps:$4 sm:$0xff]  }
  0x31   : > { %2291 = vmatprep.subr.bf16.mxu1 %v2545_v33  ;;  %1308 = vmatprep.mubr.bf16.mxu1 %v2550_v34  ;;  %v2632_v32 = vld [vmem:[%s2770_s23 + $0x19c] ss:$20 sps:$4 sm:$0xff]   ;;  %v2635_v34 = vld [vmem:[%s2770_s23 + $0x198] ss:$20 sps:$4 sm:$0xff]  }
  0x32   : > { %2426 = vmatpush3.bf16.msra.mxu0 %v2565_v35  ;;  %v2634_v33 = vld [vmem:[%s2770_s23 + $0xb0] ss:$20 sps:$4 sm:$0xff]   ;;  %v2636_v35 = vld [vmem:[%s2770_s23 + $0xd8] ss:$20 sps:$4 sm:$0xff]  }
  0x33   : > { %2427 = vmatprep.subr.bf16.mxu0 %v2575_v44 }
  0x34   : > { %2292 = vmatpush3.bf16.msra.mxu1 %v2547_v36  ;;  %v2637_v36 = vld [vmem:[%s2770_s23 + $0x1c4] ss:$20 sps:$4 sm:$0xff]  }
  0x35   : > { %2293 = vmatprep.subr.bf16.mxu1 %v2554_v38  ;;  %v2640_v38 = vld [vmem:[%s2770_s23 + $0x1c0] ss:$20 sps:$4 sm:$0xff]  }
  0x36   : > { %2428 = vmatpush3.bf16.msra.mxu0 %v2575_v44  ;;  %v2647_v44 = vld [vmem:[%s2770_s23 + $0x214] ss:$20 sps:$4 sm:$0xff]  }
  0x37   : > { %1213 = vmatmul.mubr.bf16.gmra.mrb[8].mxu0 %v2552_v37  ;;  %1309 = vmatmul.mubr.bf16.gmra.mrb[8].mxu1 %v2553_v39  ;;  %v2639_v37 = vld [vmem:[%s2770_s23 + $0x100] ss:$20 sps:$4 sm:$0xff]   ;;  %v2641_v39 = vld [vmem:[%s2770_s23 + $0x128] ss:$20 sps:$4 sm:$0xff]  }
  0x38   : > { %2294 = vmatpush3.bf16.msra.mxu1 %v2555_v40  ;;  %1220 = vmatprep.mubr.bf16.mxu0 %v2558_v42  ;;  %v2642_v40 = vld [vmem:[%s2770_s23 + $0x1ec] ss:$20 sps:$4 sm:$0xff]   ;;  %v2645_v42 = vld [vmem:[%s2770_s23 + $0x1e8] ss:$20 sps:$4 sm:$0xff]  }
  0x39   : > { %2295 = vmatprep.subr.bf16.mxu1 %v2556_v41  ;;  %1316 = vmatprep.mubr.bf16.mxu1 %v2560_v43  ;;  %v2644_v41 = vld [vmem:[%s2770_s23 + $0x150] ss:$20 sps:$4 sm:$0xff]   ;;  %v2646_v43 = vld [vmem:[%s2770_s23 + $0x178] ss:$20 sps:$4 sm:$0xff]  }
  0x3a   : > { %2429 = vmatprep.subr.bf16.mxu0 %v2588_v52 }
  0x3b   : > { %2430 = vmatpush3.bf16.msra.mxu0 %v2588_v52  ;;  %v2657_v52 = vld [vmem:[%s2770_s23 + $0x264] ss:$20 sps:$4 sm:$0xff]  }
  0x3c   : > { %2296 = vmatpush3.bf16.msra.mxu1 %v2557_v45  ;;  %2431 = vmatprep.subr.bf16.mxu0 %v2595_v55  ;;  %v2649_v45 = vld [vmem:[%s2770_s23 + $0x1a0] ss:$20 sps:$4 sm:$0xff]  }
  0x3d   : > { %2297 = vmatprep.subr.bf16.mxu1 %v2564_v48  ;;  %v2652_v48 = vld [vmem:[%s2770_s23 + $0x23c] ss:$20 sps:$4 sm:$0xff]  }
  0x3f   : > { %1221 = vmatmul.mubr.bf16.gmra.mrb[12].mxu0 %v2562_v46  ;;  %1317 = vmatmul.mubr.bf16.gmra.mrb[12].mxu1 %v2563_v47  ;;  %v2650_v46 = vld [vmem:[%s2770_s23 + $0x210] ss:$20 sps:$4 sm:$0xff]   ;;  %v2651_v47 = vld [vmem:[%s2770_s23 + $0x1c8] ss:$20 sps:$4 sm:$0xff]  }
  0x40   : > { %2298 = vmatpush3.bf16.msra.mxu1 %v2566_v49  ;;  %1228 = vmatprep.mubr.bf16.mxu0 %v2569_v51  ;;  %v2654_v49 = vld [vmem:[%s2770_s23 + $0x1f0] ss:$20 sps:$4 sm:$0xff]   ;;  %v2656_v51 = vld [vmem:[%s2770_s23 + $0x218] ss:$20 sps:$4 sm:$0xff]  }
  0x41   : > { %2299 = vmatprep.subr.bf16.mxu1 %v2567_v50  ;;  %1357 = vmatprep.mubr.bf16.mxu1 %v2573_v53  ;;  %v2655_v50 = vld [vmem:[%s2770_s23 + $0x238] ss:$20 sps:$4 sm:$0xff]   ;;  %v2659_v53 = vld [vmem:[%s2770_s23 + $0x240] ss:$20 sps:$4 sm:$0xff]  }
  0x42   : > { %2432 = vmatpush3.bf16.msra.mxu0 %v2595_v55  ;;  %v2661_v55 = vld [vmem:[%s2770_s23 + $0x268] ss:$20 sps:$4 sm:$0xff]  }
  0x43   : > { %2433 = vmatprep.subr.bf16.mxu0 %v2608_v60 }
  0x44   : > { %2300 = vmatpush3.bf16.msra.mxu1 %v2568_v54  ;;  %v2660_v54 = vld [vmem:[%s2770_s23 + $0x260] ss:$20 sps:$4 sm:$0xff]  }
  0x46   : > { %2434 = vmatpush3.bf16.msra.mxu0 %v2608_v60 }
  0x47   : > { %1229 = vmatmul.mubr.bf16.gmra.mrb[16].mxu0 %v2574_v57  ;;  %1358 = vmatmul.mubr.bf16.vlgmr.msra.gmra.mrb[16].mxu1 %v2571_v56 }
  0x48   : > { %1236 = vmatprep.mubr.bf16.mxu0 %v2576_v58  ;;  %1365 = vmatprep.mubr.bf16.mxu1 %v2578_v59 }
  0x49   : > { %2435 = vmatprep.subr.bf16.mxu0 %v2615_v62 }
  0x4a   : > { %2436 = vmatpush3.bf16.msra.mxu0 %v2615_v62 }
  0x4f   : > { %1237 = vmatmul.mubr.bf16.gmra.mrb[20].mxu0 %v2580_v61  ;;  %1366 = vmatmul.mubr.bf16.gmra.mrb[20].mxu1 %v2581_v63 }
  0x50   : > { %1244 = vmatprep.mubr.bf16.mxu0 %v2582_v0  ;;  %1373 = vmatprep.mubr.bf16.mxu1 %v2584_v1 }
  0x57   : > { %1245 = vmatmul.mubr.bf16.gmra.mrb[24].mxu0 %v2586_v2  ;;  %1374 = vmatmul.mubr.bf16.gmra.mrb[24].mxu1 %v2587_v3 }
  0x58   : > { %1252 = vmatprep.mubr.bf16.mxu0 %v2589_v4  ;;  %1381 = vmatprep.mubr.bf16.mxu1 %v2591_v5 }
  0x5f   : > { %1253 = vmatmul.mubr.bf16.gmra.mrb[28].mxu0 %v2593_v6  ;;  %1382 = vmatmul.mubr.bf16.gmra.mrb[28].mxu1 %v2594_v7 }
  0x60   : > { %1260 = vmatprep.mubr.bf16.mxu0 %v2596_v8  ;;  %1389 = vmatprep.mubr.bf16.mxu1 %v2598_v9 }
  0x67   : > { %1261 = vmatmul.mubr.bf16.gmra.mrb[32].mxu0 %v2600_v10  ;;  %1390 = vmatmul.mubr.bf16.gmra.mrb[32].mxu1 %v2601_v11 }
  0x68   : > { %1268 = vmatprep.mubr.bf16.mxu0 %v2602_v12  ;;  %1397 = vmatprep.mubr.bf16.mxu1 %v2604_v13 }
  0x6f   : > { %1269 = vmatmul.mubr.bf16.gmra.mrb[36].mxu0 %v2606_v14  ;;  %1398 = vmatmul.mubr.bf16.gmra.mrb[36].mxu1 %v2607_v15 }
  0x70   : > { %1276 = vmatprep.mubr.bf16.mxu0 %v2609_v16  ;;  %1405 = vmatprep.mubr.bf16.mxu1 %v2611_v17 }
  0x77   : > { %1277 = vmatmul.mubr.bf16.gmra.mrb[40].mxu0 %v2613_v18  ;;  %1406 = vmatmul.mubr.bf16.gmra.mrb[40].mxu1 %v2614_v19 }
  0x78   : > { %1284 = vmatprep.mubr.bf16.mxu0 %v2616_v20  ;;  %1413 = vmatprep.mubr.bf16.mxu1 %v2618_v21 }
  0x7f   : > { %1285 = vmatmul.mubr.bf16.gmra.mrb[44].mxu0 %v2620_v22  ;;  %1414 = vmatmul.mubr.bf16.gmra.mrb[44].mxu1 %v2621_v23 }
  0x80   : > { %1421 = vmatprep.mubr.bf16.mxu1 %v2622_v24  ;;  %2437 = vmatprep.mubr.bf16.mxu0 %v2624_v25 }
  0x87   : > { %1422 = vmatmul.mubr.bf16.gmra.mrb[48].mxu1 %v2625_v26  ;;  %2438 = vmatmul.mubr.bf16.vlgmr.msra.gmra.mrb[48].mxu0 %v2626_v27 }
  0x88   : > { %1429 = vmatprep.mubr.bf16.mxu1 %v2627_v28  ;;  %2441 = vmatprep.mubr.bf16.mxu0 %v2629_v29 }
  0x8f   : > { %1430 = vmatmul.mubr.bf16.gmra.mrb[52].mxu1 %v2630_v30  ;;  %2442 = vmatmul.mubr.bf16.gmra.mrb[52].mxu0 %v2631_v31 }
  0x90   : > { %1437 = vmatprep.mubr.bf16.mxu1 %v2632_v32  ;;  %2445 = vmatprep.mubr.bf16.mxu0 %v2634_v33 }
  0x97   : > { %1438 = vmatmul.mubr.bf16.gmra.mrb[56].mxu1 %v2635_v34  ;;  %2446 = vmatmul.mubr.bf16.gmra.mrb[56].mxu0 %v2636_v35 }
  0x98   : > { %1445 = vmatprep.mubr.bf16.mxu1 %v2637_v36  ;;  %2449 = vmatprep.mubr.bf16.mxu0 %v2639_v37 }
  0x9f   : > { %1446 = vmatmul.mubr.bf16.gmra.mrb[60].mxu1 %v2640_v38  ;;  %2450 = vmatmul.mubr.bf16.gmra.mrb[60].mxu0 %v2641_v39 }
  0xa0   : > { %1453 = vmatprep.mubr.bf16.mxu1 %v2642_v40  ;;  %2453 = vmatprep.mubr.bf16.mxu0 %v2644_v41  ;;  %v2964_v40 = vld [vmem:[%s3279_s2] ss:$0 sm:$0xff] }
  0xa7   : > { %1454 = vmatmul.mubr.bf16.gmra.mrb[64].mxu1 %v2645_v42  ;;  %2454 = vmatmul.mubr.bf16.gmra.mrb[64].mxu0 %v2646_v43 }
  0xa8   : > { %1461 = vmatprep.mubr.bf16.mxu1 %v2647_v44  ;;  %2457 = vmatprep.mubr.bf16.mxu0 %v2649_v45 }
  0xaf   : > { %1462 = vmatmul.mubr.bf16.gmra.mrb[68].mxu1 %v2650_v46  ;;  %2458 = vmatmul.mubr.bf16.gmra.mrb[68].mxu0 %v2651_v47 }
  0xb0   : > { %1469 = vmatprep.mubr.bf16.mxu1 %v2652_v48  ;;  %2461 = vmatprep.mubr.bf16.mxu0 %v2654_v49 }
  0xb7   : > { %1470 = vmatmul.mubr.bf16.gmra.mrb[72].mxu1 %v2655_v50  ;;  %2462 = vmatmul.mubr.bf16.gmra.mrb[72].mxu0 %v2656_v51 }
  0xb8   : > { %1477 = vmatprep.mubr.bf16.mxu1 %v2657_v52  ;;  %2465 = vmatprep.mubr.bf16.mxu0 %v2659_v53 }
  0xbf   : > { %1478 = vmatmul.mubr.bf16.gmra.mrb[76].mxu1 %v2660_v54  ;;  %2466 = vmatmul.mubr.bf16.gmra.mrb[76].mxu0 %v2661_v55 }
  0xfa   : > { %v2189_v56 = vpop.f32.mrb[0].mxu0  ;;  %v2261_v57 = vpop.f32.mrb[0].mxu1 }
  0xfb   : > { %v2190_v58 = vpop.f32.mrb[1].mxu0  ;;  %v2262_v59 = vpop.f32.mrb[1].mxu1 }
  0xfc   : > { %v2191_v60 = vadd.f32 %v2190_v58, %v2189_v56  ;;  %v2945_v61 = vadd.f32 %v2262_v59, %v2261_v57  ;;  %v2192_v62 = vpop.f32.mrb[2].mxu0  ;;  %v2264_v63 = vpop.f32.mrb[2].mxu1 }
  0xfd   : > { %v2193_v0 = vpop.f32.mrb[3].mxu0  ;;  %v2265_v1 = vpop.f32.mrb[3].mxu1 }
  0xfe   : > { %v2194_v2 = vadd.f32 %v2193_v0, %v2192_v62  ;;  %v2947_v3 = vadd.f32 %v2265_v1, %v2264_v63  ;;  %v1199_v45 = vadd.f32 %v2191_v60, %v2964_v40 }
 0x100   : > { %v1202_v52 = vadd.f32 %v2194_v2, %v2964_v40 }
 0x102   : > { %v2195_v4 = vpop.f32.mrb[4].mxu0  ;;  %v2267_v5 = vpop.f32.mrb[4].mxu1 }
 0x103   : > { %v2196_v6 = vpop.f32.mrb[5].mxu0  ;;  %v2268_v7 = vpop.f32.mrb[5].mxu1 }
 0x104   : > { %v2197_v8 = vadd.f32 %v2196_v6, %v2195_v4  ;;  %v2949_v9 = vadd.f32 %v2268_v7, %v2267_v5  ;;  %v2198_v10 = vpop.f32.mrb[6].mxu0  ;;  %v2270_v11 = vpop.f32.mrb[6].mxu1 }
 0x105   : > { %v2199_v12 = vpop.f32.mrb[7].mxu0  ;;  %v2271_v13 = vpop.f32.mrb[7].mxu1 }
 0x106   : > { %v2200_v14 = vadd.f32 %v2199_v12, %v2198_v10  ;;  %v2951_v15 = vadd.f32 %v2271_v13, %v2270_v11  ;;  %v1207_v62 = vadd.f32 %v2197_v8, %v2964_v40 }
 0x108   : > { %v1210_v6 = vadd.f32 %v2200_v14, %v2964_v40 }
 0x10a   : > { %v2201_v16 = vpop.f32.mrb[8].mxu0  ;;  %v2273_v17 = vpop.f32.mrb[8].mxu1 }
 0x10b   : > { %v2202_v18 = vpop.f32.mrb[9].mxu0  ;;  %v2274_v19 = vpop.f32.mrb[9].mxu1 }
 0x10c   : > { %v2203_v20 = vadd.f32 %v2202_v18, %v2201_v16  ;;  %v2953_v21 = vadd.f32 %v2274_v19, %v2273_v17  ;;  %v2204_v22 = vpop.f32.mrb[10].mxu0  ;;  %v2276_v23 = vpop.f32.mrb[10].mxu1 }
 0x10d   : > { %v2205_v24 = vpop.f32.mrb[11].mxu0  ;;  %v2277_v25 = vpop.f32.mrb[11].mxu1 }
 0x10e   : > { %v2206_v26 = vadd.f32 %v2205_v24, %v2204_v22  ;;  %v2955_v27 = vadd.f32 %v2277_v25, %v2276_v23  ;;  %v1215_v18 = vadd.f32 %v2203_v20, %v2964_v40 }
 0x112   : > { %v2207_v28 = vpop.f32.mrb[12].mxu0  ;;  %v2279_v29 = vpop.f32.mrb[12].mxu1 }
 0x113   : > { %v2208_v30 = vpop.f32.mrb[13].mxu0  ;;  %v2280_v31 = vpop.f32.mrb[13].mxu1 }
 0x114   : > { %v2209_v32 = vadd.f32 %v2208_v30, %v2207_v28  ;;  %v2957_v33 = vadd.f32 %v2280_v31, %v2279_v29  ;;  %v2210_v34 = vpop.f32.mrb[14].mxu0  ;;  %v2282_v35 = vpop.f32.mrb[14].mxu1  ;;  %v1218_v28 = vadd.f32 %v2206_v26, %v2964_v40 }
 0x115   : > { %v2211_v36 = vpop.f32.mrb[15].mxu0  ;;  %v2283_v37 = vpop.f32.mrb[15].mxu1 }
 0x116   : > { %v2212_v38 = vadd.f32 %v2211_v36, %v2210_v34  ;;  %v2959_v39 = vadd.f32 %v2283_v37, %v2282_v35 }
 0x11a   : > { %v2213_v41 = vpop.f32.mrb[16].mxu0  ;;  %v2301_v42 = vpop.f32.mrb[16].mxu1 }
 0x11b   : > { %v2214_v43 = vpop.f32.mrb[17].mxu0  ;;  %v2302_v44 = vpop.f32.mrb[17].mxu1 }
 0x11c   : > { %v2967_v46 = vadd.f32 %v2214_v43, %v2213_v41  ;;  %v2303_v47 = vadd.f32 %v2302_v44, %v2301_v42  ;;  %v2216_v48 = vpop.f32.mrb[18].mxu0  ;;  %v2304_v49 = vpop.f32.mrb[18].mxu1  ;;  %v1223_v41 = vadd.f32 %v2209_v32, %v2964_v40 }
 0x11d   : > { %v2217_v50 = vpop.f32.mrb[19].mxu0  ;;  %v2305_v51 = vpop.f32.mrb[19].mxu1 }
 0x11e   : > { %v2970_v53 = vadd.f32 %v2217_v50, %v2216_v48  ;;  %v2306_v54 = vadd.f32 %v2305_v51, %v2304_v49  ;;  %v2972_v55 = vadd.f32 %v2303_v47, %v1199_v45  ;;  %v1226_v48 = vadd.f32 %v2212_v38, %v2964_v40 }
 0x120   : > { %v2974_v56 = vadd.f32 %v2306_v54, %v1202_v52 }
 0x122   : > { %v2219_v57 = vpop.f32.mrb[20].mxu0  ;;  %v2307_v58 = vpop.f32.mrb[20].mxu1 }
 0x123   : > { %v2220_v59 = vpop.f32.mrb[21].mxu0  ;;  %v2308_v60 = vpop.f32.mrb[21].mxu1 }
 0x124   : > { %v2977_v63 = vadd.f32 %v2220_v59, %v2219_v57  ;;  %v2309_v0 = vadd.f32 %v2308_v60, %v2307_v58  ;;  %v2222_v1 = vpop.f32.mrb[22].mxu0  ;;  %v2310_v4 = vpop.f32.mrb[22].mxu1  ;;  %v1231_v59 = vadd.f32 %v2967_v46, %v2964_v40 }
 0x125   : > { %v2223_v5 = vpop.f32.mrb[23].mxu0  ;;  %v2311_v2 = vpop.f32.mrb[23].mxu1 }
 0x126   : > { %v2980_v7 = vadd.f32 %v2223_v5, %v2222_v1  ;;  %v2312_v10 = vadd.f32 %v2311_v2, %v2310_v4  ;;  %v2982_v11 = vadd.f32 %v2309_v0, %v1207_v62  ;;  %v1234_v5 = vadd.f32 %v2970_v53, %v2964_v40 }
 0x128   : > { %v2984_v12 = vadd.f32 %v2312_v10, %v1210_v6 }
 0x12a   : > { %v2225_v13 = vpop.f32.mrb[24].mxu0  ;;  %v2313_v16 = vpop.f32.mrb[24].mxu1 }
 0x12b   : > { %v2226_v17 = vpop.f32.mrb[25].mxu0  ;;  %v2314_v8 = vpop.f32.mrb[25].mxu1 }
 0x12c   : > { %v2987_v19 = vadd.f32 %v2226_v17, %v2225_v13  ;;  %v2315_v22 = vadd.f32 %v2314_v8, %v2313_v16  ;;  %v2228_v23 = vpop.f32.mrb[26].mxu0  ;;  %v2316_v24 = vpop.f32.mrb[26].mxu1 }
 0x12d   : > { %v2229_v25 = vpop.f32.mrb[27].mxu0  ;;  %v2317_v14 = vpop.f32.mrb[27].mxu1 }
 0x12e   : > { %v2990_v29 = vadd.f32 %v2229_v25, %v2228_v23  ;;  %v2318_v30 = vadd.f32 %v2317_v14, %v2316_v24  ;;  %v2992_v31 = vadd.f32 %v2315_v22, %v1215_v18  ;;  %v1239_v18 = vadd.f32 %v2977_v63, %v2964_v40 }
 0x130   : > { %v2994_v34 = vadd.f32 %v2318_v30, %v1218_v28  ;;  %v1242_v28 = vadd.f32 %v2980_v7, %v2964_v40 }
 0x132   : > { %v2231_v35 = vpop.f32.mrb[28].mxu0  ;;  %v2319_v36 = vpop.f32.mrb[28].mxu1 }
 0x133   : > { %v2232_v37 = vpop.f32.mrb[29].mxu0  ;;  %v2320_v20 = vpop.f32.mrb[29].mxu1 }
 0x134   : > { %v2997_v42 = vadd.f32 %v2232_v37, %v2231_v35  ;;  %v2321_v43 = vadd.f32 %v2320_v20, %v2319_v36  ;;  %v2234_v44 = vpop.f32.mrb[30].mxu0  ;;  %v2322_v45 = vpop.f32.mrb[30].mxu1 }
 0x135   : > { %v2235_v47 = vpop.f32.mrb[31].mxu0  ;;  %v2323_v26 = vpop.f32.mrb[31].mxu1 }
 0x136   : > { %v3000_v49 = vadd.f32 %v2235_v47, %v2234_v44  ;;  %v2324_v50 = vadd.f32 %v2323_v26, %v2322_v45  ;;  %v3002_v51 = vadd.f32 %v2321_v43, %v1223_v41  ;;  %v1247_v44 = vadd.f32 %v2987_v19, %v2964_v40 }
 0x138   : > { %v3004_v52 = vadd.f32 %v2324_v50, %v1226_v48 }
 0x13a   : > { %v2237_v54 = vpop.f32.mrb[32].mxu0  ;;  %v2325_v57 = vpop.f32.mrb[32].mxu1 }
 0x13b   : > { %v2238_v58 = vpop.f32.mrb[33].mxu0  ;;  %v2326_v32 = vpop.f32.mrb[33].mxu1 }
 0x13c   : > { %v3008_v60 = vadd.f32 %v2238_v58, %v2237_v54  ;;  %v2327_v62 = vadd.f32 %v2326_v32, %v2325_v57  ;;  %v2240_v0 = vpop.f32.mrb[34].mxu0  ;;  %v2328_v1 = vpop.f32.mrb[34].mxu1  ;;  %v1250_v54 = vadd.f32 %v2990_v29, %v2964_v40 }
 0x13d   : > { %v2241_v38 = vpop.f32.mrb[35].mxu0  ;;  %v2329_v4 = vpop.f32.mrb[35].mxu1 }
 0x13e   : > { %v3012_v2 = vadd.f32 %v2241_v38, %v2240_v0  ;;  %v2330_v6 = vadd.f32 %v2329_v4, %v2328_v1  ;;  %v3014_v10 = vadd.f32 %v2327_v62, %v1231_v59  ;;  %v1255_v38 = vadd.f32 %v2997_v42, %v2964_v40 }
 0x140   : > { %v3016_v13 = vadd.f32 %v2330_v6, %v1234_v5 }
 0x142   : > { %v2243_v16 = vpop.f32.mrb[36].mxu0  ;;  %v2331_v17 = vpop.f32.mrb[36].mxu1 }
 0x143   : > { %v2244_v46 = vpop.f32.mrb[37].mxu0  ;;  %v2332_v8 = vpop.f32.mrb[37].mxu1 }
 0x144   : > { %v3020_v22 = vadd.f32 %v2244_v46, %v2243_v16  ;;  %v2333_v23 = vadd.f32 %v2332_v8, %v2331_v17  ;;  %v2246_v24 = vpop.f32.mrb[38].mxu0  ;;  %v2334_v25 = vpop.f32.mrb[38].mxu1  ;;  %v1258_v46 = vadd.f32 %v3000_v49, %v2964_v40 }
 0x145   : > { %v2247_v53 = vpop.f32.mrb[39].mxu0  ;;  %v2335_v14 = vpop.f32.mrb[39].mxu1 }
 0x146   : > { %v3024_v30 = vadd.f32 %v2247_v53, %v2246_v24  ;;  %v2336_v35 = vadd.f32 %v2335_v14, %v2334_v25  ;;  %v3026_v36 = vadd.f32 %v2333_v23, %v1239_v18 }
 0x148   : > { %v3028_v37 = vadd.f32 %v2336_v35, %v1242_v28 }
 0x14a   : > { %v2249_v20 = vpop.f32.mrb[40].mxu0  ;;  %v2337_v41 = vpop.f32.mrb[40].mxu1 }
 0x14b   : > { %v2250_v63 = vpop.f32.mrb[41].mxu0  ;;  %v2338_v43 = vpop.f32.mrb[41].mxu1 }
 0x14c   : > { %v3032_v45 = vadd.f32 %v2250_v63, %v2249_v20  ;;  %v2339_v47 = vadd.f32 %v2338_v43, %v2337_v41  ;;  %v2252_v26 = vpop.f32.mrb[42].mxu0  ;;  %v2340_v48 = vpop.f32.mrb[42].mxu1  ;;  %v1263_v63 = vadd.f32 %v3008_v60, %v2964_v40 }
 0x14d   : > { %v2253_v7 = vpop.f32.mrb[43].mxu0  ;;  %v2341_v50 = vpop.f32.mrb[43].mxu1 }
 0x14e   : > { %v3036_v57 = vadd.f32 %v2253_v7, %v2252_v26  ;;  %v2342_v58 = vadd.f32 %v2341_v50, %v2340_v48  ;;  %v3038_v32 = vadd.f32 %v2339_v47, %v1247_v44 }
 0x150   : > { %v3040_v59 = vadd.f32 %v2342_v58, %v1250_v54 }
 0x152   : > { %v2255_v62 = vpop.f32.mrb[44].mxu0  ;;  %v2343_v19 = vpop.f32.mrb[44].mxu1 }
 0x153   : > { %v2256_v0 = vpop.f32.mrb[45].mxu0  ;;  %v2344_v1 = vpop.f32.mrb[45].mxu1 }
 0x154   : > { %v3044_v4 = vadd.f32 %v2256_v0, %v2255_v62  ;;  %v2345_v5 = vadd.f32 %v2344_v1, %v2343_v19  ;;  %v2258_v6 = vpop.f32.mrb[46].mxu0  ;;  %v2346_v29 = vpop.f32.mrb[46].mxu1 }
 0x155   : > { %v2259_v16 = vpop.f32.mrb[47].mxu0  ;;  %v2347_v17 = vpop.f32.mrb[47].mxu1 }
 0x156   : > { %v3048_v8 = vadd.f32 %v2259_v16, %v2258_v6  ;;  %v2348_v18 = vadd.f32 %v2347_v17, %v2346_v29  ;;  %v3050_v23 = vadd.f32 %v2345_v5, %v1255_v38 }
 0x158   : > { %v3053_v24 = vadd.f32 %v2348_v18, %v1258_v46 }
 0x15a   : > { %v2349_v25 = vpop.f32.mrb[48].mxu1  ;;  %v2439_v42 = vpop.f32.mrb[48].mxu0 }
 0x15b   : > { %v1529_v49 = vadd.f32 %v2439_v42, %v2982_v11  ;;  %v2350_v53 = vpop.f32.mrb[49].mxu1  ;;  %v1520_v14 = vpop.f32.mrb[49].mxu0  ;;  %v1266_v11 = vadd.f32 %v3012_v2, %v2964_v40 }
 0x15c   : > { %v2351_v28 = vadd.f32 %v2350_v53, %v2349_v25  ;;  %v1521_v35 = vadd.f32 %v1520_v14, %v2972_v55  ;;  %v2352_v20 = vpop.f32.mrb[50].mxu1  ;;  %v2440_v41 = vpop.f32.mrb[50].mxu0  ;;  %v1271_v14 = vadd.f32 %v3020_v22, %v2964_v40  ;;  %v1274_v22 = vadd.f32 %v3024_v30, %v2964_v40 }
 0x15d   : > { %1650 = vst.msk [vmem:[%s3058_s9 + $0x10] sm:$0xff] %vm1647_vm0, %v1529_v49  ;;  %v1532_v43 = vadd.f32 %v2440_v41, %v2984_v12  ;;  %v2353_v44 = vpop.f32.mrb[51].mxu1  ;;  %v1523_v47 = vpop.f32.mrb[51].mxu0  ;;  %v1753_v7 = vmul.f32 %v1529_v49, %v1529_v49  ;;  %v1683_v19 = vsel %vm1647_vm0, %v1529_v49, 0.0 }
 0x15e   : > { %1648 = vst.msk [vmem:[%s3058_s9] sm:$0xff] %vm1647_vm0, %v1521_v35  ;;  %v1751_v26 = vmul.f32 %v1521_v35, %v1521_v35  ;;  %v2354_v48 = vadd.f32 %v2353_v44, %v2352_v20  ;;  %v1524_v55 = vadd.f32 %v1523_v47, %v2974_v56  ;;  %v3074_v50 = vadd.f32 %v2351_v28, %v1263_v63 }
 0x15f   : > { %1651 = vst.msk [vmem:[%s3058_s9 + $0x18] sm:$0xff] %vm1647_vm0, %v1532_v43  ;;  %v1680_v60 = vsel %vm1647_vm0, %v1521_v35, 0.0  ;;  %v1754_v2 = vmul.f32 %v1532_v43, %v1532_v43  ;;  %v1786_v46 = vsel %vm1647_vm0, %v1753_v7, 0.0  ;;  %v1685_v18 = vsel %vm1647_vm0, %v1532_v43, 0.0 }
 0x160   : > { %1649 = vst.msk [vmem:[%s3058_s9 + $0x8] sm:$0xff] %vm1647_vm0, %v1524_v55  ;;  %v1681_v12 = vsel %vm1647_vm0, %v1524_v55, 0.0  ;;  %v1752_v54 = vmul.f32 %v1524_v55, %v1524_v55  ;;  %v3080_v58 = vadd.f32 %v2354_v48, %v1266_v11  ;;  %v1783_v56 = vsel %vm1647_vm0, %v1751_v26, 0.0 }
 0x161   : > { %v1682_v62 = vadd.f32 %v1681_v12, %v1680_v60  ;;  %v1788_v28 = vsel %vm1647_vm0, %v1754_v2, 0.0 }
 0x162   : > { %v1784_v0 = vsel %vm1647_vm0, %v1752_v54, 0.0  ;;  %v2355_v1 = vpop.f32.mrb[52].mxu1  ;;  %v2443_v38 = vpop.f32.mrb[52].mxu0 }
 0x163   : > { %v1684_v5 = vadd.f32 %v1683_v19, %v1682_v62  ;;  %v1785_v6 = vadd.f32 %v1784_v0, %v1783_v56  ;;  %v1545_v29 = vadd.f32 %v2443_v38, %v3002_v51  ;;  %v2356_v16 = vpop.f32.mrb[53].mxu1  ;;  %v1536_v17 = vpop.f32.mrb[53].mxu0 }
 0x164   : > { %v2357_v25 = vadd.f32 %v2356_v16, %v2355_v1  ;;  %v1537_v42 = vadd.f32 %v1536_v17, %v2992_v31  ;;  %v2358_v49 = vpop.f32.mrb[54].mxu1  ;;  %v2444_v53 = vpop.f32.mrb[54].mxu0 }
 0x165   : > { %v1787_v35 = vadd.f32 %v1786_v46, %v1785_v6  ;;  %1654 = vst.msk [vmem:[%s3058_s9 + $0x30] sm:$0xff] %vm1647_vm0, %v1545_v29  ;;  %v1686_v51 = vadd.f32 %v1685_v18, %v1684_v5  ;;  %v2359_v20 = vpop.f32.mrb[55].mxu1  ;;  %v1539_v41 = vpop.f32.mrb[55].mxu0  ;;  %v1548_v43 = vadd.f32 %v2444_v53, %v3004_v52  ;;  %v1757_v48 = vmul.f32 %v1545_v29, %v1545_v29 }
 0x166   : > { %1652 = vst.msk [vmem:[%s3058_s9 + $0x20] sm:$0xff] %vm1647_vm0, %v1537_v42  ;;  %v1687_v63 = vsel %vm1647_vm0, %v1537_v42, 0.0  ;;  %v1755_v31 = vmul.f32 %v1537_v42, %v1537_v42  ;;  %v2360_v44 = vadd.f32 %v2359_v20, %v2358_v49  ;;  %v1540_v26 = vadd.f32 %v1539_v41, %v2994_v34 }
 0x167   : > { %v1688_v47 = vadd.f32 %v1687_v63, %v1686_v51  ;;  %v1789_v11 = vadd.f32 %v1788_v28, %v1787_v35  ;;  %1655 = vst.msk [vmem:[%s3058_s9 + $0x38] sm:$0xff] %vm1647_vm0, %v1548_v43  ;;  %v3104_v7 = vadd.f32 %v2357_v25, %v1271_v14  ;;  %v1691_v34 = vsel %vm1647_vm0, %v1545_v29, 0.0 }
 0x168   : > { %v1790_v55 = vsel %vm1647_vm0, %v1755_v31, 0.0  ;;  %1653 = vst.msk [vmem:[%s3058_s9 + $0x28] sm:$0xff] %vm1647_vm0, %v1540_v26  ;;  %v1689_v52 = vsel %vm1647_vm0, %v1540_v26, 0.0  ;;  %v1756_v12 = vmul.f32 %v1540_v26, %v1540_v26  ;;  %v3109_v54 = vadd.f32 %v2360_v44, %v1274_v22 }
 0x169   : > { %v1791_v60 = vadd.f32 %v1790_v55, %v1789_v11  ;;  %v1690_v30 = vadd.f32 %v1689_v52, %v1688_v47  ;;  %v1758_v19 = vmul.f32 %v1548_v43, %v1548_v43  ;;  %v1794_v25 = vsel %vm1647_vm0, %v1757_v48, 0.0 }
 0x16a   : > { %v2361_v2 = vpop.f32.mrb[56].mxu1  ;;  %v2447_v62 = vpop.f32.mrb[56].mxu0  ;;  %v1792_v56 = vsel %vm1647_vm0, %v1756_v12, 0.0  ;;  %v1693_v29 = vsel %vm1647_vm0, %v1548_v43, 0.0  ;;  %v1279_v35 = vadd.f32 %v3032_v45, %v2964_v40  ;;  %v1282_v51 = vadd.f32 %v3036_v57, %v2964_v40 }
 0x16b   : > { %v1561_v0 = vadd.f32 %v2447_v62, %v3026_v36  ;;  %v2362_v1 = vpop.f32.mrb[57].mxu1  ;;  %v1552_v38 = vpop.f32.mrb[57].mxu0  ;;  %v1692_v5 = vadd.f32 %v1691_v34, %v1690_v30  ;;  %v1793_v6 = vadd.f32 %v1792_v56, %v1791_v60  ;;  %v1796_v20 = vsel %vm1647_vm0, %v1758_v19, 0.0 }
 0x16c   : > { %v2363_v16 = vadd.f32 %v2362_v1, %v2361_v2  ;;  %v1553_v17 = vadd.f32 %v1552_v38, %v3014_v10  ;;  %v2364_v46 = vpop.f32.mrb[58].mxu1  ;;  %v2448_v18 = vpop.f32.mrb[58].mxu0  ;;  %v1287_v55 = vadd.f32 %v3044_v4, %v2964_v40 }
 0x16d   : > { %1658 = vst.msk [vmem:[%s3058_s9 + $0x50] sm:$0xff] %vm1647_vm0, %v1561_v0  ;;  %v1564_v42 = vadd.f32 %v2448_v18, %v3028_v37  ;;  %v2365_v36 = vpop.f32.mrb[59].mxu1  ;;  %v1555_v49 = vpop.f32.mrb[59].mxu0  ;;  %v1795_v53 = vadd.f32 %v1794_v25, %v1793_v6  ;;  %v1694_v14 = vadd.f32 %v1693_v29, %v1692_v5  ;;  %v1761_v44 = vmul.f32 %v1561_v0, %v1561_v0 }
 0x16e   : > { %1656 = vst.msk [vmem:[%s3058_s9 + $0x40] sm:$0xff] %vm1647_vm0, %v1553_v17  ;;  %v1695_v10 = vsel %vm1647_vm0, %v1553_v17, 0.0  ;;  %v1759_v28 = vmul.f32 %v1553_v17, %v1553_v17  ;;  %v2366_v37 = vadd.f32 %v2365_v36, %v2364_v46  ;;  %v1556_v43 = vadd.f32 %v1555_v49, %v3016_v13 }
 0x16f   : > { %1659 = vst.msk [vmem:[%s3058_s9 + $0x58] sm:$0xff] %vm1647_vm0, %v1564_v42  ;;  %v1696_v41 = vadd.f32 %v1695_v10, %v1694_v14  ;;  %v1797_v63 = vadd.f32 %v1796_v20, %v1795_v53  ;;  %v3132_v22 = vadd.f32 %v2363_v16, %v1279_v35  ;;  %v1699_v60 = vsel %vm1647_vm0, %v1561_v0, 0.0 }
 0x170   : > { %v1798_v31 = vsel %vm1647_vm0, %v1759_v28, 0.0  ;;  %v3134_v47 = vadd.f32 %v2366_v37, %v1282_v51  ;;  %1657 = vst.msk [vmem:[%s3058_s9 + $0x48] sm:$0xff] %vm1647_vm0, %v1556_v43  ;;  %v1697_v57 = vsel %vm1647_vm0, %v1556_v43, 0.0  ;;  %v1760_v11 = vmul.f32 %v1556_v43, %v1556_v43 }
 0x171   : > { %v1799_v45 = vadd.f32 %v1798_v31, %v1797_v63  ;;  %v1698_v13 = vadd.f32 %v1697_v57, %v1696_v41  ;;  %v1762_v2 = vmul.f32 %v1564_v42, %v1564_v42  ;;  %v1802_v38 = vsel %vm1647_vm0, %v1761_v44, 0.0 }
 0x172   : > { %v2367_v26 = vpop.f32.mrb[60].mxu1  ;;  %v2451_v48 = vpop.f32.mrb[60].mxu0  ;;  %v1800_v62 = vsel %vm1647_vm0, %v1760_v11, 0.0  ;;  %v1701_v4 = vsel %vm1647_vm0, %v1564_v42, 0.0  ;;  %v1290_v18 = vadd.f32 %v3048_v8, %v2964_v40  ;;  %v1295_v8 = vadd.f32 %v2945_v61, %v2964_v40 }
 0x173   : > { %v1577_v52 = vadd.f32 %v2451_v48, %v3050_v23  ;;  %v2368_v12 = vpop.f32.mrb[61].mxu1  ;;  %v1568_v30 = vpop.f32.mrb[61].mxu0  ;;  %v1700_v5 = vadd.f32 %v1699_v60, %v1698_v13  ;;  %v1801_v0 = vadd.f32 %v1800_v62, %v1799_v45  ;;  %v1804_v36 = vsel %vm1647_vm0, %v1762_v2, 0.0 }
 0x174   : > { %v2369_v34 = vadd.f32 %v2368_v12, %v2367_v26  ;;  %v1569_v19 = vadd.f32 %v1568_v30, %v3038_v32  ;;  %v2370_v56 = vpop.f32.mrb[62].mxu1  ;;  %v2452_v1 = vpop.f32.mrb[62].mxu0 }
 0x175   : > { %1662 = vst.msk [vmem:[%s3058_s9 + $0x70] sm:$0xff] %vm1647_vm0, %v1577_v52  ;;  %v2371_v23 = vpop.f32.mrb[63].mxu1  ;;  %v1571_v6 = vpop.f32.mrb[63].mxu0  ;;  %v1580_v32 = vadd.f32 %v2452_v1, %v3053_v24  ;;  %v1803_v25 = vadd.f32 %v1802_v38, %v1801_v0  ;;  %v1702_v29 = vadd.f32 %v1701_v4, %v1700_v5  ;;  %v1765_v49 = vmul.f32 %v1577_v52, %v1577_v52 }
 0x176   : > { %1660 = vst.msk [vmem:[%s3058_s9 + $0x60] sm:$0xff] %vm1647_vm0, %v1569_v19  ;;  %v1703_v16 = vsel %vm1647_vm0, %v1569_v19, 0.0  ;;  %v1763_v17 = vmul.f32 %v1569_v19, %v1569_v19  ;;  %v2372_v46 = vadd.f32 %v2371_v23, %v2370_v56  ;;  %v1572_v42 = vadd.f32 %v1571_v6, %v3040_v59 }
 0x177   : > { %1663 = vst.msk [vmem:[%s3058_s9 + $0x78] sm:$0xff] %vm1647_vm0, %v1580_v32  ;;  %v1448_v14 = vadd.f32 %v2369_v34, %v1287_v55  ;;  %v1704_v10 = vadd.f32 %v1703_v16, %v1702_v29  ;;  %v1805_v28 = vadd.f32 %v1804_v36, %v1803_v25  ;;  %v1707_v45 = vsel %vm1647_vm0, %v1577_v52, 0.0 }
 0x178   : > { %v1806_v53 = vsel %vm1647_vm0, %v1763_v17, 0.0  ;;  %1661 = vst.msk [vmem:[%s3058_s9 + $0x68] sm:$0xff] %vm1647_vm0, %v1572_v42  ;;  %v1705_v24 = vsel %vm1647_vm0, %v1572_v42, 0.0  ;;  %v1764_v35 = vmul.f32 %v1572_v42, %v1572_v42  ;;  %v3165_v20 = vadd.f32 %v2372_v46, %v1290_v18 }
 0x179   : > { %v1807_v37 = vadd.f32 %v1806_v53, %v1805_v28  ;;  %v1706_v41 = vadd.f32 %v1705_v24, %v1704_v10  ;;  %v1766_v57 = vmul.f32 %v1580_v32, %v1580_v32  ;;  %v1810_v55 = vsel %vm1647_vm0, %v1765_v49, 0.0 }
 0x17a   : > { %v2373_v51 = vpop.f32.mrb[64].mxu1  ;;  %v2455_v59 = vpop.f32.mrb[64].mxu0  ;;  %v1808_v63 = vsel %vm1647_vm0, %v1764_v35, 0.0  ;;  %v1709_v60 = vsel %vm1647_vm0, %v1580_v32, 0.0  ;;  %v1298_v34 = vadd.f32 %v2947_v3, %v2964_v40  ;;  %v1303_v3 = vadd.f32 %v2949_v9, %v2964_v40 }
 0x17b   : > { %v1593_v31 = vadd.f32 %v2455_v59, %v3104_v7  ;;  %v2374_v43 = vpop.f32.mrb[65].mxu1  ;;  %v1584_v44 = vpop.f32.mrb[65].mxu0  ;;  %v1708_v13 = vadd.f32 %v1707_v45, %v1706_v41  ;;  %v1809_v12 = vadd.f32 %v1808_v63, %v1807_v37  ;;  %v1812_v38 = vsel %vm1647_vm0, %v1766_v57, 0.0 }
 0x17c   : > { %v2375_v11 = vadd.f32 %v2374_v43, %v2373_v51  ;;  %v1585_v61 = vadd.f32 %v1584_v44, %v3074_v50  ;;  %v2376_v26 = vpop.f32.mrb[66].mxu1  ;;  %v2456_v48 = vpop.f32.mrb[66].mxu0  ;;  %v1306_v43 = vadd.f32 %v2951_v15, %v2964_v40  ;;  %v1311_v15 = vadd.f32 %v2953_v21, %v2964_v40 }
 0x17d   : > { %1666 = vst.msk [vmem:[%s3058_s9 + $0x90] sm:$0xff] %vm1647_vm0, %v1593_v31  ;;  %v2377_v7 = vpop.f32.mrb[67].mxu1  ;;  %v1587_v30 = vpop.f32.mrb[67].mxu0  ;;  %v1596_v50 = vadd.f32 %v2456_v48, %v3109_v54  ;;  %v1811_v19 = vadd.f32 %v1810_v55, %v1809_v12  ;;  %v1710_v56 = vadd.f32 %v1709_v60, %v1708_v13  ;;  %v1769_v4 = vmul.f32 %v1593_v31, %v1593_v31 }
 0x17e   : > { %1664 = vst.msk [vmem:[%s3058_s9 + $0x80] sm:$0xff] %vm1647_vm0, %v1585_v61  ;;  %v1711_v52 = vsel %vm1647_vm0, %v1585_v61, 0.0  ;;  %v1767_v2 = vmul.f32 %v1585_v61, %v1585_v61  ;;  %v2378_v62 = vadd.f32 %v2377_v7, %v2376_v26  ;;  %v1588_v1 = vadd.f32 %v1587_v30, %v3080_v58 }
 0x17f   : > { %1667 = vst.msk [vmem:[%s3058_s9 + $0x98] sm:$0xff] %vm1647_vm0, %v1596_v50  ;;  %v1456_v0 = vadd.f32 %v2375_v11, %v1295_v8  ;;  %v1712_v23 = vadd.f32 %v1711_v52, %v1710_v56  ;;  %v1813_v6 = vadd.f32 %v1812_v38, %v1811_v19  ;;  %v1715_v49 = vsel %vm1647_vm0, %v1593_v31, 0.0 }
 0x180   : > { %v1814_v5 = vsel %vm1647_vm0, %v1767_v2, 0.0  ;;  %1665 = vst.msk [vmem:[%s3058_s9 + $0x88] sm:$0xff] %vm1647_vm0, %v1588_v1  ;;  %v1713_v54 = vsel %vm1647_vm0, %v1588_v1, 0.0  ;;  %v1768_v16 = vmul.f32 %v1588_v1, %v1588_v1  ;;  %v3191_v32 = vadd.f32 %v2378_v62, %v1298_v34 }
 0x181   : > { %v1815_v46 = vadd.f32 %v1814_v5, %v1813_v6  ;;  %v1714_v18 = vadd.f32 %v1713_v54, %v1712_v23  ;;  %v1770_v53 = vmul.f32 %v1596_v50, %v1596_v50  ;;  %v1818_v35 = vsel %vm1647_vm0, %v1769_v4, 0.0 }
 0x182   : > { %v2379_v17 = vpop.f32.mrb[68].mxu1  ;;  %v2459_v58 = vpop.f32.mrb[68].mxu0  ;;  %v1816_v25 = vsel %vm1647_vm0, %v1768_v16, 0.0  ;;  %v1717_v8 = vsel %vm1647_vm0, %v1596_v50, 0.0 }
 0x183   : > { %v1609_v29 = vadd.f32 %v2459_v58, %v1448_v14  ;;  %v2380_v42 = vpop.f32.mrb[69].mxu1  ;;  %v1600_v36 = vpop.f32.mrb[69].mxu0  ;;  %v1716_v51 = vadd.f32 %v1715_v49, %v1714_v18  ;;  %v1817_v59 = vadd.f32 %v1816_v25, %v1815_v46  ;;  %v1820_v11 = vsel %vm1647_vm0, %v1770_v53, 0.0 }
 0x184   : > { %v2381_v10 = vadd.f32 %v2380_v42, %v2379_v17  ;;  %v1601_v28 = vadd.f32 %v1600_v36, %v3132_v22  ;;  %v2382_v9 = vpop.f32.mrb[70].mxu1  ;;  %v2460_v24 = vpop.f32.mrb[70].mxu0  ;;  %v1314_v18 = vadd.f32 %v2955_v27, %v2964_v40  ;;  %v1319_v27 = vadd.f32 %v2957_v33, %v2964_v40 }
 0x185   : > { %1670 = vst.msk [vmem:[%s3058_s9 + $0xb0] sm:$0xff] %vm1647_vm0, %v1609_v29  ;;  %v2383_v14 = vpop.f32.mrb[71].mxu1  ;;  %v1603_v37 = vpop.f32.mrb[71].mxu0  ;;  %v1612_v22 = vadd.f32 %v2460_v24, %v3165_v20  ;;  %v1819_v44 = vadd.f32 %v1818_v35, %v1817_v59  ;;  %v1718_v45 = vadd.f32 %v1717_v8, %v1716_v51  ;;  %v1773_v61 = vmul.f32 %v1609_v29, %v1609_v29 }
 0x186   : > { %1668 = vst.msk [vmem:[%s3058_s9 + $0xa0] sm:$0xff] %vm1647_vm0, %v1601_v28  ;;  %v1719_v41 = vsel %vm1647_vm0, %v1601_v28, 0.0  ;;  %v1771_v63 = vmul.f32 %v1601_v28, %v1601_v28  ;;  %v2384_v31 = vadd.f32 %v2383_v14, %v2382_v9  ;;  %v1604_v57 = vadd.f32 %v1603_v37, %v3134_v47 }
 0x187   : > { %1671 = vst.msk [vmem:[%s3058_s9 + $0xb8] sm:$0xff] %vm1647_vm0, %v1612_v22  ;;  %v1464_v48 = vadd.f32 %v2381_v10, %v1303_v3  ;;  %v1720_v55 = vadd.f32 %v1719_v41, %v1718_v45  ;;  %v1821_v60 = vadd.f32 %v1820_v11, %v1819_v44  ;;  %v1723_v19 = vsel %vm1647_vm0, %v1609_v29, 0.0 }
 0x188   : > { %v1822_v26 = vsel %vm1647_vm0, %v1771_v63, 0.0  ;;  %1669 = vst.msk [vmem:[%s3058_s9 + $0xa8] sm:$0xff] %vm1647_vm0, %v1604_v57  ;;  %v1721_v20 = vsel %vm1647_vm0, %v1604_v57, 0.0  ;;  %v1772_v13 = vmul.f32 %v1604_v57, %v1604_v57  ;;  %v1467_v7 = vadd.f32 %v2384_v31, %v1306_v43 }
 0x189   : > { %v1823_v30 = vadd.f32 %v1822_v26, %v1821_v60  ;;  %v1722_v52 = vadd.f32 %v1721_v20, %v1720_v55  ;;  %v1774_v56 = vmul.f32 %v1612_v22, %v1612_v22  ;;  %v1826_v21 = vsel %vm1647_vm0, %v1773_v61, 0.0 }
 0x18a   : > { %v2385_v12 = vpop.f32.mrb[72].mxu1  ;;  %v2463_v47 = vpop.f32.mrb[72].mxu0  ;;  %v1824_v2 = vsel %vm1647_vm0, %v1772_v13, 0.0  ;;  %v1725_v23 = vsel %vm1647_vm0, %v1612_v22, 0.0  ;;  %v1322_v59 = vadd.f32 %v2959_v39, %v2964_v40 }
 0x18b   : > { %v1625_v50 = vadd.f32 %v2463_v47, %v1464_v48  ;;  %v2386_v62 = vpop.f32.mrb[73].mxu1  ;;  %v1616_v34 = vpop.f32.mrb[73].mxu0  ;;  %v1724_v6 = vadd.f32 %v1723_v19, %v1722_v52  ;;  %v1825_v54 = vadd.f32 %v1824_v2, %v1823_v30  ;;  %v1828_v36 = vsel %vm1647_vm0, %v1774_v56, 0.0 }
 0x18c   : > { %v2387_v1 = vadd.f32 %v2386_v62, %v2385_v12  ;;  %v1617_v38 = vadd.f32 %v1616_v34, %v1456_v0  ;;  %v2388_v4 = vpop.f32.mrb[74].mxu1  ;;  %v2464_v5 = vpop.f32.mrb[74].mxu0 }
 0x18d   : > { %1674 = vst.msk [vmem:[%s3058_s9 + $0xd0] sm:$0xff] %vm1647_vm0, %v1625_v50  ;;  %v2389_v16 = vpop.f32.mrb[75].mxu1  ;;  %v1619_v3 = vpop.f32.mrb[75].mxu0  ;;  %v1628_v0 = vadd.f32 %v2464_v5, %v1467_v7  ;;  %v1827_v25 = vadd.f32 %v1826_v21, %v1825_v54  ;;  %v1726_v29 = vadd.f32 %v1725_v23, %v1724_v6  ;;  %v1777_v49 = vmul.f32 %v1625_v50, %v1625_v50 }
 0x18e   : > { %1672 = vst.msk [vmem:[%s3058_s9 + $0xc0] sm:$0xff] %vm1647_vm0, %v1617_v38  ;;  %v1727_v17 = vsel %vm1647_vm0, %v1617_v38, 0.0  ;;  %v1775_v58 = vmul.f32 %v1617_v38, %v1617_v38  ;;  %v2390_v46 = vadd.f32 %v2389_v16, %v2388_v4  ;;  %v1620_v42 = vadd.f32 %v1619_v3, %v3191_v32 }
 0x18f   : > { %1675 = vst.msk [vmem:[%s3058_s9 + $0xd8] sm:$0xff] %vm1647_vm0, %v1628_v0  ;;  %v1472_v10 = vadd.f32 %v2387_v1, %v1311_v15  ;;  %v1728_v28 = vadd.f32 %v1727_v17, %v1726_v29  ;;  %v1829_v9 = vadd.f32 %v1828_v36, %v1827_v25  ;;  %v1731_v31 = vsel %vm1647_vm0, %v1625_v50, 0.0 }
 0x190   : > { %v1830_v53 = vsel %vm1647_vm0, %v1775_v58, 0.0  ;;  %1673 = vst.msk [vmem:[%s3058_s9 + $0xc8] sm:$0xff] %vm1647_vm0, %v1620_v42  ;;  %v1729_v24 = vsel %vm1647_vm0, %v1620_v42, 0.0  ;;  %v1776_v35 = vmul.f32 %v1620_v42, %v1620_v42  ;;  %v1475_v51 = vadd.f32 %v2390_v46, %v1314_v18 }
 0x191   : > { %v1831_v14 = vadd.f32 %v1830_v53, %v1829_v9  ;;  %v1730_v37 = vadd.f32 %v1729_v24, %v1728_v28  ;;  %v1778_v43 = vmul.f32 %v1628_v0, %v1628_v0  ;;  %v1834_v11 = vsel %vm1647_vm0, %v1777_v49, 0.0 }
 0x192   : > { %v2391_v8 = vpop.f32.mrb[76].mxu1  ;;  %v2467_v32 = vpop.f32.mrb[76].mxu0  ;;  %v1832_v41 = vsel %vm1647_vm0, %v1776_v35, 0.0  ;;  %v1733_v61 = vsel %vm1647_vm0, %v1628_v0, 0.0 }
 0x193   : > { %v2392_v63 = vpop.f32.mrb[77].mxu1  ;;  %v1632_v22 = vpop.f32.mrb[77].mxu0  ;;  %v1732_v26 = vadd.f32 %v1731_v31, %v1730_v37  ;;  %v1833_v39 = vadd.f32 %v1832_v41, %v1831_v14  ;;  %v1836_v7 = vsel %vm1647_vm0, %v1778_v43, 0.0 }
 0x194   : > { %v2393_v44 = vadd.f32 %v2392_v63, %v2391_v8  ;;  %v1633_v45 = vadd.f32 %v1632_v22, %v1472_v10  ;;  %v2394_v57 = vpop.f32.mrb[78].mxu1  ;;  %v2468_v33 = vpop.f32.mrb[78].mxu0 }
 0x195   : > { %v2395_v40 = vpop.f32.mrb[79].mxu1  ;;  %v1635_v48 = vpop.f32.mrb[79].mxu0  ;;  %v1835_v15 = vadd.f32 %v1834_v11, %v1833_v39  ;;  %v1734_v12 = vadd.f32 %v1733_v61, %v1732_v26 }
 0x196   : > { %v1480_v55 = vadd.f32 %v2393_v44, %v1319_v27  ;;  %1676 = vst.msk [vmem:[%s3058_s9 + $0xe0] sm:$0xff] %vm1647_vm0, %v1633_v45  ;;  %v1735_v60 = vsel %vm1647_vm0, %v1633_v45, 0.0  ;;  %v1779_v20 = vmul.f32 %v1633_v45, %v1633_v45  ;;  %v2396_v13 = vadd.f32 %v2395_v40, %v2394_v57 }
 0x197   : > { %v1636_v47 = vadd.f32 %v1635_v48, %v1475_v51  ;;  %v1736_v50 = vadd.f32 %v1735_v60, %v1734_v12  ;;  %v1837_v62 = vadd.f32 %v1836_v7, %v1835_v15 }
 0x198   : > { %v1641_v30 = vadd.f32 %v2467_v32, %v1480_v55  ;;  %v1838_v52 = vsel %vm1647_vm0, %v1779_v20, 0.0  ;;  %v1483_v2 = vadd.f32 %v2396_v13, %v1322_v59 }
 0x199   : > { %1677 = vst.msk [vmem:[%s3058_s9 + $0xe8] sm:$0xff] %vm1647_vm0, %v1636_v47  ;;  %v1737_v34 = vsel %vm1647_vm0, %v1636_v47, 0.0  ;;  %v1780_v19 = vmul.f32 %v1636_v47, %v1636_v47  ;;  %v1839_v4 = vadd.f32 %v1838_v52, %v1837_v62 }
 0x19a   : > { %1678 = vst.msk [vmem:[%s3058_s9 + $0xf0] sm:$0xff] %vm1647_vm0, %v1641_v30  ;;  %v1781_v56 = vmul.f32 %v1641_v30, %v1641_v30  ;;  %v1644_v1 = vadd.f32 %v2468_v33, %v1483_v2  ;;  %v1739_v38 = vsel %vm1647_vm0, %v1641_v30, 0.0  ;;  %v1738_v5 = vadd.f32 %v1737_v34, %v1736_v50 }
 0x19b   : > { %v1840_v21 = vsel %vm1647_vm0, %v1780_v19, 0.0 }
 0x19c   : > { %1679 = vst.msk [vmem:[%s3058_s9 + $0xf8] sm:$0xff] %vm1647_vm0, %v1644_v1  ;;  %v1741_v23 = vsel %vm1647_vm0, %v1644_v1, 0.0  ;;  %v1782_v6 = vmul.f32 %v1644_v1, %v1644_v1  ;;  %v1842_v54 = vsel %vm1647_vm0, %v1781_v56, 0.0  ;;  %v1740_v16 = vadd.f32 %v1739_v38, %v1738_v5 }
 0x19d   : > { %v1841_v3 = vadd.f32 %v1840_v21, %v1839_v4 }
 0x19e   : > { %v1844_v17 = vsel %vm1647_vm0, %v1782_v6, 0.0  ;;  %v1742_v58 = vadd.f32 %v1741_v23, %v1740_v16 }
 0x19f   : > { %v1843_v0 = vadd.f32 %v1842_v54, %v1841_v3 }
 0x1a0   : > { %v1743_v46 = vrot.slane %v1742_v58, 4 }
 0x1a1   : > { %v1845_v18 = vadd.f32 %v1844_v17, %v1843_v0 }
 0x1a2   : > { %v1744_v25 = vadd.f32 %v1743_v46, %v1742_v58 }
 0x1a3   : > { %v1846_v29 = vrot.slane %v1845_v18, 4 }
 0x1a4   : > { %v1745_v42 = vrot.slane %v1744_v25, 2 }
 0x1a5   : > { %v1847_v36 = vadd.f32 %v1846_v29, %v1845_v18 }
 0x1a6   : > { %v1746_v49 = vadd.f32 %v1745_v42, %v1744_v25 }
 0x1a7   : > { %v1848_v53 = vrot.slane %v1847_v36, 2 }
 0x1a8   : > { %v1747_v10 = vrot.slane %v1746_v49, 1 }
 0x1a9   : > { %v1849_v28 = vadd.f32 %v1848_v53, %v1847_v36 }
 0x1aa   : > { %v1748_v9 = vadd.f32 %v1747_v10, %v1746_v49 }
 0x1ab   : > { %v1850_v24 = vrot.slane %v1849_v28, 1 }
 0x1ac   : > { %1750 = vst.msk [vmem:[%s316_s11] sm:$0x1] %vm1749_vm1, %v1748_v9 }
 0x1ad   : > { %v1851_v35 = vadd.f32 %v1850_v24, %v1849_v28 }
 0x1af   : > { %1852 = vst.msk [vmem:[%s323_s14] sm:$0x1] %vm1749_vm1, %v1851_v35 }
 0x1b0 PF: > { %s16_s20 = sadd.s32 1, %s2684_s20   ;;  %s3283_s18 = smov %s2680_s19 }
 0x1b1   : > { %p13_p6 = scmp.ge.s32.totalorder %s16_s20, 4   ;;  %s3284_s19 = smov %s3286_s21 }
 0x1b3   :  { %15 = sbr.rel (!%p13_p6) target bundleno = 2 (0x2), region = 89 }

// kernel: rc_generator_forward.36
= control target key start
LH: loop header
LB: loop body
LE: loop exit
PB: predicated region body
PF: predicated region fallthrough
CT: control target
= control target key end

     0   :  { %vm671_vm0 = vcmask 519168   ;;  %s1736_s0 = inlined_call_operand.vmem [shape: f32[512,64], index: 0, kind: input, shape index: {}]   ;;  %s1737_s1 = inlined_call_operand.vmem [shape: f32[1,64], index: 1, kind: input, shape index: {}]   ;;  %s1738_s2 = inlined_call_operand.vmem [shape: f32[1,64], index: 2, kind: input, shape index: {}]   ;;  %s1739_s3 = inlined_call_operand.vmem [shape: bf16[512,64], index: 3, kind: input, shape index: {}]   ;;  %s1740_s4 = inlined_call_operand.vmem [shape: bf16[512,64], index: 4, kind: output, shape index: {}]  }
   0x1   :  { %v17_v0 = vld [vmem:[%s1736_s0] sm:$0xff]  ;;  %v18_v5 = vld [vmem:[%s1736_s0 + $0x8] sm:$0xff]  ;;  %v19_v6 = vld [vmem:[%s1736_s0 + $0x10] sm:$0xff] }
   0x2   :  { %v1060_v1 = vld [vmem:[%s1737_s1] ss:$0 sm:$0xff]  ;;  %v998_v11 = vld [vmem:[%s1739_s3 + $0x8] sm:$0xff]   ;;  %v20_v12 = vld [vmem:[%s1736_s0 + $0x18] sm:$0xff] }
   0x3   :  { %v1065_v2 = vld [vmem:[%s1738_s2] ss:$0 sm:$0xff]  ;;  %v88_v3 = vmul.f32 %v1060_v1, %v17_v0  ;;  %v89_v8 = vmul.f32 %v1060_v1, %v18_v5  ;;  %v90_v10 = vmul.f32 %v1060_v1, %v19_v6  ;;  %v876_v15 = vunpack.c.l.bf16 %v998_v11  ;;  %v999_v18 = vld [vmem:[%s1739_s3 + $0x10] sm:$0xff]   ;;  %v22_v19 = vld [vmem:[%s1736_s0 + $0x28] sm:$0xff] }
   0x4   :  { %v871_v4 = vld [vmem:[%s1739_s3] sm:$0xff]   ;;  %v91_v16 = vmul.f32 %v1060_v1, %v20_v12  ;;  %v877_v17 = vunpack.c.h.bf16 %v998_v11  ;;  %v23_v20 = vld [vmem:[%s1736_s0 + $0x30] sm:$0xff]  ;;  %v880_v24 = vunpack.c.l.bf16 %v999_v18  ;;  %v1000_v25 = vld [vmem:[%s1739_s3 + $0x18] sm:$0xff]   ;;  %v93_v28 = vmul.f32 %v1060_v1, %v22_v19 }
   0x5   :  { %v872_v7 = vunpack.c.l.bf16 %v871_v4  ;;  %v873_v9 = vunpack.c.h.bf16 %v871_v4  ;;  %v21_v13 = vld [vmem:[%s1736_s0 + $0x20] sm:$0xff]  ;;  %v159_v14 = vadd.f32 %v1065_v2, %v88_v3  ;;  %v160_v21 = vadd.f32 %v1065_v2, %v89_v8  ;;  %v24_v34 = vld [vmem:[%s1736_s0 + $0x38] sm:$0xff]  ;;  %v26_v45 = vld [vmem:[%s1736_s0 + $0x48] sm:$0xff] }
   0x6   :  { %v161_v22 = vadd.f32 %v1065_v2, %v90_v10  ;;  %v92_v23 = vmul.f32 %v1060_v1, %v21_v13  ;;  %v162_v27 = vadd.f32 %v1065_v2, %v91_v16  ;;  %v881_v29 = vunpack.c.h.bf16 %v999_v18  ;;  %v25_v39 = vld [vmem:[%s1736_s0 + $0x40] sm:$0xff]  ;;  %v27_v50 = vld [vmem:[%s1736_s0 + $0x50] sm:$0xff]  ;;  %v1002_v51 = vld [vmem:[%s1739_s3 + $0x28] sm:$0xff]  }
   0x7   :  { %v351_v26 = vadd.f32 %v872_v7, %v159_v14  ;;  %v352_v30 = vadd.f32 %v873_v9, %v160_v21  ;;  %v94_v33 = vmul.f32 %v1060_v1, %v23_v20  ;;  %v164_v37 = vadd.f32 %v1065_v2, %v93_v28  ;;  %v1001_v40 = vld [vmem:[%s1739_s3 + $0x20] sm:$0xff]   ;;  %v28_v56 = vld [vmem:[%s1736_s0 + $0x58] sm:$0xff]  ;;  %v1003_v62 = vld [vmem:[%s1739_s3 + $0x30] sm:$0xff]  }
   0x8   :  { %v353_v31 = vadd.f32 %v876_v15, %v161_v22  ;;  %v163_v32 = vadd.f32 %v1065_v2, %v92_v23  ;;  %v354_v36 = vadd.f32 %v877_v17, %v162_v27  ;;  %v884_v38 = vunpack.c.l.bf16 %v1000_v25  ;;  %v29_v61 = vld [vmem:[%s1736_s0 + $0x60] sm:$0xff]  ;;  %v30_v5 = vld [vmem:[%s1736_s0 + $0x68] sm:$0xff]  ;;  %v31_v14 = vld [vmem:[%s1736_s0 + $0x70] sm:$0xff] }
   0x9   :  { %v806_v35 = vpack.c.bf16 %v351_v26, %v351_v26  ;;  %v807_v41 = vpack.c.bf16 %v352_v30, %v352_v30  ;;  %v165_v44 = vadd.f32 %v1065_v2, %v94_v33  ;;  %v356_v47 = vadd.f32 %v881_v29, %v164_v37  ;;  %v1004_v19 = vld [vmem:[%s1739_s3 + $0x38] sm:$0xff]   ;;  %v33_v29 = vld [vmem:[%s1736_s0 + $0x80] sm:$0xff] }
   0xa   :  { %v808_v42 = vpack.c.bf16 %v353_v31, %v353_v31  ;;  %v355_v43 = vadd.f32 %v880_v24, %v163_v32  ;;  %v809_v46 = vpack.c.bf16 %v354_v36, %v354_v36  ;;  %v95_v48 = vmul.f32 %v1060_v1, %v24_v34  ;;  %v32_v20 = vld [vmem:[%s1736_s0 + $0x78] sm:$0xff]  ;;  %v1005_v30 = vld [vmem:[%s1739_s3 + $0x40] sm:$0xff]  }
   0xb   :  { %672 = vst.msk [vmem:[%s1740_s4] sm:$0xf] %vm671_vm0, %v806_v35  ;;  %v885_v49 = vunpack.c.h.bf16 %v1000_v25  ;;  %673 = vst.msk [vmem:[%s1740_s4 + $0x4] sm:$0xf] %vm671_vm0, %v807_v41  ;;  %v357_v53 = vadd.f32 %v884_v38, %v165_v44  ;;  %v96_v54 = vmul.f32 %v1060_v1, %v25_v39  ;;  %v888_v55 = vunpack.c.l.bf16 %v1001_v40  ;;  %v34_v35 = vld [vmem:[%s1736_s0 + $0x88] sm:$0xff] }
   0xc   :  { %674 = vst.msk [vmem:[%s1740_s4 + $0x8] sm:$0xf] %vm671_vm0, %v808_v42  ;;  %v810_v52 = vpack.c.bf16 %v355_v43, %v355_v43  ;;  %675 = vst.msk [vmem:[%s1740_s4 + $0xc] sm:$0xf] %vm671_vm0, %v809_v46  ;;  %v811_v57 = vpack.c.bf16 %v356_v47, %v356_v47  ;;  %v166_v58 = vadd.f32 %v1065_v2, %v95_v48  ;;  %v889_v60 = vunpack.c.h.bf16 %v1001_v40  ;;  %v35_v40 = vld [vmem:[%s1736_s0 + $0x90] sm:$0xff]  ;;  %v1006_v41 = vld [vmem:[%s1739_s3 + $0x48] sm:$0xff]  }
   0xd   :  { %v97_v59 = vmul.f32 %v1060_v1, %v26_v45  ;;  %v812_v63 = vpack.c.bf16 %v357_v53, %v357_v53  ;;  %v167_v0 = vadd.f32 %v1065_v2, %v96_v54  ;;  %v98_v3 = vmul.f32 %v1060_v1, %v27_v50  ;;  %v36_v46 = vld [vmem:[%s1736_s0 + $0x98] sm:$0xff] }
   0xe   :  { %676 = vst.msk [vmem:[%s1740_s4 + $0x10] sm:$0xf] %vm671_vm0, %v810_v52  ;;  %v892_v4 = vunpack.c.l.bf16 %v1002_v51  ;;  %677 = vst.msk [vmem:[%s1740_s4 + $0x14] sm:$0xf] %vm671_vm0, %v811_v57  ;;  %v358_v6 = vadd.f32 %v885_v49, %v166_v58  ;;  %v99_v8 = vmul.f32 %v1060_v1, %v28_v56  ;;  %v893_v9 = vunpack.c.h.bf16 %v1002_v51  ;;  %v37_v51 = vld [vmem:[%s1736_s0 + $0xa0] sm:$0xff]  ;;  %v1007_v56 = vld [vmem:[%s1739_s3 + $0x50] sm:$0xff]  }
   0xf   :  { %v168_v7 = vadd.f32 %v1065_v2, %v97_v59  ;;  %678 = vst.msk [vmem:[%s1740_s4 + $0x18] sm:$0xf] %vm671_vm0, %v812_v63  ;;  %v359_v10 = vadd.f32 %v888_v55, %v167_v0  ;;  %v169_v11 = vadd.f32 %v1065_v2, %v98_v3  ;;  %v100_v12 = vmul.f32 %v1060_v1, %v29_v61  ;;  %v38_v57 = vld [vmem:[%s1736_s0 + $0xa8] sm:$0xff] }
  0x10   :  { %v896_v13 = vunpack.c.l.bf16 %v1003_v62  ;;  %v813_v15 = vpack.c.bf16 %v358_v6, %v358_v6  ;;  %v170_v17 = vadd.f32 %v1065_v2, %v99_v8  ;;  %v101_v18 = vmul.f32 %v1060_v1, %v30_v5 }
  0x11   :  { %v360_v16 = vadd.f32 %v889_v60, %v168_v7  ;;  %v814_v21 = vpack.c.bf16 %v359_v10, %v359_v10  ;;  %v361_v22 = vadd.f32 %v892_v4, %v169_v11  ;;  %v171_v23 = vadd.f32 %v1065_v2, %v100_v12  ;;  %v39_v4 = vld [vmem:[%s1736_s0 + $0xb0] sm:$0xff]  ;;  %v40_v10 = vld [vmem:[%s1736_s0 + $0xb8] sm:$0xff] }
  0x12   :  { %v897_v24 = vunpack.c.h.bf16 %v1003_v62  ;;  %679 = vst.msk [vmem:[%s1740_s4 + $0x1c] sm:$0xf] %vm671_vm0, %v813_v15  ;;  %v362_v26 = vadd.f32 %v893_v9, %v170_v17  ;;  %v172_v27 = vadd.f32 %v1065_v2, %v101_v18  ;;  %v102_v28 = vmul.f32 %v1060_v1, %v31_v14  ;;  %v1008_v9 = vld [vmem:[%s1739_s3 + $0x58] sm:$0xff]  }
  0x13   :  { %v815_v25 = vpack.c.bf16 %v360_v16, %v360_v16  ;;  %680 = vst.msk [vmem:[%s1740_s4 + $0x20] sm:$0xf] %vm671_vm0, %v814_v21  ;;  %v816_v31 = vpack.c.bf16 %v361_v22, %v361_v22  ;;  %v363_v32 = vadd.f32 %v896_v13, %v171_v23  ;;  %v900_v33 = vunpack.c.l.bf16 %v1004_v19 }
  0x14   :  { %v103_v34 = vmul.f32 %v1060_v1, %v32_v20  ;;  %v817_v36 = vpack.c.bf16 %v362_v26, %v362_v26  ;;  %v364_v37 = vadd.f32 %v897_v24, %v172_v27  ;;  %v173_v38 = vadd.f32 %v1065_v2, %v102_v28  ;;  %v1009_v20 = vld [vmem:[%s1739_s3 + $0x60] sm:$0xff]  }
  0x15   :  { %681 = vst.msk [vmem:[%s1740_s4 + $0x24] sm:$0xf] %vm671_vm0, %v815_v25  ;;  %v901_v39 = vunpack.c.h.bf16 %v1004_v19  ;;  %682 = vst.msk [vmem:[%s1740_s4 + $0x28] sm:$0xf] %vm671_vm0, %v816_v31  ;;  %v818_v42 = vpack.c.bf16 %v363_v32, %v363_v32  ;;  %v104_v44 = vmul.f32 %v1060_v1, %v33_v29  ;;  %v904_v45 = vunpack.c.l.bf16 %v1005_v30  ;;  %v41_v19 = vld [vmem:[%s1736_s0 + $0xc0] sm:$0xff]  ;;  %v42_v25 = vld [vmem:[%s1736_s0 + $0xc8] sm:$0xff] }
  0x16   :  { %v174_v43 = vadd.f32 %v1065_v2, %v103_v34  ;;  %683 = vst.msk [vmem:[%s1740_s4 + $0x2c] sm:$0xf] %vm671_vm0, %v817_v36  ;;  %v819_v47 = vpack.c.bf16 %v364_v37, %v364_v37  ;;  %v365_v48 = vadd.f32 %v900_v33, %v173_v38  ;;  %v105_v49 = vmul.f32 %v1060_v1, %v34_v35  ;;  %v1010_v31 = vld [vmem:[%s1739_s3 + $0x68] sm:$0xff]   ;;  %v44_v36 = vld [vmem:[%s1736_s0 + $0xd8] sm:$0xff] }
  0x17   :  { %v905_v50 = vunpack.c.h.bf16 %v1005_v30  ;;  %684 = vst.msk [vmem:[%s1740_s4 + $0x30] sm:$0xf] %vm671_vm0, %v818_v42  ;;  %v175_v53 = vadd.f32 %v1065_v2, %v104_v44  ;;  %v106_v54 = vmul.f32 %v1060_v1, %v35_v40  ;;  %v908_v55 = vunpack.c.l.bf16 %v1006_v41  ;;  %v43_v30 = vld [vmem:[%s1736_s0 + $0xd0] sm:$0xff] }
  0x18   :  { %v366_v52 = vadd.f32 %v901_v39, %v174_v43  ;;  %685 = vst.msk [vmem:[%s1740_s4 + $0x34] sm:$0xf] %vm671_vm0, %v819_v47  ;;  %v820_v58 = vpack.c.bf16 %v365_v48, %v365_v48  ;;  %v176_v59 = vadd.f32 %v1065_v2, %v105_v49  ;;  %v107_v60 = vmul.f32 %v1060_v1, %v36_v46  ;;  %v1011_v46 = vld [vmem:[%s1739_s3 + $0x70] sm:$0xff]   ;;  %v46_v47 = vld [vmem:[%s1736_s0 + $0xe8] sm:$0xff] }
  0x19   :  { %v909_v61 = vunpack.c.h.bf16 %v1006_v41  ;;  %v367_v63 = vadd.f32 %v904_v45, %v175_v53  ;;  %v177_v0 = vadd.f32 %v1065_v2, %v106_v54  ;;  %v108_v3 = vmul.f32 %v1060_v1, %v37_v51  ;;  %v45_v41 = vld [vmem:[%s1736_s0 + $0xe0] sm:$0xff] }
  0x1a   :  { %v821_v62 = vpack.c.bf16 %v366_v52, %v366_v52  ;;  %686 = vst.msk [vmem:[%s1740_s4 + $0x38] sm:$0xf] %vm671_vm0, %v820_v58  ;;  %v368_v5 = vadd.f32 %v905_v50, %v176_v59  ;;  %v178_v6 = vadd.f32 %v1065_v2, %v107_v60  ;;  %v912_v7 = vunpack.c.l.bf16 %v1007_v56 }
  0x1b   :  { %v109_v8 = vmul.f32 %v1060_v1, %v38_v57  ;;  %v822_v11 = vpack.c.bf16 %v367_v63, %v367_v63  ;;  %v369_v12 = vadd.f32 %v908_v55, %v177_v0  ;;  %v179_v13 = vadd.f32 %v1065_v2, %v108_v3 }
  0x1c   :  { %687 = vst.msk [vmem:[%s1740_s4 + $0x3c] sm:$0xf] %vm671_vm0, %v821_v62  ;;  %v913_v14 = vunpack.c.h.bf16 %v1007_v56  ;;  %v823_v15 = vpack.c.bf16 %v368_v5, %v368_v5  ;;  %v370_v16 = vadd.f32 %v909_v61, %v178_v6  ;;  %v110_v18 = vmul.f32 %v1060_v1, %v39_v4  ;;  %v47_v56 = vld [vmem:[%s1736_s0 + $0xf0] sm:$0xff]  ;;  %v1012_v61 = vld [vmem:[%s1739_s3 + $0x78] sm:$0xff]  }
  0x1d   :  { %v180_v17 = vadd.f32 %v1065_v2, %v109_v8  ;;  %688 = vst.msk [vmem:[%s1740_s4 + $0x40] sm:$0xf] %vm671_vm0, %v822_v11  ;;  %v824_v21 = vpack.c.bf16 %v369_v12, %v369_v12  ;;  %v371_v22 = vadd.f32 %v912_v7, %v179_v13  ;;  %v916_v23 = vunpack.c.l.bf16 %v1008_v9  ;;  %v48_v62 = vld [vmem:[%s1736_s0 + $0xf8] sm:$0xff] }
  0x1e   :  { %v111_v24 = vmul.f32 %v1060_v1, %v40_v10  ;;  %689 = vst.msk [vmem:[%s1740_s4 + $0x44] sm:$0xf] %vm671_vm0, %v823_v15  ;;  %v825_v26 = vpack.c.bf16 %v370_v16, %v370_v16  ;;  %v181_v28 = vadd.f32 %v1065_v2, %v110_v18  ;;  %v917_v29 = vunpack.c.h.bf16 %v1008_v9  ;;  %v49_v9 = vld [vmem:[%s1736_s0 + $0x100] sm:$0xff]  ;;  %v50_v15 = vld [vmem:[%s1736_s0 + $0x108] sm:$0xff] }
  0x1f   :  { %v372_v27 = vadd.f32 %v913_v14, %v180_v17  ;;  %690 = vst.msk [vmem:[%s1740_s4 + $0x48] sm:$0xf] %vm671_vm0, %v824_v21  ;;  %v826_v32 = vpack.c.bf16 %v371_v22, %v371_v22  ;;  %v112_v34 = vmul.f32 %v1060_v1, %v41_v19  ;;  %v920_v35 = vunpack.c.l.bf16 %v1009_v20  ;;  %v1013_v10 = vld [vmem:[%s1739_s3 + $0x80] sm:$0xff]   ;;  %v1014_v21 = vld [vmem:[%s1739_s3 + $0x88] sm:$0xff]  }
  0x20   :  { %v182_v33 = vadd.f32 %v1065_v2, %v111_v24  ;;  %691 = vst.msk [vmem:[%s1740_s4 + $0x4c] sm:$0xf] %vm671_vm0, %v825_v26  ;;  %v373_v38 = vadd.f32 %v916_v23, %v181_v28  ;;  %v113_v39 = vmul.f32 %v1060_v1, %v42_v25  ;;  %v921_v40 = vunpack.c.h.bf16 %v1009_v20  ;;  %v51_v20 = vld [vmem:[%s1736_s0 + $0x110] sm:$0xff]  ;;  %v52_v26 = vld [vmem:[%s1736_s0 + $0x118] sm:$0xff] }
  0x21   :  { %v827_v37 = vpack.c.bf16 %v372_v27, %v372_v27  ;;  %692 = vst.msk [vmem:[%s1740_s4 + $0x50] sm:$0xf] %vm671_vm0, %v826_v32  ;;  %v183_v43 = vadd.f32 %v1065_v2, %v112_v34  ;;  %v114_v44 = vmul.f32 %v1060_v1, %v43_v30  ;;  %v924_v45 = vunpack.c.l.bf16 %v1010_v31 }
  0x22   :  { %v374_v42 = vadd.f32 %v917_v29, %v182_v33  ;;  %v828_v48 = vpack.c.bf16 %v373_v38, %v373_v38  ;;  %v184_v49 = vadd.f32 %v1065_v2, %v113_v39  ;;  %v115_v50 = vmul.f32 %v1060_v1, %v44_v36  ;;  %v1015_v36 = vld [vmem:[%s1739_s3 + $0x90] sm:$0xff]  }
  0x23   :  { %693 = vst.msk [vmem:[%s1740_s4 + $0x54] sm:$0xf] %vm671_vm0, %v827_v37  ;;  %v925_v51 = vunpack.c.h.bf16 %v1010_v31  ;;  %v375_v53 = vadd.f32 %v920_v35, %v183_v43  ;;  %v185_v54 = vadd.f32 %v1065_v2, %v114_v44  ;;  %v116_v55 = vmul.f32 %v1060_v1, %v45_v41  ;;  %v53_v31 = vld [vmem:[%s1736_s0 + $0x120] sm:$0xff]  ;;  %v54_v37 = vld [vmem:[%s1736_s0 + $0x128] sm:$0xff] }
  0x24   :  { %v829_v52 = vpack.c.bf16 %v374_v42, %v374_v42  ;;  %694 = vst.msk [vmem:[%s1740_s4 + $0x58] sm:$0xf] %vm671_vm0, %v828_v48  ;;  %v376_v57 = vadd.f32 %v921_v40, %v184_v49  ;;  %v186_v58 = vadd.f32 %v1065_v2, %v115_v50  ;;  %v928_v59 = vunpack.c.l.bf16 %v1011_v46 }
  0x25   :  { %v117_v60 = vmul.f32 %v1060_v1, %v46_v47  ;;  %v830_v63 = vpack.c.bf16 %v375_v53, %v375_v53  ;;  %v377_v0 = vadd.f32 %v924_v45, %v185_v54  ;;  %v187_v3 = vadd.f32 %v1065_v2, %v116_v55 }
  0x26   :  { %695 = vst.msk [vmem:[%s1740_s4 + $0x5c] sm:$0xf] %vm671_vm0, %v829_v52  ;;  %v929_v4 = vunpack.c.h.bf16 %v1011_v46  ;;  %v831_v5 = vpack.c.bf16 %v376_v57, %v376_v57  ;;  %v378_v6 = vadd.f32 %v925_v51, %v186_v58  ;;  %v118_v8 = vmul.f32 %v1060_v1, %v47_v56  ;;  %v55_v46 = vld [vmem:[%s1736_s0 + $0x130] sm:$0xff]  ;;  %v1016_v51 = vld [vmem:[%s1739_s3 + $0x98] sm:$0xff]  }
  0x27   :  { %v188_v7 = vadd.f32 %v1065_v2, %v117_v60  ;;  %696 = vst.msk [vmem:[%s1740_s4 + $0x60] sm:$0xf] %vm671_vm0, %v830_v63  ;;  %v832_v11 = vpack.c.bf16 %v377_v0, %v377_v0  ;;  %v379_v12 = vadd.f32 %v928_v59, %v187_v3  ;;  %v932_v13 = vunpack.c.l.bf16 %v1012_v61  ;;  %v56_v52 = vld [vmem:[%s1736_s0 + $0x138] sm:$0xff] }
  0x28   :  { %v119_v14 = vmul.f32 %v1060_v1, %v48_v62  ;;  %697 = vst.msk [vmem:[%s1740_s4 + $0x64] sm:$0xf] %vm671_vm0, %v831_v5  ;;  %v833_v16 = vpack.c.bf16 %v378_v6, %v378_v6  ;;  %v189_v18 = vadd.f32 %v1065_v2, %v118_v8  ;;  %v933_v19 = vunpack.c.h.bf16 %v1012_v61  ;;  %v57_v61 = vld [vmem:[%s1736_s0 + $0x140] sm:$0xff]  ;;  %v58_v5 = vld [vmem:[%s1736_s0 + $0x148] sm:$0xff] }
  0x29   :  { %v380_v17 = vadd.f32 %v929_v4, %v188_v7  ;;  %698 = vst.msk [vmem:[%s1740_s4 + $0x68] sm:$0xf] %vm671_vm0, %v832_v11  ;;  %v834_v22 = vpack.c.bf16 %v379_v12, %v379_v12  ;;  %v120_v24 = vmul.f32 %v1060_v1, %v49_v9  ;;  %v936_v25 = vunpack.c.l.bf16 %v1013_v10  ;;  %v1017_v62 = vld [vmem:[%s1739_s3 + $0xa0] sm:$0xff]   ;;  %v1018_v11 = vld [vmem:[%s1739_s3 + $0xa8] sm:$0xff]  }
  0x2a   :  { %v190_v23 = vadd.f32 %v1065_v2, %v119_v14  ;;  %699 = vst.msk [vmem:[%s1740_s4 + $0x6c] sm:$0xf] %vm671_vm0, %v833_v16  ;;  %v381_v28 = vadd.f32 %v932_v13, %v189_v18  ;;  %v121_v29 = vmul.f32 %v1060_v1, %v50_v15  ;;  %v937_v30 = vunpack.c.h.bf16 %v1013_v10  ;;  %v59_v10 = vld [vmem:[%s1736_s0 + $0x150] sm:$0xff]  ;;  %v60_v16 = vld [vmem:[%s1736_s0 + $0x158] sm:$0xff] }
  0x2b   :  { %v835_v27 = vpack.c.bf16 %v380_v17, %v380_v17  ;;  %700 = vst.msk [vmem:[%s1740_s4 + $0x70] sm:$0xf] %vm671_vm0, %v834_v22  ;;  %v191_v33 = vadd.f32 %v1065_v2, %v120_v24  ;;  %v122_v34 = vmul.f32 %v1060_v1, %v51_v20  ;;  %v940_v35 = vunpack.c.l.bf16 %v1014_v21 }
  0x2c   :  { %v382_v32 = vadd.f32 %v933_v19, %v190_v23  ;;  %v836_v38 = vpack.c.bf16 %v381_v28, %v381_v28  ;;  %v192_v39 = vadd.f32 %v1065_v2, %v121_v29  ;;  %v123_v40 = vmul.f32 %v1060_v1, %v52_v26  ;;  %v1019_v26 = vld [vmem:[%s1739_s3 + $0xb0] sm:$0xff]  }
  0x2d   :  { %701 = vst.msk [vmem:[%s1740_s4 + $0x74] sm:$0xf] %vm671_vm0, %v835_v27  ;;  %v941_v41 = vunpack.c.h.bf16 %v1014_v21  ;;  %v383_v43 = vadd.f32 %v936_v25, %v191_v33  ;;  %v193_v44 = vadd.f32 %v1065_v2, %v122_v34  ;;  %v124_v45 = vmul.f32 %v1060_v1, %v53_v31  ;;  %v61_v21 = vld [vmem:[%s1736_s0 + $0x160] sm:$0xff]  ;;  %v62_v27 = vld [vmem:[%s1736_s0 + $0x168] sm:$0xff] }
  0x2e   :  { %v837_v42 = vpack.c.bf16 %v382_v32, %v382_v32  ;;  %702 = vst.msk [vmem:[%s1740_s4 + $0x78] sm:$0xf] %vm671_vm0, %v836_v38  ;;  %v384_v47 = vadd.f32 %v937_v30, %v192_v39  ;;  %v194_v48 = vadd.f32 %v1065_v2, %v123_v40  ;;  %v944_v49 = vunpack.c.l.bf16 %v1015_v36 }
  0x2f   :  { %v125_v50 = vmul.f32 %v1060_v1, %v54_v37  ;;  %v838_v53 = vpack.c.bf16 %v383_v43, %v383_v43  ;;  %v385_v54 = vadd.f32 %v940_v35, %v193_v44  ;;  %v195_v55 = vadd.f32 %v1065_v2, %v124_v45 }
  0x30   :  { %703 = vst.msk [vmem:[%s1740_s4 + $0x7c] sm:$0xf] %vm671_vm0, %v837_v42  ;;  %v945_v56 = vunpack.c.h.bf16 %v1015_v36  ;;  %v839_v57 = vpack.c.bf16 %v384_v47, %v384_v47  ;;  %v386_v58 = vadd.f32 %v941_v41, %v194_v48  ;;  %v126_v60 = vmul.f32 %v1060_v1, %v55_v46  ;;  %v63_v36 = vld [vmem:[%s1736_s0 + $0x170] sm:$0xff]  ;;  %v1020_v41 = vld [vmem:[%s1739_s3 + $0xb8] sm:$0xff]  }
  0x31   :  { %v196_v59 = vadd.f32 %v1065_v2, %v125_v50  ;;  %704 = vst.msk [vmem:[%s1740_s4 + $0x80] sm:$0xf] %vm671_vm0, %v838_v53  ;;  %v840_v63 = vpack.c.bf16 %v385_v54, %v385_v54  ;;  %v387_v0 = vadd.f32 %v944_v49, %v195_v55  ;;  %v948_v3 = vunpack.c.l.bf16 %v1016_v51  ;;  %v64_v42 = vld [vmem:[%s1736_s0 + $0x178] sm:$0xff] }
  0x32   :  { %v127_v4 = vmul.f32 %v1060_v1, %v56_v52  ;;  %705 = vst.msk [vmem:[%s1740_s4 + $0x84] sm:$0xf] %vm671_vm0, %v839_v57  ;;  %v841_v6 = vpack.c.bf16 %v386_v58, %v386_v58  ;;  %v197_v8 = vadd.f32 %v1065_v2, %v126_v60  ;;  %v949_v9 = vunpack.c.h.bf16 %v1016_v51  ;;  %v65_v51 = vld [vmem:[%s1736_s0 + $0x180] sm:$0xff]  ;;  %v66_v57 = vld [vmem:[%s1736_s0 + $0x188] sm:$0xff] }
  0x33   :  { %v388_v7 = vadd.f32 %v945_v56, %v196_v59  ;;  %706 = vst.msk [vmem:[%s1740_s4 + $0x88] sm:$0xf] %vm671_vm0, %v840_v63  ;;  %v842_v12 = vpack.c.bf16 %v387_v0, %v387_v0  ;;  %v128_v14 = vmul.f32 %v1060_v1, %v57_v61  ;;  %v952_v15 = vunpack.c.l.bf16 %v1017_v62  ;;  %v1021_v52 = vld [vmem:[%s1739_s3 + $0xc0] sm:$0xff]   ;;  %v1022_v63 = vld [vmem:[%s1739_s3 + $0xc8] sm:$0xff]  }
  0x34   :  { %v198_v13 = vadd.f32 %v1065_v2, %v127_v4  ;;  %707 = vst.msk [vmem:[%s1740_s4 + $0x8c] sm:$0xf] %vm671_vm0, %v841_v6  ;;  %v389_v18 = vadd.f32 %v948_v3, %v197_v8  ;;  %v129_v19 = vmul.f32 %v1060_v1, %v58_v5  ;;  %v953_v20 = vunpack.c.h.bf16 %v1017_v62  ;;  %v67_v62 = vld [vmem:[%s1736_s0 + $0x190] sm:$0xff]  ;;  %v68_v6 = vld [vmem:[%s1736_s0 + $0x198] sm:$0xff] }
  0x35   :  { %v843_v17 = vpack.c.bf16 %v388_v7, %v388_v7  ;;  %708 = vst.msk [vmem:[%s1740_s4 + $0x90] sm:$0xf] %vm671_vm0, %v842_v12  ;;  %v199_v23 = vadd.f32 %v1065_v2, %v128_v14  ;;  %v130_v24 = vmul.f32 %v1060_v1, %v59_v10  ;;  %v956_v25 = vunpack.c.l.bf16 %v1018_v11 }
  0x36   :  { %v390_v22 = vadd.f32 %v949_v9, %v198_v13  ;;  %v844_v28 = vpack.c.bf16 %v389_v18, %v389_v18  ;;  %v200_v29 = vadd.f32 %v1065_v2, %v129_v19  ;;  %v131_v30 = vmul.f32 %v1060_v1, %v60_v16  ;;  %v1023_v16 = vld [vmem:[%s1739_s3 + $0xd0] sm:$0xff]  }
  0x37   :  { %709 = vst.msk [vmem:[%s1740_s4 + $0x94] sm:$0xf] %vm671_vm0, %v843_v17  ;;  %v957_v31 = vunpack.c.h.bf16 %v1018_v11  ;;  %v391_v33 = vadd.f32 %v952_v15, %v199_v23  ;;  %v201_v34 = vadd.f32 %v1065_v2, %v130_v24  ;;  %v132_v35 = vmul.f32 %v1060_v1, %v61_v21  ;;  %v69_v11 = vld [vmem:[%s1736_s0 + $0x1a0] sm:$0xff]  ;;  %v70_v17 = vld [vmem:[%s1736_s0 + $0x1a8] sm:$0xff] }
  0x38   :  { %v845_v32 = vpack.c.bf16 %v390_v22, %v390_v22  ;;  %710 = vst.msk [vmem:[%s1740_s4 + $0x98] sm:$0xf] %vm671_vm0, %v844_v28  ;;  %v392_v37 = vadd.f32 %v953_v20, %v200_v29  ;;  %v202_v38 = vadd.f32 %v1065_v2, %v131_v30  ;;  %v960_v39 = vunpack.c.l.bf16 %v1019_v26 }
  0x39   :  { %v133_v40 = vmul.f32 %v1060_v1, %v62_v27  ;;  %v846_v43 = vpack.c.bf16 %v391_v33, %v391_v33  ;;  %v393_v44 = vadd.f32 %v956_v25, %v201_v34  ;;  %v203_v45 = vadd.f32 %v1065_v2, %v132_v35 }
  0x3a   :  { %711 = vst.msk [vmem:[%s1740_s4 + $0x9c] sm:$0xf] %vm671_vm0, %v845_v32  ;;  %v961_v46 = vunpack.c.h.bf16 %v1019_v26  ;;  %v847_v47 = vpack.c.bf16 %v392_v37, %v392_v37  ;;  %v394_v48 = vadd.f32 %v957_v31, %v202_v38  ;;  %v134_v50 = vmul.f32 %v1060_v1, %v63_v36  ;;  %v71_v26 = vld [vmem:[%s1736_s0 + $0x1b0] sm:$0xff]  ;;  %v1024_v31 = vld [vmem:[%s1739_s3 + $0xd8] sm:$0xff]  }
  0x3b   :  { %v204_v49 = vadd.f32 %v1065_v2, %v133_v40  ;;  %712 = vst.msk [vmem:[%s1740_s4 + $0xa0] sm:$0xf] %vm671_vm0, %v846_v43  ;;  %v848_v53 = vpack.c.bf16 %v393_v44, %v393_v44  ;;  %v395_v54 = vadd.f32 %v960_v39, %v203_v45  ;;  %v964_v55 = vunpack.c.l.bf16 %v1020_v41  ;;  %v72_v32 = vld [vmem:[%s1736_s0 + $0x1b8] sm:$0xff] }
  0x3c   :  { %v135_v56 = vmul.f32 %v1060_v1, %v64_v42  ;;  %713 = vst.msk [vmem:[%s1740_s4 + $0xa4] sm:$0xf] %vm671_vm0, %v847_v47  ;;  %v849_v58 = vpack.c.bf16 %v394_v48, %v394_v48  ;;  %v205_v60 = vadd.f32 %v1065_v2, %v134_v50  ;;  %v965_v61 = vunpack.c.h.bf16 %v1020_v41  ;;  %v73_v41 = vld [vmem:[%s1736_s0 + $0x1c0] sm:$0xff]  ;;  %v74_v47 = vld [vmem:[%s1736_s0 + $0x1c8] sm:$0xff] }
  0x3d   :  { %v396_v59 = vadd.f32 %v961_v46, %v204_v49  ;;  %714 = vst.msk [vmem:[%s1740_s4 + $0xa8] sm:$0xf] %vm671_vm0, %v848_v53  ;;  %v850_v0 = vpack.c.bf16 %v395_v54, %v395_v54  ;;  %v136_v4 = vmul.f32 %v1060_v1, %v65_v51  ;;  %v968_v5 = vunpack.c.l.bf16 %v1021_v52  ;;  %v1025_v42 = vld [vmem:[%s1739_s3 + $0xe0] sm:$0xff]   ;;  %v1026_v53 = vld [vmem:[%s1739_s3 + $0xe8] sm:$0xff]  }
  0x3e   :  { %v206_v3 = vadd.f32 %v1065_v2, %v135_v56  ;;  %715 = vst.msk [vmem:[%s1740_s4 + $0xac] sm:$0xf] %vm671_vm0, %v849_v58  ;;  %v397_v8 = vadd.f32 %v964_v55, %v205_v60  ;;  %v137_v9 = vmul.f32 %v1060_v1, %v66_v57  ;;  %v969_v10 = vunpack.c.h.bf16 %v1021_v52  ;;  %v75_v52 = vld [vmem:[%s1736_s0 + $0x1d0] sm:$0xff]  ;;  %v76_v58 = vld [vmem:[%s1736_s0 + $0x1d8] sm:$0xff] }
  0x3f   :  { %v851_v7 = vpack.c.bf16 %v396_v59, %v396_v59  ;;  %716 = vst.msk [vmem:[%s1740_s4 + $0xb0] sm:$0xf] %vm671_vm0, %v850_v0  ;;  %v207_v13 = vadd.f32 %v1065_v2, %v136_v4  ;;  %v138_v14 = vmul.f32 %v1060_v1, %v67_v62  ;;  %v972_v15 = vunpack.c.l.bf16 %v1022_v63 }
  0x40   :  { %v398_v12 = vadd.f32 %v965_v61, %v206_v3  ;;  %v852_v18 = vpack.c.bf16 %v397_v8, %v397_v8  ;;  %v208_v19 = vadd.f32 %v1065_v2, %v137_v9  ;;  %v139_v20 = vmul.f32 %v1060_v1, %v68_v6  ;;  %v1027_v6 = vld [vmem:[%s1739_s3 + $0xf0] sm:$0xff]  }
  0x41   :  { %717 = vst.msk [vmem:[%s1740_s4 + $0xb4] sm:$0xf] %vm671_vm0, %v851_v7  ;;  %v973_v21 = vunpack.c.h.bf16 %v1022_v63  ;;  %v399_v23 = vadd.f32 %v968_v5, %v207_v13  ;;  %v209_v24 = vadd.f32 %v1065_v2, %v138_v14  ;;  %v140_v25 = vmul.f32 %v1060_v1, %v69_v11  ;;  %v77_v63 = vld [vmem:[%s1736_s0 + $0x1e0] sm:$0xff]  ;;  %v78_v7 = vld [vmem:[%s1736_s0 + $0x1e8] sm:$0xff] }
  0x42   :  { %v853_v22 = vpack.c.bf16 %v398_v12, %v398_v12  ;;  %718 = vst.msk [vmem:[%s1740_s4 + $0xb8] sm:$0xf] %vm671_vm0, %v852_v18  ;;  %v400_v27 = vadd.f32 %v969_v10, %v208_v19  ;;  %v210_v28 = vadd.f32 %v1065_v2, %v139_v20  ;;  %v976_v29 = vunpack.c.l.bf16 %v1023_v16 }
  0x43   :  { %v141_v30 = vmul.f32 %v1060_v1, %v70_v17  ;;  %v854_v33 = vpack.c.bf16 %v399_v23, %v399_v23  ;;  %v401_v34 = vadd.f32 %v972_v15, %v209_v24  ;;  %v211_v35 = vadd.f32 %v1065_v2, %v140_v25 }
  0x44   :  { %719 = vst.msk [vmem:[%s1740_s4 + $0xbc] sm:$0xf] %vm671_vm0, %v853_v22  ;;  %v977_v36 = vunpack.c.h.bf16 %v1023_v16  ;;  %v855_v37 = vpack.c.bf16 %v400_v27, %v400_v27  ;;  %v402_v38 = vadd.f32 %v973_v21, %v210_v28  ;;  %v142_v40 = vmul.f32 %v1060_v1, %v71_v26  ;;  %v79_v16 = vld [vmem:[%s1736_s0 + $0x1f0] sm:$0xff]  ;;  %v1028_v21 = vld [vmem:[%s1739_s3 + $0xf8] sm:$0xff]  }
  0x45   :  { %v212_v39 = vadd.f32 %v1065_v2, %v141_v30  ;;  %720 = vst.msk [vmem:[%s1740_s4 + $0xc0] sm:$0xf] %vm671_vm0, %v854_v33  ;;  %v856_v43 = vpack.c.bf16 %v401_v34, %v401_v34  ;;  %v403_v44 = vadd.f32 %v976_v29, %v211_v35  ;;  %v980_v45 = vunpack.c.l.bf16 %v1024_v31  ;;  %v80_v22 = vld [vmem:[%s1736_s0 + $0x1f8] sm:$0xff] }
  0x46   :  { %v143_v46 = vmul.f32 %v1060_v1, %v72_v32  ;;  %721 = vst.msk [vmem:[%s1740_s4 + $0xc4] sm:$0xf] %vm671_vm0, %v855_v37  ;;  %v857_v48 = vpack.c.bf16 %v402_v38, %v402_v38  ;;  %v213_v50 = vadd.f32 %v1065_v2, %v142_v40  ;;  %v981_v51 = vunpack.c.h.bf16 %v1024_v31 }
  0x47   :  { %v404_v49 = vadd.f32 %v977_v36, %v212_v39  ;;  %722 = vst.msk [vmem:[%s1740_s4 + $0xc8] sm:$0xf] %vm671_vm0, %v856_v43  ;;  %v858_v54 = vpack.c.bf16 %v403_v44, %v403_v44  ;;  %v144_v56 = vmul.f32 %v1060_v1, %v73_v41  ;;  %v984_v57 = vunpack.c.l.bf16 %v1025_v42 }
  0x48   :  { %v214_v55 = vadd.f32 %v1065_v2, %v143_v46  ;;  %723 = vst.msk [vmem:[%s1740_s4 + $0xcc] sm:$0xf] %vm671_vm0, %v857_v48  ;;  %v405_v60 = vadd.f32 %v980_v45, %v213_v50  ;;  %v145_v61 = vmul.f32 %v1060_v1, %v74_v47  ;;  %v985_v62 = vunpack.c.h.bf16 %v1025_v42 }
  0x49   :  { %v859_v59 = vpack.c.bf16 %v404_v49, %v404_v49  ;;  %724 = vst.msk [vmem:[%s1740_s4 + $0xd0] sm:$0xf] %vm671_vm0, %v858_v54  ;;  %v215_v3 = vadd.f32 %v1065_v2, %v144_v56  ;;  %v146_v4 = vmul.f32 %v1060_v1, %v75_v52  ;;  %v988_v5 = vunpack.c.l.bf16 %v1026_v53 }
  0x4a   :  { %v406_v0 = vadd.f32 %v981_v51, %v214_v55  ;;  %v860_v8 = vpack.c.bf16 %v405_v60, %v405_v60  ;;  %v216_v9 = vadd.f32 %v1065_v2, %v145_v61  ;;  %v147_v10 = vmul.f32 %v1060_v1, %v76_v58 }
  0x4b   :  { %725 = vst.msk [vmem:[%s1740_s4 + $0xd4] sm:$0xf] %vm671_vm0, %v859_v59  ;;  %v989_v11 = vunpack.c.h.bf16 %v1026_v53  ;;  %v407_v13 = vadd.f32 %v984_v57, %v215_v3  ;;  %v217_v14 = vadd.f32 %v1065_v2, %v146_v4  ;;  %v148_v15 = vmul.f32 %v1060_v1, %v77_v63 }
  0x4c   :  { %v861_v12 = vpack.c.bf16 %v406_v0, %v406_v0  ;;  %726 = vst.msk [vmem:[%s1740_s4 + $0xd8] sm:$0xf] %vm671_vm0, %v860_v8  ;;  %v408_v17 = vadd.f32 %v985_v62, %v216_v9  ;;  %v218_v18 = vadd.f32 %v1065_v2, %v147_v10  ;;  %v992_v19 = vunpack.c.l.bf16 %v1027_v6 }
  0x4d   :  { %v149_v20 = vmul.f32 %v1060_v1, %v78_v7  ;;  %v862_v23 = vpack.c.bf16 %v407_v13, %v407_v13  ;;  %v409_v24 = vadd.f32 %v988_v5, %v217_v14  ;;  %v219_v25 = vadd.f32 %v1065_v2, %v148_v15 }
  0x4e   :  { %727 = vst.msk [vmem:[%s1740_s4 + $0xdc] sm:$0xf] %vm671_vm0, %v861_v12  ;;  %v993_v26 = vunpack.c.h.bf16 %v1027_v6  ;;  %v863_v27 = vpack.c.bf16 %v408_v17, %v408_v17  ;;  %v410_v28 = vadd.f32 %v989_v11, %v218_v18  ;;  %v150_v30 = vmul.f32 %v1060_v1, %v79_v16 }
  0x4f   :  { %v220_v29 = vadd.f32 %v1065_v2, %v149_v20  ;;  %728 = vst.msk [vmem:[%s1740_s4 + $0xe0] sm:$0xf] %vm671_vm0, %v862_v23  ;;  %v864_v31 = vpack.c.bf16 %v409_v24, %v409_v24  ;;  %v411_v32 = vadd.f32 %v992_v19, %v219_v25  ;;  %v996_v33 = vunpack.c.l.bf16 %v1028_v21 }
  0x50   :  { %v151_v34 = vmul.f32 %v1060_v1, %v80_v22  ;;  %729 = vst.msk [vmem:[%s1740_s4 + $0xe4] sm:$0xf] %vm671_vm0, %v863_v27  ;;  %v865_v35 = vpack.c.bf16 %v410_v28, %v410_v28  ;;  %v221_v37 = vadd.f32 %v1065_v2, %v150_v30  ;;  %v997_v38 = vunpack.c.h.bf16 %v1028_v21 }
  0x51   :  { %v412_v36 = vadd.f32 %v993_v26, %v220_v29  ;;  %730 = vst.msk [vmem:[%s1740_s4 + $0xe8] sm:$0xf] %vm671_vm0, %v864_v31  ;;  %v866_v39 = vpack.c.bf16 %v411_v32, %v411_v32 }
  0x52   :  { %v222_v40 = vadd.f32 %v1065_v2, %v151_v34  ;;  %731 = vst.msk [vmem:[%s1740_s4 + $0xec] sm:$0xf] %vm671_vm0, %v865_v35  ;;  %v413_v41 = vadd.f32 %v996_v33, %v221_v37 }
  0x53   :  { %v867_v1 = vpack.c.bf16 %v412_v36, %v412_v36  ;;  %732 = vst.msk [vmem:[%s1740_s4 + $0xf0] sm:$0xf] %vm671_vm0, %v866_v39 }
  0x54   :  { %v414_v42 = vadd.f32 %v997_v38, %v222_v40  ;;  %v868_v43 = vpack.c.bf16 %v413_v41, %v413_v41 }
  0x55   :  { %733 = vst.msk [vmem:[%s1740_s4 + $0xf4] sm:$0xf] %vm671_vm0, %v867_v1 }
  0x56   :  { %v869_v2 = vpack.c.bf16 %v414_v42, %v414_v42  ;;  %734 = vst.msk [vmem:[%s1740_s4 + $0xf8] sm:$0xf] %vm671_vm0, %v868_v43 }
  0x58   :  { %735 = vst.msk [vmem:[%s1740_s4 + $0xfc] sm:$0xf] %vm671_vm0, %v869_v2 }

// kernel: rc_generator_forward.37
= control target key start
LH: loop header
LB: loop body
LE: loop exit
PB: predicated region body
PF: predicated region fallthrough
CT: control target
= control target key end

     0   :  { %s1313_s12 = smov 0   ;;  %s1315_s13 = smov 0   ;;  %s1493_s0 = inlined_call_operand.vmem [shape: bf16[4,512,256], index: 0, kind: input, shape index: {}]   ;;  %s1494_s1 = inlined_call_operand.vmem [shape: bf16[4,256,128], index: 1, kind: input, shape index: {}]   ;;  %s1495_s2 = inlined_call_operand.vmem [shape: f32[1,128], index: 2, kind: input, shape index: {}]   ;;  %s1496_s3 = inlined_call_operand.vmem [shape: f32[4,512,128], index: 3, kind: output, shape index: {}]  }
   0x1   :  { %s1317_s14 = smov 0   ;;  %s1319_s15 = smov 0  }
   0x2   :  { %s1321_s16 = smov 0  }
   0x3 LB: > { %s22_s17 = sadd.s32 1, %s1283_s14  ;;  %s25_s18 = sadd.s32 1, %s1287_s15  ;;  %s1291_s16 = sphi %s1321_s16, %s13_s16   ;;  %s1287_s15 = sphi %s1319_s15, %s1500_s15   ;;  %s1283_s14 = sphi %s1317_s14, %s1499_s14   ;;  %s1279_s13 = sphi %s1315_s13, %s1498_s13   ;;  %s1275_s12 = sphi %s1313_s12, %s1497_s12  }
   0x4   : > { %p23_p0 = scmp.ge.s32.totalorder %s22_s17, 2  ;;  %p895_p1 = scmp.ge.s32.totalorder %s1291_s16, 1 }
   0x5   : > { %p169_p2 = scmp.lt.s32.totalorder %s1291_s16, 9 }
   0x6   : > { %s1502_s17 = smov (%p23_p0, %s22_s17), 0  ;;  %s1504_s18 = smov (!%p23_p0, %s25_s18), %s1287_s15 }
   0x7   : > { %p170_p3 = pnand %p895_p1, %p169_p2  ;;  %p27_p4 = scmp.ge.s32.totalorder %s1504_s18, 4 }
   0x8   : > { %p208_p5 = scmp.lt.s32.totalorder (!%p170_p3), %s1279_s13, 3  ;;  %s896_s19 = sshll.u32 (!%p170_p3), %s1275_s12, 5  ;;  %v1406_v50 = vld [vmem:[%s1495_s2] ss:$0 sm:$0xff] (!%p170_p3) }
   0x9   : > { %s1506_s18 = smov (%p27_p4, %s1504_s18), 0  ;;  %173 = sbr.rel (%p170_p3) target bundleno = 342 (0x156), region = 32 }
   0xa   : > { %p210_p6 = scmp.lt.s32.totalorder (!%p170_p3), %s896_s19, 63 }
  0x10   : > { %s1508_s13 = smov (!%p208_p5, %s1279_s13), 3  ;;  %s1510_s19 = smov (!%p210_p6, %s896_s19), 63 }
  0x11   : > { %s898_s20 = sshll.u32 %s1508_s13, 7  ;;  %s903_s21 = sshll.u32 %s1508_s13, 6 }
  0x12   : > { %s1346_s24 = scalar_lea.vmem %s1494_s1, %s898_s20  ;;  %s1349_s25 = sadd.s32 %s903_s21, %s1510_s19 }
  0x13   : > { %v1125_v0 = vld [vmem:[%s1346_s24 + $0x40] sm:$0xff]   ;;  %v1127_v2 = vld [vmem:[%s1346_s24 + $0x48] sm:$0xff]   ;;  %v1129_v4 = vld [vmem:[%s1346_s24 + $0x50] sm:$0xff]   ;;  %s897_s26 = sshll.u32 %s1510_s19, 1  ;;  %s904_s7 = sshll.u32 %s1349_s25, 3 }
  0x14   : > { %v1126_v1 = vld [vmem:[%s1346_s24] sm:$0xff]   ;;  %957 = vmatprep.subr.bf16.mxu0 %v1125_v0  ;;  %1069 = vmatprep.subr.bf16.mxu1 %v1125_v0  ;;  %v1128_v3 = vld [vmem:[%s1346_s24 + $0x8] sm:$0xff]   ;;  %v1130_v5 = vld [vmem:[%s1346_s24 + $0x10] sm:$0xff]   ;;  %s214_s27 = sadd.s32 %s898_s20, %s897_s26  ;;  %s1418_s10 = scalar_lea.vmem %s1496_s3, %s904_s7 }
  0x15   : > { %958 = vmatpush3.bf16.msra.mxu0 %v1126_v1  ;;  %1077 = vmatpush3.bf16.msra.mxu1 %v1126_v1  ;;  %v1131_v6 = vld [vmem:[%s1346_s24 + $0x58] sm:$0xff]   ;;  %s899_s28 = sshll.u32 %s214_s27, 2  ;;  %v1133_v8 = vld [vmem:[%s1346_s24 + $0x60] sm:$0xff]   ;;  %v1135_v10 = vld [vmem:[%s1346_s24 + $0x68] sm:$0xff]  }
  0x16   : > { %959 = vmatprep.subr.bf16.mxu0 %v1127_v2  ;;  %1070 = vmatprep.subr.bf16.mxu1 %v1127_v2  ;;  %v1132_v7 = vld [vmem:[%s1346_s24 + $0x18] sm:$0xff]   ;;  %s1362_s4 = scalar_lea.vmem %s1493_s0, %s899_s28  ;;  %v1134_v9 = vld [vmem:[%s1346_s24 + $0x20] sm:$0xff]   ;;  %v1136_v13 = vld [vmem:[%s1346_s24 + $0x28] sm:$0xff]  }
  0x17   : > { %v1143_v11 = vld [vmem:[%s1362_s4 + $0x4] ss:$8 sps:$4 sm:$0xff]   ;;  %v1137_v14 = vld [vmem:[%s1346_s24 + $0x70] sm:$0xff]   ;;  %v1139_v16 = vld [vmem:[%s1346_s24 + $0x78] sm:$0xff]  }
  0x18   : > { %v1146_v12 = vld [vmem:[%s1362_s4 + $0x84] ss:$8 sps:$4 sm:$0xff]   ;;  %593 = vmatprep.mubr.bf16.mxu0 %v1143_v11  ;;  %v1138_v15 = vld [vmem:[%s1346_s24 + $0x30] sm:$0xff]   ;;  %v1140_v17 = vld [vmem:[%s1346_s24 + $0x38] sm:$0xff]  }
  0x19   : > { %960 = vmatpush3.bf16.msra.mxu0 %v1128_v3  ;;  %1078 = vmatpush3.bf16.msra.mxu1 %v1128_v3  ;;  %v1141_v18 = vld [vmem:[%s1362_s4] ss:$8 sps:$4 sm:$0xff]   ;;  %v1147_v20 = vld [vmem:[%s1362_s4 + $0x14] ss:$8 sps:$4 sm:$0xff]   ;;  %v1151_v22 = vld [vmem:[%s1362_s4 + $0x10] ss:$8 sps:$4 sm:$0xff]  }
  0x1a   : > { %961 = vmatprep.subr.bf16.mxu0 %v1129_v4  ;;  %1071 = vmatprep.subr.bf16.mxu1 %v1129_v4  ;;  %v1144_v19 = vld [vmem:[%s1362_s4 + $0x80] ss:$8 sps:$4 sm:$0xff]   ;;  %v1149_v21 = vld [vmem:[%s1362_s4 + $0x94] ss:$8 sps:$4 sm:$0xff]   ;;  %v1152_v23 = vld [vmem:[%s1362_s4 + $0x90] ss:$8 sps:$4 sm:$0xff]  }
  0x1b   : > { %657 = vmatprep.mubr.bf16.mxu1 %v1146_v12  ;;  %v1153_v24 = vld [vmem:[%s1362_s4 + $0x24] ss:$8 sps:$4 sm:$0xff]   ;;  %v1157_v26 = vld [vmem:[%s1362_s4 + $0x20] ss:$8 sps:$4 sm:$0xff]   ;;  %v1159_v28 = vld [vmem:[%s1362_s4 + $0x34] ss:$8 sps:$4 sm:$0xff]  }
  0x1c   : > { %v1155_v25 = vld [vmem:[%s1362_s4 + $0xa4] ss:$8 sps:$4 sm:$0xff]   ;;  %v1158_v27 = vld [vmem:[%s1362_s4 + $0xa0] ss:$8 sps:$4 sm:$0xff]   ;;  %v1161_v29 = vld [vmem:[%s1362_s4 + $0xb4] ss:$8 sps:$4 sm:$0xff]  }
  0x1d   : > { %962 = vmatpush3.bf16.msra.mxu0 %v1130_v5  ;;  %1079 = vmatpush3.bf16.msra.mxu1 %v1130_v5  ;;  %v1163_v30 = vld [vmem:[%s1362_s4 + $0x30] ss:$8 sps:$4 sm:$0xff]   ;;  %v1165_v32 = vld [vmem:[%s1362_s4 + $0x44] ss:$8 sps:$4 sm:$0xff]   ;;  %v1169_v34 = vld [vmem:[%s1362_s4 + $0x40] ss:$8 sps:$4 sm:$0xff]  }
  0x1e   : > { %963 = vmatprep.subr.bf16.mxu0 %v1131_v6  ;;  %1072 = vmatprep.subr.bf16.mxu1 %v1131_v6  ;;  %v1164_v31 = vld [vmem:[%s1362_s4 + $0xb0] ss:$8 sps:$4 sm:$0xff]   ;;  %v1167_v33 = vld [vmem:[%s1362_s4 + $0xc4] ss:$8 sps:$4 sm:$0xff]   ;;  %v1170_v35 = vld [vmem:[%s1362_s4 + $0xc0] ss:$8 sps:$4 sm:$0xff]  }
  0x1f   : > { %v1171_v36 = vld [vmem:[%s1362_s4 + $0x54] ss:$8 sps:$4 sm:$0xff]   ;;  %v1175_v38 = vld [vmem:[%s1362_s4 + $0x50] ss:$8 sps:$4 sm:$0xff]   ;;  %v1177_v40 = vld [vmem:[%s1362_s4 + $0x64] ss:$8 sps:$4 sm:$0xff]  }
  0x20   : > { %v1173_v37 = vld [vmem:[%s1362_s4 + $0xd4] ss:$8 sps:$4 sm:$0xff]   ;;  %v1176_v39 = vld [vmem:[%s1362_s4 + $0xd0] ss:$8 sps:$4 sm:$0xff]   ;;  %v1179_v41 = vld [vmem:[%s1362_s4 + $0xe4] ss:$8 sps:$4 sm:$0xff]  }
  0x21   : > { %964 = vmatpush3.bf16.msra.mxu0 %v1132_v7  ;;  %1080 = vmatpush3.bf16.msra.mxu1 %v1132_v7  ;;  %v1181_v42 = vld [vmem:[%s1362_s4 + $0x60] ss:$8 sps:$4 sm:$0xff]   ;;  %v1183_v44 = vld [vmem:[%s1362_s4 + $0x74] ss:$8 sps:$4 sm:$0xff]   ;;  %v1187_v46 = vld [vmem:[%s1362_s4 + $0x70] ss:$8 sps:$4 sm:$0xff]  }
  0x22   : > { %965 = vmatprep.subr.bf16.mxu0 %v1133_v8  ;;  %1073 = vmatprep.subr.bf16.mxu1 %v1133_v8  ;;  %v1182_v43 = vld [vmem:[%s1362_s4 + $0xe0] ss:$8 sps:$4 sm:$0xff]   ;;  %v1185_v45 = vld [vmem:[%s1362_s4 + $0xf4] ss:$8 sps:$4 sm:$0xff]   ;;  %v1188_v47 = vld [vmem:[%s1362_s4 + $0xf0] ss:$8 sps:$4 sm:$0xff]  }
  0x25   : > { %966 = vmatpush3.bf16.msra.mxu0 %v1134_v9  ;;  %1081 = vmatpush3.bf16.msra.mxu1 %v1134_v9 }
  0x26   : > { %967 = vmatprep.subr.bf16.mxu0 %v1135_v10  ;;  %1074 = vmatprep.subr.bf16.mxu1 %v1135_v10 }
  0x29   : > { %968 = vmatpush3.bf16.msra.mxu0 %v1136_v13  ;;  %1082 = vmatpush3.bf16.msra.mxu1 %v1136_v13 }
  0x2a   : > { %969 = vmatprep.subr.bf16.mxu0 %v1137_v14  ;;  %1075 = vmatprep.subr.bf16.mxu1 %v1137_v14 }
  0x2d   : > { %970 = vmatpush3.bf16.msra.mxu0 %v1138_v15  ;;  %1083 = vmatpush3.bf16.msra.mxu1 %v1138_v15 }
  0x2e   : > { %971 = vmatprep.subr.bf16.mxu0 %v1139_v16  ;;  %1076 = vmatprep.subr.bf16.mxu1 %v1139_v16 }
  0x31   : > { %972 = vmatpush3.bf16.msra.mxu0 %v1140_v17  ;;  %1084 = vmatpush3.bf16.msra.mxu1 %v1140_v17 }
  0x34   : > { %594 = vmatmul.mubr.bf16.vlgmr.msra.gmra.mrb[0].mxu0 %v1141_v18  ;;  %658 = vmatmul.mubr.bf16.vlgmr.msra.gmra.mrb[0].mxu1 %v1144_v19 }
  0x35   : > { %601 = vmatprep.mubr.bf16.mxu0 %v1147_v20  ;;  %665 = vmatprep.mubr.bf16.mxu1 %v1149_v21 }
  0x3c   : > { %602 = vmatmul.mubr.bf16.gmra.mrb[4].mxu0 %v1151_v22  ;;  %666 = vmatmul.mubr.bf16.gmra.mrb[4].mxu1 %v1152_v23 }
  0x3d   : > { %609 = vmatprep.mubr.bf16.mxu0 %v1153_v24  ;;  %673 = vmatprep.mubr.bf16.mxu1 %v1155_v25 }
  0x44   : > { %610 = vmatmul.mubr.bf16.gmra.mrb[8].mxu0 %v1157_v26  ;;  %674 = vmatmul.mubr.bf16.gmra.mrb[8].mxu1 %v1158_v27 }
  0x45   : > { %617 = vmatprep.mubr.bf16.mxu0 %v1159_v28  ;;  %681 = vmatprep.mubr.bf16.mxu1 %v1161_v29 }
  0x4c   : > { %618 = vmatmul.mubr.bf16.gmra.mrb[12].mxu0 %v1163_v30  ;;  %682 = vmatmul.mubr.bf16.gmra.mrb[12].mxu1 %v1164_v31 }
  0x4d   : > { %625 = vmatprep.mubr.bf16.mxu0 %v1165_v32  ;;  %689 = vmatprep.mubr.bf16.mxu1 %v1167_v33 }
  0x54   : > { %626 = vmatmul.mubr.bf16.gmra.mrb[16].mxu0 %v1169_v34  ;;  %690 = vmatmul.mubr.bf16.gmra.mrb[16].mxu1 %v1170_v35 }
  0x55   : > { %633 = vmatprep.mubr.bf16.mxu0 %v1171_v36  ;;  %697 = vmatprep.mubr.bf16.mxu1 %v1173_v37 }
  0x5c   : > { %634 = vmatmul.mubr.bf16.gmra.mrb[20].mxu0 %v1175_v38  ;;  %698 = vmatmul.mubr.bf16.gmra.mrb[20].mxu1 %v1176_v39 }
  0x5d   : > { %641 = vmatprep.mubr.bf16.mxu0 %v1177_v40  ;;  %705 = vmatprep.mubr.bf16.mxu1 %v1179_v41 }
  0x64   : > { %642 = vmatmul.mubr.bf16.gmra.mrb[24].mxu0 %v1181_v42  ;;  %706 = vmatmul.mubr.bf16.gmra.mrb[24].mxu1 %v1182_v43 }
  0x65   : > { %649 = vmatprep.mubr.bf16.mxu0 %v1183_v44  ;;  %713 = vmatprep.mubr.bf16.mxu1 %v1185_v45 }
  0x6c   : > { %650 = vmatmul.mubr.bf16.gmra.mrb[28].mxu0 %v1187_v46  ;;  %714 = vmatmul.mubr.bf16.gmra.mrb[28].mxu1 %v1188_v47 }
 0x107   : > { %v973_v48 = vpop.f32.mrb[0].mxu0  ;;  %v1021_v49 = vpop.f32.mrb[0].mxu1 }
 0x108   : > { %v974_v51 = vpop.f32.mrb[1].mxu0  ;;  %v1022_v52 = vpop.f32.mrb[1].mxu1 }
 0x109   : > { %v975_v53 = vadd.f32 %v974_v51, %v973_v48  ;;  %v1023_v54 = vadd.f32 %v1022_v52, %v1021_v49  ;;  %v976_v55 = vpop.f32.mrb[2].mxu0  ;;  %v1024_v56 = vpop.f32.mrb[2].mxu1 }
 0x10a   : > { %v977_v57 = vpop.f32.mrb[3].mxu0  ;;  %v1025_v58 = vpop.f32.mrb[3].mxu1 }
 0x10b   : > { %v596_v59 = vadd.f32 %v975_v53, %v1406_v50  ;;  %v660_v60 = vadd.f32 %v1023_v54, %v1406_v50  ;;  %v978_v61 = vadd.f32 %v977_v57, %v976_v55  ;;  %v1026_v62 = vadd.f32 %v1025_v58, %v1024_v56 }
 0x10d   : > { %1189 = vtanh.f32 %v596_v59  ;;  %v599_v63 = vadd.f32 %v978_v61, %v1406_v50  ;;  %v663_v0 = vadd.f32 %v1026_v62, %v1406_v50 }
 0x10e   : > { %1191 = vtanh.f32 %v660_v60 }
 0x10f   : > { %1193 = vtanh.f32 %v599_v63  ;;  %v979_v1 = vpop.f32.mrb[4].mxu0  ;;  %v1027_v2 = vpop.f32.mrb[4].mxu1 }
 0x110   : > { %1195 = vtanh.f32 %v663_v0  ;;  %v980_v3 = vpop.f32.mrb[5].mxu0  ;;  %v1028_v4 = vpop.f32.mrb[5].mxu1 }
 0x111   : > { %v981_v5 = vadd.f32 %v980_v3, %v979_v1  ;;  %v1029_v6 = vadd.f32 %v1028_v4, %v1027_v2  ;;  %v982_v7 = vpop.f32.mrb[6].mxu0  ;;  %v1030_v8 = vpop.f32.mrb[6].mxu1 }
 0x112   : > { %v983_v9 = vpop.f32.mrb[7].mxu0  ;;  %v1031_v10 = vpop.f32.mrb[7].mxu1 }
 0x113   : > { %v604_v11 = vadd.f32 %v981_v5, %v1406_v50  ;;  %v668_v12 = vadd.f32 %v1029_v6, %v1406_v50  ;;  %v984_v13 = vadd.f32 %v983_v9, %v982_v7  ;;  %v1032_v14 = vadd.f32 %v1031_v10, %v1030_v8 }
 0x115   : > { %1197 = vtanh.f32 %v604_v11  ;;  %v607_v15 = vadd.f32 %v984_v13, %v1406_v50  ;;  %v671_v16 = vadd.f32 %v1032_v14, %v1406_v50 }
 0x116   : > { %1199 = vtanh.f32 %v668_v12 }
 0x117   : > { %v1190_v17 = vpop.eup %1189  ;;  %1201 = vtanh.f32 %v607_v15  ;;  %v985_v18 = vpop.f32.mrb[8].mxu0 }
 0x118   : > { %v1033_v19 = vpop.f32.mrb[8].mxu1  ;;  %v1192_v20 = vpop.eup %1191  ;;  %754 = vst [vmem:[%s1418_s10] sm:$0xff] %v1190_v17  ;;  %1203 = vtanh.f32 %v671_v16 }
 0x119   : > { %v986_v21 = vpop.f32.mrb[9].mxu0  ;;  %v1034_v22 = vpop.f32.mrb[9].mxu1  ;;  %770 = vst [vmem:[%s1418_s10 + $0x80] sm:$0xff] %v1192_v20 }
 0x11a   : > { %v1194_v23 = vpop.eup %1193  ;;  %v987_v24 = vadd.f32 %v986_v21, %v985_v18  ;;  %v1035_v25 = vadd.f32 %v1034_v22, %v1033_v19  ;;  %v988_v26 = vpop.f32.mrb[10].mxu0 }
 0x11b   : > { %v1036_v27 = vpop.f32.mrb[10].mxu1  ;;  %v1196_v28 = vpop.eup %1195  ;;  %755 = vst [vmem:[%s1418_s10 + $0x8] sm:$0xff] %v1194_v23 }
 0x11c   : > { %v989_v29 = vpop.f32.mrb[11].mxu0  ;;  %v1037_v30 = vpop.f32.mrb[11].mxu1  ;;  %771 = vst [vmem:[%s1418_s10 + $0x88] sm:$0xff] %v1196_v28  ;;  %v612_v31 = vadd.f32 %v987_v24, %v1406_v50  ;;  %v676_v32 = vadd.f32 %v1035_v25, %v1406_v50 }
 0x11d   : > { %v990_v33 = vadd.f32 %v989_v29, %v988_v26  ;;  %v1038_v34 = vadd.f32 %v1037_v30, %v1036_v27 }
 0x11e   : > { %1205 = vtanh.f32 %v612_v31 }
 0x11f   : > { %v615_v35 = vadd.f32 %v990_v33, %v1406_v50  ;;  %v679_v36 = vadd.f32 %v1038_v34, %v1406_v50  ;;  %1207 = vtanh.f32 %v676_v32  ;;  %v1198_v37 = vpop.eup %1197  ;;  %v991_v38 = vpop.f32.mrb[12].mxu0 }
 0x120   : > { %v1039_v39 = vpop.f32.mrb[12].mxu1  ;;  %v1200_v40 = vpop.eup %1199  ;;  %756 = vst [vmem:[%s1418_s10 + $0x10] sm:$0xff] %v1198_v37 }
 0x121   : > { %1209 = vtanh.f32 %v615_v35  ;;  %v992_v41 = vpop.f32.mrb[13].mxu0  ;;  %v1040_v42 = vpop.f32.mrb[13].mxu1  ;;  %772 = vst [vmem:[%s1418_s10 + $0x90] sm:$0xff] %v1200_v40 }
 0x122   : > { %1211 = vtanh.f32 %v679_v36  ;;  %v1202_v43 = vpop.eup %1201  ;;  %v993_v44 = vadd.f32 %v992_v41, %v991_v38  ;;  %v1041_v45 = vadd.f32 %v1040_v42, %v1039_v39  ;;  %v994_v46 = vpop.f32.mrb[14].mxu0 }
 0x123   : > { %v1042_v47 = vpop.f32.mrb[14].mxu1  ;;  %v1204_v48 = vpop.eup %1203  ;;  %757 = vst [vmem:[%s1418_s10 + $0x18] sm:$0xff] %v1202_v43 }
 0x124   : > { %v995_v49 = vpop.f32.mrb[15].mxu0  ;;  %v1043_v51 = vpop.f32.mrb[15].mxu1  ;;  %773 = vst [vmem:[%s1418_s10 + $0x98] sm:$0xff] %v1204_v48  ;;  %v620_v52 = vadd.f32 %v993_v44, %v1406_v50  ;;  %v684_v53 = vadd.f32 %v1041_v45, %v1406_v50 }
 0x125   : > { %v996_v54 = vadd.f32 %v995_v49, %v994_v46  ;;  %v1044_v55 = vadd.f32 %v1043_v51, %v1042_v47 }
 0x126   : > { %1213 = vtanh.f32 %v620_v52 }
 0x127   : > { %v623_v56 = vadd.f32 %v996_v54, %v1406_v50  ;;  %v687_v57 = vadd.f32 %v1044_v55, %v1406_v50  ;;  %1215 = vtanh.f32 %v684_v53  ;;  %v997_v59 = vpop.f32.mrb[16].mxu0  ;;  %v1045_v60 = vpop.f32.mrb[16].mxu1 }
 0x128   : > { %v1206_v58 = vpop.eup %1205  ;;  %v998_v62 = vpop.f32.mrb[17].mxu0 }
 0x129   : > { %1217 = vtanh.f32 %v623_v56  ;;  %v1208_v61 = vpop.eup %1207  ;;  %758 = vst [vmem:[%s1418_s10 + $0x20] sm:$0xff] %v1206_v58  ;;  %v1046_v63 = vpop.f32.mrb[17].mxu1  ;;  %v999_v1 = vadd.f32 %v998_v62, %v997_v59 }
 0x12a   : > { %1219 = vtanh.f32 %v687_v57  ;;  %774 = vst [vmem:[%s1418_s10 + $0xa0] sm:$0xff] %v1208_v61  ;;  %v1047_v2 = vadd.f32 %v1046_v63, %v1045_v60  ;;  %v1000_v3 = vpop.f32.mrb[18].mxu0  ;;  %v1048_v4 = vpop.f32.mrb[18].mxu1 }
 0x12b   : > { %v1210_v0 = vpop.eup %1209  ;;  %v1001_v6 = vpop.f32.mrb[19].mxu0  ;;  %v628_v8 = vadd.f32 %v999_v1, %v1406_v50 }
 0x12c   : > { %v1212_v5 = vpop.eup %1211  ;;  %759 = vst [vmem:[%s1418_s10 + $0x28] sm:$0xff] %v1210_v0  ;;  %v1049_v7 = vpop.f32.mrb[19].mxu1  ;;  %v692_v9 = vadd.f32 %v1047_v2, %v1406_v50  ;;  %v1002_v10 = vadd.f32 %v1001_v6, %v1000_v3 }
 0x12d   : > { %775 = vst [vmem:[%s1418_s10 + $0xa8] sm:$0xff] %v1212_v5  ;;  %v1050_v11 = vadd.f32 %v1049_v7, %v1048_v4  ;;  %1221 = vtanh.f32 %v628_v8 }
 0x12e   : > { %v631_v12 = vadd.f32 %v1002_v10, %v1406_v50  ;;  %1223 = vtanh.f32 %v692_v9 }
 0x12f   : > { %v695_v13 = vadd.f32 %v1050_v11, %v1406_v50  ;;  %v1003_v15 = vpop.f32.mrb[20].mxu0  ;;  %v1051_v16 = vpop.f32.mrb[20].mxu1 }
 0x130   : > { %v1214_v14 = vpop.eup %1213  ;;  %1225 = vtanh.f32 %v631_v12  ;;  %v1004_v18 = vpop.f32.mrb[21].mxu0 }
 0x131   : > { %v1216_v17 = vpop.eup %1215  ;;  %760 = vst [vmem:[%s1418_s10 + $0x30] sm:$0xff] %v1214_v14  ;;  %1227 = vtanh.f32 %v695_v13  ;;  %v1052_v19 = vpop.f32.mrb[21].mxu1  ;;  %v1005_v21 = vadd.f32 %v1004_v18, %v1003_v15 }
 0x132   : > { %776 = vst [vmem:[%s1418_s10 + $0xb0] sm:$0xff] %v1216_v17  ;;  %v1053_v22 = vadd.f32 %v1052_v19, %v1051_v16  ;;  %v1006_v23 = vpop.f32.mrb[22].mxu0  ;;  %v1054_v24 = vpop.f32.mrb[22].mxu1 }
 0x133   : > { %v1218_v20 = vpop.eup %1217  ;;  %v1007_v26 = vpop.f32.mrb[23].mxu0  ;;  %v636_v28 = vadd.f32 %v1005_v21, %v1406_v50 }
 0x134   : > { %v1220_v25 = vpop.eup %1219  ;;  %761 = vst [vmem:[%s1418_s10 + $0x38] sm:$0xff] %v1218_v20  ;;  %v1055_v27 = vpop.f32.mrb[23].mxu1  ;;  %v700_v29 = vadd.f32 %v1053_v22, %v1406_v50  ;;  %v1008_v30 = vadd.f32 %v1007_v26, %v1006_v23 }
 0x135   : > { %777 = vst [vmem:[%s1418_s10 + $0xb8] sm:$0xff] %v1220_v25  ;;  %v1056_v31 = vadd.f32 %v1055_v27, %v1054_v24  ;;  %1229 = vtanh.f32 %v636_v28 }
 0x136   : > { %v639_v32 = vadd.f32 %v1008_v30, %v1406_v50  ;;  %1231 = vtanh.f32 %v700_v29 }
 0x137   : > { %v703_v33 = vadd.f32 %v1056_v31, %v1406_v50  ;;  %v1222_v34 = vpop.eup %1221  ;;  %v1009_v35 = vpop.f32.mrb[24].mxu0 }
 0x138   : > { %1233 = vtanh.f32 %v639_v32  ;;  %v1057_v36 = vpop.f32.mrb[24].mxu1  ;;  %v1224_v37 = vpop.eup %1223  ;;  %762 = vst [vmem:[%s1418_s10 + $0x40] sm:$0xff] %v1222_v34 }
 0x139   : > { %1235 = vtanh.f32 %v703_v33  ;;  %v1010_v38 = vpop.f32.mrb[25].mxu0  ;;  %v1058_v39 = vpop.f32.mrb[25].mxu1  ;;  %778 = vst [vmem:[%s1418_s10 + $0xc0] sm:$0xff] %v1224_v37 }
 0x13a   : > { %v1226_v40 = vpop.eup %1225  ;;  %v1011_v41 = vadd.f32 %v1010_v38, %v1009_v35  ;;  %v1059_v42 = vadd.f32 %v1058_v39, %v1057_v36  ;;  %v1012_v43 = vpop.f32.mrb[26].mxu0 }
 0x13b   : > { %v1060_v44 = vpop.f32.mrb[26].mxu1  ;;  %v1228_v45 = vpop.eup %1227  ;;  %763 = vst [vmem:[%s1418_s10 + $0x48] sm:$0xff] %v1226_v40 }
 0x13c   : > { %v1013_v46 = vpop.f32.mrb[27].mxu0  ;;  %v1061_v47 = vpop.f32.mrb[27].mxu1  ;;  %779 = vst [vmem:[%s1418_s10 + $0xc8] sm:$0xff] %v1228_v45  ;;  %v644_v48 = vadd.f32 %v1011_v41, %v1406_v50  ;;  %v708_v49 = vadd.f32 %v1059_v42, %v1406_v50 }
 0x13d   : > { %v1014_v51 = vadd.f32 %v1013_v46, %v1012_v43  ;;  %v1062_v52 = vadd.f32 %v1061_v47, %v1060_v44 }
 0x13e   : > { %1237 = vtanh.f32 %v644_v48 }
 0x13f   : > { %v647_v53 = vadd.f32 %v1014_v51, %v1406_v50  ;;  %v711_v54 = vadd.f32 %v1062_v52, %v1406_v50  ;;  %1239 = vtanh.f32 %v708_v49  ;;  %v1230_v55 = vpop.eup %1229  ;;  %v1015_v56 = vpop.f32.mrb[28].mxu0 }
 0x140   : > { %v1063_v57 = vpop.f32.mrb[28].mxu1  ;;  %v1232_v58 = vpop.eup %1231  ;;  %764 = vst [vmem:[%s1418_s10 + $0x50] sm:$0xff] %v1230_v55 }
 0x141   : > { %1241 = vtanh.f32 %v647_v53  ;;  %v1016_v59 = vpop.f32.mrb[29].mxu0  ;;  %v1064_v60 = vpop.f32.mrb[29].mxu1  ;;  %780 = vst [vmem:[%s1418_s10 + $0xd0] sm:$0xff] %v1232_v58 }
 0x142   : > { %1243 = vtanh.f32 %v711_v54  ;;  %v1234_v61 = vpop.eup %1233  ;;  %v1017_v62 = vadd.f32 %v1016_v59, %v1015_v56  ;;  %v1065_v63 = vadd.f32 %v1064_v60, %v1063_v57  ;;  %v1018_v0 = vpop.f32.mrb[30].mxu0 }
 0x143   : > { %v1066_v1 = vpop.f32.mrb[30].mxu1  ;;  %v1236_v2 = vpop.eup %1235  ;;  %765 = vst [vmem:[%s1418_s10 + $0x58] sm:$0xff] %v1234_v61 }
 0x144   : > { %v1019_v3 = vpop.f32.mrb[31].mxu0  ;;  %v1067_v4 = vpop.f32.mrb[31].mxu1  ;;  %781 = vst [vmem:[%s1418_s10 + $0xd8] sm:$0xff] %v1236_v2  ;;  %v652_v5 = vadd.f32 %v1017_v62, %v1406_v50  ;;  %v716_v6 = vadd.f32 %v1065_v63, %v1406_v50 }
 0x145   : > { %v1020_v7 = vadd.f32 %v1019_v3, %v1018_v0  ;;  %v1068_v8 = vadd.f32 %v1067_v4, %v1066_v1 }
 0x146   : > { %1245 = vtanh.f32 %v652_v5 }
 0x147   : > { %v655_v9 = vadd.f32 %v1020_v7, %v1406_v50  ;;  %v719_v10 = vadd.f32 %v1068_v8, %v1406_v50  ;;  %1247 = vtanh.f32 %v716_v6 }
 0x148   : > { %v1238_v11 = vpop.eup %1237 }
 0x149   : > { %1249 = vtanh.f32 %v655_v9  ;;  %v1240_v12 = vpop.eup %1239  ;;  %766 = vst [vmem:[%s1418_s10 + $0x60] sm:$0xff] %v1238_v11 }
 0x14a   : > { %1251 = vtanh.f32 %v719_v10  ;;  %782 = vst [vmem:[%s1418_s10 + $0xe0] sm:$0xff] %v1240_v12 }
 0x14b   : > { %v1242_v13 = vpop.eup %1241 }
 0x14c   : > { %v1244_v14 = vpop.eup %1243  ;;  %767 = vst [vmem:[%s1418_s10 + $0x68] sm:$0xff] %v1242_v13 }
 0x14d   : > { %783 = vst [vmem:[%s1418_s10 + $0xe8] sm:$0xff] %v1244_v14 }
 0x150   : > { %v1246_v15 = vpop.eup %1245 }
 0x151   : > { %v1248_v16 = vpop.eup %1247  ;;  %768 = vst [vmem:[%s1418_s10 + $0x70] sm:$0xff] %v1246_v15 }
 0x152   : > { %784 = vst [vmem:[%s1418_s10 + $0xf0] sm:$0xff] %v1248_v16 }
 0x153   : > { %v1250_v17 = vpop.eup %1249 }
 0x154   : > { %v1252_v50 = vpop.eup %1251  ;;  %769 = vst [vmem:[%s1418_s10 + $0x78] sm:$0xff] %v1250_v17 }
 0x155   : > { %785 = vst [vmem:[%s1418_s10 + $0xf8] sm:$0xff] %v1252_v50 }
 0x156 PF: > { %s13_s16 = sadd.s32 1, %s1291_s16   ;;  %s1497_s12 = smov %s1283_s14 }
 0x157   : > { %p10_p7 = scmp.ge.s32.totalorder %s13_s16, 10   ;;  %s1498_s13 = smov %s1287_s15 }
 0x158   : > { %s1499_s14 = smov %s1502_s17  ;;  %s1500_s15 = smov %s1506_s18 }
 0x159   :  { %12 = sbr.rel (!%p10_p7) target bundleno = 3 (0x3), region = 65 }

</bundles_post_ra>
